<compile_context>
chip_gen: v5e
topology: v5e:2x2
jax: 0.10.0
libtpu: 0.0.40
codegen_flags: <defaults>
</compile_context>

<pallas_src>
import functools

import jax
import jax.numpy as jnp
from jax.experimental import pallas as pl
from jax.experimental.pallas import tpu as pltpu

LANE = 128        # padded channel width (lane dim)
BATCH_TILE = 16   # batch rows per grid step (bf16 sublane-tile aligned)


def _round_up(x, m):
    return (x + m - 1) // m * m


def _conv_out_spatial(H, W):
    h1, w1 = (H - 8) // 4 + 1, (W - 8) // 4 + 1
    h2, w2 = (h1 - 4) // 2 + 1, (w1 - 4) // 2 + 1
    return h2 - 2, w2 - 2


# ---------------------------------------------------------------------------
# Fused forward kernel.
# ---------------------------------------------------------------------------
def _dqn_fused_kernel(x_ref, w1_ref, b1_ref, w2_ref, b2_ref, w3_ref, b3_ref,
                      wf1_ref, bf1_ref, wf2_ref, bf2_ref, q_ref):
    f32 = jnp.float32
    bf16 = jnp.bfloat16

    H4, W4, TB, C0 = x_ref.shape          # space-to-depth'd input, C0 = 4*4*4 = 64
    CP = w1_ref.shape[-1]                 # padded channel width (128)
    HID = wf1_ref.shape[-1]               # fc1 hidden width (512)
    OH1, OW1 = H4 - 1, W4 - 1             # conv1 (8x8 s4) == 2x2 s1 on s2d input
    OH2, OW2 = (OH1 - 4) // 2 + 1, (OW1 - 4) // 2 + 1
    OH3, OW3 = OH2 - 2, OW2 - 2

    x = x_ref[...]                                            # (H4, W4, TB, 64) bf16

    # ---- conv1 + ReLU: 2x2 stride-1 conv over the space-to-depth input -----
    acc = jnp.zeros((OH1 * OW1 * TB, CP), f32)
    for a in range(2):
        for b in range(2):
            slab = x[a:a + OH1, b:b + OW1]                    # (OH1, OW1, TB, 64)
            acc += jnp.dot(slab.reshape(OH1 * OW1 * TB, C0), w1_ref[a, b],
                           preferred_element_type=f32)
    h1 = jnp.maximum(acc + b1_ref[...], 0.0)
    h1 = h1.reshape(OH1, OW1, TB, CP).astype(bf16)

    # ---- conv2 + ReLU: 4x4 stride-2.  Split each spatial dim into
    # (coarse, parity) so the strided window read becomes unit-stride slices
    # over leading dims. ------------------------------------------------------
    h1r = h1.reshape(OH1 // 2, 2, OW1 // 2, 2, TB, CP)
    acc = jnp.zeros((OH2 * OW2 * TB, CP), f32)
    for i in range(4):
        di, ri = divmod(i, 2)
        for j in range(4):
            dj, rj = divmod(j, 2)
            slab = h1r[di:di + OH2, ri, dj:dj + OW2, rj]      # (OH2, OW2, TB, 128)
            acc += jnp.dot(slab.reshape(OH2 * OW2 * TB, CP), w2_ref[i, j],
                           preferred_element_type=f32)
    h2 = jnp.maximum(acc + b2_ref[...], 0.0)
    h2 = h2.reshape(OH2, OW2, TB, CP).astype(bf16)

    # ---- conv3 + ReLU: 3x3 stride-1 -----------------------------------------
    acc = jnp.zeros((OH3 * OW3 * TB, CP), f32)
    for i in range(3):
        for j in range(3):
            slab = h2[i:i + OH3, j:j + OW3]                   # (OH3, OW3, TB, 128)
            acc += jnp.dot(slab.reshape(OH3 * OW3 * TB, CP), w3_ref[i, j],
                           preferred_element_type=f32)
    h3 = jnp.maximum(acc + b3_ref[...], 0.0)
    h3 = h3.reshape(OH3, OW3, TB, CP).astype(bf16)

    # ---- fc1 + ReLU: contract over (h, w, c) as per-position matmuls --------
    acc = jnp.zeros((TB, HID), f32)
    for h in range(OH3):
        for w in range(OW3):
            acc += jnp.dot(h3[h, w], wf1_ref[h, w], preferred_element_type=f32)
    hf = jnp.maximum(acc + bf1_ref[...], 0.0).astype(bf16)

    # ---- fc2 ----------------------------------------------------------------
    q = jnp.dot(hf, wf2_ref[...], preferred_element_type=f32) + bf2_ref[...]
    q_ref[...] = q


# ---------------------------------------------------------------------------
# Wrapper: input space-to-depth packing + one pallas_call for the whole net.
# ---------------------------------------------------------------------------
def _resident_spec(arr):
    n = arr.ndim
    return pl.BlockSpec(arr.shape, lambda b, _n=n: (0,) * _n)


def dqn_forward(packed, x, *, n_actions):
    """x: (N, 4, H, W) float32 (NCHW, like PyTorch) -> (N, n_actions) float32."""
    N, C, H, W = x.shape
    assert C == 4
    assert H % 4 == 0 and W % 4 == 0, "H, W must be multiples of 4 for this kernel"
    H4, W4 = H // 4, W // 4
    OH1, OW1 = H4 - 1, W4 - 1
    assert OH1 % 2 == 0 and OW1 % 2 == 0 and OH1 >= 8 and OW1 >= 8
    OH2, OW2 = (OH1 - 4) // 2 + 1, (OW1 - 4) // 2 + 1
    OH3, OW3 = OH2 - 2, OW2 - 2

    Np = _round_up(N, BATCH_TILE)
    if Np != N:
        x = jnp.pad(x, ((0, Np - N), (0, 0), (0, 0), (0, 0)))

    # One-time per-forward layout op: NCHW -> space-to-depth (H/4, W/4, Np, 64),
    # channel order inside the 64 = (dh, dw, c); matches pack_params.
    xs = x.reshape(Np, 4, H4, 4, W4, 4).transpose(2, 4, 0, 3, 5, 1)
    xs = xs.reshape(H4, W4, Np, 64).astype(jnp.bfloat16)

    # Advisory cost for XLA's scheduler (real flops of the padded network).
    flops = 2 * Np * (OH1 * OW1 * 4 * 64 * LANE
                      + OH2 * OW2 * 16 * LANE * LANE
                      + OH3 * OW3 * 9 * LANE * LANE
                      + OH3 * OW3 * LANE * 512
                      + 512 * LANE)
    bytes_accessed = (int(xs.size) * 2 + Np * LANE * 4
                      + sum(int(v.size) * v.dtype.itemsize for v in packed.values()))

    grid = (Np // BATCH_TILE,)
    q = pl.pallas_call(
        _dqn_fused_kernel,
        out_shape=jax.ShapeDtypeStruct((Np, LANE), jnp.float32),
        grid=grid,
        in_specs=[
            pl.BlockSpec((H4, W4, BATCH_TILE, 64), lambda b: (0, 0, b, 0)),
            _resident_spec(packed["w1"]), _resident_spec(packed["b1"]),
            _resident_spec(packed["w2"]), _resident_spec(packed["b2"]),
            _resident_spec(packed["w3"]), _resident_spec(packed["b3"]),
            _resident_spec(packed["wf1"]), _resident_spec(packed["bf1"]),
            _resident_spec(packed["wf2"]), _resident_spec(packed["bf2"]),
        ],
        out_specs=pl.BlockSpec((BATCH_TILE, LANE), lambda b: (b, 0)),
        compiler_params=pltpu.CompilerParams(
            dimension_semantics=("parallel",),
            vmem_limit_bytes=32 * 1024 * 1024),
        cost_estimate=pl.CostEstimate(flops=int(flops), transcendentals=0,
                                      bytes_accessed=int(bytes_accessed)),
    )(xs, packed["w1"], packed["b1"], packed["w2"], packed["b2"],
      packed["w3"], packed["b3"], packed["wf1"], packed["bf1"],
      packed["wf2"], packed["bf2"])
    return q[:N, :n_actions]


# ---------------------------------------------------------------------------
# Parameters (canonical PyTorch layout) + one-time packing for the kernel.
# ---------------------------------------------------------------------------
def init_dqn_params(key, H, W, n_actions):
    """PyTorch-style init: OIHW conv weights, fc1 expecting NCHW-flatten rows."""
    def uinit(k, shape, fan_in):
        bound = 1.0 / jnp.sqrt(jnp.float32(fan_in))
        return jax.random.uniform(k, shape, jnp.float32, -bound, bound)

    h3, w3 = _conv_out_spatial(H, W)
    conv_out = 64 * h3 * w3
    ks = jax.random.split(key, 10)
    return {
        "conv1_w": uinit(ks[0], (32, 4, 8, 8), 4 * 8 * 8),
        "conv1_b": uinit(ks[1], (32,), 4 * 8 * 8),
        "conv2_w": uinit(ks[2], (64, 32, 4, 4), 32 * 4 * 4),
        "conv2_b": uinit(ks[3], (64,), 32 * 4 * 4),
        "conv3_w": uinit(ks[4], (64, 64, 3, 3), 64 * 3 * 3),
        "conv3_b": uinit(ks[5], (64,), 64 * 3 * 3),
        "fc1_w": uinit(ks[6], (conv_out, 512), conv_out),
        "fc1_b": uinit(ks[7], (512,), conv_out),
        "fc2_w": uinit(ks[8], (512, n_actions), 512),
        "fc2_b": uinit(ks[9], (n_actions,), 512),
    }


def pack_params(params, H, W):
    """One-time packing to the layouts the fused kernel expects (bf16 weights,
    f32 biases, all channel dims zero-padded to 128 -> numerically exact)."""
    bf16, f32 = jnp.bfloat16, jnp.float32
    H3, W3 = _conv_out_spatial(H, W)

    def pad_axis(a, axis, size):
        pad = [(0, 0)] * a.ndim
        pad[axis] = (0, size - a.shape[axis])
        return jnp.pad(a, pad)

    # conv1 (32,4,8,8) -> (2, 2, 64, 128): tap (a,b) of the 2x2 macro-kernel on
    # the space-to-depth input; row order inside a tap = (dh, dw, c).
    w1 = params["conv1_w"].reshape(32, 4, 2, 4, 2, 4)        # (oc, c, a, dh, b, dw)
    w1 = w1.transpose(2, 4, 3, 5, 1, 0).reshape(2, 2, 64, 32)
    w1 = pad_axis(w1, 3, LANE).astype(bf16)
    b1 = pad_axis(params["conv1_b"].reshape(1, 32), 1, LANE).astype(f32)

    # conv2 (64,32,4,4) -> (4, 4, 128, 128)
    w2 = params["conv2_w"].transpose(2, 3, 1, 0)             # (kh, kw, ic, oc)
    w2 = pad_axis(pad_axis(w2, 2, LANE), 3, LANE).astype(bf16)
    b2 = pad_axis(params["conv2_b"].reshape(1, 64), 1, LANE).astype(f32)

    # conv3 (64,64,3,3) -> (3, 3, 128, 128)
    w3 = params["conv3_w"].transpose(2, 3, 1, 0)
    w3 = pad_axis(pad_axis(w3, 2, LANE), 3, LANE).astype(bf16)
    b3 = pad_axis(params["conv3_b"].reshape(1, 64), 1, LANE).astype(f32)

    # fc1 (64*H3*W3, 512): PyTorch flatten order is (c, h, w); regroup rows to
    # (h, w, c_pad128, 512) so the kernel contracts per spatial position.
    wf1 = params["fc1_w"].reshape(64, H3, W3, 512).transpose(1, 2, 0, 3)
    wf1 = pad_axis(wf1, 2, LANE).astype(bf16)
    bf1 = params["fc1_b"].reshape(1, 512).astype(f32)

    n_actions = params["fc2_w"].shape[1]
    wf2 = pad_axis(params["fc2_w"], 1, LANE).astype(bf16)
    bf2 = pad_axis(params["fc2_b"].reshape(1, n_actions), 1, LANE).astype(f32)

    return dict(w1=w1, b1=b1, w2=w2, b2=b2, w3=w3, b3=b3,
                wf1=wf1, bf1=bf1, wf2=wf2, bf2=bf2)


# ---------------------------------------------------------------------------
# Pure-JAX f32 reference with exact PyTorch semantics (NCHW).
# ---------------------------------------------------------------------------
def dqn_forward_ref(params, x):
    def conv(x, w, b, s):
        y = jax.lax.conv_general_dilated(
            x, w, window_strides=(s, s), padding="VALID",
            dimension_numbers=("NCHW", "OIHW", "NCHW"))
        return jax.nn.relu(y + b[None, :, None, None])

    x = conv(x, params["conv1_w"], params["conv1_b"], 4)
    x = conv(x, params["conv2_w"], params["conv2_b"], 2)
    x = conv(x, params["conv3_w"], params["conv3_b"], 1)
    x = x.reshape(x.shape[0], -1)
    x = jax.nn.relu(x @ params["fc1_w"] + params["fc1_b"])
    return x @ params["fc2_w"] + params["fc2_b"]


if __name__ == "__main__":
    # Small but non-trivial shapes: batch=8, 4 stacked frames, 44x44 input.
    # Conv stack: 44 -> 10 -> 4 -> 2 spatial (so conv_out = 64*2*2 = 256).
    B, C, H, W = 8, 4, 44, 44
    N_ACTIONS = 4

    key = jax.random.PRNGKey(0)
    kx, kp = jax.random.split(key)
    x = jax.random.normal(kx, (B, C, H, W), dtype=jnp.float32)
    params = init_dqn_params(kp, H, W, N_ACTIONS)
    packed = pack_params(params, H, W)          # one-time weight packing

    fwd = jax.jit(functools.partial(dqn_forward, n_actions=N_ACTIONS))
    q = jax.block_until_ready(fwd(packed, x))
    assert q.shape == (B, N_ACTIONS) and q.dtype == jnp.float32

    q_ref = jax.block_until_ready(dqn_forward_ref(params, x))
    # bf16 MXU operands (f32 accumulation) -> slightly looser tolerance.
    err = float(jnp.max(jnp.abs(q - q_ref)))
    assert jnp.allclose(q, q_ref, atol=5e-2, rtol=5e-2), err

    print("KERNEL_OK")
</pallas_src>

<mosaic_0001>
module attributes {stable_mosaic.version = 11 : i64} {
  func.func @_dqn_fused_kernel(%arg0: i32, %arg1: memref<11x11x16x64xbf16, #tpu.memory_space<vmem>>, %arg2: memref<2x2x64x128xbf16, #tpu.memory_space<vmem>>, %arg3: memref<1x128xf32, #tpu.memory_space<vmem>>, %arg4: memref<4x4x128x128xbf16, #tpu.memory_space<vmem>>, %arg5: memref<1x128xf32, #tpu.memory_space<vmem>>, %arg6: memref<3x3x128x128xbf16, #tpu.memory_space<vmem>>, %arg7: memref<1x128xf32, #tpu.memory_space<vmem>>, %arg8: memref<2x2x128x512xbf16, #tpu.memory_space<vmem>>, %arg9: memref<1x512xf32, #tpu.memory_space<vmem>>, %arg10: memref<512x128xbf16, #tpu.memory_space<vmem>>, %arg11: memref<1x128xf32, #tpu.memory_space<vmem>>, %arg12: memref<16x128xf32, #tpu.memory_space<vmem>>) attributes {dimension_semantics = [#tpu.dimension_semantics<parallel>], iteration_bounds = array<i64: 1>, scalar_prefetch = 0 : i64, scratch_operands = 0 : i64, tpu.core_type = #tpu.core_type<tc>, window_params = [{transform_indices = @transform_0, window_bounds = array<i64: 11, 11, 16, 64>}, {pipeline_mode = #tpu.pipeline_mode<synchronous>, transform_indices = @transform_1, window_bounds = array<i64: 2, 2, 64, 128>}, {pipeline_mode = #tpu.pipeline_mode<synchronous>, transform_indices = @transform_2, window_bounds = array<i64: 1, 128>}, {pipeline_mode = #tpu.pipeline_mode<synchronous>, transform_indices = @transform_3, window_bounds = array<i64: 4, 4, 128, 128>}, {pipeline_mode = #tpu.pipeline_mode<synchronous>, transform_indices = @transform_4, window_bounds = array<i64: 1, 128>}, {pipeline_mode = #tpu.pipeline_mode<synchronous>, transform_indices = @transform_5, window_bounds = array<i64: 3, 3, 128, 128>}, {pipeline_mode = #tpu.pipeline_mode<synchronous>, transform_indices = @transform_6, window_bounds = array<i64: 1, 128>}, {pipeline_mode = #tpu.pipeline_mode<synchronous>, transform_indices = @transform_7, window_bounds = array<i64: 2, 2, 128, 512>}, {pipeline_mode = #tpu.pipeline_mode<synchronous>, transform_indices = @transform_8, window_bounds = array<i64: 1, 512>}, {pipeline_mode = #tpu.pipeline_mode<synchronous>, transform_indices = @transform_9, window_bounds = array<i64: 512, 128>}, {pipeline_mode = #tpu.pipeline_mode<synchronous>, transform_indices = @transform_10, window_bounds = array<i64: 1, 128>}, {transform_indices = @transform_11, window_bounds = array<i64: 16, 128>}]} {
    %c0 = arith.constant 0 : index
    %c0_0 = arith.constant 0 : index
    %c0_1 = arith.constant 0 : index
    %c0_2 = arith.constant 0 : index
    %0 = vector.load %arg1[%c0, %c0_0, %c0_1, %c0_2] : memref<11x11x16x64xbf16, #tpu.memory_space<vmem>>, vector<11x11x16x64xbf16>
    %cst = arith.constant 0.000000e+00 : f32
    %1 = vector.broadcast %cst : f32 to vector<1600x128xf32>
    %2 = vector.extract_strided_slice %0 {offsets = [0, 0, 0, 0], sizes = [10, 10, 16, 64], strides = [1, 1, 1, 1]} : vector<11x11x16x64xbf16> to vector<10x10x16x64xbf16>
    %3 = vector.shape_cast %2 : vector<10x10x16x64xbf16> to vector<1600x64xbf16>
    %c0_3 = arith.constant 0 : index
    %c0_4 = arith.constant 0 : index
    %c0_5 = arith.constant 0 : index
    %c0_6 = arith.constant 0 : index
    %4 = vector.load %arg2[%c0_3, %c0_4, %c0_5, %c0_6] : memref<2x2x64x128xbf16, #tpu.memory_space<vmem>>, vector<1x1x64x128xbf16>
    %5 = vector.shape_cast %4 : vector<1x1x64x128xbf16> to vector<64x128xbf16>
    %cst_7 = arith.constant dense<0.000000e+00> : vector<1600x128xf32>
    %6 = tpu.matmul %3, %5, %cst_7 {dimension_numbers = #tpu.dot_dimension_numbers<[1], [0], [0], [1], [0, 0, 1, 1], [], []>} : vector<1600x64xbf16>, vector<64x128xbf16>, vector<1600x128xf32> -> vector<1600x128xf32>
    %7 = arith.addf %1, %6 : vector<1600x128xf32>
    %8 = vector.extract_strided_slice %0 {offsets = [0, 1, 0, 0], sizes = [10, 10, 16, 64], strides = [1, 1, 1, 1]} : vector<11x11x16x64xbf16> to vector<10x10x16x64xbf16>
    %9 = vector.shape_cast %8 : vector<10x10x16x64xbf16> to vector<1600x64xbf16>
    %c0_8 = arith.constant 0 : index
    %c1 = arith.constant 1 : index
    %c0_9 = arith.constant 0 : index
    %c0_10 = arith.constant 0 : index
    %10 = vector.load %arg2[%c0_8, %c1, %c0_9, %c0_10] : memref<2x2x64x128xbf16, #tpu.memory_space<vmem>>, vector<1x1x64x128xbf16>
    %11 = vector.shape_cast %10 : vector<1x1x64x128xbf16> to vector<64x128xbf16>
    %cst_11 = arith.constant dense<0.000000e+00> : vector<1600x128xf32>
    %12 = tpu.matmul %9, %11, %cst_11 {dimension_numbers = #tpu.dot_dimension_numbers<[1], [0], [0], [1], [0, 0, 1, 1], [], []>} : vector<1600x64xbf16>, vector<64x128xbf16>, vector<1600x128xf32> -> vector<1600x128xf32>
    %13 = arith.addf %7, %12 : vector<1600x128xf32>
    %14 = vector.extract_strided_slice %0 {offsets = [1, 0, 0, 0], sizes = [10, 10, 16, 64], strides = [1, 1, 1, 1]} : vector<11x11x16x64xbf16> to vector<10x10x16x64xbf16>
    %15 = vector.shape_cast %14 : vector<10x10x16x64xbf16> to vector<1600x64xbf16>
    %c1_12 = arith.constant 1 : index
    %c0_13 = arith.constant 0 : index
    %c0_14 = arith.constant 0 : index
    %c0_15 = arith.constant 0 : index
    %16 = vector.load %arg2[%c1_12, %c0_13, %c0_14, %c0_15] : memref<2x2x64x128xbf16, #tpu.memory_space<vmem>>, vector<1x1x64x128xbf16>
    %17 = vector.shape_cast %16 : vector<1x1x64x128xbf16> to vector<64x128xbf16>
    %cst_16 = arith.constant dense<0.000000e+00> : vector<1600x128xf32>
    %18 = tpu.matmul %15, %17, %cst_16 {dimension_numbers = #tpu.dot_dimension_numbers<[1], [0], [0], [1], [0, 0, 1, 1], [], []>} : vector<1600x64xbf16>, vector<64x128xbf16>, vector<1600x128xf32> -> vector<1600x128xf32>
    %19 = arith.addf %13, %18 : vector<1600x128xf32>
    %20 = vector.extract_strided_slice %0 {offsets = [1, 1, 0, 0], sizes = [10, 10, 16, 64], strides = [1, 1, 1, 1]} : vector<11x11x16x64xbf16> to vector<10x10x16x64xbf16>
    %21 = vector.shape_cast %20 : vector<10x10x16x64xbf16> to vector<1600x64xbf16>
    %c1_17 = arith.constant 1 : index
    %c1_18 = arith.constant 1 : index
    %c0_19 = arith.constant 0 : index
    %c0_20 = arith.constant 0 : index
    %22 = vector.load %arg2[%c1_17, %c1_18, %c0_19, %c0_20] : memref<2x2x64x128xbf16, #tpu.memory_space<vmem>>, vector<1x1x64x128xbf16>
    %23 = vector.shape_cast %22 : vector<1x1x64x128xbf16> to vector<64x128xbf16>
    %cst_21 = arith.constant dense<0.000000e+00> : vector<1600x128xf32>
    %24 = tpu.matmul %21, %23, %cst_21 {dimension_numbers = #tpu.dot_dimension_numbers<[1], [0], [0], [1], [0, 0, 1, 1], [], []>} : vector<1600x64xbf16>, vector<64x128xbf16>, vector<1600x128xf32> -> vector<1600x128xf32>
    %25 = arith.addf %19, %24 : vector<1600x128xf32>
    %c0_22 = arith.constant 0 : index
    %c0_23 = arith.constant 0 : index
    %26 = vector.load %arg3[%c0_22, %c0_23] : memref<1x128xf32, #tpu.memory_space<vmem>>, vector<1x128xf32>
    %27 = vector.broadcast %26 : vector<1x128xf32> to vector<1600x128xf32>
    %28 = arith.addf %25, %27 : vector<1600x128xf32>
    %cst_24 = arith.constant 0.000000e+00 : f32
    %29 = vector.broadcast %cst_24 : f32 to vector<1600x128xf32>
    %30 = arith.maximumf %28, %29 : vector<1600x128xf32>
    %31 = vector.shape_cast %30 : vector<1600x128xf32> to vector<10x10x16x128xf32>
    %32 = arith.truncf %31 : vector<10x10x16x128xf32> to vector<10x10x16x128xbf16>
    %33 = vector.shape_cast %32 : vector<10x10x16x128xbf16> to vector<5x2x5x2x16x128xbf16>
    %cst_25 = arith.constant 0.000000e+00 : f32
    %34 = vector.broadcast %cst_25 : f32 to vector<256x128xf32>
    %35 = vector.extract_strided_slice %33 {offsets = [0, 0, 0, 0, 0, 0], sizes = [4, 1, 4, 1, 16, 128], strides = [1, 1, 1, 1, 1, 1]} : vector<5x2x5x2x16x128xbf16> to vector<4x1x4x1x16x128xbf16>
    %36 = vector.shape_cast %35 : vector<4x1x4x1x16x128xbf16> to vector<4x4x16x128xbf16>
    %37 = vector.shape_cast %36 : vector<4x4x16x128xbf16> to vector<256x128xbf16>
    %c0_26 = arith.constant 0 : index
    %c0_27 = arith.constant 0 : index
    %c0_28 = arith.constant 0 : index
    %c0_29 = arith.constant 0 : index
    %38 = vector.load %arg4[%c0_26, %c0_27, %c0_28, %c0_29] : memref<4x4x128x128xbf16, #tpu.memory_space<vmem>>, vector<1x1x128x128xbf16>
    %39 = vector.shape_cast %38 : vector<1x1x128x128xbf16> to vector<128x128xbf16>
    %cst_30 = arith.constant dense<0.000000e+00> : vector<256x128xf32>
    %40 = tpu.matmul %37, %39, %cst_30 {dimension_numbers = #tpu.dot_dimension_numbers<[1], [0], [0], [1], [0, 0, 1, 1], [], []>} : vector<256x128xbf16>, vector<128x128xbf16>, vector<256x128xf32> -> vector<256x128xf32>
    %41 = arith.addf %34, %40 : vector<256x128xf32>
    %42 = vector.extract_strided_slice %33 {offsets = [0, 0, 0, 1, 0, 0], sizes = [4, 1, 4, 1, 16, 128], strides = [1, 1, 1, 1, 1, 1]} : vector<5x2x5x2x16x128xbf16> to vector<4x1x4x1x16x128xbf16>
    %43 = vector.shape_cast %42 : vector<4x1x4x1x16x128xbf16> to vector<4x4x16x128xbf16>
    %44 = vector.shape_cast %43 : vector<4x4x16x128xbf16> to vector<256x128xbf16>
    %c0_31 = arith.constant 0 : index
    %c1_32 = arith.constant 1 : index
    %c0_33 = arith.constant 0 : index
    %c0_34 = arith.constant 0 : index
    %45 = vector.load %arg4[%c0_31, %c1_32, %c0_33, %c0_34] : memref<4x4x128x128xbf16, #tpu.memory_space<vmem>>, vector<1x1x128x128xbf16>
    %46 = vector.shape_cast %45 : vector<1x1x128x128xbf16> to vector<128x128xbf16>
    %cst_35 = arith.constant dense<0.000000e+00> : vector<256x128xf32>
    %47 = tpu.matmul %44, %46, %cst_35 {dimension_numbers = #tpu.dot_dimension_numbers<[1], [0], [0], [1], [0, 0, 1, 1], [], []>} : vector<256x128xbf16>, vector<128x128xbf16>, vector<256x128xf32> -> vector<256x128xf32>
    %48 = arith.addf %41, %47 : vector<256x128xf32>
    %49 = vector.extract_strided_slice %33 {offsets = [0, 0, 1, 0, 0, 0], sizes = [4, 1, 4, 1, 16, 128], strides = [1, 1, 1, 1, 1, 1]} : vector<5x2x5x2x16x128xbf16> to vector<4x1x4x1x16x128xbf16>
    %50 = vector.shape_cast %49 : vector<4x1x4x1x16x128xbf16> to vector<4x4x16x128xbf16>
    %51 = vector.shape_cast %50 : vector<4x4x16x128xbf16> to vector<256x128xbf16>
    %c0_36 = arith.constant 0 : index
    %c2 = arith.constant 2 : index
    %c0_37 = arith.constant 0 : index
    %c0_38 = arith.constant 0 : index
    %52 = vector.load %arg4[%c0_36, %c2, %c0_37, %c0_38] : memref<4x4x128x128xbf16, #tpu.memory_space<vmem>>, vector<1x1x128x128xbf16>
    %53 = vector.shape_cast %52 : vector<1x1x128x128xbf16> to vector<128x128xbf16>
    %cst_39 = arith.constant dense<0.000000e+00> : vector<256x128xf32>
    %54 = tpu.matmul %51, %53, %cst_39 {dimension_numbers = #tpu.dot_dimension_numbers<[1], [0], [0], [1], [0, 0, 1, 1], [], []>} : vector<256x128xbf16>, vector<128x128xbf16>, vector<256x128xf32> -> vector<256x128xf32>
    %55 = arith.addf %48, %54 : vector<256x128xf32>
    %56 = vector.extract_strided_slice %33 {offsets = [0, 0, 1, 1, 0, 0], sizes = [4, 1, 4, 1, 16, 128], strides = [1, 1, 1, 1, 1, 1]} : vector<5x2x5x2x16x128xbf16> to vector<4x1x4x1x16x128xbf16>
    %57 = vector.shape_cast %56 : vector<4x1x4x1x16x128xbf16> to vector<4x4x16x128xbf16>
    %58 = vector.shape_cast %57 : vector<4x4x16x128xbf16> to vector<256x128xbf16>
    %c0_40 = arith.constant 0 : index
    %c3 = arith.constant 3 : index
    %c0_41 = arith.constant 0 : index
    %c0_42 = arith.constant 0 : index
    %59 = vector.load %arg4[%c0_40, %c3, %c0_41, %c0_42] : memref<4x4x128x128xbf16, #tpu.memory_space<vmem>>, vector<1x1x128x128xbf16>
    %60 = vector.shape_cast %59 : vector<1x1x128x128xbf16> to vector<128x128xbf16>
    %cst_43 = arith.constant dense<0.000000e+00> : vector<256x128xf32>
    %61 = tpu.matmul %58, %60, %cst_43 {dimension_numbers = #tpu.dot_dimension_numbers<[1], [0], [0], [1], [0, 0, 1, 1], [], []>} : vector<256x128xbf16>, vector<128x128xbf16>, vector<256x128xf32> -> vector<256x128xf32>
    %62 = arith.addf %55, %61 : vector<256x128xf32>
    %63 = vector.extract_strided_slice %33 {offsets = [0, 1, 0, 0, 0, 0], sizes = [4, 1, 4, 1, 16, 128], strides = [1, 1, 1, 1, 1, 1]} : vector<5x2x5x2x16x128xbf16> to vector<4x1x4x1x16x128xbf16>
    %64 = vector.shape_cast %63 : vector<4x1x4x1x16x128xbf16> to vector<4x4x16x128xbf16>
    %65 = vector.shape_cast %64 : vector<4x4x16x128xbf16> to vector<256x128xbf16>
    %c1_44 = arith.constant 1 : index
    %c0_45 = arith.constant 0 : index
    %c0_46 = arith.constant 0 : index
    %c0_47 = arith.constant 0 : index
    %66 = vector.load %arg4[%c1_44, %c0_45, %c0_46, %c0_47] : memref<4x4x128x128xbf16, #tpu.memory_space<vmem>>, vector<1x1x128x128xbf16>
    %67 = vector.shape_cast %66 : vector<1x1x128x128xbf16> to vector<128x128xbf16>
    %cst_48 = arith.constant dense<0.000000e+00> : vector<256x128xf32>
    %68 = tpu.matmul %65, %67, %cst_48 {dimension_numbers = #tpu.dot_dimension_numbers<[1], [0], [0], [1], [0, 0, 1, 1], [], []>} : vector<256x128xbf16>, vector<128x128xbf16>, vector<256x128xf32> -> vector<256x128xf32>
    %69 = arith.addf %62, %68 : vector<256x128xf32>
    %70 = vector.extract_strided_slice %33 {offsets = [0, 1, 0, 1, 0, 0], sizes = [4, 1, 4, 1, 16, 128], strides = [1, 1, 1, 1, 1, 1]} : vector<5x2x5x2x16x128xbf16> to vector<4x1x4x1x16x128xbf16>
    %71 = vector.shape_cast %70 : vector<4x1x4x1x16x128xbf16> to vector<4x4x16x128xbf16>
    %72 = vector.shape_cast %71 : vector<4x4x16x128xbf16> to vector<256x128xbf16>
    %c1_49 = arith.constant 1 : index
    %c1_50 = arith.constant 1 : index
    %c0_51 = arith.constant 0 : index
    %c0_52 = arith.constant 0 : index
    %73 = vector.load %arg4[%c1_49, %c1_50, %c0_51, %c0_52] : memref<4x4x128x128xbf16, #tpu.memory_space<vmem>>, vector<1x1x128x128xbf16>
    %74 = vector.shape_cast %73 : vector<1x1x128x128xbf16> to vector<128x128xbf16>
    %cst_53 = arith.constant dense<0.000000e+00> : vector<256x128xf32>
    %75 = tpu.matmul %72, %74, %cst_53 {dimension_numbers = #tpu.dot_dimension_numbers<[1], [0], [0], [1], [0, 0, 1, 1], [], []>} : vector<256x128xbf16>, vector<128x128xbf16>, vector<256x128xf32> -> vector<256x128xf32>
    %76 = arith.addf %69, %75 : vector<256x128xf32>
    %77 = vector.extract_strided_slice %33 {offsets = [0, 1, 1, 0, 0, 0], sizes = [4, 1, 4, 1, 16, 128], strides = [1, 1, 1, 1, 1, 1]} : vector<5x2x5x2x16x128xbf16> to vector<4x1x4x1x16x128xbf16>
    %78 = vector.shape_cast %77 : vector<4x1x4x1x16x128xbf16> to vector<4x4x16x128xbf16>
    %79 = vector.shape_cast %78 : vector<4x4x16x128xbf16> to vector<256x128xbf16>
    %c1_54 = arith.constant 1 : index
    %c2_55 = arith.constant 2 : index
    %c0_56 = arith.constant 0 : index
    %c0_57 = arith.constant 0 : index
    %80 = vector.load %arg4[%c1_54, %c2_55, %c0_56, %c0_57] : memref<4x4x128x128xbf16, #tpu.memory_space<vmem>>, vector<1x1x128x128xbf16>
    %81 = vector.shape_cast %80 : vector<1x1x128x128xbf16> to vector<128x128xbf16>
    %cst_58 = arith.constant dense<0.000000e+00> : vector<256x128xf32>
    %82 = tpu.matmul %79, %81, %cst_58 {dimension_numbers = #tpu.dot_dimension_numbers<[1], [0], [0], [1], [0, 0, 1, 1], [], []>} : vector<256x128xbf16>, vector<128x128xbf16>, vector<256x128xf32> -> vector<256x128xf32>
    %83 = arith.addf %76, %82 : vector<256x128xf32>
    %84 = vector.extract_strided_slice %33 {offsets = [0, 1, 1, 1, 0, 0], sizes = [4, 1, 4, 1, 16, 128], strides = [1, 1, 1, 1, 1, 1]} : vector<5x2x5x2x16x128xbf16> to vector<4x1x4x1x16x128xbf16>
    %85 = vector.shape_cast %84 : vector<4x1x4x1x16x128xbf16> to vector<4x4x16x128xbf16>
    %86 = vector.shape_cast %85 : vector<4x4x16x128xbf16> to vector<256x128xbf16>
    %c1_59 = arith.constant 1 : index
    %c3_60 = arith.constant 3 : index
    %c0_61 = arith.constant 0 : index
    %c0_62 = arith.constant 0 : index
    %87 = vector.load %arg4[%c1_59, %c3_60, %c0_61, %c0_62] : memref<4x4x128x128xbf16, #tpu.memory_space<vmem>>, vector<1x1x128x128xbf16>
    %88 = vector.shape_cast %87 : vector<1x1x128x128xbf16> to vector<128x128xbf16>
    %cst_63 = arith.constant dense<0.000000e+00> : vector<256x128xf32>
    %89 = tpu.matmul %86, %88, %cst_63 {dimension_numbers = #tpu.dot_dimension_numbers<[1], [0], [0], [1], [0, 0, 1, 1], [], []>} : vector<256x128xbf16>, vector<128x128xbf16>, vector<256x128xf32> -> vector<256x128xf32>
    %90 = arith.addf %83, %89 : vector<256x128xf32>
    %91 = vector.extract_strided_slice %33 {offsets = [1, 0, 0, 0, 0, 0], sizes = [4, 1, 4, 1, 16, 128], strides = [1, 1, 1, 1, 1, 1]} : vector<5x2x5x2x16x128xbf16> to vector<4x1x4x1x16x128xbf16>
    %92 = vector.shape_cast %91 : vector<4x1x4x1x16x128xbf16> to vector<4x4x16x128xbf16>
    %93 = vector.shape_cast %92 : vector<4x4x16x128xbf16> to vector<256x128xbf16>
    %c2_64 = arith.constant 2 : index
    %c0_65 = arith.constant 0 : index
    %c0_66 = arith.constant 0 : index
    %c0_67 = arith.constant 0 : index
    %94 = vector.load %arg4[%c2_64, %c0_65, %c0_66, %c0_67] : memref<4x4x128x128xbf16, #tpu.memory_space<vmem>>, vector<1x1x128x128xbf16>
    %95 = vector.shape_cast %94 : vector<1x1x128x128xbf16> to vector<128x128xbf16>
    %cst_68 = arith.constant dense<0.000000e+00> : vector<256x128xf32>
    %96 = tpu.matmul %93, %95, %cst_68 {dimension_numbers = #tpu.dot_dimension_numbers<[1], [0], [0], [1], [0, 0, 1, 1], [], []>} : vector<256x128xbf16>, vector<128x128xbf16>, vector<256x128xf32> -> vector<256x128xf32>
    %97 = arith.addf %90, %96 : vector<256x128xf32>
    %98 = vector.extract_strided_slice %33 {offsets = [1, 0, 0, 1, 0, 0], sizes = [4, 1, 4, 1, 16, 128], strides = [1, 1, 1, 1, 1, 1]} : vector<5x2x5x2x16x128xbf16> to vector<4x1x4x1x16x128xbf16>
    %99 = vector.shape_cast %98 : vector<4x1x4x1x16x128xbf16> to vector<4x4x16x128xbf16>
    %100 = vector.shape_cast %99 : vector<4x4x16x128xbf16> to vector<256x128xbf16>
    %c2_69 = arith.constant 2 : index
    %c1_70 = arith.constant 1 : index
    %c0_71 = arith.constant 0 : index
    %c0_72 = arith.constant 0 : index
    %101 = vector.load %arg4[%c2_69, %c1_70, %c0_71, %c0_72] : memref<4x4x128x128xbf16, #tpu.memory_space<vmem>>, vector<1x1x128x128xbf16>
    %102 = vector.shape_cast %101 : vector<1x1x128x128xbf16> to vector<128x128xbf16>
    %cst_73 = arith.constant dense<0.000000e+00> : vector<256x128xf32>
    %103 = tpu.matmul %100, %102, %cst_73 {dimension_numbers = #tpu.dot_dimension_numbers<[1], [0], [0], [1], [0, 0, 1, 1], [], []>} : vector<256x128xbf16>, vector<128x128xbf16>, vector<256x128xf32> -> vector<256x128xf32>
    %104 = arith.addf %97, %103 : vector<256x128xf32>
    %105 = vector.extract_strided_slice %33 {offsets = [1, 0, 1, 0, 0, 0], sizes = [4, 1, 4, 1, 16, 128], strides = [1, 1, 1, 1, 1, 1]} : vector<5x2x5x2x16x128xbf16> to vector<4x1x4x1x16x128xbf16>
    %106 = vector.shape_cast %105 : vector<4x1x4x1x16x128xbf16> to vector<4x4x16x128xbf16>
    %107 = vector.shape_cast %106 : vector<4x4x16x128xbf16> to vector<256x128xbf16>
    %c2_74 = arith.constant 2 : index
    %c2_75 = arith.constant 2 : index
    %c0_76 = arith.constant 0 : index
    %c0_77 = arith.constant 0 : index
    %108 = vector.load %arg4[%c2_74, %c2_75, %c0_76, %c0_77] : memref<4x4x128x128xbf16, #tpu.memory_space<vmem>>, vector<1x1x128x128xbf16>
    %109 = vector.shape_cast %108 : vector<1x1x128x128xbf16> to vector<128x128xbf16>
    %cst_78 = arith.constant dense<0.000000e+00> : vector<256x128xf32>
    %110 = tpu.matmul %107, %109, %cst_78 {dimension_numbers = #tpu.dot_dimension_numbers<[1], [0], [0], [1], [0, 0, 1, 1], [], []>} : vector<256x128xbf16>, vector<128x128xbf16>, vector<256x128xf32> -> vector<256x128xf32>
    %111 = arith.addf %104, %110 : vector<256x128xf32>
    %112 = vector.extract_strided_slice %33 {offsets = [1, 0, 1, 1, 0, 0], sizes = [4, 1, 4, 1, 16, 128], strides = [1, 1, 1, 1, 1, 1]} : vector<5x2x5x2x16x128xbf16> to vector<4x1x4x1x16x128xbf16>
    %113 = vector.shape_cast %112 : vector<4x1x4x1x16x128xbf16> to vector<4x4x16x128xbf16>
    %114 = vector.shape_cast %113 : vector<4x4x16x128xbf16> to vector<256x128xbf16>
    %c2_79 = arith.constant 2 : index
    %c3_80 = arith.constant 3 : index
    %c0_81 = arith.constant 0 : index
    %c0_82 = arith.constant 0 : index
    %115 = vector.load %arg4[%c2_79, %c3_80, %c0_81, %c0_82] : memref<4x4x128x128xbf16, #tpu.memory_space<vmem>>, vector<1x1x128x128xbf16>
    %116 = vector.shape_cast %115 : vector<1x1x128x128xbf16> to vector<128x128xbf16>
    %cst_83 = arith.constant dense<0.000000e+00> : vector<256x128xf32>
    %117 = tpu.matmul %114, %116, %cst_83 {dimension_numbers = #tpu.dot_dimension_numbers<[1], [0], [0], [1], [0, 0, 1, 1], [], []>} : vector<256x128xbf16>, vector<128x128xbf16>, vector<256x128xf32> -> vector<256x128xf32>
    %118 = arith.addf %111, %117 : vector<256x128xf32>
    %119 = vector.extract_strided_slice %33 {offsets = [1, 1, 0, 0, 0, 0], sizes = [4, 1, 4, 1, 16, 128], strides = [1, 1, 1, 1, 1, 1]} : vector<5x2x5x2x16x128xbf16> to vector<4x1x4x1x16x128xbf16>
    %120 = vector.shape_cast %119 : vector<4x1x4x1x16x128xbf16> to vector<4x4x16x128xbf16>
    %121 = vector.shape_cast %120 : vector<4x4x16x128xbf16> to vector<256x128xbf16>
    %c3_84 = arith.constant 3 : index
    %c0_85 = arith.constant 0 : index
    %c0_86 = arith.constant 0 : index
    %c0_87 = arith.constant 0 : index
    %122 = vector.load %arg4[%c3_84, %c0_85, %c0_86, %c0_87] : memref<4x4x128x128xbf16, #tpu.memory_space<vmem>>, vector<1x1x128x128xbf16>
    %123 = vector.shape_cast %122 : vector<1x1x128x128xbf16> to vector<128x128xbf16>
    %cst_88 = arith.constant dense<0.000000e+00> : vector<256x128xf32>
    %124 = tpu.matmul %121, %123, %cst_88 {dimension_numbers = #tpu.dot_dimension_numbers<[1], [0], [0], [1], [0, 0, 1, 1], [], []>} : vector<256x128xbf16>, vector<128x128xbf16>, vector<256x128xf32> -> vector<256x128xf32>
    %125 = arith.addf %118, %124 : vector<256x128xf32>
    %126 = vector.extract_strided_slice %33 {offsets = [1, 1, 0, 1, 0, 0], sizes = [4, 1, 4, 1, 16, 128], strides = [1, 1, 1, 1, 1, 1]} : vector<5x2x5x2x16x128xbf16> to vector<4x1x4x1x16x128xbf16>
    %127 = vector.shape_cast %126 : vector<4x1x4x1x16x128xbf16> to vector<4x4x16x128xbf16>
    %128 = vector.shape_cast %127 : vector<4x4x16x128xbf16> to vector<256x128xbf16>
    %c3_89 = arith.constant 3 : index
    %c1_90 = arith.constant 1 : index
    %c0_91 = arith.constant 0 : index
    %c0_92 = arith.constant 0 : index
    %129 = vector.load %arg4[%c3_89, %c1_90, %c0_91, %c0_92] : memref<4x4x128x128xbf16, #tpu.memory_space<vmem>>, vector<1x1x128x128xbf16>
    %130 = vector.shape_cast %129 : vector<1x1x128x128xbf16> to vector<128x128xbf16>
    %cst_93 = arith.constant dense<0.000000e+00> : vector<256x128xf32>
    %131 = tpu.matmul %128, %130, %cst_93 {dimension_numbers = #tpu.dot_dimension_numbers<[1], [0], [0], [1], [0, 0, 1, 1], [], []>} : vector<256x128xbf16>, vector<128x128xbf16>, vector<256x128xf32> -> vector<256x128xf32>
    %132 = arith.addf %125, %131 : vector<256x128xf32>
    %133 = vector.extract_strided_slice %33 {offsets = [1, 1, 1, 0, 0, 0], sizes = [4, 1, 4, 1, 16, 128], strides = [1, 1, 1, 1, 1, 1]} : vector<5x2x5x2x16x128xbf16> to vector<4x1x4x1x16x128xbf16>
    %134 = vector.shape_cast %133 : vector<4x1x4x1x16x128xbf16> to vector<4x4x16x128xbf16>
    %135 = vector.shape_cast %134 : vector<4x4x16x128xbf16> to vector<256x128xbf16>
    %c3_94 = arith.constant 3 : index
    %c2_95 = arith.constant 2 : index
    %c0_96 = arith.constant 0 : index
    %c0_97 = arith.constant 0 : index
    %136 = vector.load %arg4[%c3_94, %c2_95, %c0_96, %c0_97] : memref<4x4x128x128xbf16, #tpu.memory_space<vmem>>, vector<1x1x128x128xbf16>
    %137 = vector.shape_cast %136 : vector<1x1x128x128xbf16> to vector<128x128xbf16>
    %cst_98 = arith.constant dense<0.000000e+00> : vector<256x128xf32>
    %138 = tpu.matmul %135, %137, %cst_98 {dimension_numbers = #tpu.dot_dimension_numbers<[1], [0], [0], [1], [0, 0, 1, 1], [], []>} : vector<256x128xbf16>, vector<128x128xbf16>, vector<256x128xf32> -> vector<256x128xf32>
    %139 = arith.addf %132, %138 : vector<256x128xf32>
    %140 = vector.extract_strided_slice %33 {offsets = [1, 1, 1, 1, 0, 0], sizes = [4, 1, 4, 1, 16, 128], strides = [1, 1, 1, 1, 1, 1]} : vector<5x2x5x2x16x128xbf16> to vector<4x1x4x1x16x128xbf16>
    %141 = vector.shape_cast %140 : vector<4x1x4x1x16x128xbf16> to vector<4x4x16x128xbf16>
    %142 = vector.shape_cast %141 : vector<4x4x16x128xbf16> to vector<256x128xbf16>
    %c3_99 = arith.constant 3 : index
    %c3_100 = arith.constant 3 : index
    %c0_101 = arith.constant 0 : index
    %c0_102 = arith.constant 0 : index
    %143 = vector.load %arg4[%c3_99, %c3_100, %c0_101, %c0_102] : memref<4x4x128x128xbf16, #tpu.memory_space<vmem>>, vector<1x1x128x128xbf16>
    %144 = vector.shape_cast %143 : vector<1x1x128x128xbf16> to vector<128x128xbf16>
    %cst_103 = arith.constant dense<0.000000e+00> : vector<256x128xf32>
    %145 = tpu.matmul %142, %144, %cst_103 {dimension_numbers = #tpu.dot_dimension_numbers<[1], [0], [0], [1], [0, 0, 1, 1], [], []>} : vector<256x128xbf16>, vector<128x128xbf16>, vector<256x128xf32> -> vector<256x128xf32>
    %146 = arith.addf %139, %145 : vector<256x128xf32>
    %c0_104 = arith.constant 0 : index
    %c0_105 = arith.constant 0 : index
    %147 = vector.load %arg5[%c0_104, %c0_105] : memref<1x128xf32, #tpu.memory_space<vmem>>, vector<1x128xf32>
    %148 = vector.broadcast %147 : vector<1x128xf32> to vector<256x128xf32>
    %149 = arith.addf %146, %148 : vector<256x128xf32>
    %cst_106 = arith.constant 0.000000e+00 : f32
    %150 = vector.broadcast %cst_106 : f32 to vector<256x128xf32>
    %151 = arith.maximumf %149, %150 : vector<256x128xf32>
    %152 = vector.shape_cast %151 : vector<256x128xf32> to vector<4x4x16x128xf32>
    %153 = arith.truncf %152 : vector<4x4x16x128xf32> to vector<4x4x16x128xbf16>
    %cst_107 = arith.constant 0.000000e+00 : f32
    %154 = vector.broadcast %cst_107 : f32 to vector<64x128xf32>
    %155 = vector.extract_strided_slice %153 {offsets = [0, 0, 0, 0], sizes = [2, 2, 16, 128], strides = [1, 1, 1, 1]} : vector<4x4x16x128xbf16> to vector<2x2x16x128xbf16>
    %156 = vector.shape_cast %155 : vector<2x2x16x128xbf16> to vector<64x128xbf16>
    %c0_108 = arith.constant 0 : index
    %c0_109 = arith.constant 0 : index
    %c0_110 = arith.constant 0 : index
    %c0_111 = arith.constant 0 : index
    %157 = vector.load %arg6[%c0_108, %c0_109, %c0_110, %c0_111] : memref<3x3x128x128xbf16, #tpu.memory_space<vmem>>, vector<1x1x128x128xbf16>
    %158 = vector.shape_cast %157 : vector<1x1x128x128xbf16> to vector<128x128xbf16>
    %cst_112 = arith.constant dense<0.000000e+00> : vector<64x128xf32>
    %159 = tpu.matmul %156, %158, %cst_112 {dimension_numbers = #tpu.dot_dimension_numbers<[1], [0], [0], [1], [0, 0, 1, 1], [], []>} : vector<64x128xbf16>, vector<128x128xbf16>, vector<64x128xf32> -> vector<64x128xf32>
    %160 = arith.addf %154, %159 : vector<64x128xf32>
    %161 = vector.extract_strided_slice %153 {offsets = [0, 1, 0, 0], sizes = [2, 2, 16, 128], strides = [1, 1, 1, 1]} : vector<4x4x16x128xbf16> to vector<2x2x16x128xbf16>
    %162 = vector.shape_cast %161 : vector<2x2x16x128xbf16> to vector<64x128xbf16>
    %c0_113 = arith.constant 0 : index
    %c1_114 = arith.constant 1 : index
    %c0_115 = arith.constant 0 : index
    %c0_116 = arith.constant 0 : index
    %163 = vector.load %arg6[%c0_113, %c1_114, %c0_115, %c0_116] : memref<3x3x128x128xbf16, #tpu.memory_space<vmem>>, vector<1x1x128x128xbf16>
    %164 = vector.shape_cast %163 : vector<1x1x128x128xbf16> to vector<128x128xbf16>
    %cst_117 = arith.constant dense<0.000000e+00> : vector<64x128xf32>
    %165 = tpu.matmul %162, %164, %cst_117 {dimension_numbers = #tpu.dot_dimension_numbers<[1], [0], [0], [1], [0, 0, 1, 1], [], []>} : vector<64x128xbf16>, vector<128x128xbf16>, vector<64x128xf32> -> vector<64x128xf32>
    %166 = arith.addf %160, %165 : vector<64x128xf32>
    %167 = vector.extract_strided_slice %153 {offsets = [0, 2, 0, 0], sizes = [2, 2, 16, 128], strides = [1, 1, 1, 1]} : vector<4x4x16x128xbf16> to vector<2x2x16x128xbf16>
    %168 = vector.shape_cast %167 : vector<2x2x16x128xbf16> to vector<64x128xbf16>
    %c0_118 = arith.constant 0 : index
    %c2_119 = arith.constant 2 : index
    %c0_120 = arith.constant 0 : index
    %c0_121 = arith.constant 0 : index
    %169 = vector.load %arg6[%c0_118, %c2_119, %c0_120, %c0_121] : memref<3x3x128x128xbf16, #tpu.memory_space<vmem>>, vector<1x1x128x128xbf16>
    %170 = vector.shape_cast %169 : vector<1x1x128x128xbf16> to vector<128x128xbf16>
    %cst_122 = arith.constant dense<0.000000e+00> : vector<64x128xf32>
    %171 = tpu.matmul %168, %170, %cst_122 {dimension_numbers = #tpu.dot_dimension_numbers<[1], [0], [0], [1], [0, 0, 1, 1], [], []>} : vector<64x128xbf16>, vector<128x128xbf16>, vector<64x128xf32> -> vector<64x128xf32>
    %172 = arith.addf %166, %171 : vector<64x128xf32>
    %173 = vector.extract_strided_slice %153 {offsets = [1, 0, 0, 0], sizes = [2, 2, 16, 128], strides = [1, 1, 1, 1]} : vector<4x4x16x128xbf16> to vector<2x2x16x128xbf16>
    %174 = vector.shape_cast %173 : vector<2x2x16x128xbf16> to vector<64x128xbf16>
    %c1_123 = arith.constant 1 : index
    %c0_124 = arith.constant 0 : index
    %c0_125 = arith.constant 0 : index
    %c0_126 = arith.constant 0 : index
    %175 = vector.load %arg6[%c1_123, %c0_124, %c0_125, %c0_126] : memref<3x3x128x128xbf16, #tpu.memory_space<vmem>>, vector<1x1x128x128xbf16>
    %176 = vector.shape_cast %175 : vector<1x1x128x128xbf16> to vector<128x128xbf16>
    %cst_127 = arith.constant dense<0.000000e+00> : vector<64x128xf32>
    %177 = tpu.matmul %174, %176, %cst_127 {dimension_numbers = #tpu.dot_dimension_numbers<[1], [0], [0], [1], [0, 0, 1, 1], [], []>} : vector<64x128xbf16>, vector<128x128xbf16>, vector<64x128xf32> -> vector<64x128xf32>
    %178 = arith.addf %172, %177 : vector<64x128xf32>
    %179 = vector.extract_strided_slice %153 {offsets = [1, 1, 0, 0], sizes = [2, 2, 16, 128], strides = [1, 1, 1, 1]} : vector<4x4x16x128xbf16> to vector<2x2x16x128xbf16>
    %180 = vector.shape_cast %179 : vector<2x2x16x128xbf16> to vector<64x128xbf16>
    %c1_128 = arith.constant 1 : index
    %c1_129 = arith.constant 1 : index
    %c0_130 = arith.constant 0 : index
    %c0_131 = arith.constant 0 : index
    %181 = vector.load %arg6[%c1_128, %c1_129, %c0_130, %c0_131] : memref<3x3x128x128xbf16, #tpu.memory_space<vmem>>, vector<1x1x128x128xbf16>
    %182 = vector.shape_cast %181 : vector<1x1x128x128xbf16> to vector<128x128xbf16>
    %cst_132 = arith.constant dense<0.000000e+00> : vector<64x128xf32>
    %183 = tpu.matmul %180, %182, %cst_132 {dimension_numbers = #tpu.dot_dimension_numbers<[1], [0], [0], [1], [0, 0, 1, 1], [], []>} : vector<64x128xbf16>, vector<128x128xbf16>, vector<64x128xf32> -> vector<64x128xf32>
    %184 = arith.addf %178, %183 : vector<64x128xf32>
    %185 = vector.extract_strided_slice %153 {offsets = [1, 2, 0, 0], sizes = [2, 2, 16, 128], strides = [1, 1, 1, 1]} : vector<4x4x16x128xbf16> to vector<2x2x16x128xbf16>
    %186 = vector.shape_cast %185 : vector<2x2x16x128xbf16> to vector<64x128xbf16>
    %c1_133 = arith.constant 1 : index
    %c2_134 = arith.constant 2 : index
    %c0_135 = arith.constant 0 : index
    %c0_136 = arith.constant 0 : index
    %187 = vector.load %arg6[%c1_133, %c2_134, %c0_135, %c0_136] : memref<3x3x128x128xbf16, #tpu.memory_space<vmem>>, vector<1x1x128x128xbf16>
    %188 = vector.shape_cast %187 : vector<1x1x128x128xbf16> to vector<128x128xbf16>
    %cst_137 = arith.constant dense<0.000000e+00> : vector<64x128xf32>
    %189 = tpu.matmul %186, %188, %cst_137 {dimension_numbers = #tpu.dot_dimension_numbers<[1], [0], [0], [1], [0, 0, 1, 1], [], []>} : vector<64x128xbf16>, vector<128x128xbf16>, vector<64x128xf32> -> vector<64x128xf32>
    %190 = arith.addf %184, %189 : vector<64x128xf32>
    %191 = vector.extract_strided_slice %153 {offsets = [2, 0, 0, 0], sizes = [2, 2, 16, 128], strides = [1, 1, 1, 1]} : vector<4x4x16x128xbf16> to vector<2x2x16x128xbf16>
    %192 = vector.shape_cast %191 : vector<2x2x16x128xbf16> to vector<64x128xbf16>
    %c2_138 = arith.constant 2 : index
    %c0_139 = arith.constant 0 : index
    %c0_140 = arith.constant 0 : index
    %c0_141 = arith.constant 0 : index
    %193 = vector.load %arg6[%c2_138, %c0_139, %c0_140, %c0_141] : memref<3x3x128x128xbf16, #tpu.memory_space<vmem>>, vector<1x1x128x128xbf16>
    %194 = vector.shape_cast %193 : vector<1x1x128x128xbf16> to vector<128x128xbf16>
    %cst_142 = arith.constant dense<0.000000e+00> : vector<64x128xf32>
    %195 = tpu.matmul %192, %194, %cst_142 {dimension_numbers = #tpu.dot_dimension_numbers<[1], [0], [0], [1], [0, 0, 1, 1], [], []>} : vector<64x128xbf16>, vector<128x128xbf16>, vector<64x128xf32> -> vector<64x128xf32>
    %196 = arith.addf %190, %195 : vector<64x128xf32>
    %197 = vector.extract_strided_slice %153 {offsets = [2, 1, 0, 0], sizes = [2, 2, 16, 128], strides = [1, 1, 1, 1]} : vector<4x4x16x128xbf16> to vector<2x2x16x128xbf16>
    %198 = vector.shape_cast %197 : vector<2x2x16x128xbf16> to vector<64x128xbf16>
    %c2_143 = arith.constant 2 : index
    %c1_144 = arith.constant 1 : index
    %c0_145 = arith.constant 0 : index
    %c0_146 = arith.constant 0 : index
    %199 = vector.load %arg6[%c2_143, %c1_144, %c0_145, %c0_146] : memref<3x3x128x128xbf16, #tpu.memory_space<vmem>>, vector<1x1x128x128xbf16>
    %200 = vector.shape_cast %199 : vector<1x1x128x128xbf16> to vector<128x128xbf16>
    %cst_147 = arith.constant dense<0.000000e+00> : vector<64x128xf32>
    %201 = tpu.matmul %198, %200, %cst_147 {dimension_numbers = #tpu.dot_dimension_numbers<[1], [0], [0], [1], [0, 0, 1, 1], [], []>} : vector<64x128xbf16>, vector<128x128xbf16>, vector<64x128xf32> -> vector<64x128xf32>
    %202 = arith.addf %196, %201 : vector<64x128xf32>
    %203 = vector.extract_strided_slice %153 {offsets = [2, 2, 0, 0], sizes = [2, 2, 16, 128], strides = [1, 1, 1, 1]} : vector<4x4x16x128xbf16> to vector<2x2x16x128xbf16>
    %204 = vector.shape_cast %203 : vector<2x2x16x128xbf16> to vector<64x128xbf16>
    %c2_148 = arith.constant 2 : index
    %c2_149 = arith.constant 2 : index
    %c0_150 = arith.constant 0 : index
    %c0_151 = arith.constant 0 : index
    %205 = vector.load %arg6[%c2_148, %c2_149, %c0_150, %c0_151] : memref<3x3x128x128xbf16, #tpu.memory_space<vmem>>, vector<1x1x128x128xbf16>
    %206 = vector.shape_cast %205 : vector<1x1x128x128xbf16> to vector<128x128xbf16>
    %cst_152 = arith.constant dense<0.000000e+00> : vector<64x128xf32>
    %207 = tpu.matmul %204, %206, %cst_152 {dimension_numbers = #tpu.dot_dimension_numbers<[1], [0], [0], [1], [0, 0, 1, 1], [], []>} : vector<64x128xbf16>, vector<128x128xbf16>, vector<64x128xf32> -> vector<64x128xf32>
    %208 = arith.addf %202, %207 : vector<64x128xf32>
    %c0_153 = arith.constant 0 : index
    %c0_154 = arith.constant 0 : index
    %209 = vector.load %arg7[%c0_153, %c0_154] : memref<1x128xf32, #tpu.memory_space<vmem>>, vector<1x128xf32>
    %210 = vector.broadcast %209 : vector<1x128xf32> to vector<64x128xf32>
    %211 = arith.addf %208, %210 : vector<64x128xf32>
    %cst_155 = arith.constant 0.000000e+00 : f32
    %212 = vector.broadcast %cst_155 : f32 to vector<64x128xf32>
    %213 = arith.maximumf %211, %212 : vector<64x128xf32>
    %214 = vector.shape_cast %213 : vector<64x128xf32> to vector<2x2x16x128xf32>
    %215 = arith.truncf %214 : vector<2x2x16x128xf32> to vector<2x2x16x128xbf16>
    %cst_156 = arith.constant 0.000000e+00 : f32
    %216 = vector.broadcast %cst_156 : f32 to vector<16x512xf32>
    %217 = vector.extract_strided_slice %215 {offsets = [0, 0, 0, 0], sizes = [1, 1, 16, 128], strides = [1, 1, 1, 1]} : vector<2x2x16x128xbf16> to vector<1x1x16x128xbf16>
    %218 = vector.shape_cast %217 : vector<1x1x16x128xbf16> to vector<16x128xbf16>
    %c0_157 = arith.constant 0 : index
    %c0_158 = arith.constant 0 : index
    %c0_159 = arith.constant 0 : index
    %c0_160 = arith.constant 0 : index
    %219 = vector.load %arg8[%c0_157, %c0_158, %c0_159, %c0_160] : memref<2x2x128x512xbf16, #tpu.memory_space<vmem>>, vector<1x1x128x512xbf16>
    %220 = vector.shape_cast %219 : vector<1x1x128x512xbf16> to vector<128x512xbf16>
    %cst_161 = arith.constant dense<0.000000e+00> : vector<16x512xf32>
    %221 = tpu.matmul %218, %220, %cst_161 {dimension_numbers = #tpu.dot_dimension_numbers<[1], [0], [0], [1], [0, 0, 1, 1], [], []>} : vector<16x128xbf16>, vector<128x512xbf16>, vector<16x512xf32> -> vector<16x512xf32>
    %222 = arith.addf %216, %221 : vector<16x512xf32>
    %223 = vector.extract_strided_slice %215 {offsets = [0, 1, 0, 0], sizes = [1, 1, 16, 128], strides = [1, 1, 1, 1]} : vector<2x2x16x128xbf16> to vector<1x1x16x128xbf16>
    %224 = vector.shape_cast %223 : vector<1x1x16x128xbf16> to vector<16x128xbf16>
    %c0_162 = arith.constant 0 : index
    %c1_163 = arith.constant 1 : index
    %c0_164 = arith.constant 0 : index
    %c0_165 = arith.constant 0 : index
    %225 = vector.load %arg8[%c0_162, %c1_163, %c0_164, %c0_165] : memref<2x2x128x512xbf16, #tpu.memory_space<vmem>>, vector<1x1x128x512xbf16>
    %226 = vector.shape_cast %225 : vector<1x1x128x512xbf16> to vector<128x512xbf16>
    %cst_166 = arith.constant dense<0.000000e+00> : vector<16x512xf32>
    %227 = tpu.matmul %224, %226, %cst_166 {dimension_numbers = #tpu.dot_dimension_numbers<[1], [0], [0], [1], [0, 0, 1, 1], [], []>} : vector<16x128xbf16>, vector<128x512xbf16>, vector<16x512xf32> -> vector<16x512xf32>
    %228 = arith.addf %222, %227 : vector<16x512xf32>
    %229 = vector.extract_strided_slice %215 {offsets = [1, 0, 0, 0], sizes = [1, 1, 16, 128], strides = [1, 1, 1, 1]} : vector<2x2x16x128xbf16> to vector<1x1x16x128xbf16>
    %230 = vector.shape_cast %229 : vector<1x1x16x128xbf16> to vector<16x128xbf16>
    %c1_167 = arith.constant 1 : index
    %c0_168 = arith.constant 0 : index
    %c0_169 = arith.constant 0 : index
    %c0_170 = arith.constant 0 : index
    %231 = vector.load %arg8[%c1_167, %c0_168, %c0_169, %c0_170] : memref<2x2x128x512xbf16, #tpu.memory_space<vmem>>, vector<1x1x128x512xbf16>
    %232 = vector.shape_cast %231 : vector<1x1x128x512xbf16> to vector<128x512xbf16>
    %cst_171 = arith.constant dense<0.000000e+00> : vector<16x512xf32>
    %233 = tpu.matmul %230, %232, %cst_171 {dimension_numbers = #tpu.dot_dimension_numbers<[1], [0], [0], [1], [0, 0, 1, 1], [], []>} : vector<16x128xbf16>, vector<128x512xbf16>, vector<16x512xf32> -> vector<16x512xf32>
    %234 = arith.addf %228, %233 : vector<16x512xf32>
    %235 = vector.extract_strided_slice %215 {offsets = [1, 1, 0, 0], sizes = [1, 1, 16, 128], strides = [1, 1, 1, 1]} : vector<2x2x16x128xbf16> to vector<1x1x16x128xbf16>
    %236 = vector.shape_cast %235 : vector<1x1x16x128xbf16> to vector<16x128xbf16>
    %c1_172 = arith.constant 1 : index
    %c1_173 = arith.constant 1 : index
    %c0_174 = arith.constant 0 : index
    %c0_175 = arith.constant 0 : index
    %237 = vector.load %arg8[%c1_172, %c1_173, %c0_174, %c0_175] : memref<2x2x128x512xbf16, #tpu.memory_space<vmem>>, vector<1x1x128x512xbf16>
    %238 = vector.shape_cast %237 : vector<1x1x128x512xbf16> to vector<128x512xbf16>
    %cst_176 = arith.constant dense<0.000000e+00> : vector<16x512xf32>
    %239 = tpu.matmul %236, %238, %cst_176 {dimension_numbers = #tpu.dot_dimension_numbers<[1], [0], [0], [1], [0, 0, 1, 1], [], []>} : vector<16x128xbf16>, vector<128x512xbf16>, vector<16x512xf32> -> vector<16x512xf32>
    %240 = arith.addf %234, %239 : vector<16x512xf32>
    %c0_177 = arith.constant 0 : index
    %c0_178 = arith.constant 0 : index
    %241 = vector.load %arg9[%c0_177, %c0_178] : memref<1x512xf32, #tpu.memory_space<vmem>>, vector<1x512xf32>
    %242 = vector.broadcast %241 : vector<1x512xf32> to vector<16x512xf32>
    %243 = arith.addf %240, %242 : vector<16x512xf32>
    %cst_179 = arith.constant 0.000000e+00 : f32
    %244 = vector.broadcast %cst_179 : f32 to vector<16x512xf32>
    %245 = arith.maximumf %243, %244 : vector<16x512xf32>
    %246 = arith.truncf %245 : vector<16x512xf32> to vector<16x512xbf16>
    %c0_180 = arith.constant 0 : index
    %c0_181 = arith.constant 0 : index
    %247 = vector.load %arg10[%c0_180, %c0_181] : memref<512x128xbf16, #tpu.memory_space<vmem>>, vector<512x128xbf16>
    %cst_182 = arith.constant dense<0.000000e+00> : vector<16x128xf32>
    %248 = tpu.matmul %246, %247, %cst_182 {dimension_numbers = #tpu.dot_dimension_numbers<[1], [0], [0], [1], [0, 0, 1, 1], [], []>} : vector<16x512xbf16>, vector<512x128xbf16>, vector<16x128xf32> -> vector<16x128xf32>
    %c0_183 = arith.constant 0 : index
    %c0_184 = arith.constant 0 : index
    %249 = vector.load %arg11[%c0_183, %c0_184] : memref<1x128xf32, #tpu.memory_space<vmem>>, vector<1x128xf32>
    %250 = vector.broadcast %249 : vector<1x128xf32> to vector<16x128xf32>
    %251 = arith.addf %248, %250 : vector<16x128xf32>
    %c0_185 = arith.constant 0 : index
    %c0_186 = arith.constant 0 : index
    %252 = vector.load %arg12[%c0_185, %c0_186] : memref<16x128xf32, #tpu.memory_space<vmem>>, vector<16x128xf32>
    tpu.vector_store %arg12[%c0_185, %c0_186], %251 {strides = array<i32>} : memref<16x128xf32, #tpu.memory_space<vmem>>, vector<16x128xf32>,
    return
  }
  func.func @transform_0(%arg0: i32) -> (i32, i32, i32, i32) {
    %c0_i32 = arith.constant 0 : i32
    %c0_i32_0 = arith.constant 0 : i32
    %c0_i32_1 = arith.constant 0 : i32
    %c0_i32_2 = arith.constant 0 : i32
    return %c0_i32, %c0_i32_0, %arg0, %c0_i32_1 : i32, i32, i32, i32
  }
  func.func @transform_1(%arg0: i32) -> (i32, i32, i32, i32) {
    %c0_i32 = arith.constant 0 : i32
    %c0_i32_0 = arith.constant 0 : i32
    %c0_i32_1 = arith.constant 0 : i32
    %c0_i32_2 = arith.constant 0 : i32
    %c0_i32_3 = arith.constant 0 : i32
    return %c0_i32, %c0_i32_0, %c0_i32_1, %c0_i32_2 : i32, i32, i32, i32
  }
  func.func @transform_2(%arg0: i32) -> (i32, i32) {
    %c0_i32 = arith.constant 0 : i32
    %c0_i32_0 = arith.constant 0 : i32
    %c0_i32_1 = arith.constant 0 : i32
    return %c0_i32, %c0_i32_0 : i32, i32
  }
  func.func @transform_3(%arg0: i32) -> (i32, i32, i32, i32) {
    %c0_i32 = arith.constant 0 : i32
    %c0_i32_0 = arith.constant 0 : i32
    %c0_i32_1 = arith.constant 0 : i32
    %c0_i32_2 = arith.constant 0 : i32
    %c0_i32_3 = arith.constant 0 : i32
    return %c0_i32, %c0_i32_0, %c0_i32_1, %c0_i32_2 : i32, i32, i32, i32
  }
  func.func @transform_4(%arg0: i32) -> (i32, i32) {
    %c0_i32 = arith.constant 0 : i32
    %c0_i32_0 = arith.constant 0 : i32
    %c0_i32_1 = arith.constant 0 : i32
    return %c0_i32, %c0_i32_0 : i32, i32
  }
  func.func @transform_5(%arg0: i32) -> (i32, i32, i32, i32) {
    %c0_i32 = arith.constant 0 : i32
    %c0_i32_0 = arith.constant 0 : i32
    %c0_i32_1 = arith.constant 0 : i32
    %c0_i32_2 = arith.constant 0 : i32
    %c0_i32_3 = arith.constant 0 : i32
    return %c0_i32, %c0_i32_0, %c0_i32_1, %c0_i32_2 : i32, i32, i32, i32
  }
  func.func @transform_6(%arg0: i32) -> (i32, i32) {
    %c0_i32 = arith.constant 0 : i32
    %c0_i32_0 = arith.constant 0 : i32
    %c0_i32_1 = arith.constant 0 : i32
    return %c0_i32, %c0_i32_0 : i32, i32
  }
  func.func @transform_7(%arg0: i32) -> (i32, i32, i32, i32) {
    %c0_i32 = arith.constant 0 : i32
    %c0_i32_0 = arith.constant 0 : i32
    %c0_i32_1 = arith.constant 0 : i32
    %c0_i32_2 = arith.constant 0 : i32
    %c0_i32_3 = arith.constant 0 : i32
    return %c0_i32, %c0_i32_0, %c0_i32_1, %c0_i32_2 : i32, i32, i32, i32
  }
  func.func @transform_8(%arg0: i32) -> (i32, i32) {
    %c0_i32 = arith.constant 0 : i32
    %c0_i32_0 = arith.constant 0 : i32
    %c0_i32_1 = arith.constant 0 : i32
    return %c0_i32, %c0_i32_0 : i32, i32
  }
  func.func @transform_9(%arg0: i32) -> (i32, i32) {
    %c0_i32 = arith.constant 0 : i32
    %c0_i32_0 = arith.constant 0 : i32
    %c0_i32_1 = arith.constant 0 : i32
    return %c0_i32, %c0_i32_0 : i32, i32
  }
  func.func @transform_10(%arg0: i32) -> (i32, i32) {
    %c0_i32 = arith.constant 0 : i32
    %c0_i32_0 = arith.constant 0 : i32
    %c0_i32_1 = arith.constant 0 : i32
    return %c0_i32, %c0_i32_0 : i32, i32
  }
  func.func @transform_11(%arg0: i32) -> (i32, i32) {
    %c0_i32 = arith.constant 0 : i32
    %c0_i32_0 = arith.constant 0 : i32
    return %arg0, %c0_i32 : i32, i32
  }
}

</mosaic_0001>

<bundles_post_ra>
// kernel: dqn_forward.1
= control target key start
LH: loop header
LB: loop body
LE: loop exit
PB: predicated region body
PF: predicated region fallthrough
CT: control target
= control target key end

     0   :  { %vm822_vm0 = vcmask 523264   ;;  %s18138_s1 = inlined_call_operand.vmem [shape: bf16[2,2,64,128], index: 1, kind: input, shape index: {}]   ;;  %s18139_s0 = inlined_call_operand.vmem [shape: bf16[11,11,16,64], index: 0, kind: input, shape index: {}]   ;;  %s18140_s3 = inlined_call_operand.vmem [shape: bf16[4,4,128,128], index: 3, kind: input, shape index: {}]   ;;  %s18141_s2 = inlined_call_operand.vmem [shape: f32[1,128], index: 2, kind: input, shape index: {}]   ;;  %s18142_s5 = inlined_call_operand.vmem [shape: bf16[3,3,128,128], index: 5, kind: input, shape index: {}]   ;;  %s18143_s4 = inlined_call_operand.vmem [shape: f32[1,128], index: 4, kind: input, shape index: {}]   ;;  %s18144_s6 = inlined_call_operand.vmem [shape: f32[1,128], index: 6, kind: input, shape index: {}]   ;;  %s18145_s7 = inlined_call_operand.vmem [shape: bf16[2,2,128,512], index: 7, kind: input, shape index: {}]   ;;  %s18146_s9 = inlined_call_operand.vmem [shape: bf16[512,128], index: 9, kind: input, shape index: {}]   ;;  %s18147_s8 = inlined_call_operand.vmem [shape: f32[1,512], index: 8, kind: input, shape index: {}]   ;;  %s18148_s10 = inlined_call_operand.vmem [shape: f32[1,128], index: 10, kind: input, shape index: {}]   ;;  %s18149_s11 = inlined_call_operand.vmem [shape: f32[16,128], index: 11, kind: output, shape index: {}]  }
   0x1   :  { %v13448_v0 = vld [vmem:[%s18138_s1 + $0x38] sm:$0xff]  ;;  %v13447_v2 = vld [vmem:[%s18138_s1 + $0x30] sm:$0xff]  ;;  %v13446_v4 = vld [vmem:[%s18138_s1 + $0x28] sm:$0xff] }
   0x2   :  { %v13444_v1 = vld [vmem:[%s18138_s1 + $0x18] sm:$0xff]  ;;  %1127 = vmatpush.bf16.msra.mxu0 %v13448_v0  ;;  %13817 = vmatpush.bf16.msra.mxu2 %v13448_v0  ;;  %v13443_v3 = vld [vmem:[%s18138_s1 + $0x10] sm:$0xff]  ;;  %v13442_v5 = vld [vmem:[%s18138_s1 + $0x8] sm:$0xff] }
   0x3   :  { %1740 = vmatpush.bf16.msra.mxu1 %v13444_v1  ;;  %13821 = vmatpush.bf16.msra.mxu3 %v13444_v1  ;;  %v13445_v6 = vld [vmem:[%s18138_s1 + $0x20] sm:$0xff]  ;;  %v13452_v8 = vld [vmem:[%s18138_s1 + $0x58] sm:$0xff]  ;;  %v13321_v10 = vld [vmem:[%s18139_s0 + $0x8] sm:$0xff] }
   0x4   :  { %v13441_v7 = vld [vmem:[%s18138_s1] sm:$0xff]  ;;  %v13456_v9 = vld [vmem:[%s18138_s1 + $0x78] sm:$0xff]  ;;  %v13429_v11 = vld [vmem:[%s18139_s0 + $0x368] sm:$0xff] }
   0x5   :  { %v13320_v12 = vld [vmem:[%s18139_s0] sm:$0xff]  ;;  %v13472_v14 = vld [vmem:[%s18140_s3 + $0x78] sm:$0xff]  ;;  %v13451_v15 = vld [vmem:[%s18138_s1 + $0x50] sm:$0xff] }
   0x6   :  { %1128 = vmatpush.bf16.msra.mxu0 %v13447_v2  ;;  %13818 = vmatpush.bf16.msra.mxu2 %v13447_v2  ;;  %v13428_v13 = vld [vmem:[%s18139_s0 + $0x360] sm:$0xff]  ;;  %v13455_v16 = vld [vmem:[%s18138_s1 + $0x70] sm:$0xff]  ;;  %v13450_v17 = vld [vmem:[%s18138_s1 + $0x48] sm:$0xff] }
   0x7   :  { %1741 = vmatpush.bf16.msra.mxu1 %v13443_v3  ;;  %13822 = vmatpush.bf16.msra.mxu3 %v13443_v3  ;;  %v13454_v18 = vld [vmem:[%s18138_s1 + $0x68] sm:$0xff]  ;;  %v13449_v19 = vld [vmem:[%s18138_s1 + $0x40] sm:$0xff]  ;;  %v13322_v21 = vld [vmem:[%s18139_s0 + $0x10] sm:$0xff] }
   0x8   :  { %v13453_v20 = vld [vmem:[%s18138_s1 + $0x60] sm:$0xff]  ;;  %v13970_v22 = vld [vmem:[%s18139_s0 + $0x58] sm:$0xff]  ;;  %v13995_v27 = vld [vmem:[%s18139_s0 + $0x68] sm:$0xff] }
   0x9   :  { %v13975_v23 = vld [vmem:[%s18139_s0 + $0x60] sm:$0xff]  ;;  %v13480_v24 = vld [vmem:[%s18140_s3 + $0xb8] sm:$0xff]  ;;  %v14009_v29 = vld [vmem:[%s18139_s0 + $0x70] sm:$0xff] }
   0xa   :  { %1129 = vmatpush.bf16.msra.mxu0 %v13446_v4  ;;  %13819 = vmatpush.bf16.msra.mxu2 %v13446_v4  ;;  %v13488_v25 = vld [vmem:[%s18140_s3 + $0xf8] sm:$0xff]  ;;  %v13324_v28 = vld [vmem:[%s18139_s0 + $0x20] sm:$0xff]  ;;  %v13325_v31 = vld [vmem:[%s18139_s0 + $0x28] sm:$0xff] }
   0xb   :  { %1742 = vmatpush.bf16.msra.mxu1 %v13442_v5  ;;  %13823 = vmatpush.bf16.msra.mxu3 %v13442_v5  ;;  %v13323_v26 = vld [vmem:[%s18139_s0 + $0x18] sm:$0xff]  ;;  %v13326_v33 = vld [vmem:[%s18139_s0 + $0x30] sm:$0xff]  ;;  %v14040_v34 = vld [vmem:[%s18139_s0 + $0x80] sm:$0xff] }
   0xc   :  { %v13464_v30 = vld [vmem:[%s18140_s3 + $0x38] sm:$0xff]  ;;  %v14054_v36 = vld [vmem:[%s18139_s0 + $0x88] sm:$0xff]  ;;  %v13328_v37 = vld [vmem:[%s18139_s0 + $0x40] sm:$0xff] }
   0xd   :  { %v14026_v32 = vld [vmem:[%s18139_s0 + $0x78] sm:$0xff]  ;;  %v14068_v38 = vld [vmem:[%s18139_s0 + $0x90] sm:$0xff]  ;;  %v13329_v39 = vld [vmem:[%s18139_s0 + $0x48] sm:$0xff] }
   0xe   :  { %1130 = vmatpush.bf16.msra.mxu0 %v13445_v6  ;;  %13820 = vmatpush.bf16.msra.mxu2 %v13445_v6  ;;  %v13327_v35 = vld [vmem:[%s18139_s0 + $0x38] sm:$0xff]  ;;  %v13330_v52 = vld [vmem:[%s18139_s0 + $0x50] sm:$0xff]  ;;  %v14100_v55 = vld [vmem:[%s18139_s0 + $0xa0] sm:$0xff] }
   0xf   :  { %1743 = vmatpush.bf16.msra.mxu1 %v13441_v7  ;;  %13824 = vmatpush.bf16.msra.mxu3 %v13441_v7  ;;  %v14082_v41 = vld [vmem:[%s18139_s0 + $0x98] sm:$0xff]  ;;  %v14111_v63 = vld [vmem:[%s18141_s2] ss:$0 sm:$0xff]  ;;  %v14117_v7 = vld [vmem:[%s18139_s0 + $0xa8] sm:$0xff] }
  0x11   :  { %10868 = vmatmul.msk.bf16.vlgmr.msra.gmra.mxu0 %vm822_vm0, %v13321_v10  ;;  %10967 = vmatmul.msk.bf16.vlgmr.msra.gmra.mxu2 %vm822_vm0, %v13429_v11 }
  0x12   :  { %2362 = vmatpush.bf16.msrb.mxu2 %v13452_v8  ;;  %11024 = vmatmul.msk.bf16.vlgmr.msra.gmra.mxu1 %vm822_vm0, %v13320_v12 }
  0x13   :  { %3112 = vmatpush.bf16.msrb.mxu3 %v13456_v9  ;;  %4598 = vmatpush.bf16.msrb.mxu0 %v13472_v14 }
  0x14   :  { %11123 = vmatmul.msk.bf16.vlgmr.msra.gmra.mxu3 %vm822_vm0, %v13428_v13  ;;  %4831 = vmatpush.bf16.msrb.mxu1 %v13464_v30 }
  0x16   :  { %2363 = vmatpush.bf16.msrb.mxu2 %v13451_v15 }
  0x17   :  { %3113 = vmatpush.bf16.msrb.mxu3 %v13455_v16 }
  0x1a   :  { %2364 = vmatpush.bf16.msrb.mxu2 %v13450_v17 }
  0x1b   :  { %3114 = vmatpush.bf16.msrb.mxu3 %v13454_v18 }
  0x1e   :  { %2365 = vmatpush.bf16.msrb.mxu2 %v13449_v19 }
  0x1f   :  { %3115 = vmatpush.bf16.msrb.mxu3 %v13453_v20 }
  0x21   :  { %10869 = vmatmul.msk.bf16.gmra.mxu0 %vm822_vm0, %v13322_v21  ;;  %11188 = vmatmul.msk.bf16.vlgmr.msrb.gmra.mxu2 %vm822_vm0, %v13970_v22 }
  0x22   :  { %11025 = vmatmul.msk.bf16.gmra.mxu1 %vm822_vm0, %v13321_v10  ;;  %5009 = vmatpush.bf16.msra.mxu2 %v13480_v24 }
  0x23   :  { %5219 = vmatpush.bf16.msra.mxu3 %v13488_v25 }
  0x24   :  { %11316 = vmatmul.msk.bf16.vlgmr.msrb.gmra.mxu3 %vm822_vm0, %v13975_v23 }
  0x31   :  { %10870 = vmatmul.msk.bf16.gmra.mxu0 %vm822_vm0, %v13323_v26  ;;  %11189 = vmatmul.msk.bf16.gmra.mxu2 %vm822_vm0, %v13975_v23 }
  0x32   :  { %11026 = vmatmul.msk.bf16.gmra.mxu1 %vm822_vm0, %v13322_v21 }
  0x34   :  { %11317 = vmatmul.msk.bf16.gmra.mxu3 %vm822_vm0, %v13995_v27 }
  0x41   :  { %10871 = vmatmul.msk.bf16.gmra.mxu0 %vm822_vm0, %v13324_v28  ;;  %11190 = vmatmul.msk.bf16.gmra.mxu2 %vm822_vm0, %v13995_v27 }
  0x42   :  { %11027 = vmatmul.msk.bf16.gmra.mxu1 %vm822_vm0, %v13323_v26 }
  0x44   :  { %11318 = vmatmul.msk.bf16.gmra.mxu3 %vm822_vm0, %v14009_v29 }
  0x51   :  { %10872 = vmatmul.msk.bf16.gmra.mxu0 %vm822_vm0, %v13325_v31  ;;  %11191 = vmatmul.msk.bf16.gmra.mxu2 %vm822_vm0, %v14009_v29 }
  0x52   :  { %11028 = vmatmul.msk.bf16.gmra.mxu1 %vm822_vm0, %v13324_v28 }
  0x54   :  { %11319 = vmatmul.msk.bf16.gmra.mxu3 %vm822_vm0, %v14026_v32 }
  0x61   :  { %10873 = vmatmul.msk.bf16.gmra.mxu0 %vm822_vm0, %v13326_v33  ;;  %11192 = vmatmul.msk.bf16.gmra.mxu2 %vm822_vm0, %v14026_v32 }
  0x62   :  { %11029 = vmatmul.msk.bf16.gmra.mxu1 %vm822_vm0, %v13325_v31 }
  0x64   :  { %11320 = vmatmul.msk.bf16.gmra.mxu3 %vm822_vm0, %v14040_v34 }
  0x71   :  { %10874 = vmatmul.msk.bf16.gmra.mxu0 %vm822_vm0, %v13327_v35  ;;  %11193 = vmatmul.msk.bf16.gmra.mxu2 %vm822_vm0, %v14040_v34 }
  0x72   :  { %11030 = vmatmul.msk.bf16.gmra.mxu1 %vm822_vm0, %v13326_v33 }
  0x74   :  { %11321 = vmatmul.msk.bf16.gmra.mxu3 %vm822_vm0, %v14054_v36 }
  0x81   :  { %10875 = vmatmul.msk.bf16.gmra.mxu0 %vm822_vm0, %v13328_v37  ;;  %11194 = vmatmul.msk.bf16.gmra.mxu2 %vm822_vm0, %v14054_v36 }
  0x82   :  { %11031 = vmatmul.msk.bf16.gmra.mxu1 %vm822_vm0, %v13327_v35  ;;  %v14134_v35 = vld [vmem:[%s18139_s0 + $0xb0] sm:$0xff] }
  0x84   :  { %11322 = vmatmul.msk.bf16.gmra.mxu3 %vm822_vm0, %v14068_v38 }
  0x8e   :  { %v1132_v40 = vpop.f32.mrf.mxu0 }
  0x8f   :  { %v1745_v42 = vpop.f32.mrf.mxu1 }
  0x90   :  { %v1746_v43 = vadd.f32 %v1745_v42, %v1132_v40 }
  0x91   :  { %10876 = vmatmul.msk.bf16.gmra.mxu0 %vm822_vm0, %v13329_v39  ;;  %11195 = vmatmul.msk.bf16.gmra.mxu2 %vm822_vm0, %v14068_v38 }
  0x92   :  { %11032 = vmatmul.msk.bf16.gmra.mxu1 %vm822_vm0, %v13328_v37 }
  0x94   :  { %11323 = vmatmul.msk.bf16.gmra.mxu3 %vm822_vm0, %v14082_v41  ;;  %v1627_v44 = vpop.f32.mrf.mxu2 }
  0x96   :  { %v1134_v47 = vpop.f32.mrf.mxu0 }
  0x97   :  { %v2240_v45 = vpop.f32.mrf.mxu3  ;;  %v1747_v48 = vpop.f32.mrf.mxu1 }
  0x98   :  { %v14090_v46 = vadd.f32 %v2240_v45, %v1627_v44  ;;  %v1748_v49 = vadd.f32 %v1747_v48, %v1134_v47 }
  0x9c   :  { %v1629_v50 = vpop.f32.mrf.mxu2 }
  0x9e   :  { %v1137_v54 = vpop.f32.mrf.mxu0 }
  0x9f   :  { %v2242_v51 = vpop.f32.mrf.mxu3  ;;  %v1750_v56 = vpop.f32.mrf.mxu1 }
  0xa0   :  { %v14095_v53 = vadd.f32 %v2242_v51, %v1629_v50  ;;  %v1751_v57 = vadd.f32 %v1750_v56, %v1137_v54 }
  0xa1   :  { %10877 = vmatmul.msk.bf16.gmra.mxu0 %vm822_vm0, %v13330_v52  ;;  %11196 = vmatmul.msk.bf16.gmra.mxu2 %vm822_vm0, %v14082_v41 }
  0xa2   :  { %11033 = vmatmul.msk.bf16.gmra.mxu1 %vm822_vm0, %v13329_v39  ;;  %v14139_v39 = vld [vmem:[%s18139_s0 + $0xb8] sm:$0xff] }
  0xa4   :  { %11324 = vmatmul.msk.bf16.gmra.mxu3 %vm822_vm0, %v14100_v55  ;;  %v2367_v58 = vpop.f32.mrf.mxu2 }
  0xa5   :  { %v2867_v59 = vadd.f32 %v2367_v58, %v1746_v43 }
  0xa6   :  { %v1139_v61 = vpop.f32.mrf.mxu0 }
  0xa7   :  { %v3117_v60 = vpop.f32.mrf.mxu3  ;;  %v1752_v0 = vpop.f32.mrf.mxu1 }
  0xa8   :  { %v3617_v62 = vadd.f32 %v3117_v60, %v2867_v59  ;;  %v1753_v1 = vadd.f32 %v1752_v0, %v1139_v61 }
  0xaa   :  { %v3821_v2 = vadd.f32 %v14111_v63, %v3617_v62 }
  0xac   :  { %v2369_v3 = vpop.f32.mrf.mxu2  ;;  %v4021_v8 = vmax.f32 %v3821_v2, 0.0 }
  0xad   :  { %v2868_v4 = vadd.f32 %v2369_v3, %v1748_v49  ;;  %v14156_v3 = vld [vmem:[%s18139_s0 + $0xc0] sm:$0xff] }
  0xae   :  { %v1142_v6 = vpop.f32.mrf.mxu0  ;;  %v4221_v13 = vpack.c.bf16 %v4021_v8, %v4021_v8 }
  0xaf   :  { %v3119_v5 = vpop.f32.mrf.mxu3  ;;  %v1755_v10 = vpop.f32.mrf.mxu1 }
  0xb0   :  { %v3618_v9 = vadd.f32 %v3119_v5, %v2868_v4  ;;  %v1756_v11 = vadd.f32 %v1755_v10, %v1142_v6  ;;  %v4719_v20 = vunpack.c.l.b16 %v4221_v13 }
  0xb1   :  { %10878 = vmatmul.msk.bf16.gmra.mxu0 %vm822_vm0, %v13975_v23  ;;  %11197 = vmatmul.msk.bf16.gmra.mxu2 %vm822_vm0, %v14100_v55 }
  0xb2   :  { %v3822_v12 = vadd.f32 %v14111_v63, %v3618_v9  ;;  %11034 = vmatmul.msk.bf16.gmra.mxu1 %vm822_vm0, %v13970_v22 }
  0xb4   :  { %11325 = vmatmul.msk.bf16.gmra.mxu3 %vm822_vm0, %v14117_v7  ;;  %v4022_v14 = vmax.f32 %v3822_v12, 0.0  ;;  %v2372_v15 = vpop.f32.mrf.mxu2 }
  0xb5   :  { %v2869_v17 = vadd.f32 %v2372_v15, %v1751_v57 }
  0xb6   :  { %v4222_v16 = vpack.c.bf16 %v4022_v14, %v4022_v14  ;;  %v1144_v19 = vpop.f32.mrf.mxu0 }
  0xb7   :  { %v3122_v18 = vpop.f32.mrf.mxu3  ;;  %v1757_v25 = vpop.f32.mrf.mxu1 }
  0xb8   :  { %v4720_v21 = vunpack.c.l.b16 %v4222_v16  ;;  %v3619_v24 = vadd.f32 %v3122_v18, %v2869_v17  ;;  %v1758_v26 = vadd.f32 %v1757_v25, %v1144_v19 }
  0xba   :  { %v14128_v28 = vpack.c.b16 %v4720_v21, %v4719_v20  ;;  %v3823_v30 = vadd.f32 %v14111_v63, %v3619_v24  ;;  %v13471_v21 = vld [vmem:[%s18140_s3 + $0x70] sm:$0xff] }
  0xbb   :  { %4599 = vmatpush.bf16.msrb.mxu0 %v13471_v21 }
  0xbc   :  { %v2374_v22 = vpop.f32.mrf.mxu2  ;;  %v4023_v40 = vmax.f32 %v3823_v30, 0.0 }
  0xbd   :  { %v2870_v31 = vadd.f32 %v2374_v22, %v1753_v1 }
  0xbe   :  { %v1147_v37 = vpop.f32.mrf.mxu0  ;;  %v4223_v47 = vpack.c.bf16 %v4023_v40, %v4023_v40 }
  0xbf   :  { %v3124_v33 = vpop.f32.mrf.mxu3  ;;  %v1760_v43 = vpop.f32.mrf.mxu1 }
  0xc0   :  { %v3620_v42 = vadd.f32 %v3124_v33, %v2870_v31  ;;  %v1761_v44 = vadd.f32 %v1760_v43, %v1147_v37  ;;  %v4486_v56 = vunpack.c.l.b16 %v4223_v47  ;;  %v14176_v33 = vld [vmem:[%s18139_s0 + $0xc8] sm:$0xff] }
  0xc1   :  { %10879 = vmatmul.msk.bf16.gmra.mxu0 %vm822_vm0, %v13995_v27  ;;  %11198 = vmatmul.msk.bf16.gmra.mxu2 %vm822_vm0, %v14134_v35 }
  0xc2   :  { %v3824_v45 = vadd.f32 %v14111_v63, %v3620_v42  ;;  %11035 = vmatmul.msk.bf16.gmra.mxu1 %vm822_vm0, %v13975_v23 }
  0xc4   :  { %11326 = vmatmul.msk.bf16.gmra.mxu3 %vm822_vm0, %v14139_v39  ;;  %v4024_v48 = vmax.f32 %v3824_v45, 0.0  ;;  %v2377_v49 = vpop.f32.mrf.mxu2 }
  0xc5   :  { %v2871_v51 = vadd.f32 %v2377_v49, %v1756_v11 }
  0xc6   :  { %v4224_v50 = vpack.c.bf16 %v4024_v48, %v4024_v48  ;;  %v1149_v54 = vpop.f32.mrf.mxu0 }
  0xc7   :  { %v3127_v52 = vpop.f32.mrf.mxu3  ;;  %v1762_v59 = vpop.f32.mrf.mxu1 }
  0xc8   :  { %v4487_v57 = vunpack.c.l.b16 %v4224_v50  ;;  %v3621_v58 = vadd.f32 %v3127_v52, %v2871_v51  ;;  %v1763_v60 = vadd.f32 %v1762_v59, %v1149_v54 }
  0xca   :  { %v14150_v61 = vpack.c.b16 %v4487_v57, %v4486_v56  ;;  %v3825_v62 = vadd.f32 %v14111_v63, %v3621_v58 }
  0xcc   :  { %v2379_v23 = vpop.f32.mrf.mxu2  ;;  %v4025_v4 = vmax.f32 %v3825_v62, 0.0 }
  0xcd   :  { %v2872_v0 = vadd.f32 %v2379_v23, %v1758_v26 }
  0xce   :  { %v1152_v2 = vpop.f32.mrf.mxu0  ;;  %v4225_v10 = vpack.c.bf16 %v4025_v4, %v4025_v4 }
  0xcf   :  { %v3129_v1 = vpop.f32.mrf.mxu3  ;;  %v1765_v6 = vpop.f32.mrf.mxu1 }
  0xd0   :  { %v3622_v5 = vadd.f32 %v3129_v1, %v2872_v0  ;;  %v1766_v8 = vadd.f32 %v1765_v6, %v1152_v2  ;;  %v4721_v17 = vunpack.c.l.b16 %v4225_v10  ;;  %v14193_v2 = vld [vmem:[%s18139_s0 + $0xd0] sm:$0xff] }
  0xd1   :  { %10880 = vmatmul.msk.bf16.gmra.mxu0 %vm822_vm0, %v14009_v29  ;;  %11199 = vmatmul.msk.bf16.gmra.mxu2 %vm822_vm0, %v14139_v39 }
  0xd2   :  { %v3826_v9 = vadd.f32 %v14111_v63, %v3622_v5  ;;  %11036 = vmatmul.msk.bf16.gmra.mxu1 %vm822_vm0, %v13995_v27 }
  0xd4   :  { %11327 = vmatmul.msk.bf16.gmra.mxu3 %vm822_vm0, %v14156_v3  ;;  %v4026_v11 = vmax.f32 %v3826_v9, 0.0  ;;  %v2382_v12 = vpop.f32.mrf.mxu2 }
  0xd5   :  { %v2873_v14 = vadd.f32 %v2382_v12, %v1761_v44 }
  0xd6   :  { %v4226_v13 = vpack.c.bf16 %v4026_v11, %v4026_v11  ;;  %v1154_v16 = vpop.f32.mrf.mxu0 }
  0xd7   :  { %v3132_v15 = vpop.f32.mrf.mxu3  ;;  %v1767_v20 = vpop.f32.mrf.mxu1 }
  0xd8   :  { %v4722_v18 = vunpack.c.l.b16 %v4226_v13  ;;  %v3623_v19 = vadd.f32 %v3132_v15, %v2873_v14  ;;  %v1768_v24 = vadd.f32 %v1767_v20, %v1154_v16 }
  0xda   :  { %v14170_v27 = vpack.c.b16 %v4722_v18, %v4721_v17  ;;  %v3827_v25 = vadd.f32 %v14111_v63, %v3623_v19 }
  0xdc   :  { %v2384_v26 = vpop.f32.mrf.mxu2  ;;  %v4027_v37 = vmax.f32 %v3827_v25, 0.0 }
  0xdd   :  { %v2874_v30 = vadd.f32 %v2384_v26, %v1763_v60 }
  0xde   :  { %v1157_v31 = vpop.f32.mrf.mxu0  ;;  %v4227_v45 = vpack.c.bf16 %v4027_v37, %v4027_v37 }
  0xdf   :  { %v3134_v22 = vpop.f32.mrf.mxu3  ;;  %v1770_v42 = vpop.f32.mrf.mxu1 }
  0xe0   :  { %v3624_v40 = vadd.f32 %v3134_v22, %v2874_v30  ;;  %v1771_v43 = vadd.f32 %v1770_v42, %v1157_v31  ;;  %v4488_v54 = vunpack.c.l.b16 %v4227_v45  ;;  %v14210_v31 = vld [vmem:[%s18139_s0 + $0xd8] sm:$0xff] }
  0xe1   :  { %10881 = vmatmul.msk.bf16.gmra.mxu0 %vm822_vm0, %v14026_v32  ;;  %11200 = vmatmul.msk.bf16.gmra.mxu2 %vm822_vm0, %v14156_v3 }
  0xe2   :  { %v3828_v44 = vadd.f32 %v14111_v63, %v3624_v40  ;;  %11037 = vmatmul.msk.bf16.gmra.mxu1 %vm822_vm0, %v14009_v29 }
  0xe4   :  { %11328 = vmatmul.msk.bf16.gmra.mxu3 %vm822_vm0, %v14176_v33  ;;  %v4028_v47 = vmax.f32 %v3828_v44, 0.0  ;;  %v2387_v48 = vpop.f32.mrf.mxu2  ;;  %v13487_v44 = vld [vmem:[%s18140_s3 + $0xf0] sm:$0xff] }
  0xe5   :  { %v2875_v50 = vadd.f32 %v2387_v48, %v1766_v8  ;;  %5220 = vmatpush.bf16.msra.mxu3 %v13487_v44  ;;  %v14253_v44 = vld [vmem:[%s18139_s0 + $0xe8] sm:$0xff] }
  0xe6   :  { %v4228_v49 = vpack.c.bf16 %v4028_v47, %v4028_v47  ;;  %v1159_v52 = vpop.f32.mrf.mxu0 }
  0xe7   :  { %v3137_v51 = vpop.f32.mrf.mxu3  ;;  %v1772_v58 = vpop.f32.mrf.mxu1 }
  0xe8   :  { %v4489_v56 = vunpack.c.l.b16 %v4228_v49  ;;  %v3625_v57 = vadd.f32 %v3137_v51, %v2875_v50  ;;  %v1773_v59 = vadd.f32 %v1772_v58, %v1159_v52 }
  0xea   :  { %v14187_v60 = vpack.c.b16 %v4489_v56, %v4488_v54  ;;  %v3829_v62 = vadd.f32 %v14111_v63, %v3625_v57 }
  0xec   :  { %v2389_v29 = vpop.f32.mrf.mxu2  ;;  %v4029_v4 = vmax.f32 %v3829_v62, 0.0 }
  0xed   :  { %v2876_v23 = vadd.f32 %v2389_v29, %v1768_v24 }
  0xee   :  { %v1162_v1 = vpop.f32.mrf.mxu0  ;;  %v4229_v10 = vpack.c.bf16 %v4029_v4, %v4029_v4 }
  0xef   :  { %v3139_v0 = vpop.f32.mrf.mxu3  ;;  %v1775_v6 = vpop.f32.mrf.mxu1 }
  0xf0   :  { %v3626_v5 = vadd.f32 %v3139_v0, %v2876_v23  ;;  %v1776_v8 = vadd.f32 %v1775_v6, %v1162_v1  ;;  %v4723_v17 = vunpack.c.l.b16 %v4229_v10  ;;  %v14233_v6 = vld [vmem:[%s18139_s0 + $0xe0] sm:$0xff] }
  0xf1   :  { %10882 = vmatmul.msk.bf16.gmra.mxu0 %vm822_vm0, %v14040_v34  ;;  %11201 = vmatmul.msk.bf16.gmra.mxu2 %vm822_vm0, %v14176_v33 }
  0xf2   :  { %v3830_v9 = vadd.f32 %v14111_v63, %v3626_v5  ;;  %11038 = vmatmul.msk.bf16.gmra.mxu1 %vm822_vm0, %v14026_v32 }
  0xf4   :  { %11329 = vmatmul.msk.bf16.gmra.mxu3 %vm822_vm0, %v14193_v2  ;;  %v4030_v11 = vmax.f32 %v3830_v9, 0.0  ;;  %v2392_v12 = vpop.f32.mrf.mxu2 }
  0xf5   :  { %v2877_v14 = vadd.f32 %v2392_v12, %v1771_v43  ;;  %v13479_v43 = vld [vmem:[%s18140_s3 + $0xb0] sm:$0xff] }
  0xf6   :  { %v4230_v13 = vpack.c.bf16 %v4030_v11, %v4030_v11  ;;  %v1164_v16 = vpop.f32.mrf.mxu0  ;;  %5010 = vmatpush.bf16.msra.mxu2 %v13479_v43  ;;  %v13463_v11 = vld [vmem:[%s18140_s3 + $0x30] sm:$0xff] }
  0xf7   :  { %v3142_v15 = vpop.f32.mrf.mxu3  ;;  %v1777_v20 = vpop.f32.mrf.mxu1  ;;  %4832 = vmatpush.bf16.msrb.mxu1 %v13463_v11  ;;  %v14270_v11 = vld [vmem:[%s18139_s0 + $0xf0] sm:$0xff] }
  0xf8   :  { %v4724_v18 = vunpack.c.l.b16 %v4230_v13  ;;  %v3627_v19 = vadd.f32 %v3142_v15, %v2877_v14  ;;  %v1778_v21 = vadd.f32 %v1777_v20, %v1164_v16 }
  0xfa   :  { %v14204_v24 = vpack.c.b16 %v4724_v18, %v4723_v17  ;;  %v3831_v25 = vadd.f32 %v14111_v63, %v3627_v19 }
  0xfc   :  { %v2394_v32 = vpop.f32.mrf.mxu2  ;;  %v4031_v37 = vmax.f32 %v3831_v25, 0.0 }
  0xfd   :  { %v2878_v26 = vadd.f32 %v2394_v32, %v1773_v59 }
  0xfe   :  { %v1167_v22 = vpop.f32.mrf.mxu0  ;;  %v4231_v48 = vpack.c.bf16 %v4031_v37, %v4031_v37 }
  0xff   :  { %v3144_v30 = vpop.f32.mrf.mxu3  ;;  %v1780_v42 = vpop.f32.mrf.mxu1 }
 0x100   :  { %v3628_v40 = vadd.f32 %v3144_v30, %v2878_v26  ;;  %v1781_v45 = vadd.f32 %v1780_v42, %v1167_v22  ;;  %v4490_v57 = vunpack.c.l.b16 %v4231_v48 }
 0x101   :  { %10883 = vmatmul.msk.bf16.gmra.mxu0 %vm822_vm0, %v14054_v36  ;;  %11202 = vmatmul.msk.bf16.gmra.mxu2 %vm822_vm0, %v14193_v2 }
 0x102   :  { %v3832_v47 = vadd.f32 %v14111_v63, %v3628_v40  ;;  %11039 = vmatmul.msk.bf16.gmra.mxu1 %vm822_vm0, %v14040_v34 }
 0x104   :  { %11330 = vmatmul.msk.bf16.gmra.mxu3 %vm822_vm0, %v14210_v31  ;;  %v4032_v49 = vmax.f32 %v3832_v47, 0.0  ;;  %v2397_v50 = vpop.f32.mrf.mxu2 }
 0x105   :  { %v2879_v52 = vadd.f32 %v2397_v50, %v1776_v8 }
 0x106   :  { %v4232_v51 = vpack.c.bf16 %v4032_v49, %v4032_v49  ;;  %v1169_v56 = vpop.f32.mrf.mxu0 }
 0x107   :  { %v3147_v54 = vpop.f32.mrf.mxu3  ;;  %v1782_v62 = vpop.f32.mrf.mxu1 }
 0x108   :  { %v4491_v58 = vunpack.c.l.b16 %v4232_v51  ;;  %v3629_v59 = vadd.f32 %v3147_v54, %v2879_v52  ;;  %v1783_v29 = vadd.f32 %v1782_v62, %v1169_v56 }
 0x10a   :  { %v14227_v23 = vpack.c.b16 %v4491_v58, %v4490_v57  ;;  %v3833_v34 = vadd.f32 %v14111_v63, %v3629_v59 }
 0x10c   :  { %v2399_v0 = vpop.f32.mrf.mxu2  ;;  %v4033_v8 = vmax.f32 %v3833_v34, 0.0 }
 0x10d   :  { %v2880_v1 = vadd.f32 %v2399_v0, %v1778_v21 }
 0x10e   :  { %v1172_v5 = vpop.f32.mrf.mxu0  ;;  %v4233_v14 = vpack.c.bf16 %v4033_v8, %v4033_v8 }
 0x10f   :  { %v3149_v4 = vpop.f32.mrf.mxu3  ;;  %v1785_v10 = vpop.f32.mrf.mxu1 }
 0x110   :  { %v3630_v9 = vadd.f32 %v3149_v4, %v2880_v1  ;;  %v1786_v12 = vadd.f32 %v1785_v10, %v1172_v5  ;;  %v4725_v21 = vunpack.c.l.b16 %v4233_v14 }
 0x111   :  { %10884 = vmatmul.msk.bf16.gmra.mxu0 %vm822_vm0, %v14068_v38  ;;  %11203 = vmatmul.msk.bf16.gmra.mxu2 %vm822_vm0, %v14210_v31 }
 0x112   :  { %v3834_v13 = vadd.f32 %v14111_v63, %v3630_v9  ;;  %11040 = vmatmul.msk.bf16.gmra.mxu1 %vm822_vm0, %v14054_v36 }
 0x114   :  { %11331 = vmatmul.msk.bf16.gmra.mxu3 %vm822_vm0, %v14233_v6  ;;  %v4034_v15 = vmax.f32 %v3834_v13, 0.0  ;;  %v2402_v16 = vpop.f32.mrf.mxu2 }
 0x115   :  { %v2881_v18 = vadd.f32 %v2402_v16, %v1781_v45 }
 0x116   :  { %v4234_v17 = vpack.c.bf16 %v4034_v15, %v4034_v15  ;;  %v1174_v20 = vpop.f32.mrf.mxu0 }
 0x117   :  { %v3152_v19 = vpop.f32.mrf.mxu3  ;;  %v1787_v26 = vpop.f32.mrf.mxu1 }
 0x118   :  { %v4726_v25 = vunpack.c.l.b16 %v4234_v17  ;;  %v3631_v32 = vadd.f32 %v3152_v19, %v2881_v18  ;;  %v1788_v30 = vadd.f32 %v1787_v26, %v1174_v20 }
 0x11a   :  { %v14247_v22 = vpack.c.b16 %v4726_v25, %v4725_v21  ;;  %v3835_v36 = vadd.f32 %v14111_v63, %v3631_v32 }
 0x11c   :  { %v2404_v37 = vpop.f32.mrf.mxu2  ;;  %v4035_v45 = vmax.f32 %v3835_v36, 0.0 }
 0x11d   :  { %v2882_v40 = vadd.f32 %v2404_v37, %v1783_v29 }
 0x11e   :  { %v1177_v43 = vpop.f32.mrf.mxu0  ;;  %v4235_v51 = vpack.c.bf16 %v4035_v45, %v4035_v45 }
 0x11f   :  { %v3154_v42 = vpop.f32.mrf.mxu3  ;;  %v1790_v48 = vpop.f32.mrf.mxu1 }
 0x120   :  { %v3632_v47 = vadd.f32 %v3154_v42, %v2882_v40  ;;  %v1791_v49 = vadd.f32 %v1790_v48, %v1177_v43  ;;  %v4492_v62 = vunpack.c.l.b16 %v4235_v51 }
 0x121   :  { %10885 = vmatmul.msk.bf16.gmra.mxu0 %vm822_vm0, %v14082_v41  ;;  %11204 = vmatmul.msk.bf16.gmra.mxu2 %vm822_vm0, %v14233_v6 }
 0x122   :  { %v3836_v50 = vadd.f32 %v14111_v63, %v3632_v47  ;;  %11041 = vmatmul.msk.bf16.gmra.mxu1 %vm822_vm0, %v14068_v38 }
 0x124   :  { %11332 = vmatmul.msk.bf16.gmra.mxu3 %vm822_vm0, %v14253_v44  ;;  %v4036_v52 = vmax.f32 %v3836_v50, 0.0  ;;  %v2407_v54 = vpop.f32.mrf.mxu2  ;;  %v14287_v50 = vld [vmem:[%s18139_s0 + $0xf8] sm:$0xff] }
 0x125   :  { %v2883_v57 = vadd.f32 %v2407_v54, %v1786_v12 }
 0x126   :  { %v4236_v56 = vpack.c.bf16 %v4036_v52, %v4036_v52  ;;  %v1179_v59 = vpop.f32.mrf.mxu0 }
 0x127   :  { %v3157_v58 = vpop.f32.mrf.mxu3  ;;  %v1792_v0 = vpop.f32.mrf.mxu1 }
 0x128   :  { %v4493_v29 = vunpack.c.l.b16 %v4236_v56  ;;  %v3633_v34 = vadd.f32 %v3157_v58, %v2883_v57  ;;  %v1793_v1 = vadd.f32 %v1792_v0, %v1179_v59 }
 0x12a   :  { %v14264_v4 = vpack.c.b16 %v4493_v29, %v4492_v62  ;;  %v3837_v5 = vadd.f32 %v14111_v63, %v3633_v34 }
 0x12c   :  { %v2409_v38 = vpop.f32.mrf.mxu2  ;;  %v4037_v12 = vmax.f32 %v3837_v5, 0.0 }
 0x12d   :  { %v2884_v8 = vadd.f32 %v2409_v38, %v1788_v30 }
 0x12e   :  { %v1182_v10 = vpop.f32.mrf.mxu0  ;;  %v4237_v17 = vpack.c.bf16 %v4037_v12, %v4037_v12 }
 0x12f   :  { %v3159_v9 = vpop.f32.mrf.mxu3  ;;  %v1795_v14 = vpop.f32.mrf.mxu1 }
 0x130   :  { %v3634_v13 = vadd.f32 %v3159_v9, %v2884_v8  ;;  %v1796_v15 = vadd.f32 %v1795_v14, %v1182_v10  ;;  %v4945_v26 = vunpack.c.l.b16 %v4237_v17 }
 0x131   :  { %10886 = vmatmul.msk.bf16.gmra.mxu0 %vm822_vm0, %v14100_v55  ;;  %11205 = vmatmul.msk.bf16.gmra.mxu2 %vm822_vm0, %v14253_v44 }
 0x132   :  { %v3838_v16 = vadd.f32 %v14111_v63, %v3634_v13  ;;  %11042 = vmatmul.msk.bf16.gmra.mxu1 %vm822_vm0, %v14082_v41 }
 0x134   :  { %11333 = vmatmul.msk.bf16.gmra.mxu3 %vm822_vm0, %v14270_v11  ;;  %v4038_v18 = vmax.f32 %v3838_v16, 0.0  ;;  %v2412_v19 = vpop.f32.mrf.mxu2  ;;  %v14304_v16 = vld [vmem:[%s18139_s0 + $0x100] sm:$0xff] }
 0x135   :  { %v2885_v21 = vadd.f32 %v2412_v19, %v1791_v49 }
 0x136   :  { %v4238_v20 = vpack.c.bf16 %v4038_v18, %v4038_v18  ;;  %v1184_v32 = vpop.f32.mrf.mxu0 }
 0x137   :  { %v3162_v25 = vpop.f32.mrf.mxu3  ;;  %v1797_v37 = vpop.f32.mrf.mxu1 }
 0x138   :  { %v4946_v30 = vunpack.c.l.b16 %v4238_v20  ;;  %v3635_v36 = vadd.f32 %v3162_v25, %v2885_v21  ;;  %v1798_v40 = vadd.f32 %v1797_v37, %v1184_v32 }
 0x13a   :  { %v14281_v42 = vpack.c.b16 %v4946_v30, %v4945_v26  ;;  %v3839_v43 = vadd.f32 %v14111_v63, %v3635_v36 }
 0x13c   :  { %v2414_v41 = vpop.f32.mrf.mxu2  ;;  %v4039_v49 = vmax.f32 %v3839_v43, 0.0 }
 0x13d   :  { %v2886_v45 = vadd.f32 %v2414_v41, %v1793_v1 }
 0x13e   :  { %v1187_v48 = vpop.f32.mrf.mxu0  ;;  %v4239_v57 = vpack.c.bf16 %v4039_v49, %v4039_v49 }
 0x13f   :  { %v3164_v47 = vpop.f32.mrf.mxu3  ;;  %v1800_v52 = vpop.f32.mrf.mxu1 }
 0x140   :  { %v3636_v51 = vadd.f32 %v3164_v47, %v2886_v45  ;;  %v1801_v54 = vadd.f32 %v1800_v52, %v1187_v48  ;;  %v5155_v1 = vunpack.c.l.b16 %v4239_v57  ;;  %v14326_v57 = vld [vmem:[%s18139_s0 + $0x110] sm:$0xff] }
 0x141   :  { %10887 = vmatmul.msk.bf16.gmra.mxu0 %vm822_vm0, %v14117_v7  ;;  %11206 = vmatmul.msk.bf16.gmra.mxu2 %vm822_vm0, %v14270_v11 }
 0x142   :  { %v3840_v56 = vadd.f32 %v14111_v63, %v3636_v51  ;;  %11043 = vmatmul.msk.bf16.gmra.mxu1 %vm822_vm0, %v14100_v55 }
 0x144   :  { %11334 = vmatmul.msk.bf16.gmra.mxu3 %vm822_vm0, %v14287_v50  ;;  %v4040_v58 = vmax.f32 %v3840_v56, 0.0  ;;  %v2417_v59 = vpop.f32.mrf.mxu2  ;;  %v14321_v56 = vld [vmem:[%s18139_s0 + $0x108] sm:$0xff] }
 0x145   :  { %v2887_v29 = vadd.f32 %v2417_v59, %v1796_v15 }
 0x146   :  { %v4240_v62 = vpack.c.bf16 %v4040_v58, %v4040_v58  ;;  %v1189_v0 = vpop.f32.mrf.mxu0 }
 0x147   :  { %v3167_v34 = vpop.f32.mrf.mxu3  ;;  %v1802_v7 = vpop.f32.mrf.mxu1 }
 0x148   :  { %v5156_v5 = vunpack.c.l.b16 %v4240_v62  ;;  %v3637_v38 = vadd.f32 %v3167_v34, %v2887_v29  ;;  %v1803_v8 = vadd.f32 %v1802_v7, %v1189_v0 }
 0x14a   :  { %v14298_v9 = vpack.c.b16 %v5156_v5, %v5155_v1  ;;  %v3841_v10 = vadd.f32 %v14111_v63, %v3637_v38 }
 0x14c   :  { %v2419_v55 = vpop.f32.mrf.mxu2  ;;  %v4041_v15 = vmax.f32 %v3841_v10, 0.0 }
 0x14d   :  { %v2888_v12 = vadd.f32 %v2419_v55, %v1798_v40 }
 0x14e   :  { %v1192_v14 = vpop.f32.mrf.mxu0  ;;  %v4241_v21 = vpack.c.bf16 %v4041_v15, %v4041_v15 }
 0x14f   :  { %v3169_v13 = vpop.f32.mrf.mxu3  ;;  %v1805_v18 = vpop.f32.mrf.mxu1 }
 0x150   :  { %v3638_v17 = vadd.f32 %v3169_v13, %v2888_v12  ;;  %v1806_v19 = vadd.f32 %v1805_v18, %v1192_v14  ;;  %v5389_v40 = vunpack.c.l.b16 %v4241_v21 }
 0x151   :  { %10888 = vmatmul.msk.bf16.gmra.mxu0 %vm822_vm0, %v14139_v39  ;;  %11207 = vmatmul.msk.bf16.gmra.mxu2 %vm822_vm0, %v14287_v50 }
 0x152   :  { %v3842_v20 = vadd.f32 %v14111_v63, %v3638_v17  ;;  %11044 = vmatmul.msk.bf16.gmra.mxu1 %vm822_vm0, %v14134_v35 }
 0x154   :  { %11335 = vmatmul.msk.bf16.gmra.mxu3 %vm822_vm0, %v14304_v16  ;;  %v4042_v25 = vmax.f32 %v3842_v20, 0.0  ;;  %v2422_v32 = vpop.f32.mrf.mxu2 }
 0x155   :  { %v2889_v30 = vadd.f32 %v2422_v32, %v1801_v54  ;;  %v14343_v32 = vld [vmem:[%s18139_s0 + $0x118] sm:$0xff] }
 0x156   :  { %v4242_v26 = vpack.c.bf16 %v4042_v25, %v4042_v25  ;;  %v1194_v37 = vpop.f32.mrf.mxu0 }
 0x157   :  { %v3172_v36 = vpop.f32.mrf.mxu3  ;;  %v1807_v45 = vpop.f32.mrf.mxu1 }
 0x158   :  { %v5390_v43 = vunpack.c.l.b16 %v4242_v26  ;;  %v3639_v41 = vadd.f32 %v3172_v36, %v2889_v30  ;;  %v1808_v47 = vadd.f32 %v1807_v45, %v1194_v37 }
 0x15a   :  { %v14315_v48 = vpack.c.b16 %v5390_v43, %v5389_v40  ;;  %v3843_v49 = vadd.f32 %v14111_v63, %v3639_v41 }
 0x15c   :  { %18236 = vst [vmem:[#allocation2_spill] sm:$0xff] %v14315_v48  ;;  %v2424_v35 = vpop.f32.mrf.mxu2  ;;  %v4043_v58 = vmax.f32 %v3843_v49, 0.0 }
 0x15d   :  { %v2890_v51 = vadd.f32 %v2424_v35, %v1803_v8 }
 0x15e   :  { %v1197_v54 = vpop.f32.mrf.mxu0  ;;  %v4243_v0 = vpack.c.bf16 %v4043_v58, %v4043_v58 }
 0x15f   :  { %v3174_v52 = vpop.f32.mrf.mxu3  ;;  %v1810_v62 = vpop.f32.mrf.mxu1 }
 0x160   :  { %v3640_v59 = vadd.f32 %v3174_v52, %v2890_v51  ;;  %v1811_v29 = vadd.f32 %v1810_v62, %v1197_v54  ;;  %v5671_v55 = vunpack.c.l.b16 %v4243_v0 }
 0x161   :  { %10889 = vmatmul.msk.bf16.gmra.mxu0 %vm822_vm0, %v14156_v3  ;;  %11208 = vmatmul.msk.bf16.gmra.mxu2 %vm822_vm0, %v14321_v56 }
 0x162   :  { %v3844_v34 = vadd.f32 %v14111_v63, %v3640_v59  ;;  %11045 = vmatmul.msk.bf16.gmra.mxu1 %vm822_vm0, %v14139_v39 }
 0x164   :  { %11336 = vmatmul.msk.bf16.gmra.mxu3 %vm822_vm0, %v14326_v57  ;;  %v4044_v1 = vmax.f32 %v3844_v34, 0.0  ;;  %v2427_v5 = vpop.f32.mrf.mxu2 }
 0x165   :  { %v2891_v7 = vadd.f32 %v2427_v5, %v1806_v19 }
 0x166   :  { %v4244_v38 = vpack.c.bf16 %v4044_v1, %v4044_v1  ;;  %v1199_v10 = vpop.f32.mrf.mxu0 }
 0x167   :  { %v3177_v8 = vpop.f32.mrf.mxu3  ;;  %v1812_v14 = vpop.f32.mrf.mxu1 }
 0x168   :  { %v5672_v12 = vunpack.c.l.b16 %v4244_v38  ;;  %v3641_v13 = vadd.f32 %v3177_v8, %v2891_v7  ;;  %v1813_v15 = vadd.f32 %v1812_v14, %v1199_v10  ;;  %v14360_v38 = vld [vmem:[%s18139_s0 + $0x120] sm:$0xff] }
 0x16a   :  { %v14337_v17 = vpack.c.b16 %v5672_v12, %v5671_v55  ;;  %v3845_v18 = vadd.f32 %v14111_v63, %v3641_v13 }
 0x16c   :  { %18237 = vst [vmem:[#allocation3_spill] sm:$0xff] %v14337_v17  ;;  %v2429_v39 = vpop.f32.mrf.mxu2  ;;  %v4045_v19 = vmax.f32 %v3845_v18, 0.0 }
 0x16d   :  { %v2892_v20 = vadd.f32 %v2429_v39, %v1808_v47 }
 0x16e   :  { %v1202_v25 = vpop.f32.mrf.mxu0  ;;  %v4245_v40 = vpack.c.bf16 %v4045_v19, %v4045_v19 }
 0x16f   :  { %v3179_v21 = vpop.f32.mrf.mxu3  ;;  %v1815_v30 = vpop.f32.mrf.mxu1 }
 0x170   :  { %v3642_v26 = vadd.f32 %v3179_v21, %v2892_v20  ;;  %v1816_v36 = vadd.f32 %v1815_v30, %v1202_v25  ;;  %v5391_v51 = vunpack.c.l.b16 %v4245_v40 }
 0x171   :  { %10890 = vmatmul.msk.bf16.gmra.mxu0 %vm822_vm0, %v14176_v33  ;;  %11209 = vmatmul.msk.bf16.gmra.mxu2 %vm822_vm0, %v14326_v57 }
 0x172   :  { %v3846_v37 = vadd.f32 %v14111_v63, %v3642_v26  ;;  %11046 = vmatmul.msk.bf16.gmra.mxu1 %vm822_vm0, %v14156_v3 }
 0x174   :  { %11337 = vmatmul.msk.bf16.gmra.mxu3 %vm822_vm0, %v14343_v32  ;;  %v4046_v43 = vmax.f32 %v3846_v37, 0.0  ;;  %v2432_v41 = vpop.f32.mrf.mxu2 }
 0x175   :  { %v2893_v47 = vadd.f32 %v2432_v41, %v1811_v29 }
 0x176   :  { %v4246_v45 = vpack.c.bf16 %v4046_v43, %v4046_v43  ;;  %v1204_v35 = vpop.f32.mrf.mxu0 }
 0x177   :  { %v3182_v49 = vpop.f32.mrf.mxu3  ;;  %v1817_v58 = vpop.f32.mrf.mxu1 }
 0x178   :  { %v5392_v52 = vunpack.c.l.b16 %v4246_v45  ;;  %v3643_v54 = vadd.f32 %v3182_v49, %v2893_v47  ;;  %v1818_v59 = vadd.f32 %v1817_v58, %v1204_v35  ;;  %v14377_v47 = vld [vmem:[%s18139_s0 + $0x128] sm:$0xff] }
 0x17a   :  { %v14354_v62 = vpack.c.b16 %v5392_v52, %v5391_v51  ;;  %v3847_v34 = vadd.f32 %v14111_v63, %v3643_v54 }
 0x17c   :  { %18238 = vst [vmem:[#allocation4_spill] sm:$0xff] %v14354_v62  ;;  %v2434_v3 = vpop.f32.mrf.mxu2  ;;  %v4047_v29 = vmax.f32 %v3847_v34, 0.0 }
 0x17d   :  { %v2894_v0 = vadd.f32 %v2434_v3, %v1813_v15 }
 0x17e   :  { %v1207_v5 = vpop.f32.mrf.mxu0  ;;  %v4247_v12 = vpack.c.bf16 %v4047_v29, %v4047_v29 }
 0x17f   :  { %v3184_v1 = vpop.f32.mrf.mxu3  ;;  %v1820_v8 = vpop.f32.mrf.mxu1 }
 0x180   :  { %v3644_v7 = vadd.f32 %v3184_v1, %v2894_v0  ;;  %v1821_v10 = vadd.f32 %v1820_v8, %v1207_v5  ;;  %v5673_v21 = vunpack.c.l.b16 %v4247_v12 }
 0x181   :  { %10891 = vmatmul.msk.bf16.gmra.mxu0 %vm822_vm0, %v14193_v2  ;;  %11210 = vmatmul.msk.bf16.gmra.mxu2 %vm822_vm0, %v14343_v32 }
 0x182   :  { %v3848_v55 = vadd.f32 %v14111_v63, %v3644_v7  ;;  %11047 = vmatmul.msk.bf16.gmra.mxu1 %vm822_vm0, %v14176_v33 }
 0x184   :  { %11338 = vmatmul.msk.bf16.gmra.mxu3 %vm822_vm0, %v14360_v38  ;;  %v4048_v13 = vmax.f32 %v3848_v55, 0.0  ;;  %v2437_v14 = vpop.f32.mrf.mxu2 }
 0x185   :  { %v2895_v18 = vadd.f32 %v2437_v14, %v1816_v36 }
 0x186   :  { %v4248_v15 = vpack.c.bf16 %v4048_v13, %v4048_v13  ;;  %v1209_v20 = vpop.f32.mrf.mxu0 }
 0x187   :  { %v3187_v39 = vpop.f32.mrf.mxu3  ;;  %v1822_v26 = vpop.f32.mrf.mxu1 }
 0x188   :  { %v5674_v25 = vunpack.c.l.b16 %v4248_v15  ;;  %v3645_v19 = vadd.f32 %v3187_v39, %v2895_v18  ;;  %v1823_v30 = vadd.f32 %v1822_v26, %v1209_v20  ;;  %v14394_v39 = vld [vmem:[%s18139_s0 + $0x130] sm:$0xff] }
 0x18a   :  { %v14371_v37 = vpack.c.b16 %v5674_v25, %v5673_v21  ;;  %v3849_v40 = vadd.f32 %v14111_v63, %v3645_v19  ;;  %v13470_v25 = vld [vmem:[%s18140_s3 + $0x68] sm:$0xff] }
 0x18b   :  { %4600 = vmatpush.bf16.msrb.mxu0 %v13470_v25 }
 0x18c   :  { %18239 = vst [vmem:[#allocation5_spill] sm:$0xff] %v14371_v37  ;;  %v2439_v33 = vpop.f32.mrf.mxu2  ;;  %v4049_v36 = vmax.f32 %v3849_v40, 0.0 }
 0x18d   :  { %v2896_v43 = vadd.f32 %v2439_v33, %v1818_v59 }
 0x18e   :  { %v1212_v45 = vpop.f32.mrf.mxu0  ;;  %v4249_v54 = vpack.c.bf16 %v4049_v36, %v4049_v36 }
 0x18f   :  { %v3189_v41 = vpop.f32.mrf.mxu3  ;;  %v1825_v35 = vpop.f32.mrf.mxu1 }
 0x190   :  { %v3646_v49 = vadd.f32 %v3189_v41, %v2896_v43  ;;  %v1826_v51 = vadd.f32 %v1825_v35, %v1212_v45  ;;  %v5393_v5 = vunpack.c.l.b16 %v4249_v54 }
 0x191   :  { %10892 = vmatmul.msk.bf16.gmra.mxu0 %vm822_vm0, %v14210_v31  ;;  %11211 = vmatmul.msk.bf16.gmra.mxu2 %vm822_vm0, %v14360_v38 }
 0x192   :  { %v3850_v52 = vadd.f32 %v14111_v63, %v3646_v49  ;;  %11048 = vmatmul.msk.bf16.gmra.mxu1 %vm822_vm0, %v14193_v2 }
 0x194   :  { %11339 = vmatmul.msk.bf16.gmra.mxu3 %vm822_vm0, %v14377_v47  ;;  %v4050_v58 = vmax.f32 %v3850_v52, 0.0  ;;  %v2442_v59 = vpop.f32.mrf.mxu2 }
 0x195   :  { %v2897_v3 = vadd.f32 %v2442_v59, %v1821_v10 }
 0x196   :  { %v4250_v34 = vpack.c.bf16 %v4050_v58, %v4050_v58  ;;  %v1214_v1 = vpop.f32.mrf.mxu0 }
 0x197   :  { %v3192_v0 = vpop.f32.mrf.mxu3  ;;  %v1827_v8 = vpop.f32.mrf.mxu1 }
 0x198   :  { %v5394_v29 = vunpack.c.l.b16 %v4250_v34  ;;  %v3647_v7 = vadd.f32 %v3192_v0, %v2897_v3  ;;  %v1828_v55 = vadd.f32 %v1827_v8, %v1214_v1 }
 0x19a   :  { %v14388_v12 = vpack.c.b16 %v5394_v29, %v5393_v5  ;;  %v3851_v13 = vadd.f32 %v14111_v63, %v3647_v7  ;;  %v14414_v5 = vld [vmem:[%s18139_s0 + $0x138] sm:$0xff] }
 0x19c   :  { %18240 = vst [vmem:[#allocation6_spill] sm:$0xff] %v14388_v12  ;;  %v2444_v2 = vpop.f32.mrf.mxu2  ;;  %v4051_v10 = vmax.f32 %v3851_v13, 0.0 }
 0x19d   :  { %v2898_v14 = vadd.f32 %v2444_v2, %v1823_v30 }
 0x19e   :  { %v1217_v18 = vpop.f32.mrf.mxu0  ;;  %v4251_v30 = vpack.c.bf16 %v4051_v10, %v4051_v10 }
 0x19f   :  { %v3194_v15 = vpop.f32.mrf.mxu3  ;;  %v1830_v21 = vpop.f32.mrf.mxu1 }
 0x1a0   :  { %v3648_v20 = vadd.f32 %v3194_v15, %v2898_v14  ;;  %v1831_v19 = vadd.f32 %v1830_v21, %v1217_v18  ;;  %v5675_v49 = vunpack.c.l.b16 %v4251_v30 }
 0x1a1   :  { %10893 = vmatmul.msk.bf16.gmra.mxu0 %vm822_vm0, %v14233_v6  ;;  %11212 = vmatmul.msk.bf16.gmra.mxu2 %vm822_vm0, %v14377_v47 }
 0x1a2   :  { %v3852_v26 = vadd.f32 %v14111_v63, %v3648_v20  ;;  %11049 = vmatmul.msk.bf16.gmra.mxu1 %vm822_vm0, %v14210_v31 }
 0x1a4   :  { %11340 = vmatmul.msk.bf16.gmra.mxu3 %vm822_vm0, %v14394_v39  ;;  %v4052_v40 = vmax.f32 %v3852_v26, 0.0  ;;  %v2447_v33 = vpop.f32.mrf.mxu2 }
 0x1a5   :  { %v2899_v41 = vadd.f32 %v2447_v33, %v1826_v51 }
 0x1a6   :  { %v4252_v43 = vpack.c.bf16 %v4052_v40, %v4052_v40  ;;  %v1219_v36 = vpop.f32.mrf.mxu0 }
 0x1a7   :  { %v3197_v45 = vpop.f32.mrf.mxu3  ;;  %v1832_v54 = vpop.f32.mrf.mxu1 }
 0x1a8   :  { %v5676_v35 = vunpack.c.l.b16 %v4252_v43  ;;  %v3649_v52 = vadd.f32 %v3197_v45, %v2899_v41  ;;  %v1833_v58 = vadd.f32 %v1832_v54, %v1219_v36 }
 0x1aa   :  { %v14408_v59 = vpack.c.b16 %v5676_v35, %v5675_v49  ;;  %v3853_v31 = vadd.f32 %v14111_v63, %v3649_v52  ;;  %v14431_v49 = vld [vmem:[%s18139_s0 + $0x140] sm:$0xff] }
 0x1ac   :  { %18241 = vst [vmem:[#allocation7_spill] sm:$0xff] %v14408_v59  ;;  %v2449_v34 = vpop.f32.mrf.mxu2  ;;  %v4053_v51 = vmax.f32 %v3853_v31, 0.0 }
 0x1ad   :  { %v2900_v3 = vadd.f32 %v2449_v34, %v1828_v55 }
 0x1ae   :  { %v1222_v1 = vpop.f32.mrf.mxu0  ;;  %v4253_v55 = vpack.c.bf16 %v4053_v51, %v4053_v51 }
 0x1af   :  { %v3199_v0 = vpop.f32.mrf.mxu3  ;;  %v1835_v7 = vpop.f32.mrf.mxu1 }
 0x1b0   :  { %v3650_v29 = vadd.f32 %v3199_v0, %v2900_v3  ;;  %v1836_v8 = vadd.f32 %v1835_v7, %v1222_v1  ;;  %v5395_v21 = vunpack.c.l.b16 %v4253_v55 }
 0x1b1   :  { %10894 = vmatmul.msk.bf16.gmra.mxu0 %vm822_vm0, %v14253_v44  ;;  %11213 = vmatmul.msk.bf16.gmra.mxu2 %vm822_vm0, %v14394_v39 }
 0x1b2   :  { %v3854_v13 = vadd.f32 %v14111_v63, %v3650_v29  ;;  %11050 = vmatmul.msk.bf16.gmra.mxu1 %vm822_vm0, %v14233_v6 }
 0x1b4   :  { %11341 = vmatmul.msk.bf16.gmra.mxu3 %vm822_vm0, %v14414_v5  ;;  %v4054_v2 = vmax.f32 %v3854_v13, 0.0  ;;  %v2452_v14 = vpop.f32.mrf.mxu2 }
 0x1b5   :  { %v2901_v18 = vadd.f32 %v2452_v14, %v1831_v19 }
 0x1b6   :  { %v4254_v15 = vpack.c.bf16 %v4054_v2, %v4054_v2  ;;  %v1224_v20 = vpop.f32.mrf.mxu0  ;;  %v13478_v2 = vld [vmem:[%s18140_s3 + $0xa8] sm:$0xff] }
 0x1b7   :  { %v3202_v10 = vpop.f32.mrf.mxu3  ;;  %v1837_v30 = vpop.f32.mrf.mxu1  ;;  %5011 = vmatpush.bf16.msra.mxu2 %v13478_v2  ;;  %v14479_v2 = vld [vmem:[%s18139_s0 + $0x150] sm:$0xff] }
 0x1b8   :  { %v5396_v25 = vunpack.c.l.b16 %v4254_v15  ;;  %v3651_v26 = vadd.f32 %v3202_v10, %v2901_v18  ;;  %v1838_v40 = vadd.f32 %v1837_v30, %v1224_v20 }
 0x1ba   :  { %v14425_v33 = vpack.c.b16 %v5396_v25, %v5395_v21  ;;  %v3855_v43 = vadd.f32 %v14111_v63, %v3651_v26  ;;  %v14459_v26 = vld [vmem:[%s18139_s0 + $0x148] sm:$0xff] }
 0x1bc   :  { %18242 = vst [vmem:[#allocation8_spill] sm:$0xff] %v14425_v33  ;;  %v2454_v6 = vpop.f32.mrf.mxu2  ;;  %v4055_v19 = vmax.f32 %v3855_v43, 0.0 }
 0x1bd   :  { %v2902_v41 = vadd.f32 %v2454_v6, %v1833_v58 }
 0x1be   :  { %v1227_v36 = vpop.f32.mrf.mxu0  ;;  %v4255_v58 = vpack.c.bf16 %v4055_v19, %v4055_v19 }
 0x1bf   :  { %v3204_v45 = vpop.f32.mrf.mxu3  ;;  %v1840_v52 = vpop.f32.mrf.mxu1 }
 0x1c0   :  { %v3652_v35 = vadd.f32 %v3204_v45, %v2902_v41  ;;  %v1841_v54 = vadd.f32 %v1840_v52, %v1227_v36 }
 0x1c1   :  { %10895 = vmatmul.msk.bf16.gmra.mxu0 %vm822_vm0, %v14270_v11  ;;  %11214 = vmatmul.msk.bf16.gmra.mxu2 %vm822_vm0, %v14414_v5 }
 0x1c2   :  { %v3856_v31 = vadd.f32 %v14111_v63, %v3652_v35  ;;  %11051 = vmatmul.msk.bf16.gmra.mxu1 %vm822_vm0, %v14253_v44  ;;  %v5677_v63 = vunpack.c.l.b16 %v4255_v58  ;;  %v13486_v44 = vld [vmem:[%s18140_s3 + $0xe8] sm:$0xff] }
 0x1c3   :  { %5221 = vmatpush.bf16.msra.mxu3 %v13486_v44 }
 0x1c4   :  { %11342 = vmatmul.msk.bf16.gmra.mxu3 %vm822_vm0, %v14431_v49  ;;  %v4056_v34 = vmax.f32 %v3856_v31, 0.0  ;;  %v2457_v3 = vpop.f32.mrf.mxu2 }
 0x1c5   :  { %v2903_v1 = vadd.f32 %v2457_v3, %v1836_v8  ;;  %v14453_v8 = vld [vmem:[%s18141_s2] ss:$0 sm:$0xff] }
 0x1c6   :  { %v4256_v0 = vpack.c.bf16 %v4056_v34, %v4056_v34  ;;  %v1229_v29 = vpop.f32.mrf.mxu0 }
 0x1c7   :  { %v3207_v51 = vpop.f32.mrf.mxu3  ;;  %v1842_v55 = vpop.f32.mrf.mxu1 }
 0x1c8   :  { %v5678_v7 = vunpack.c.l.b16 %v4256_v0  ;;  %v3653_v13 = vadd.f32 %v3207_v51, %v2903_v1  ;;  %v1843_v14 = vadd.f32 %v1842_v55, %v1229_v29  ;;  %v13462_v51 = vld [vmem:[%s18140_s3 + $0x28] sm:$0xff] }
 0x1c9   :  { %4833 = vmatpush.bf16.msrb.mxu1 %v13462_v51 }
 0x1ca   :  { %v14448_v15 = vpack.c.b16 %v5678_v7, %v5677_v63  ;;  %v3857_v18 = vadd.f32 %v14453_v8, %v3653_v13 }
 0x1cc   :  { %18243 = vst [vmem:[#allocation9_spill] sm:$0xff] %v14448_v15  ;;  %v2459_v10 = vpop.f32.mrf.mxu2  ;;  %v4057_v30 = vmax.f32 %v3857_v18, 0.0 }
 0x1cd   :  { %v2904_v20 = vadd.f32 %v2459_v10, %v1838_v40 }
 0x1ce   :  { %v1232_v25 = vpop.f32.mrf.mxu0  ;;  %v4257_v40 = vpack.c.bf16 %v4057_v30, %v4057_v30 }
 0x1cf   :  { %v3209_v21 = vpop.f32.mrf.mxu3  ;;  %v1845_v6 = vpop.f32.mrf.mxu1 }
 0x1d0   :  { %v3654_v43 = vadd.f32 %v3209_v21, %v2904_v20  ;;  %v1846_v41 = vadd.f32 %v1845_v6, %v1232_v25  ;;  %v5929_v34 = vunpack.c.l.b16 %v4257_v40 }
 0x1d1   :  { %10896 = vmatmul.msk.bf16.gmra.mxu0 %vm822_vm0, %v14287_v50  ;;  %11215 = vmatmul.msk.bf16.gmra.mxu2 %vm822_vm0, %v14431_v49 }
 0x1d2   :  { %v3858_v45 = vadd.f32 %v14453_v8, %v3654_v43  ;;  %11052 = vmatmul.msk.bf16.gmra.mxu1 %vm822_vm0, %v14270_v11 }
 0x1d4   :  { %11343 = vmatmul.msk.bf16.gmra.mxu3 %vm822_vm0, %v14459_v26  ;;  %v4058_v36 = vmax.f32 %v3858_v45, 0.0  ;;  %v2462_v19 = vpop.f32.mrf.mxu2 }
 0x1d5   :  { %v2905_v52 = vadd.f32 %v2462_v19, %v1841_v54 }
 0x1d6   :  { %v4258_v35 = vpack.c.bf16 %v4058_v36, %v4058_v36  ;;  %v1234_v58 = vpop.f32.mrf.mxu0 }
 0x1d7   :  { %v3212_v31 = vpop.f32.mrf.mxu3  ;;  %v1847_v1 = vpop.f32.mrf.mxu1 }
 0x1d8   :  { %v5930_v3 = vunpack.c.l.b16 %v4258_v35  ;;  %v3655_v0 = vadd.f32 %v3212_v31, %v2905_v52  ;;  %v1848_v29 = vadd.f32 %v1847_v1, %v1234_v58  ;;  %v14496_v1 = vld [vmem:[%s18139_s0 + $0x158] sm:$0xff] }
 0x1da   :  { %v14473_v11 = vpack.c.b16 %v5930_v3, %v5929_v34  ;;  %v3859_v63 = vadd.f32 %v14453_v8, %v3655_v0 }
 0x1dc   :  { %18244 = vst [vmem:[#allocation10_spill] sm:$0xff] %v14473_v11  ;;  %v2464_v7 = vpop.f32.mrf.mxu2  ;;  %v4059_v44 = vmax.f32 %v3859_v63, 0.0 }
 0x1dd   :  { %v2906_v13 = vadd.f32 %v2464_v7, %v1843_v14 }
 0x1de   :  { %v1237_v54 = vpop.f32.mrf.mxu0  ;;  %v4259_v14 = vpack.c.bf16 %v4059_v44, %v4059_v44 }
 0x1df   :  { %v3214_v55 = vpop.f32.mrf.mxu3  ;;  %v1850_v10 = vpop.f32.mrf.mxu1 }
 0x1e0   :  { %v3656_v18 = vadd.f32 %v3214_v55, %v2906_v13  ;;  %v1851_v20 = vadd.f32 %v1850_v10, %v1237_v54  ;;  %v6139_v36 = vunpack.c.l.b16 %v4259_v14 }
 0x1e1   :  { %10897 = vmatmul.msk.bf16.gmra.mxu0 %vm822_vm0, %v14304_v16  ;;  %11216 = vmatmul.msk.bf16.gmra.mxu2 %vm822_vm0, %v14459_v26 }
 0x1e2   :  { %v3860_v21 = vadd.f32 %v14453_v8, %v3656_v18  ;;  %11053 = vmatmul.msk.bf16.gmra.mxu1 %vm822_vm0, %v14287_v50 }
 0x1e4   :  { %11344 = vmatmul.msk.bf16.gmra.mxu3 %vm822_vm0, %v14479_v2  ;;  %v4060_v25 = vmax.f32 %v3860_v21, 0.0  ;;  %v2467_v30 = vpop.f32.mrf.mxu2 }
 0x1e5   :  { %v2907_v6 = vadd.f32 %v2467_v30, %v1846_v41 }
 0x1e6   :  { %v4260_v43 = vpack.c.bf16 %v4060_v25, %v4060_v25  ;;  %v1239_v40 = vpop.f32.mrf.mxu0 }
 0x1e7   :  { %v3217_v45 = vpop.f32.mrf.mxu3  ;;  %v1852_v16 = vpop.f32.mrf.mxu1 }
 0x1e8   :  { %v6140_v19 = vunpack.c.l.b16 %v4260_v43  ;;  %v3657_v35 = vadd.f32 %v3217_v45, %v2907_v6  ;;  %v1853_v52 = vadd.f32 %v1852_v16, %v1239_v40  ;;  %v14518_v16 = vld [vmem:[%s18139_s0 + $0x168] sm:$0xff] }
 0x1ea   :  { %v14490_v31 = vpack.c.b16 %v6140_v19, %v6139_v36  ;;  %v3861_v58 = vadd.f32 %v14453_v8, %v3657_v35  ;;  %v14513_v35 = vld [vmem:[%s18139_s0 + $0x160] sm:$0xff] }
 0x1ec   :  { %18245 = vst [vmem:[#allocation11_spill] sm:$0xff] %v14490_v31  ;;  %v2469_v50 = vpop.f32.mrf.mxu2  ;;  %v4061_v41 = vmax.f32 %v3861_v58, 0.0 }
 0x1ed   :  { %v2908_v34 = vadd.f32 %v2469_v50, %v1848_v29 }
 0x1ee   :  { %v1242_v0 = vpop.f32.mrf.mxu0  ;;  %v4261_v29 = vpack.c.bf16 %v4061_v41, %v4061_v41 }
 0x1ef   :  { %v3219_v3 = vpop.f32.mrf.mxu3  ;;  %v1855_v63 = vpop.f32.mrf.mxu1 }
 0x1f0   :  { %v3658_v51 = vadd.f32 %v3219_v3, %v2908_v34  ;;  %v1856_v7 = vadd.f32 %v1855_v63, %v1242_v0  ;;  %v4727_v14 = vunpack.c.l.b16 %v4261_v29 }
 0x1f1   :  { %10898 = vmatmul.msk.bf16.gmra.mxu0 %vm822_vm0, %v14326_v57  ;;  %11217 = vmatmul.msk.bf16.gmra.mxu2 %vm822_vm0, %v14479_v2 }
 0x1f2   :  { %v3862_v13 = vadd.f32 %v14453_v8, %v3658_v51  ;;  %11054 = vmatmul.msk.bf16.gmra.mxu1 %vm822_vm0, %v14321_v56 }
 0x1f4   :  { %11345 = vmatmul.msk.bf16.gmra.mxu3 %vm822_vm0, %v14496_v1  ;;  %v4062_v55 = vmax.f32 %v3862_v13, 0.0  ;;  %v2472_v54 = vpop.f32.mrf.mxu2 }
 0x1f5   :  { %v2909_v18 = vadd.f32 %v2472_v54, %v1851_v20 }
 0x1f6   :  { %v4262_v44 = vpack.c.bf16 %v4062_v55, %v4062_v55  ;;  %v1244_v21 = vpop.f32.mrf.mxu0 }
 0x1f7   :  { %v3222_v10 = vpop.f32.mrf.mxu3  ;;  %v1857_v43 = vpop.f32.mrf.mxu1 }
 0x1f8   :  { %v4728_v25 = vunpack.c.l.b16 %v4262_v44  ;;  %v3659_v30 = vadd.f32 %v3222_v10, %v2909_v18  ;;  %v1858_v6 = vadd.f32 %v1857_v43, %v1244_v21 }
 0x1fa   :  { %v14507_v45 = vpack.c.b16 %v4728_v25, %v4727_v14  ;;  %v3863_v40 = vadd.f32 %v14453_v8, %v3659_v30 }
 0x1fc   :  { %v2474_v56 = vpop.f32.mrf.mxu2  ;;  %v4063_v58 = vmax.f32 %v3863_v40, 0.0 }
 0x1fd   :  { %v2910_v36 = vadd.f32 %v2474_v56, %v1853_v52  ;;  %v14535_v56 = vld [vmem:[%s18139_s0 + $0x170] sm:$0xff] }
 0x1fe   :  { %v1247_v20 = vpop.f32.mrf.mxu0  ;;  %v4263_v52 = vpack.c.bf16 %v4063_v58, %v4063_v58 }
 0x1ff   :  { %v3224_v19 = vpop.f32.mrf.mxu3  ;;  %v1860_v34 = vpop.f32.mrf.mxu1 }
 0x200   :  { %v3660_v50 = vadd.f32 %v3224_v19, %v2910_v36  ;;  %v1861_v3 = vadd.f32 %v1860_v34, %v1247_v20  ;;  %v4494_v54 = vunpack.c.l.b16 %v4263_v52 }
 0x201   :  { %10899 = vmatmul.msk.bf16.gmra.mxu0 %vm822_vm0, %v14343_v32  ;;  %11218 = vmatmul.msk.bf16.gmra.mxu2 %vm822_vm0, %v14513_v35 }
 0x202   :  { %v3864_v0 = vadd.f32 %v14453_v8, %v3660_v50  ;;  %11055 = vmatmul.msk.bf16.gmra.mxu1 %vm822_vm0, %v14326_v57 }
 0x204   :  { %11346 = vmatmul.msk.bf16.gmra.mxu3 %vm822_vm0, %v14518_v16  ;;  %v4064_v41 = vmax.f32 %v3864_v0, 0.0  ;;  %v2477_v51 = vpop.f32.mrf.mxu2 }
 0x205   :  { %v2911_v13 = vadd.f32 %v2477_v51, %v1856_v7 }
 0x206   :  { %v4264_v63 = vpack.c.bf16 %v4064_v41, %v4064_v41  ;;  %v1249_v55 = vpop.f32.mrf.mxu0 }
 0x207   :  { %v3227_v29 = vpop.f32.mrf.mxu3  ;;  %v1862_v10 = vpop.f32.mrf.mxu1 }
 0x208   :  { %v4495_v44 = vunpack.c.l.b16 %v4264_v63  ;;  %v3661_v18 = vadd.f32 %v3227_v29, %v2911_v13  ;;  %v1863_v21 = vadd.f32 %v1862_v10, %v1249_v55 }
 0x20a   :  { %v14529_v14 = vpack.c.b16 %v4495_v44, %v4494_v54  ;;  %v3865_v25 = vadd.f32 %v14453_v8, %v3661_v18 }
 0x20c   :  { %v2479_v57 = vpop.f32.mrf.mxu2  ;;  %v4065_v7 = vmax.f32 %v3865_v25, 0.0 }
 0x20d   :  { %v2912_v30 = vadd.f32 %v2479_v57, %v1858_v6 }
 0x20e   :  { %v1252_v40 = vpop.f32.mrf.mxu0  ;;  %v4265_v6 = vpack.c.bf16 %v4065_v7, %v4065_v7 }
 0x20f   :  { %v3229_v43 = vpop.f32.mrf.mxu3  ;;  %v1865_v19 = vpop.f32.mrf.mxu1 }
 0x210   :  { %v3662_v36 = vadd.f32 %v3229_v43, %v2912_v30  ;;  %v1866_v20 = vadd.f32 %v1865_v19, %v1252_v40  ;;  %v4729_v63 = vunpack.c.l.b16 %v4265_v6  ;;  %v14552_v30 = vld [vmem:[%s18139_s0 + $0x178] sm:$0xff] }
 0x211   :  { %10900 = vmatmul.msk.bf16.gmra.mxu0 %vm822_vm0, %v14360_v38  ;;  %11219 = vmatmul.msk.bf16.gmra.mxu2 %vm822_vm0, %v14518_v16 }
 0x212   :  { %v3866_v58 = vadd.f32 %v14453_v8, %v3662_v36  ;;  %11056 = vmatmul.msk.bf16.gmra.mxu1 %vm822_vm0, %v14343_v32 }
 0x214   :  { %11347 = vmatmul.msk.bf16.gmra.mxu3 %vm822_vm0, %v14535_v56  ;;  %v4066_v50 = vmax.f32 %v3866_v58, 0.0  ;;  %v2482_v34 = vpop.f32.mrf.mxu2 }
 0x215   :  { %v2913_v52 = vadd.f32 %v2482_v34, %v1861_v3 }
 0x216   :  { %v4266_v0 = vpack.c.bf16 %v4066_v50, %v4066_v50  ;;  %v1254_v51 = vpop.f32.mrf.mxu0 }
 0x217   :  { %v3232_v41 = vpop.f32.mrf.mxu3  ;;  %v1867_v55 = vpop.f32.mrf.mxu1 }
 0x218   :  { %v4730_v13 = vunpack.c.l.b16 %v4266_v0  ;;  %v3663_v29 = vadd.f32 %v3232_v41, %v2913_v52  ;;  %v1868_v54 = vadd.f32 %v1867_v55, %v1254_v51 }
 0x21a   :  { %v14546_v44 = vpack.c.b16 %v4730_v13, %v4729_v63  ;;  %v3867_v18 = vadd.f32 %v14453_v8, %v3663_v29 }
 0x21c   :  { %v2484_v32 = vpop.f32.mrf.mxu2  ;;  %v4067_v3 = vmax.f32 %v3867_v18, 0.0 }
 0x21d   :  { %v2914_v10 = vadd.f32 %v2484_v32, %v1863_v21 }
 0x21e   :  { %v1257_v57 = vpop.f32.mrf.mxu0  ;;  %v4267_v21 = vpack.c.bf16 %v4067_v3, %v4067_v3 }
 0x21f   :  { %v3234_v25 = vpop.f32.mrf.mxu3  ;;  %v1870_v40 = vpop.f32.mrf.mxu1 }
 0x220   :  { %v3664_v43 = vadd.f32 %v3234_v25, %v2914_v10  ;;  %v1871_v7 = vadd.f32 %v1870_v40, %v1257_v57  ;;  %v4496_v52 = vunpack.c.l.b16 %v4267_v21  ;;  %v14569_v25 = vld [vmem:[%s18139_s0 + $0x180] sm:$0xff] }
 0x221   :  { %10901 = vmatmul.msk.bf16.gmra.mxu0 %vm822_vm0, %v14377_v47  ;;  %11220 = vmatmul.msk.bf16.gmra.mxu2 %vm822_vm0, %v14535_v56 }
 0x222   :  { %v3868_v36 = vadd.f32 %v14453_v8, %v3664_v43  ;;  %11057 = vmatmul.msk.bf16.gmra.mxu1 %vm822_vm0, %v14360_v38 }
 0x224   :  { %11348 = vmatmul.msk.bf16.gmra.mxu3 %vm822_vm0, %v14552_v30  ;;  %v4068_v19 = vmax.f32 %v3868_v36, 0.0  ;;  %v2487_v58 = vpop.f32.mrf.mxu2 }
 0x225   :  { %v2915_v50 = vadd.f32 %v2487_v58, %v1866_v20 }
 0x226   :  { %v4268_v6 = vpack.c.bf16 %v4068_v19, %v4068_v19  ;;  %v1259_v0 = vpop.f32.mrf.mxu0 }
 0x227   :  { %v3237_v34 = vpop.f32.mrf.mxu3  ;;  %v1872_v63 = vpop.f32.mrf.mxu1 }
 0x228   :  { %v4497_v41 = vunpack.c.l.b16 %v4268_v6  ;;  %v3665_v51 = vadd.f32 %v3237_v34, %v2915_v50  ;;  %v1873_v13 = vadd.f32 %v1872_v63, %v1259_v0 }
 0x22a   :  { %v14563_v29 = vpack.c.b16 %v4497_v41, %v4496_v52  ;;  %v3869_v55 = vadd.f32 %v14453_v8, %v3665_v51 }
 0x22c   :  { %v2489_v38 = vpop.f32.mrf.mxu2  ;;  %v4069_v20 = vmax.f32 %v3869_v55, 0.0 }
 0x22d   :  { %v2916_v18 = vadd.f32 %v2489_v38, %v1868_v54 }
 0x22e   :  { %v1262_v10 = vpop.f32.mrf.mxu0  ;;  %v4269_v54 = vpack.c.bf16 %v4069_v20, %v4069_v20 }
 0x22f   :  { %v3239_v32 = vpop.f32.mrf.mxu3  ;;  %v1875_v3 = vpop.f32.mrf.mxu1 }
 0x230   :  { %v3666_v57 = vadd.f32 %v3239_v32, %v2916_v18  ;;  %v1876_v43 = vadd.f32 %v1875_v3, %v1262_v10  ;;  %v4731_v34 = vunpack.c.l.b16 %v4269_v54  ;;  %v14586_v10 = vld [vmem:[%s18139_s0 + $0x188] sm:$0xff] }
 0x231   :  { %10902 = vmatmul.msk.bf16.gmra.mxu0 %vm822_vm0, %v14394_v39  ;;  %11221 = vmatmul.msk.bf16.gmra.mxu2 %vm822_vm0, %v14552_v30 }
 0x232   :  { %v3870_v40 = vadd.f32 %v14453_v8, %v3666_v57  ;;  %11058 = vmatmul.msk.bf16.gmra.mxu1 %vm822_vm0, %v14377_v47 }
 0x234   :  { %11349 = vmatmul.msk.bf16.gmra.mxu3 %vm822_vm0, %v14569_v25  ;;  %v4070_v36 = vmax.f32 %v3870_v40, 0.0  ;;  %v2492_v21 = vpop.f32.mrf.mxu2 }
 0x235   :  { %v2917_v58 = vadd.f32 %v2492_v21, %v1871_v7 }
 0x236   :  { %v4270_v19 = vpack.c.bf16 %v4070_v36, %v4070_v36  ;;  %v1264_v50 = vpop.f32.mrf.mxu0 }
 0x237   :  { %v3242_v6 = vpop.f32.mrf.mxu3  ;;  %v1877_v41 = vpop.f32.mrf.mxu1 }
 0x238   :  { %v4732_v0 = vunpack.c.l.b16 %v4270_v19  ;;  %v3667_v52 = vadd.f32 %v3242_v6, %v2917_v58  ;;  %v1878_v51 = vadd.f32 %v1877_v41, %v1264_v50 }
 0x23a   :  { %v14580_v63 = vpack.c.b16 %v4732_v0, %v4731_v34  ;;  %v3871_v55 = vadd.f32 %v14453_v8, %v3667_v52 }
 0x23c   :  { %v2494_v47 = vpop.f32.mrf.mxu2  ;;  %v4071_v7 = vmax.f32 %v3871_v55, 0.0 }
 0x23d   :  { %v2918_v38 = vadd.f32 %v2494_v47, %v1873_v13 }
 0x23e   :  { %v1267_v32 = vpop.f32.mrf.mxu0  ;;  %v4271_v13 = vpack.c.bf16 %v4071_v7, %v4071_v7  ;;  %v14603_v7 = vld [vmem:[%s18139_s0 + $0x190] sm:$0xff] }
 0x23f   :  { %v3244_v18 = vpop.f32.mrf.mxu3  ;;  %v1880_v57 = vpop.f32.mrf.mxu1 }
 0x240   :  { %v3668_v20 = vadd.f32 %v3244_v18, %v2918_v38  ;;  %v1881_v3 = vadd.f32 %v1880_v57, %v1267_v32  ;;  %v4498_v50 = vunpack.c.l.b16 %v4271_v13 }
 0x241   :  { %10903 = vmatmul.msk.bf16.gmra.mxu0 %vm822_vm0, %v14414_v5  ;;  %11222 = vmatmul.msk.bf16.gmra.mxu2 %vm822_vm0, %v14569_v25 }
 0x242   :  { %v3872_v40 = vadd.f32 %v14453_v8, %v3668_v20  ;;  %11059 = vmatmul.msk.bf16.gmra.mxu1 %vm822_vm0, %v14394_v39 }
 0x244   :  { %11350 = vmatmul.msk.bf16.gmra.mxu3 %vm822_vm0, %v14586_v10  ;;  %v4072_v54 = vmax.f32 %v3872_v40, 0.0  ;;  %v2497_v36 = vpop.f32.mrf.mxu2 }
 0x245   :  { %v2919_v19 = vadd.f32 %v2497_v36, %v1876_v43 }
 0x246   :  { %v4272_v21 = vpack.c.bf16 %v4072_v54, %v4072_v54  ;;  %v1269_v6 = vpop.f32.mrf.mxu0 }
 0x247   :  { %v3247_v58 = vpop.f32.mrf.mxu3  ;;  %v1882_v52 = vpop.f32.mrf.mxu1 }
 0x248   :  { %v4499_v34 = vunpack.c.l.b16 %v4272_v21  ;;  %v3669_v0 = vadd.f32 %v3247_v58, %v2919_v19  ;;  %v1883_v41 = vadd.f32 %v1882_v52, %v1269_v6 }
 0x24a   :  { %v14597_v55 = vpack.c.b16 %v4499_v34, %v4498_v50  ;;  %v3873_v47 = vadd.f32 %v14453_v8, %v3669_v0 }
 0x24c   :  { %v2499_v39 = vpop.f32.mrf.mxu2  ;;  %v4073_v43 = vmax.f32 %v3873_v47, 0.0 }
 0x24d   :  { %v2920_v38 = vadd.f32 %v2499_v39, %v1878_v51 }
 0x24e   :  { %v1272_v32 = vpop.f32.mrf.mxu0  ;;  %v4273_v51 = vpack.c.bf16 %v4073_v43, %v4073_v43  ;;  %v14620_v43 = vld [vmem:[%s18139_s0 + $0x198] sm:$0xff] }
 0x24f   :  { %v3249_v18 = vpop.f32.mrf.mxu3  ;;  %v1885_v57 = vpop.f32.mrf.mxu1 }
 0x250   :  { %v3670_v20 = vadd.f32 %v3249_v18, %v2920_v38  ;;  %v1886_v40 = vadd.f32 %v1885_v57, %v1272_v32  ;;  %v4733_v50 = vunpack.c.l.b16 %v4273_v51  ;;  %v13469_v51 = vld [vmem:[%s18140_s3 + $0x60] sm:$0xff] }
 0x251   :  { %10904 = vmatmul.msk.bf16.gmra.mxu0 %vm822_vm0, %v14431_v49  ;;  %11223 = vmatmul.msk.bf16.gmra.mxu2 %vm822_vm0, %v14586_v10 }
 0x252   :  { %v3874_v13 = vadd.f32 %v14453_v8, %v3670_v20  ;;  %11060 = vmatmul.msk.bf16.gmra.mxu1 %vm822_vm0, %v14414_v5  ;;  %4601 = vmatpush.bf16.msrb.mxu0 %v13469_v51  ;;  %v14640_v51 = vld [vmem:[%s18139_s0 + $0x1a0] sm:$0xff] }
 0x254   :  { %11351 = vmatmul.msk.bf16.gmra.mxu3 %vm822_vm0, %v14603_v7  ;;  %v4074_v54 = vmax.f32 %v3874_v13, 0.0  ;;  %v2502_v36 = vpop.f32.mrf.mxu2 }
 0x255   :  { %v2921_v19 = vadd.f32 %v2502_v36, %v1881_v3 }
 0x256   :  { %v4274_v21 = vpack.c.bf16 %v4074_v54, %v4074_v54  ;;  %v1274_v6 = vpop.f32.mrf.mxu0 }
 0x257   :  { %v3252_v58 = vpop.f32.mrf.mxu3  ;;  %v1887_v52 = vpop.f32.mrf.mxu1 }
 0x258   :  { %v4734_v34 = vunpack.c.l.b16 %v4274_v21  ;;  %v3671_v0 = vadd.f32 %v3252_v58, %v2921_v19  ;;  %v1888_v47 = vadd.f32 %v1887_v52, %v1274_v6 }
 0x25a   :  { %v14614_v39 = vpack.c.b16 %v4734_v34, %v4733_v50  ;;  %v3875_v38 = vadd.f32 %v14453_v8, %v3671_v0 }
 0x25c   :  { %v2504_v5 = vpop.f32.mrf.mxu2  ;;  %v4075_v3 = vmax.f32 %v3875_v38, 0.0 }
 0x25d   :  { %v2922_v18 = vadd.f32 %v2504_v5, %v1883_v41 }
 0x25e   :  { %v1277_v20 = vpop.f32.mrf.mxu0  ;;  %v4275_v41 = vpack.c.bf16 %v4075_v3, %v4075_v3 }
 0x25f   :  { %v3254_v32 = vpop.f32.mrf.mxu3  ;;  %v1890_v13 = vpop.f32.mrf.mxu1 }
 0x260   :  { %v3672_v57 = vadd.f32 %v3254_v32, %v2922_v18  ;;  %v1891_v54 = vadd.f32 %v1890_v13, %v1277_v20  ;;  %v4500_v0 = vunpack.c.l.b16 %v4275_v41 }
 0x261   :  { %10905 = vmatmul.msk.bf16.gmra.mxu0 %vm822_vm0, %v14459_v26  ;;  %11224 = vmatmul.msk.bf16.gmra.mxu2 %vm822_vm0, %v14603_v7 }
 0x262   :  { %v3876_v36 = vadd.f32 %v14453_v8, %v3672_v57  ;;  %11061 = vmatmul.msk.bf16.gmra.mxu1 %vm822_vm0, %v14431_v49 }
 0x264   :  { %11352 = vmatmul.msk.bf16.gmra.mxu3 %vm822_vm0, %v14620_v43  ;;  %v4076_v21 = vmax.f32 %v3876_v36, 0.0  ;;  %v2507_v19 = vpop.f32.mrf.mxu2 }
 0x265   :  { %v2923_v6 = vadd.f32 %v2507_v19, %v1886_v40 }
 0x266   :  { %v4276_v58 = vpack.c.bf16 %v4076_v21, %v4076_v21  ;;  %v1279_v34 = vpop.f32.mrf.mxu0 }
 0x267   :  { %v3257_v50 = vpop.f32.mrf.mxu3  ;;  %v1892_v5 = vpop.f32.mrf.mxu1 }
 0x268   :  { %v4501_v52 = vunpack.c.l.b16 %v4276_v58  ;;  %v3673_v38 = vadd.f32 %v3257_v50, %v2923_v6  ;;  %v1893_v18 = vadd.f32 %v1892_v5, %v1279_v34 }
 0x26a   :  { %v14634_v32 = vpack.c.b16 %v4501_v52, %v4500_v0  ;;  %v3877_v49 = vadd.f32 %v14453_v8, %v3673_v38 }
 0x26c   :  { %v2509_v20 = vpop.f32.mrf.mxu2  ;;  %v4077_v40 = vmax.f32 %v3877_v49, 0.0 }
 0x26d   :  { %v2924_v57 = vadd.f32 %v2509_v20, %v1888_v47 }
 0x26e   :  { %v1282_v3 = vpop.f32.mrf.mxu0  ;;  %v4277_v47 = vpack.c.bf16 %v4077_v40, %v4077_v40  ;;  %v14657_v40 = vld [vmem:[%s18139_s0 + $0x1a8] sm:$0xff] }
 0x26f   :  { %v3259_v13 = vpop.f32.mrf.mxu3  ;;  %v1895_v41 = vpop.f32.mrf.mxu1 }
 0x270   :  { %v3674_v36 = vadd.f32 %v3259_v13, %v2924_v57  ;;  %v1896_v21 = vadd.f32 %v1895_v41, %v1282_v3  ;;  %v4947_v38 = vunpack.c.l.b16 %v4277_v47 }
 0x271   :  { %10906 = vmatmul.msk.bf16.gmra.mxu0 %vm822_vm0, %v14479_v2  ;;  %11225 = vmatmul.msk.bf16.gmra.mxu2 %vm822_vm0, %v14620_v43 }
 0x272   :  { %v3878_v19 = vadd.f32 %v14453_v8, %v3674_v36  ;;  %11062 = vmatmul.msk.bf16.gmra.mxu1 %vm822_vm0, %v14459_v26 }
 0x274   :  { %11353 = vmatmul.msk.bf16.gmra.mxu3 %vm822_vm0, %v14640_v51  ;;  %v4078_v58 = vmax.f32 %v3878_v19, 0.0  ;;  %v2512_v6 = vpop.f32.mrf.mxu2 }
 0x275   :  { %v2925_v34 = vadd.f32 %v2512_v6, %v1891_v54 }
 0x276   :  { %v4278_v50 = vpack.c.bf16 %v4078_v58, %v4078_v58  ;;  %v1284_v52 = vpop.f32.mrf.mxu0 }
 0x277   :  { %v3262_v0 = vpop.f32.mrf.mxu3  ;;  %v1897_v20 = vpop.f32.mrf.mxu1 }
 0x278   :  { %v4948_v5 = vunpack.c.l.b16 %v4278_v50  ;;  %v3675_v49 = vadd.f32 %v3262_v0, %v2925_v34  ;;  %v1898_v57 = vadd.f32 %v1897_v20, %v1284_v52 }
 0x27a   :  { %v14651_v13 = vpack.c.b16 %v4948_v5, %v4947_v38  ;;  %v3879_v3 = vadd.f32 %v14453_v8, %v3675_v49 }
 0x27c   :  { %v2514_v26 = vpop.f32.mrf.mxu2  ;;  %v4079_v54 = vmax.f32 %v3879_v3, 0.0 }
 0x27d   :  { %v2926_v36 = vadd.f32 %v2514_v26, %v1893_v18 }
 0x27e   :  { %v1287_v31 = vpop.f32.mrf.mxu0  ;;  %v4279_v18 = vpack.c.bf16 %v4079_v54, %v4079_v54  ;;  %v14674_v54 = vld [vmem:[%s18139_s0 + $0x1b0] sm:$0xff] }
 0x27f   :  { %v3264_v41 = vpop.f32.mrf.mxu3  ;;  %v1900_v47 = vpop.f32.mrf.mxu1 }
 0x280   :  { %v3676_v19 = vadd.f32 %v3264_v41, %v2926_v36  ;;  %v1901_v58 = vadd.f32 %v1900_v47, %v1287_v31  ;;  %v5157_v5 = vunpack.c.l.b16 %v4279_v18 }
 0x281   :  { %10907 = vmatmul.msk.bf16.gmra.mxu0 %vm822_vm0, %v14496_v1  ;;  %11226 = vmatmul.msk.bf16.gmra.mxu2 %vm822_vm0, %v14640_v51 }
 0x282   :  { %v3880_v6 = vadd.f32 %v14453_v8, %v3676_v19  ;;  %11063 = vmatmul.msk.bf16.gmra.mxu1 %vm822_vm0, %v14479_v2 }
 0x284   :  { %11354 = vmatmul.msk.bf16.gmra.mxu3 %vm822_vm0, %v14657_v40  ;;  %v4080_v50 = vmax.f32 %v3880_v6, 0.0  ;;  %v2517_v34 = vpop.f32.mrf.mxu2 }
 0x285   :  { %v2927_v52 = vadd.f32 %v2517_v34, %v1896_v21  ;;  %v13485_v34 = vld [vmem:[%s18140_s3 + $0xe0] sm:$0xff] }
 0x286   :  { %v4280_v0 = vpack.c.bf16 %v4080_v50, %v4080_v50  ;;  %v1289_v38 = vpop.f32.mrf.mxu0  ;;  %v13477_v50 = vld [vmem:[%s18140_s3 + $0xa0] sm:$0xff]  ;;  %5222 = vmatpush.bf16.msra.mxu3 %v13485_v34 }
 0x287   :  { %v3267_v31 = vpop.f32.mrf.mxu3  ;;  %v1902_v1 = vpop.f32.mrf.mxu1  ;;  %5012 = vmatpush.bf16.msra.mxu2 %v13477_v50  ;;  %v14697_v50 = vld [vmem:[%s18139_s0 + $0x1b8] sm:$0xff]  ;;  %v14702_v34 = vld [vmem:[%s18139_s0 + $0x1c0] sm:$0xff] }
 0x288   :  { %v5158_v49 = vunpack.c.l.b16 %v4280_v0  ;;  %v3677_v20 = vadd.f32 %v3267_v31, %v2927_v52  ;;  %v1903_v3 = vadd.f32 %v1902_v1, %v1289_v38 }
 0x28a   :  { %v14668_v26 = vpack.c.b16 %v5158_v49, %v5157_v5  ;;  %v3881_v36 = vadd.f32 %v14453_v8, %v3677_v20 }
 0x28c   :  { %v2519_v2 = vpop.f32.mrf.mxu2  ;;  %v4081_v21 = vmax.f32 %v3881_v36, 0.0 }
 0x28d   :  { %v2928_v41 = vadd.f32 %v2519_v2, %v1898_v57 }
 0x28e   :  { %v1292_v47 = vpop.f32.mrf.mxu0  ;;  %v4281_v52 = vpack.c.bf16 %v4081_v21, %v4081_v21 }
 0x28f   :  { %v3269_v19 = vpop.f32.mrf.mxu3  ;;  %v1905_v18 = vpop.f32.mrf.mxu1 }
 0x290   :  { %v3678_v6 = vadd.f32 %v3269_v19, %v2928_v41  ;;  %v1906_v0 = vadd.f32 %v1905_v18, %v1292_v47  ;;  %v5397_v36 = vunpack.c.l.b16 %v4281_v52 }
 0x291   :  { %10908 = vmatmul.msk.bf16.gmra.mxu0 %vm822_vm0, %v14518_v16  ;;  %11227 = vmatmul.msk.bf16.gmra.mxu2 %vm822_vm0, %v14657_v40 }
 0x292   :  { %v3882_v57 = vadd.f32 %v14453_v8, %v3678_v6  ;;  %11064 = vmatmul.msk.bf16.gmra.mxu1 %vm822_vm0, %v14513_v35 }
 0x294   :  { %11355 = vmatmul.msk.bf16.gmra.mxu3 %vm822_vm0, %v14674_v54  ;;  %v4082_v31 = vmax.f32 %v3882_v57, 0.0  ;;  %v2522_v38 = vpop.f32.mrf.mxu2 }
 0x295   :  { %v2929_v49 = vadd.f32 %v2522_v38, %v1901_v58  ;;  %v13461_v38 = vld [vmem:[%s18140_s3 + $0x20] sm:$0xff] }
 0x296   :  { %v4282_v5 = vpack.c.bf16 %v4082_v31, %v4082_v31  ;;  %v1294_v1 = vpop.f32.mrf.mxu0  ;;  %4834 = vmatpush.bf16.msrb.mxu1 %v13461_v38  ;;  %v14722_v38 = vld [vmem:[%s18139_s0 + $0x1c8] sm:$0xff] }
 0x297   :  { %v3272_v20 = vpop.f32.mrf.mxu3  ;;  %v1907_v19 = vpop.f32.mrf.mxu1 }
 0x298   :  { %v5398_v2 = vunpack.c.l.b16 %v4282_v5  ;;  %v3679_v41 = vadd.f32 %v3272_v20, %v2929_v49  ;;  %v1908_v47 = vadd.f32 %v1907_v19, %v1294_v1 }
 0x29a   :  { %v14691_v6 = vpack.c.b16 %v5398_v2, %v5397_v36  ;;  %v3883_v35 = vadd.f32 %v14453_v8, %v3679_v41 }
 0x29c   :  { %18246 = vst [vmem:[#allocation12_spill] sm:$0xff] %v14691_v6  ;;  %v2524_v18 = vpop.f32.mrf.mxu2  ;;  %v4083_v57 = vmax.f32 %v3883_v35, 0.0 }
 0x29d   :  { %v2930_v11 = vadd.f32 %v2524_v18, %v1903_v3 }
 0x29e   :  { %v1297_v58 = vpop.f32.mrf.mxu0 }
 0x29f   :  { %v3274_v21 = vpop.f32.mrf.mxu3  ;;  %v1910_v31 = vpop.f32.mrf.mxu1 }
 0x2a0   :  { %v3680_v52 = vadd.f32 %v3274_v21, %v2930_v11  ;;  %v1911_v3 = vadd.f32 %v1910_v31, %v1297_v58  ;;  %v4283_v11 = vpack.c.bf16 %v4083_v57, %v4083_v57 }
 0x2a1   :  { %10909 = vmatmul.msk.bf16.gmra.mxu0 %vm822_vm0, %v14535_v56  ;;  %11228 = vmatmul.msk.bf16.gmra.mxu2 %vm822_vm0, %v14697_v50 }
 0x2a2   :  { %v3884_v5 = vadd.f32 %v14453_v8, %v3680_v52  ;;  %11065 = vmatmul.msk.bf16.gmra.mxu1 %vm822_vm0, %v14518_v16  ;;  %v5679_v19 = vunpack.c.l.b16 %v4283_v11 }
 0x2a4   :  { %11356 = vmatmul.msk.bf16.gmra.mxu3 %vm822_vm0, %v14702_v34  ;;  %v4084_v49 = vmax.f32 %v3884_v5, 0.0  ;;  %v2527_v20 = vpop.f32.mrf.mxu2 }
 0x2a5   :  { %v2931_v36 = vadd.f32 %v2527_v20, %v1906_v0 }
 0x2a6   :  { %v4284_v1 = vpack.c.bf16 %v4084_v49, %v4084_v49  ;;  %v1299_v41 = vpop.f32.mrf.mxu0 }
 0x2a7   :  { %v3277_v2 = vpop.f32.mrf.mxu3  ;;  %v1912_v21 = vpop.f32.mrf.mxu1 }
 0x2a8   :  { %v5680_v35 = vunpack.c.l.b16 %v4284_v1  ;;  %v3681_v18 = vadd.f32 %v3277_v2, %v2931_v36  ;;  %v1913_v58 = vadd.f32 %v1912_v21, %v1299_v41 }
 0x2aa   :  { %v14716_v52 = vpack.c.b16 %v5680_v35, %v5679_v19  ;;  %v3885_v16 = vadd.f32 %v14453_v8, %v3681_v18 }
 0x2ac   :  { %18247 = vst [vmem:[#allocation13_spill] sm:$0xff] %v14716_v52  ;;  %v2529_v31 = vpop.f32.mrf.mxu2  ;;  %v4085_v0 = vmax.f32 %v3885_v16, 0.0 }
 0x2ad   :  { %v2932_v6 = vadd.f32 %v2529_v31, %v1908_v47 }
 0x2ae   :  { %v1302_v57 = vpop.f32.mrf.mxu0  ;;  %v4285_v47 = vpack.c.bf16 %v4085_v0, %v4085_v0  ;;  %v14739_v0 = vld [vmem:[%s18139_s0 + $0x1d0] sm:$0xff] }
 0x2af   :  { %v3279_v15 = vpop.f32.mrf.mxu3  ;;  %v1915_v11 = vpop.f32.mrf.mxu1 }
 0x2b0   :  { %v3682_v5 = vadd.f32 %v3279_v15, %v2932_v6  ;;  %v1916_v49 = vadd.f32 %v1915_v11, %v1302_v57  ;;  %v5399_v19 = vunpack.c.l.b16 %v4285_v47 }
 0x2b1   :  { %10910 = vmatmul.msk.bf16.gmra.mxu0 %vm822_vm0, %v14552_v30  ;;  %11229 = vmatmul.msk.bf16.gmra.mxu2 %vm822_vm0, %v14702_v34 }
 0x2b2   :  { %v3886_v20 = vadd.f32 %v14453_v8, %v3682_v5  ;;  %11066 = vmatmul.msk.bf16.gmra.mxu1 %vm822_vm0, %v14535_v56 }
 0x2b4   :  { %11357 = vmatmul.msk.bf16.gmra.mxu3 %vm822_vm0, %v14722_v38  ;;  %v4086_v1 = vmax.f32 %v3886_v20, 0.0  ;;  %v2532_v36 = vpop.f32.mrf.mxu2 }
 0x2b5   :  { %v2933_v6 = vadd.f32 %v2532_v36, %v1911_v3 }
 0x2b6   :  { %v4286_v15 = vpack.c.bf16 %v4086_v1, %v4086_v1  ;;  %v1304_v41 = vpop.f32.mrf.mxu0 }
 0x2b7   :  { %v3282_v2 = vpop.f32.mrf.mxu3  ;;  %v1917_v21 = vpop.f32.mrf.mxu1 }
 0x2b8   :  { %v5400_v35 = vunpack.c.l.b16 %v4286_v15  ;;  %v3683_v18 = vadd.f32 %v3282_v2, %v2933_v6  ;;  %v1918_v16 = vadd.f32 %v1917_v21, %v1304_v41 }
 0x2ba   :  { %v14733_v31 = vpack.c.b16 %v5400_v35, %v5399_v19  ;;  %v3887_v57 = vadd.f32 %v14453_v8, %v3683_v18 }
 0x2bc   :  { %18248 = vst [vmem:[#allocation14_spill] sm:$0xff] %v14733_v31  ;;  %v2534_v56 = vpop.f32.mrf.mxu2  ;;  %v4087_v3 = vmax.f32 %v3887_v57, 0.0 }
 0x2bd   :  { %v2934_v5 = vadd.f32 %v2534_v56, %v1913_v58 }
 0x2be   :  { %v1307_v52 = vpop.f32.mrf.mxu0  ;;  %v4287_v58 = vpack.c.bf16 %v4087_v3, %v4087_v3  ;;  %v14756_v3 = vld [vmem:[%s18139_s0 + $0x1d8] sm:$0xff] }
 0x2bf   :  { %v3284_v11 = vpop.f32.mrf.mxu3  ;;  %v1920_v47 = vpop.f32.mrf.mxu1 }
 0x2c0   :  { %v3684_v20 = vadd.f32 %v3284_v11, %v2934_v5  ;;  %v1921_v1 = vadd.f32 %v1920_v47, %v1307_v52  ;;  %v5681_v35 = vunpack.c.l.b16 %v4287_v58 }
 0x2c1   :  { %10911 = vmatmul.msk.bf16.gmra.mxu0 %vm822_vm0, %v14569_v25  ;;  %11230 = vmatmul.msk.bf16.gmra.mxu2 %vm822_vm0, %v14722_v38 }
 0x2c2   :  { %v3888_v36 = vadd.f32 %v14453_v8, %v3684_v20  ;;  %11067 = vmatmul.msk.bf16.gmra.mxu1 %vm822_vm0, %v14552_v30 }
 0x2c4   :  { %11358 = vmatmul.msk.bf16.gmra.mxu3 %vm822_vm0, %v14739_v0  ;;  %v4088_v15 = vmax.f32 %v3888_v36, 0.0  ;;  %v2537_v6 = vpop.f32.mrf.mxu2 }
 0x2c5   :  { %v2935_v41 = vadd.f32 %v2537_v6, %v1916_v49 }
 0x2c6   :  { %v4288_v2 = vpack.c.bf16 %v4088_v15, %v4088_v15  ;;  %v1309_v19 = vpop.f32.mrf.mxu0 }
 0x2c7   :  { %v3287_v52 = vpop.f32.mrf.mxu3  ;;  %v1922_v57 = vpop.f32.mrf.mxu1 }
 0x2c8   :  { %v5682_v18 = vunpack.c.l.b16 %v4288_v2  ;;  %v3685_v21 = vadd.f32 %v3287_v52, %v2935_v41  ;;  %v1923_v56 = vadd.f32 %v1922_v57, %v1309_v19 }
 0x2ca   :  { %v14750_v5 = vpack.c.b16 %v5682_v18, %v5681_v35  ;;  %v3889_v11 = vadd.f32 %v14453_v8, %v3685_v21 }
 0x2cc   :  { %18249 = vst [vmem:[#allocation15_spill] sm:$0xff] %v14750_v5  ;;  %v2539_v30 = vpop.f32.mrf.mxu2  ;;  %v4089_v49 = vmax.f32 %v3889_v11, 0.0 }
 0x2cd   :  { %v2936_v20 = vadd.f32 %v2539_v30, %v1918_v16 }
 0x2ce   :  { %v1312_v31 = vpop.f32.mrf.mxu0  ;;  %v4289_v16 = vpack.c.bf16 %v4089_v49, %v4089_v49  ;;  %v14773_v49 = vld [vmem:[%s18139_s0 + $0x1e0] sm:$0xff] }
 0x2cf   :  { %v3289_v47 = vpop.f32.mrf.mxu3  ;;  %v1925_v58 = vpop.f32.mrf.mxu1 }
 0x2d0   :  { %v3686_v36 = vadd.f32 %v3289_v47, %v2936_v20  ;;  %v1926_v15 = vadd.f32 %v1925_v58, %v1312_v31  ;;  %v5401_v18 = vunpack.c.l.b16 %v4289_v16 }
 0x2d1   :  { %10912 = vmatmul.msk.bf16.gmra.mxu0 %vm822_vm0, %v14586_v10  ;;  %11231 = vmatmul.msk.bf16.gmra.mxu2 %vm822_vm0, %v14739_v0 }
 0x2d2   :  { %v3890_v6 = vadd.f32 %v14453_v8, %v3686_v36  ;;  %11068 = vmatmul.msk.bf16.gmra.mxu1 %vm822_vm0, %v14569_v25 }
 0x2d4   :  { %11359 = vmatmul.msk.bf16.gmra.mxu3 %vm822_vm0, %v14756_v3  ;;  %v4090_v2 = vmax.f32 %v3890_v6, 0.0  ;;  %v2542_v41 = vpop.f32.mrf.mxu2 }
 0x2d5   :  { %v2937_v19 = vadd.f32 %v2542_v41, %v1921_v1 }
 0x2d6   :  { %v4290_v52 = vpack.c.bf16 %v4090_v2, %v4090_v2  ;;  %v1314_v35 = vpop.f32.mrf.mxu0 }
 0x2d7   :  { %v3292_v31 = vpop.f32.mrf.mxu3  ;;  %v1927_v11 = vpop.f32.mrf.mxu1 }
 0x2d8   :  { %v5402_v21 = vunpack.c.l.b16 %v4290_v52  ;;  %v3687_v57 = vadd.f32 %v3292_v31, %v2937_v19  ;;  %v1928_v30 = vadd.f32 %v1927_v11, %v1314_v35 }
 0x2da   :  { %v14767_v20 = vpack.c.b16 %v5402_v21, %v5401_v18  ;;  %v3891_v47 = vadd.f32 %v14453_v8, %v3687_v57 }
 0x2dc   :  { %18250 = vst [vmem:[#allocation16_spill] sm:$0xff] %v14767_v20  ;;  %v2544_v25 = vpop.f32.mrf.mxu2  ;;  %v4091_v1 = vmax.f32 %v3891_v47, 0.0 }
 0x2dd   :  { %v2938_v36 = vadd.f32 %v2544_v25, %v1923_v56 }
 0x2de   :  { %v1317_v5 = vpop.f32.mrf.mxu0  ;;  %v4291_v56 = vpack.c.bf16 %v4091_v1, %v4091_v1 }
 0x2df   :  { %v3294_v58 = vpop.f32.mrf.mxu3  ;;  %v1930_v16 = vpop.f32.mrf.mxu1 }
 0x2e0   :  { %v3688_v6 = vadd.f32 %v3294_v58, %v2938_v36  ;;  %v1931_v2 = vadd.f32 %v1930_v16, %v1317_v5  ;;  %v14795_v16 = vld [vmem:[%s18139_s0 + $0x1e8] sm:$0xff] }
 0x2e1   :  { %10913 = vmatmul.msk.bf16.gmra.mxu0 %vm822_vm0, %v14603_v7  ;;  %11232 = vmatmul.msk.bf16.gmra.mxu2 %vm822_vm0, %v14756_v3 }
 0x2e2   :  { %v3892_v41 = vadd.f32 %v14453_v8, %v3688_v6  ;;  %11069 = vmatmul.msk.bf16.gmra.mxu1 %vm822_vm0, %v14586_v10  ;;  %v5683_v8 = vunpack.c.l.b16 %v4291_v56  ;;  %v14789_v10 = vld [vmem:[%s18141_s2] ss:$0 sm:$0xff] }
 0x2e4   :  { %11360 = vmatmul.msk.bf16.gmra.mxu3 %vm822_vm0, %v14773_v49  ;;  %v4092_v52 = vmax.f32 %v3892_v41, 0.0  ;;  %v2547_v19 = vpop.f32.mrf.mxu2 }
 0x2e5   :  { %v2939_v35 = vadd.f32 %v2547_v19, %v1926_v15 }
 0x2e6   :  { %v4292_v31 = vpack.c.bf16 %v4092_v52, %v4092_v52  ;;  %v1319_v18 = vpop.f32.mrf.mxu0 }
 0x2e7   :  { %v3297_v5 = vpop.f32.mrf.mxu3  ;;  %v1932_v11 = vpop.f32.mrf.mxu1 }
 0x2e8   :  { %v5684_v21 = vunpack.c.l.b16 %v4292_v31  ;;  %v3689_v57 = vadd.f32 %v3297_v5, %v2939_v35  ;;  %v1933_v47 = vadd.f32 %v1932_v11, %v1319_v18 }
 0x2ea   :  { %v14784_v25 = vpack.c.b16 %v5684_v21, %v5683_v8  ;;  %v3893_v36 = vadd.f32 %v14789_v10, %v3689_v57 }
 0x2ec   :  { %18251 = vst [vmem:[#allocation17_spill] sm:$0xff] %v14784_v25  ;;  %v2549_v58 = vpop.f32.mrf.mxu2  ;;  %v4093_v41 = vmax.f32 %v3893_v36, 0.0 }
 0x2ed   :  { %v2940_v1 = vadd.f32 %v2549_v58, %v1928_v30 }
 0x2ee   :  { %v1322_v15 = vpop.f32.mrf.mxu0  ;;  %v4293_v30 = vpack.c.bf16 %v4093_v41, %v4093_v41  ;;  %v14812_v41 = vld [vmem:[%s18139_s0 + $0x1f0] sm:$0xff] }
 0x2ef   :  { %v3299_v6 = vpop.f32.mrf.mxu3  ;;  %v1935_v52 = vpop.f32.mrf.mxu1 }
 0x2f0   :  { %v3690_v56 = vadd.f32 %v3299_v6, %v2940_v1  ;;  %v1936_v19 = vadd.f32 %v1935_v52, %v1322_v15  ;;  %v5403_v11 = vunpack.c.l.b16 %v4293_v30 }
 0x2f1   :  { %10914 = vmatmul.msk.bf16.gmra.mxu0 %vm822_vm0, %v14620_v43  ;;  %11233 = vmatmul.msk.bf16.gmra.mxu2 %vm822_vm0, %v14773_v49 }
 0x2f2   :  { %v3894_v31 = vadd.f32 %v14789_v10, %v3690_v56  ;;  %11070 = vmatmul.msk.bf16.gmra.mxu1 %vm822_vm0, %v14603_v7 }
 0x2f4   :  { %11361 = vmatmul.msk.bf16.gmra.mxu3 %vm822_vm0, %v14795_v16  ;;  %v4094_v35 = vmax.f32 %v3894_v31, 0.0  ;;  %v2552_v5 = vpop.f32.mrf.mxu2 }
 0x2f5   :  { %v2941_v8 = vadd.f32 %v2552_v5, %v1931_v2 }
 0x2f6   :  { %v4294_v18 = vpack.c.bf16 %v4094_v35, %v4094_v35  ;;  %v1324_v57 = vpop.f32.mrf.mxu0 }
 0x2f7   :  { %v3302_v21 = vpop.f32.mrf.mxu3  ;;  %v1937_v1 = vpop.f32.mrf.mxu1 }
 0x2f8   :  { %v5404_v36 = vunpack.c.l.b16 %v4294_v18  ;;  %v3691_v58 = vadd.f32 %v3302_v21, %v2941_v8  ;;  %v1938_v6 = vadd.f32 %v1937_v1, %v1324_v57 }
 0x2fa   :  { %v14806_v15 = vpack.c.b16 %v5404_v36, %v5403_v11  ;;  %v3895_v56 = vadd.f32 %v14789_v10, %v3691_v58 }
 0x2fc   :  { %18252 = vst [vmem:[#allocation18_spill] sm:$0xff] %v14806_v15  ;;  %v2554_v7 = vpop.f32.mrf.mxu2  ;;  %v4095_v2 = vmax.f32 %v3895_v56, 0.0 }
 0x2fd   :  { %v2942_v52 = vadd.f32 %v2554_v7, %v1933_v47 }
 0x2fe   :  { %v1327_v20 = vpop.f32.mrf.mxu0  ;;  %v4295_v47 = vpack.c.bf16 %v4095_v2, %v4095_v2  ;;  %v14829_v2 = vld [vmem:[%s18139_s0 + $0x1f8] sm:$0xff] }
 0x2ff   :  { %v3304_v25 = vpop.f32.mrf.mxu3  ;;  %v1940_v30 = vpop.f32.mrf.mxu1 }
 0x300   :  { %v3692_v31 = vadd.f32 %v3304_v25, %v2942_v52  ;;  %v1941_v35 = vadd.f32 %v1940_v30, %v1327_v20  ;;  %v5685_v11 = vunpack.c.l.b16 %v4295_v47 }
 0x301   :  { %10915 = vmatmul.msk.bf16.gmra.mxu0 %vm822_vm0, %v14640_v51  ;;  %11234 = vmatmul.msk.bf16.gmra.mxu2 %vm822_vm0, %v14795_v16 }
 0x302   :  { %v3896_v5 = vadd.f32 %v14789_v10, %v3692_v31  ;;  %11071 = vmatmul.msk.bf16.gmra.mxu1 %vm822_vm0, %v14620_v43 }
 0x304   :  { %11362 = vmatmul.msk.bf16.gmra.mxu3 %vm822_vm0, %v14812_v41  ;;  %v4096_v18 = vmax.f32 %v3896_v5, 0.0  ;;  %v2557_v8 = vpop.f32.mrf.mxu2 }
 0x305   :  { %v2943_v21 = vadd.f32 %v2557_v8, %v1936_v19 }
 0x306   :  { %v4296_v25 = vpack.c.bf16 %v4096_v18, %v4096_v18  ;;  %v1329_v57 = vpop.f32.mrf.mxu0 }
 0x307   :  { %v3307_v20 = vpop.f32.mrf.mxu3  ;;  %v1942_v1 = vpop.f32.mrf.mxu1 }
 0x308   :  { %v5686_v36 = vunpack.c.l.b16 %v4296_v25  ;;  %v3693_v58 = vadd.f32 %v3307_v20, %v2943_v21  ;;  %v1943_v56 = vadd.f32 %v1942_v1, %v1329_v57 }
 0x30a   :  { %v14823_v7 = vpack.c.b16 %v5686_v36, %v5685_v11  ;;  %v3897_v52 = vadd.f32 %v14789_v10, %v3693_v58 }
 0x30c   :  { %18253 = vst [vmem:[#allocation19_spill] sm:$0xff] %v14823_v7  ;;  %v2559_v43 = vpop.f32.mrf.mxu2  ;;  %v4097_v19 = vmax.f32 %v3897_v52, 0.0 }
 0x30d   :  { %v2944_v31 = vadd.f32 %v2559_v43, %v1938_v6 }
 0x30e   :  { %v1332_v15 = vpop.f32.mrf.mxu0  ;;  %v4297_v6 = vpack.c.bf16 %v4097_v19, %v4097_v19  ;;  %v14846_v19 = vld [vmem:[%s18139_s0 + $0x200] sm:$0xff] }
 0x30f   :  { %v3309_v30 = vpop.f32.mrf.mxu3  ;;  %v1945_v47 = vpop.f32.mrf.mxu1 }
 0x310   :  { %v3694_v5 = vadd.f32 %v3309_v30, %v2944_v31  ;;  %v1946_v18 = vadd.f32 %v1945_v47, %v1332_v15  ;;  %v5931_v36 = vunpack.c.l.b16 %v4297_v6 }
 0x311   :  { %10916 = vmatmul.msk.bf16.gmra.mxu0 %vm822_vm0, %v14657_v40  ;;  %11235 = vmatmul.msk.bf16.gmra.mxu2 %vm822_vm0, %v14812_v41 }
 0x312   :  { %v3898_v8 = vadd.f32 %v14789_v10, %v3694_v5  ;;  %11072 = vmatmul.msk.bf16.gmra.mxu1 %vm822_vm0, %v14640_v51 }
 0x314   :  { %11363 = vmatmul.msk.bf16.gmra.mxu3 %vm822_vm0, %v14829_v2  ;;  %v4098_v25 = vmax.f32 %v3898_v8, 0.0  ;;  %v2562_v21 = vpop.f32.mrf.mxu2 }
 0x315   :  { %v2945_v57 = vadd.f32 %v2562_v21, %v1941_v35 }
 0x316   :  { %v4298_v20 = vpack.c.bf16 %v4098_v25, %v4098_v25  ;;  %v1334_v11 = vpop.f32.mrf.mxu0 }
 0x317   :  { %v3312_v15 = vpop.f32.mrf.mxu3  ;;  %v1947_v52 = vpop.f32.mrf.mxu1 }
 0x318   :  { %v5932_v58 = vunpack.c.l.b16 %v4298_v20  ;;  %v3695_v1 = vadd.f32 %v3312_v15, %v2945_v57  ;;  %v1948_v43 = vadd.f32 %v1947_v52, %v1334_v11 }
 0x31a   :  { %v14840_v31 = vpack.c.b16 %v5932_v58, %v5931_v36  ;;  %v3899_v30 = vadd.f32 %v14789_v10, %v3695_v1 }
 0x31c   :  { %18254 = vst [vmem:[#allocation20_spill] sm:$0xff] %v14840_v31  ;;  %v2564_v51 = vpop.f32.mrf.mxu2  ;;  %v4099_v35 = vmax.f32 %v3899_v30, 0.0  ;;  %v13468_v30 = vld [vmem:[%s18140_s3 + $0x58] sm:$0xff] }
 0x31d   :  { %v2946_v5 = vadd.f32 %v2564_v51, %v1943_v56  ;;  %4602 = vmatpush.bf16.msrb.mxu0 %v13468_v30 }
 0x31e   :  { %v1337_v7 = vpop.f32.mrf.mxu0  ;;  %v4299_v56 = vpack.c.bf16 %v4099_v35, %v4099_v35 }
 0x31f   :  { %v3314_v47 = vpop.f32.mrf.mxu3  ;;  %v1950_v6 = vpop.f32.mrf.mxu1 }
 0x320   :  { %v3696_v8 = vadd.f32 %v3314_v47, %v2946_v5  ;;  %v1951_v25 = vadd.f32 %v1950_v6, %v1337_v7  ;;  %v6141_v58 = vunpack.c.l.b16 %v4299_v56  ;;  %v14866_v6 = vld [vmem:[%s18139_s0 + $0x208] sm:$0xff] }
 0x321   :  { %10917 = vmatmul.msk.bf16.gmra.mxu0 %vm822_vm0, %v14674_v54  ;;  %11236 = vmatmul.msk.bf16.gmra.mxu2 %vm822_vm0, %v14829_v2 }
 0x322   :  { %v3900_v21 = vadd.f32 %v14789_v10, %v3696_v8  ;;  %11073 = vmatmul.msk.bf16.gmra.mxu1 %vm822_vm0, %v14657_v40 }
 0x324   :  { %11364 = vmatmul.msk.bf16.gmra.mxu3 %vm822_vm0, %v14846_v19  ;;  %v4100_v20 = vmax.f32 %v3900_v21, 0.0  ;;  %v2567_v57 = vpop.f32.mrf.mxu2 }
 0x325   :  { %v2947_v11 = vadd.f32 %v2567_v57, %v1946_v18 }
 0x326   :  { %v4300_v15 = vpack.c.bf16 %v4100_v20, %v4100_v20  ;;  %v1339_v36 = vpop.f32.mrf.mxu0 }
 0x327   :  { %v3317_v7 = vpop.f32.mrf.mxu3  ;;  %v1952_v54 = vpop.f32.mrf.mxu1 }
 0x328   :  { %v6142_v1 = vunpack.c.l.b16 %v4300_v15  ;;  %v3697_v52 = vadd.f32 %v3317_v7, %v2947_v11  ;;  %v1953_v51 = vadd.f32 %v1952_v54, %v1339_v36 }
 0x32a   :  { %v14860_v40 = vpack.c.b16 %v6142_v1, %v6141_v58  ;;  %v3901_v5 = vadd.f32 %v14789_v10, %v3697_v52 }
 0x32c   :  { %18255 = vst [vmem:[#allocation21_spill] sm:$0xff] %v14860_v40  ;;  %v2569_v47 = vpop.f32.mrf.mxu2  ;;  %v4101_v21 = vmax.f32 %v3901_v5, 0.0 }
 0x32d   :  { %v2948_v35 = vadd.f32 %v2569_v47, %v1948_v43 }
 0x32e   :  { %v1342_v18 = vpop.f32.mrf.mxu0  ;;  %v4301_v43 = vpack.c.bf16 %v4101_v21, %v4101_v21  ;;  %v14883_v21 = vld [vmem:[%s18139_s0 + $0x210] sm:$0xff] }
 0x32f   :  { %v3319_v8 = vpop.f32.mrf.mxu3  ;;  %v1955_v20 = vpop.f32.mrf.mxu1 }
 0x330   :  { %v3698_v56 = vadd.f32 %v3319_v8, %v2948_v35  ;;  %v1956_v57 = vadd.f32 %v1955_v20, %v1342_v18  ;;  %v4735_v54 = vunpack.c.l.b16 %v4301_v43 }
 0x331   :  { %10918 = vmatmul.msk.bf16.gmra.mxu0 %vm822_vm0, %v14702_v34  ;;  %11237 = vmatmul.msk.bf16.gmra.mxu2 %vm822_vm0, %v14846_v19 }
 0x332   :  { %v3902_v15 = vadd.f32 %v14789_v10, %v3698_v56  ;;  %11074 = vmatmul.msk.bf16.gmra.mxu1 %vm822_vm0, %v14697_v50 }
 0x334   :  { %11365 = vmatmul.msk.bf16.gmra.mxu3 %vm822_vm0, %v14866_v6  ;;  %v4102_v11 = vmax.f32 %v3902_v15, 0.0  ;;  %v2572_v7 = vpop.f32.mrf.mxu2  ;;  %v14888_v15 = vld [vmem:[%s18139_s0 + $0x218] sm:$0xff] }
 0x335   :  { %v2949_v58 = vadd.f32 %v2572_v7, %v1951_v25 }
 0x336   :  { %v4302_v36 = vpack.c.bf16 %v4102_v11, %v4102_v11  ;;  %v1344_v52 = vpop.f32.mrf.mxu0 }
 0x337   :  { %v3322_v1 = vpop.f32.mrf.mxu3  ;;  %v1957_v47 = vpop.f32.mrf.mxu1 }
 0x338   :  { %v4736_v30 = vunpack.c.l.b16 %v4302_v36  ;;  %v3699_v5 = vadd.f32 %v3322_v1, %v2949_v58  ;;  %v1958_v35 = vadd.f32 %v1957_v47, %v1344_v52 }
 0x33a   :  { %v14877_v8 = vpack.c.b16 %v4736_v30, %v4735_v54  ;;  %v3903_v18 = vadd.f32 %v14789_v10, %v3699_v5 }
 0x33c   :  { %v2574_v50 = vpop.f32.mrf.mxu2  ;;  %v4103_v43 = vmax.f32 %v3903_v18, 0.0 }
 0x33d   :  { %v2950_v56 = vadd.f32 %v2574_v50, %v1953_v51 }
 0x33e   :  { %v1347_v25 = vpop.f32.mrf.mxu0  ;;  %v4303_v51 = vpack.c.bf16 %v4103_v43, %v4103_v43  ;;  %v14905_v43 = vld [vmem:[%s18139_s0 + $0x220] sm:$0xff] }
 0x33f   :  { %v3324_v20 = vpop.f32.mrf.mxu3  ;;  %v1960_v7 = vpop.f32.mrf.mxu1 }
 0x340   :  { %v3700_v11 = vadd.f32 %v3324_v20, %v2950_v56  ;;  %v1961_v36 = vadd.f32 %v1960_v7, %v1347_v25  ;;  %v4502_v18 = vunpack.c.l.b16 %v4303_v51 }
 0x341   :  { %10919 = vmatmul.msk.bf16.gmra.mxu0 %vm822_vm0, %v14722_v38  ;;  %11238 = vmatmul.msk.bf16.gmra.mxu2 %vm822_vm0, %v14883_v21 }
 0x342   :  { %v3904_v58 = vadd.f32 %v14789_v10, %v3700_v11  ;;  %11075 = vmatmul.msk.bf16.gmra.mxu1 %vm822_vm0, %v14702_v34 }
 0x344   :  { %11366 = vmatmul.msk.bf16.gmra.mxu3 %vm822_vm0, %v14888_v15  ;;  %v4104_v1 = vmax.f32 %v3904_v58, 0.0  ;;  %v2577_v52 = vpop.f32.mrf.mxu2 }
 0x345   :  { %v2951_v30 = vadd.f32 %v2577_v52, %v1956_v57 }
 0x346   :  { %v4304_v54 = vpack.c.bf16 %v4104_v1, %v4104_v1  ;;  %v1349_v47 = vpop.f32.mrf.mxu0 }
 0x347   :  { %v3327_v5 = vpop.f32.mrf.mxu3  ;;  %v1962_v20 = vpop.f32.mrf.mxu1 }
 0x348   :  { %v4503_v50 = vunpack.c.l.b16 %v4304_v54  ;;  %v3701_v56 = vadd.f32 %v3327_v5, %v2951_v30  ;;  %v1963_v25 = vadd.f32 %v1962_v20, %v1349_v47 }
 0x34a   :  { %v14899_v11 = vpack.c.b16 %v4503_v50, %v4502_v18  ;;  %v3905_v7 = vadd.f32 %v14789_v10, %v3701_v56 }
 0x34c   :  { %v2579_v34 = vpop.f32.mrf.mxu2  ;;  %v4105_v57 = vmax.f32 %v3905_v7, 0.0 }
 0x34d   :  { %v2952_v40 = vadd.f32 %v2579_v34, %v1958_v35  ;;  %v13484_v34 = vld [vmem:[%s18140_s3 + $0xd8] sm:$0xff] }
 0x34e   :  { %v1352_v33 = vpop.f32.mrf.mxu0  ;;  %v4305_v35 = vpack.c.bf16 %v4105_v57, %v4105_v57  ;;  %5223 = vmatpush.bf16.msra.mxu3 %v13484_v34 }
 0x34f   :  { %v3329_v31 = vpop.f32.mrf.mxu3  ;;  %v1965_v51 = vpop.f32.mrf.mxu1 }
 0x350   :  { %v3702_v58 = vadd.f32 %v3329_v31, %v2952_v40  ;;  %v1966_v1 = vadd.f32 %v1965_v51, %v1352_v33  ;;  %v4737_v47 = vunpack.c.l.b16 %v4305_v35  ;;  %v14928_v35 = vld [vmem:[%s18139_s0 + $0x228] sm:$0xff] }
 0x351   :  { %10920 = vmatmul.msk.bf16.gmra.mxu0 %vm822_vm0, %v14739_v0  ;;  %11239 = vmatmul.msk.bf16.gmra.mxu2 %vm822_vm0, %v14888_v15 }
 0x352   :  { %v3906_v52 = vadd.f32 %v14789_v10, %v3702_v58  ;;  %11076 = vmatmul.msk.bf16.gmra.mxu1 %vm822_vm0, %v14722_v38  ;;  %v13476_v38 = vld [vmem:[%s18140_s3 + $0x98] sm:$0xff] }
 0x353   :  { %5013 = vmatpush.bf16.msra.mxu2 %v13476_v38 }
 0x354   :  { %11367 = vmatmul.msk.bf16.gmra.mxu3 %vm822_vm0, %v14905_v43  ;;  %v4106_v54 = vmax.f32 %v3906_v52, 0.0  ;;  %v2582_v30 = vpop.f32.mrf.mxu2 }
 0x355   :  { %v2953_v40 = vadd.f32 %v2582_v30, %v1961_v36 }
 0x356   :  { %v4306_v31 = vpack.c.bf16 %v4106_v54, %v4106_v54  ;;  %v1354_v5 = vpop.f32.mrf.mxu0 }
 0x357   :  { %v3332_v33 = vpop.f32.mrf.mxu3  ;;  %v1967_v56 = vpop.f32.mrf.mxu1 }
 0x358   :  { %v4738_v18 = vunpack.c.l.b16 %v4306_v31  ;;  %v3703_v50 = vadd.f32 %v3332_v33, %v2953_v40  ;;  %v1968_v20 = vadd.f32 %v1967_v56, %v1354_v5  ;;  %v13460_v40 = vld [vmem:[%s18140_s3 + $0x18] sm:$0xff] }
 0x359   :  { %4835 = vmatpush.bf16.msrb.mxu1 %v13460_v40  ;;  %v14948_v40 = vld [vmem:[%s18139_s0 + $0x230] sm:$0xff] }
 0x35a   :  { %v14916_v7 = vpack.c.b16 %v4738_v18, %v4737_v47  ;;  %v3907_v57 = vadd.f32 %v14789_v10, %v3703_v50 }
 0x35c   :  { %v2584_v36 = vpop.f32.mrf.mxu2  ;;  %v4107_v54 = vmax.f32 %v3907_v57, 0.0 }
 0x35d   :  { %v2954_v58 = vadd.f32 %v2584_v36, %v1963_v25 }
 0x35e   :  { %v1357_v52 = vpop.f32.mrf.mxu0  ;;  %v4307_v25 = vpack.c.bf16 %v4107_v54, %v4107_v54 }
 0x35f   :  { %v3334_v51 = vpop.f32.mrf.mxu3  ;;  %v1970_v31 = vpop.f32.mrf.mxu1 }
 0x360   :  { %v3704_v30 = vadd.f32 %v3334_v51, %v2954_v58  ;;  %v1971_v33 = vadd.f32 %v1970_v31, %v1357_v52  ;;  %v4504_v57 = vunpack.c.l.b16 %v4307_v25 }
 0x361   :  { %10921 = vmatmul.msk.bf16.gmra.mxu0 %vm822_vm0, %v14756_v3  ;;  %11240 = vmatmul.msk.bf16.gmra.mxu2 %vm822_vm0, %v14905_v43 }
 0x362   :  { %v3908_v5 = vadd.f32 %v14789_v10, %v3704_v30  ;;  %11077 = vmatmul.msk.bf16.gmra.mxu1 %vm822_vm0, %v14739_v0 }
 0x364   :  { %11368 = vmatmul.msk.bf16.gmra.mxu3 %vm822_vm0, %v14928_v35  ;;  %v4108_v47 = vmax.f32 %v3908_v5, 0.0  ;;  %v2587_v18 = vpop.f32.mrf.mxu2 }
 0x365   :  { %v2955_v56 = vadd.f32 %v2587_v18, %v1966_v1 }
 0x366   :  { %v4308_v50 = vpack.c.bf16 %v4108_v47, %v4108_v47  ;;  %v1359_v34 = vpop.f32.mrf.mxu0 }
 0x367   :  { %v3337_v38 = vpop.f32.mrf.mxu3  ;;  %v1972_v51 = vpop.f32.mrf.mxu1 }
 0x368   :  { %v4505_v36 = vunpack.c.l.b16 %v4308_v50  ;;  %v3705_v58 = vadd.f32 %v3337_v38, %v2955_v56  ;;  %v1973_v52 = vadd.f32 %v1972_v51, %v1359_v34 }
 0x36a   :  { %v14942_v30 = vpack.c.b16 %v4505_v36, %v4504_v57  ;;  %v3909_v0 = vadd.f32 %v14789_v10, %v3705_v58 }
 0x36c   :  { %v2589_v31 = vpop.f32.mrf.mxu2  ;;  %v4109_v1 = vmax.f32 %v3909_v0, 0.0 }
 0x36d   :  { %v2956_v59 = vadd.f32 %v2589_v31, %v1968_v20 }
 0x36e   :  { %v1362_v54 = vpop.f32.mrf.mxu0  ;;  %v4309_v20 = vpack.c.bf16 %v4109_v1, %v4109_v1  ;;  %v14965_v1 = vld [vmem:[%s18139_s0 + $0x238] sm:$0xff] }
 0x36f   :  { %v3339_v12 = vpop.f32.mrf.mxu3  ;;  %v1975_v25 = vpop.f32.mrf.mxu1 }
 0x370   :  { %v3706_v5 = vadd.f32 %v3339_v12, %v2956_v59  ;;  %v1976_v47 = vadd.f32 %v1975_v25, %v1362_v54  ;;  %v4739_v57 = vunpack.c.l.b16 %v4309_v20 }
 0x371   :  { %10922 = vmatmul.msk.bf16.gmra.mxu0 %vm822_vm0, %v14773_v49  ;;  %11241 = vmatmul.msk.bf16.gmra.mxu2 %vm822_vm0, %v14928_v35 }
 0x372   :  { %v3910_v18 = vadd.f32 %v14789_v10, %v3706_v5  ;;  %11078 = vmatmul.msk.bf16.gmra.mxu1 %vm822_vm0, %v14756_v3 }
 0x374   :  { %11369 = vmatmul.msk.bf16.gmra.mxu3 %vm822_vm0, %v14948_v40  ;;  %v4110_v50 = vmax.f32 %v3910_v18, 0.0  ;;  %v2592_v56 = vpop.f32.mrf.mxu2 }
 0x375   :  { %v2957_v59 = vadd.f32 %v2592_v56, %v1971_v33 }
 0x376   :  { %v4310_v12 = vpack.c.bf16 %v4110_v50, %v4110_v50  ;;  %v1364_v34 = vpop.f32.mrf.mxu0 }
 0x377   :  { %v3342_v38 = vpop.f32.mrf.mxu3  ;;  %v1977_v51 = vpop.f32.mrf.mxu1 }
 0x378   :  { %v4740_v36 = vunpack.c.l.b16 %v4310_v12  ;;  %v3707_v58 = vadd.f32 %v3342_v38, %v2957_v59  ;;  %v1978_v0 = vadd.f32 %v1977_v51, %v1364_v34 }
 0x37a   :  { %v14959_v31 = vpack.c.b16 %v4740_v36, %v4739_v57  ;;  %v3911_v54 = vadd.f32 %v14789_v10, %v3707_v58 }
 0x37c   :  { %18256 = vst [vmem:[#allocation22_spill] sm:$0xff] %v14959_v31  ;;  %v2594_v3 = vpop.f32.mrf.mxu2  ;;  %v4111_v33 = vmax.f32 %v3911_v54, 0.0 }
 0x37d   :  { %v2958_v5 = vadd.f32 %v2594_v3, %v1973_v52 }
 0x37e   :  { %v1367_v37 = vpop.f32.mrf.mxu0  ;;  %v4311_v52 = vpack.c.bf16 %v4111_v33, %v4111_v33  ;;  %v14982_v33 = vld [vmem:[%s18139_s0 + $0x240] sm:$0xff] }
 0x37f   :  { %v3344_v25 = vpop.f32.mrf.mxu3  ;;  %v1980_v20 = vpop.f32.mrf.mxu1 }
 0x380   :  { %v3708_v18 = vadd.f32 %v3344_v25, %v2958_v5  ;;  %v1981_v50 = vadd.f32 %v1980_v20, %v1367_v37  ;;  %v4506_v36 = vunpack.c.l.b16 %v4311_v52 }
 0x381   :  { %10923 = vmatmul.msk.bf16.gmra.mxu0 %vm822_vm0, %v14795_v16  ;;  %11242 = vmatmul.msk.bf16.gmra.mxu2 %vm822_vm0, %v14948_v40 }
 0x382   :  { %v3912_v56 = vadd.f32 %v14789_v10, %v3708_v18  ;;  %11079 = vmatmul.msk.bf16.gmra.mxu1 %vm822_vm0, %v14773_v49 }
 0x384   :  { %11370 = vmatmul.msk.bf16.gmra.mxu3 %vm822_vm0, %v14965_v1  ;;  %v4112_v12 = vmax.f32 %v3912_v56, 0.0  ;;  %v2597_v59 = vpop.f32.mrf.mxu2 }
 0x385   :  { %v2959_v34 = vadd.f32 %v2597_v59, %v1976_v47 }
 0x386   :  { %v4312_v38 = vpack.c.bf16 %v4112_v12, %v4112_v12  ;;  %v1369_v57 = vpop.f32.mrf.mxu0 }
 0x387   :  { %v3347_v37 = vpop.f32.mrf.mxu3  ;;  %v1982_v54 = vpop.f32.mrf.mxu1 }
 0x388   :  { %v4507_v58 = vunpack.c.l.b16 %v4312_v38  ;;  %v3709_v51 = vadd.f32 %v3347_v37, %v2959_v34  ;;  %v1983_v3 = vadd.f32 %v1982_v54, %v1369_v57 }
 0x38a   :  { %v14976_v5 = vpack.c.b16 %v4507_v58, %v4506_v36  ;;  %v3913_v25 = vadd.f32 %v14789_v10, %v3709_v51 }
 0x38c   :  { %18257 = vst [vmem:[#allocation23_spill] sm:$0xff] %v14976_v5  ;;  %v2599_v49 = vpop.f32.mrf.mxu2  ;;  %v4113_v47 = vmax.f32 %v3913_v25, 0.0 }
 0x38d   :  { %v2960_v18 = vadd.f32 %v2599_v49, %v1978_v0 }
 0x38e   :  { %v1372_v62 = vpop.f32.mrf.mxu0  ;;  %v4313_v0 = vpack.c.bf16 %v4113_v47, %v4113_v47  ;;  %v14999_v47 = vld [vmem:[%s18139_s0 + $0x248] sm:$0xff] }
 0x38f   :  { %v3349_v20 = vpop.f32.mrf.mxu3  ;;  %v1985_v52 = vpop.f32.mrf.mxu1 }
 0x390   :  { %v3710_v56 = vadd.f32 %v3349_v20, %v2960_v18  ;;  %v1986_v12 = vadd.f32 %v1985_v52, %v1372_v62  ;;  %v4741_v58 = vunpack.c.l.b16 %v4313_v0 }
 0x391   :  { %10924 = vmatmul.msk.bf16.gmra.mxu0 %vm822_vm0, %v14812_v41  ;;  %11243 = vmatmul.msk.bf16.gmra.mxu2 %vm822_vm0, %v14965_v1 }
 0x392   :  { %v3914_v59 = vadd.f32 %v14789_v10, %v3710_v56  ;;  %11080 = vmatmul.msk.bf16.gmra.mxu1 %vm822_vm0, %v14795_v16 }
 0x394   :  { %11371 = vmatmul.msk.bf16.gmra.mxu3 %vm822_vm0, %v14982_v33  ;;  %v4114_v38 = vmax.f32 %v3914_v59, 0.0  ;;  %v2602_v34 = vpop.f32.mrf.mxu2 }
 0x395   :  { %v2961_v57 = vadd.f32 %v2602_v34, %v1981_v50 }
 0x396   :  { %v4314_v37 = vpack.c.bf16 %v4114_v38, %v4114_v38  ;;  %v1374_v36 = vpop.f32.mrf.mxu0 }
 0x397   :  { %v3352_v62 = vpop.f32.mrf.mxu3  ;;  %v1987_v25 = vpop.f32.mrf.mxu1 }
 0x398   :  { %v4742_v51 = vunpack.c.l.b16 %v4314_v37  ;;  %v3711_v54 = vadd.f32 %v3352_v62, %v2961_v57  ;;  %v1988_v49 = vadd.f32 %v1987_v25, %v1374_v36 }
 0x39a   :  { %v14993_v18 = vpack.c.b16 %v4742_v51, %v4741_v58  ;;  %v3915_v20 = vadd.f32 %v14789_v10, %v3711_v54 }
 0x39c   :  { %18258 = vst [vmem:[#allocation24_spill] sm:$0xff] %v14993_v18  ;;  %v2604_v16 = vpop.f32.mrf.mxu2  ;;  %v4115_v50 = vmax.f32 %v3915_v20, 0.0 }
 0x39d   :  { %v2962_v56 = vadd.f32 %v2604_v16, %v1983_v3 }
 0x39e   :  { %v1377_v17 = vpop.f32.mrf.mxu0  ;;  %v4315_v3 = vpack.c.bf16 %v4115_v50, %v4115_v50  ;;  %v15016_v50 = vld [vmem:[%s18139_s0 + $0x250] sm:$0xff] }
 0x39f   :  { %v3354_v52 = vpop.f32.mrf.mxu3  ;;  %v1990_v0 = vpop.f32.mrf.mxu1 }
 0x3a0   :  { %v3712_v59 = vadd.f32 %v3354_v52, %v2962_v56  ;;  %v1991_v38 = vadd.f32 %v1990_v0, %v1377_v17  ;;  %v4508_v51 = vunpack.c.l.b16 %v4315_v3 }
 0x3a1   :  { %10925 = vmatmul.msk.bf16.gmra.mxu0 %vm822_vm0, %v14829_v2  ;;  %11244 = vmatmul.msk.bf16.gmra.mxu2 %vm822_vm0, %v14982_v33 }
 0x3a2   :  { %v3916_v34 = vadd.f32 %v14789_v10, %v3712_v59  ;;  %11081 = vmatmul.msk.bf16.gmra.mxu1 %vm822_vm0, %v14812_v41 }
 0x3a4   :  { %11372 = vmatmul.msk.bf16.gmra.mxu3 %vm822_vm0, %v14999_v47  ;;  %v4116_v37 = vmax.f32 %v3916_v34, 0.0  ;;  %v2607_v57 = vpop.f32.mrf.mxu2 }
 0x3a5   :  { %v2963_v36 = vadd.f32 %v2607_v57, %v1986_v12 }
 0x3a6   :  { %v4316_v62 = vpack.c.bf16 %v4116_v37, %v4116_v37  ;;  %v1379_v58 = vpop.f32.mrf.mxu0 }
 0x3a7   :  { %v3357_v17 = vpop.f32.mrf.mxu3  ;;  %v1992_v20 = vpop.f32.mrf.mxu1 }
 0x3a8   :  { %v4509_v54 = vunpack.c.l.b16 %v4316_v62  ;;  %v3713_v25 = vadd.f32 %v3357_v17, %v2963_v36  ;;  %v1993_v16 = vadd.f32 %v1992_v20, %v1379_v58 }
 0x3aa   :  { %v15010_v56 = vpack.c.b16 %v4509_v54, %v4508_v51  ;;  %v3917_v52 = vadd.f32 %v14789_v10, %v3713_v25 }
 0x3ac   :  { %18259 = vst [vmem:[#allocation25_spill] sm:$0xff] %v15010_v56  ;;  %v2609_v41 = vpop.f32.mrf.mxu2  ;;  %v4117_v12 = vmax.f32 %v3917_v52, 0.0 }
 0x3ad   :  { %v2964_v59 = vadd.f32 %v2609_v41, %v1988_v49 }
 0x3ae   :  { %v1382_v48 = vpop.f32.mrf.mxu0  ;;  %v4317_v49 = vpack.c.bf16 %v4117_v12, %v4117_v12  ;;  %v15033_v12 = vld [vmem:[%s18139_s0 + $0x258] sm:$0xff] }
 0x3af   :  { %v3359_v0 = vpop.f32.mrf.mxu3  ;;  %v1995_v3 = vpop.f32.mrf.mxu1 }
 0x3b0   :  { %v3714_v34 = vadd.f32 %v3359_v0, %v2964_v59  ;;  %v1996_v37 = vadd.f32 %v1995_v3, %v1382_v48  ;;  %v4949_v54 = vunpack.c.l.b16 %v4317_v49 }
 0x3b1   :  { %10926 = vmatmul.msk.bf16.gmra.mxu0 %vm822_vm0, %v14846_v19  ;;  %11245 = vmatmul.msk.bf16.gmra.mxu2 %vm822_vm0, %v14999_v47 }
 0x3b2   :  { %v3918_v57 = vadd.f32 %v14789_v10, %v3714_v34  ;;  %11082 = vmatmul.msk.bf16.gmra.mxu1 %vm822_vm0, %v14829_v2 }
 0x3b4   :  { %11373 = vmatmul.msk.bf16.gmra.mxu3 %vm822_vm0, %v15016_v50  ;;  %v4118_v62 = vmax.f32 %v3918_v57, 0.0  ;;  %v2612_v36 = vpop.f32.mrf.mxu2 }
 0x3b5   :  { %v2965_v58 = vadd.f32 %v2612_v36, %v1991_v38 }
 0x3b6   :  { %v4318_v17 = vpack.c.bf16 %v4118_v62, %v4118_v62  ;;  %v1384_v51 = vpop.f32.mrf.mxu0 }
 0x3b7   :  { %v3362_v48 = vpop.f32.mrf.mxu3  ;;  %v1997_v52 = vpop.f32.mrf.mxu1 }
 0x3b8   :  { %v4950_v25 = vunpack.c.l.b16 %v4318_v17  ;;  %v3715_v20 = vadd.f32 %v3362_v48, %v2965_v58  ;;  %v1998_v41 = vadd.f32 %v1997_v52, %v1384_v51 }
 0x3ba   :  { %v15027_v59 = vpack.c.b16 %v4950_v25, %v4949_v54  ;;  %v3919_v0 = vadd.f32 %v14789_v10, %v3715_v20 }
 0x3bc   :  { %18260 = vst [vmem:[#allocation26_spill] sm:$0xff] %v15027_v59  ;;  %v2614_v2 = vpop.f32.mrf.mxu2  ;;  %v4119_v38 = vmax.f32 %v3919_v0, 0.0 }
 0x3bd   :  { %v2966_v34 = vadd.f32 %v2614_v2, %v1993_v16 }
 0x3be   :  { %v1387_v18 = vpop.f32.mrf.mxu0  ;;  %v4319_v16 = vpack.c.bf16 %v4119_v38, %v4119_v38  ;;  %v15050_v38 = vld [vmem:[%s18139_s0 + $0x260] sm:$0xff] }
 0x3bf   :  { %v3364_v3 = vpop.f32.mrf.mxu3  ;;  %v2000_v49 = vpop.f32.mrf.mxu1 }
 0x3c0   :  { %v3716_v57 = vadd.f32 %v3364_v3, %v2966_v34  ;;  %v2001_v62 = vadd.f32 %v2000_v49, %v1387_v18  ;;  %v5159_v25 = vunpack.c.l.b16 %v4319_v16 }
 0x3c1   :  { %10927 = vmatmul.msk.bf16.gmra.mxu0 %vm822_vm0, %v14866_v6  ;;  %11246 = vmatmul.msk.bf16.gmra.mxu2 %vm822_vm0, %v15016_v50 }
 0x3c2   :  { %v3920_v36 = vadd.f32 %v14789_v10, %v3716_v57  ;;  %11083 = vmatmul.msk.bf16.gmra.mxu1 %vm822_vm0, %v14846_v19 }
 0x3c4   :  { %11374 = vmatmul.msk.bf16.gmra.mxu3 %vm822_vm0, %v15033_v12  ;;  %v4120_v17 = vmax.f32 %v3920_v36, 0.0  ;;  %v2617_v58 = vpop.f32.mrf.mxu2 }
 0x3c5   :  { %v2967_v51 = vadd.f32 %v2617_v58, %v1996_v37 }
 0x3c6   :  { %v4320_v48 = vpack.c.bf16 %v4120_v17, %v4120_v17  ;;  %v1389_v54 = vpop.f32.mrf.mxu0 }
 0x3c7   :  { %v3367_v18 = vpop.f32.mrf.mxu3  ;;  %v2002_v6 = vpop.f32.mrf.mxu1 }
 0x3c8   :  { %v5160_v20 = vunpack.c.l.b16 %v4320_v48  ;;  %v3717_v52 = vadd.f32 %v3367_v18, %v2967_v51  ;;  %v2003_v0 = vadd.f32 %v2002_v6, %v1389_v54 }
 0x3ca   :  { %v15044_v2 = vpack.c.b16 %v5160_v20, %v5159_v25  ;;  %v3921_v34 = vadd.f32 %v14789_v10, %v3717_v52 }
 0x3cc   :  { %18261 = vst [vmem:[#allocation27_spill] sm:$0xff] %v15044_v2  ;;  %v2619_v19 = vpop.f32.mrf.mxu2  ;;  %v4121_v37 = vmax.f32 %v3921_v34, 0.0 }
 0x3cd   :  { %v2968_v3 = vadd.f32 %v2619_v19, %v1998_v41 }
 0x3ce   :  { %v1392_v49 = vpop.f32.mrf.mxu0  ;;  %v4321_v41 = vpack.c.bf16 %v4121_v37, %v4121_v37  ;;  %v15067_v37 = vld [vmem:[%s18139_s0 + $0x268] sm:$0xff] }
 0x3cf   :  { %v3369_v57 = vpop.f32.mrf.mxu3  ;;  %v2005_v16 = vpop.f32.mrf.mxu1 }
 0x3d0   :  { %v3718_v36 = vadd.f32 %v3369_v57, %v2968_v3  ;;  %v2006_v17 = vadd.f32 %v2005_v16, %v1392_v49  ;;  %v5405_v52 = vunpack.c.l.b16 %v4321_v41 }
 0x3d1   :  { %10928 = vmatmul.msk.bf16.gmra.mxu0 %vm822_vm0, %v14888_v15  ;;  %11247 = vmatmul.msk.bf16.gmra.mxu2 %vm822_vm0, %v15033_v12 }
 0x3d2   :  { %v3922_v58 = vadd.f32 %v14789_v10, %v3718_v36  ;;  %11084 = vmatmul.msk.bf16.gmra.mxu1 %vm822_vm0, %v14883_v21 }
 0x3d4   :  { %11375 = vmatmul.msk.bf16.gmra.mxu3 %vm822_vm0, %v15050_v38  ;;  %v4122_v48 = vmax.f32 %v3922_v58, 0.0  ;;  %v2622_v51 = vpop.f32.mrf.mxu2  ;;  %v15072_v58 = vld [vmem:[%s18139_s0 + $0x270] sm:$0xff] }
 0x3d5   :  { %v2969_v54 = vadd.f32 %v2622_v51, %v2001_v62 }
 0x3d6   :  { %v4322_v18 = vpack.c.bf16 %v4122_v48, %v4122_v48  ;;  %v1394_v20 = vpop.f32.mrf.mxu0 }
 0x3d7   :  { %v3372_v25 = vpop.f32.mrf.mxu3  ;;  %v2007_v19 = vpop.f32.mrf.mxu1 }
 0x3d8   :  { %v5406_v6 = vunpack.c.l.b16 %v4322_v18  ;;  %v3719_v34 = vadd.f32 %v3372_v25, %v2969_v54  ;;  %v2008_v3 = vadd.f32 %v2007_v19, %v1394_v20 }
 0x3da   :  { %v15061_v57 = vpack.c.b16 %v5406_v6, %v5405_v52  ;;  %v3923_v49 = vadd.f32 %v14789_v10, %v3719_v34 }
 0x3dc   :  { %18262 = vst [vmem:[#allocation28_spill] sm:$0xff] %v15061_v57  ;;  %v2624_v21 = vpop.f32.mrf.mxu2  ;;  %v4123_v41 = vmax.f32 %v3923_v49, 0.0 }
 0x3dd   :  { %v2970_v36 = vadd.f32 %v2624_v21, %v2003_v0 }
 0x3de   :  { %v1397_v62 = vpop.f32.mrf.mxu0  ;;  %v4323_v0 = vpack.c.bf16 %v4123_v41, %v4123_v41  ;;  %v15089_v41 = vld [vmem:[%s18139_s0 + $0x278] sm:$0xff] }
 0x3df   :  { %v3374_v16 = vpop.f32.mrf.mxu3  ;;  %v2010_v51 = vpop.f32.mrf.mxu1 }
 0x3e0   :  { %v3720_v48 = vadd.f32 %v3374_v16, %v2970_v36  ;;  %v2011_v18 = vadd.f32 %v2010_v51, %v1397_v62  ;;  %v5687_v49 = vunpack.c.l.b16 %v4323_v0 }
 0x3e1   :  { %10929 = vmatmul.msk.bf16.gmra.mxu0 %vm822_vm0, %v14905_v43  ;;  %11248 = vmatmul.msk.bf16.gmra.mxu2 %vm822_vm0, %v15067_v37 }
 0x3e2   :  { %v3924_v54 = vadd.f32 %v14789_v10, %v3720_v48  ;;  %11085 = vmatmul.msk.bf16.gmra.mxu1 %vm822_vm0, %v14888_v15 }
 0x3e4   :  { %11376 = vmatmul.msk.bf16.gmra.mxu3 %vm822_vm0, %v15072_v58  ;;  %v4124_v25 = vmax.f32 %v3924_v54, 0.0  ;;  %v2627_v20 = vpop.f32.mrf.mxu2 }
 0x3e5   :  { %v2971_v6 = vadd.f32 %v2627_v20, %v2006_v17 }
 0x3e6   :  { %v4324_v52 = vpack.c.bf16 %v4124_v25, %v4124_v25  ;;  %v1399_v19 = vpop.f32.mrf.mxu0  ;;  %v13467_v25 = vld [vmem:[%s18140_s3 + $0x50] sm:$0xff] }
 0x3e7   :  { %v3377_v34 = vpop.f32.mrf.mxu3  ;;  %v2012_v16 = vpop.f32.mrf.mxu1  ;;  %4603 = vmatpush.bf16.msrb.mxu0 %v13467_v25  ;;  %v15109_v25 = vld [vmem:[%s18139_s0 + $0x280] sm:$0xff] }
 0x3e8   :  { %v5688_v21 = vunpack.c.l.b16 %v4324_v52  ;;  %v3721_v36 = vadd.f32 %v3377_v34, %v2971_v6  ;;  %v2013_v62 = vadd.f32 %v2012_v16, %v1399_v19 }
 0x3ea   :  { %v15083_v48 = vpack.c.b16 %v5688_v21, %v5687_v49  ;;  %v3925_v51 = vadd.f32 %v14789_v10, %v3721_v36 }
 0x3ec   :  { %18263 = vst [vmem:[#allocation29_spill] sm:$0xff] %v15083_v48  ;;  %v2629_v15 = vpop.f32.mrf.mxu2  ;;  %v4125_v17 = vmax.f32 %v3925_v51, 0.0 }
 0x3ed   :  { %v2972_v57 = vadd.f32 %v2629_v15, %v2008_v3 }
 0x3ee   :  { %v1402_v59 = vpop.f32.mrf.mxu0 }
 0x3ef   :  { %v3379_v2 = vpop.f32.mrf.mxu3  ;;  %v2015_v0 = vpop.f32.mrf.mxu1 }
 0x3f0   :  { %v3722_v54 = vadd.f32 %v3379_v2, %v2972_v57  ;;  %v2016_v20 = vadd.f32 %v2015_v0, %v1402_v59  ;;  %v4325_v2 = vpack.c.bf16 %v4125_v17, %v4125_v17 }
 0x3f1   :  { %10930 = vmatmul.msk.bf16.gmra.mxu0 %vm822_vm0, %v14928_v35  ;;  %11249 = vmatmul.msk.bf16.gmra.mxu2 %vm822_vm0, %v15072_v58 }
 0x3f2   :  { %v3926_v52 = vadd.f32 %v14789_v10, %v3722_v54  ;;  %11086 = vmatmul.msk.bf16.gmra.mxu1 %vm822_vm0, %v14905_v43  ;;  %v5407_v49 = vunpack.c.l.b16 %v4325_v2 }
 0x3f4   :  { %11377 = vmatmul.msk.bf16.gmra.mxu3 %vm822_vm0, %v15089_v41  ;;  %v4126_v3 = vmax.f32 %v3926_v52, 0.0  ;;  %v2632_v57 = vpop.f32.mrf.mxu2 }
 0x3f5   :  { %v2973_v59 = vadd.f32 %v2632_v57, %v2011_v18 }
 0x3f6   :  { %v4326_v6 = vpack.c.bf16 %v4126_v3, %v4126_v3  ;;  %v1404_v19 = vpop.f32.mrf.mxu0 }
 0x3f7   :  { %v3382_v34 = vpop.f32.mrf.mxu3  ;;  %v2017_v16 = vpop.f32.mrf.mxu1 }
 0x3f8   :  { %v5408_v21 = vunpack.c.l.b16 %v4326_v6  ;;  %v3723_v36 = vadd.f32 %v3382_v34, %v2973_v59  ;;  %v2018_v51 = vadd.f32 %v2017_v16, %v1404_v19 }
 0x3fa   :  { %v15103_v15 = vpack.c.b16 %v5408_v21, %v5407_v49  ;;  %v3927_v43 = vadd.f32 %v14789_v10, %v3723_v36 }
 0x3fc   :  { %18264 = vst [vmem:[#allocation30_spill] sm:$0xff] %v15103_v15  ;;  %v2634_v54 = vpop.f32.mrf.mxu2  ;;  %v4127_v18 = vmax.f32 %v3927_v43, 0.0 }
 0x3fd   :  { %v2974_v0 = vadd.f32 %v2634_v54, %v2013_v62 }
 0x3fe   :  { %v1407_v17 = vpop.f32.mrf.mxu0  ;;  %v4327_v62 = vpack.c.bf16 %v4127_v18, %v4127_v18 }
 0x3ff   :  { %v3384_v48 = vpop.f32.mrf.mxu3  ;;  %v2020_v2 = vpop.f32.mrf.mxu1 }
 0x400   :  { %v3724_v52 = vadd.f32 %v3384_v48, %v2974_v0  ;;  %v2021_v3 = vadd.f32 %v2020_v2, %v1407_v17  ;;  %v15131_v2 = vld [vmem:[%s18139_s0 + $0x288] sm:$0xff] }
 0x401   :  { %10931 = vmatmul.msk.bf16.gmra.mxu0 %vm822_vm0, %v14948_v40  ;;  %11250 = vmatmul.msk.bf16.gmra.mxu2 %vm822_vm0, %v15089_v41 }
 0x402   :  { %v3928_v57 = vadd.f32 %v14789_v10, %v3724_v52  ;;  %11087 = vmatmul.msk.bf16.gmra.mxu1 %vm822_vm0, %v14928_v35  ;;  %v5689_v10 = vunpack.c.l.b16 %v4327_v62  ;;  %v15125_v35 = vld [vmem:[%s18141_s2] ss:$0 sm:$0xff] }
 0x404   :  { %11378 = vmatmul.msk.bf16.gmra.mxu3 %vm822_vm0, %v15109_v25  ;;  %v4128_v6 = vmax.f32 %v3928_v57, 0.0  ;;  %v2637_v59 = vpop.f32.mrf.mxu2 }
 0x405   :  { %v2975_v34 = vadd.f32 %v2637_v59, %v2016_v20 }
 0x406   :  { %v4328_v48 = vpack.c.bf16 %v4128_v6, %v4128_v6  ;;  %v1409_v49 = vpop.f32.mrf.mxu0 }
 0x407   :  { %v3387_v19 = vpop.f32.mrf.mxu3  ;;  %v2022_v16 = vpop.f32.mrf.mxu1 }
 0x408   :  { %v5690_v21 = vunpack.c.l.b16 %v4328_v48  ;;  %v3725_v36 = vadd.f32 %v3387_v19, %v2975_v34  ;;  %v2023_v43 = vadd.f32 %v2022_v16, %v1409_v49 }
 0x40a   :  { %v15120_v54 = vpack.c.b16 %v5690_v21, %v5689_v10  ;;  %v3929_v0 = vadd.f32 %v15125_v35, %v3725_v36 }
 0x40c   :  { %18265 = vst [vmem:[#allocation31_spill] sm:$0xff] %v15120_v54  ;;  %v2639_v17 = vpop.f32.mrf.mxu2  ;;  %v4129_v57 = vmax.f32 %v3929_v0, 0.0 }
 0x40d   :  { %v2976_v18 = vadd.f32 %v2639_v17, %v2018_v51 }
 0x40e   :  { %v1412_v20 = vpop.f32.mrf.mxu0  ;;  %v4329_v51 = vpack.c.bf16 %v4129_v57, %v4129_v57  ;;  %v15148_v57 = vld [vmem:[%s18139_s0 + $0x290] sm:$0xff] }
 0x40f   :  { %v3389_v52 = vpop.f32.mrf.mxu3  ;;  %v2025_v6 = vpop.f32.mrf.mxu1 }
 0x410   :  { %v3726_v62 = vadd.f32 %v3389_v52, %v2976_v18  ;;  %v2026_v59 = vadd.f32 %v2025_v6, %v1412_v20  ;;  %v5409_v16 = vunpack.c.l.b16 %v4329_v51 }
 0x411   :  { %10932 = vmatmul.msk.bf16.gmra.mxu0 %vm822_vm0, %v14965_v1  ;;  %11251 = vmatmul.msk.bf16.gmra.mxu2 %vm822_vm0, %v15109_v25 }
 0x412   :  { %v3930_v48 = vadd.f32 %v15125_v35, %v3726_v62  ;;  %11088 = vmatmul.msk.bf16.gmra.mxu1 %vm822_vm0, %v14948_v40 }
 0x414   :  { %11379 = vmatmul.msk.bf16.gmra.mxu3 %vm822_vm0, %v15131_v2  ;;  %v4130_v34 = vmax.f32 %v3930_v48, 0.0  ;;  %v2642_v19 = vpop.f32.mrf.mxu2 }
 0x415   :  { %v2977_v10 = vadd.f32 %v2642_v19, %v2021_v3  ;;  %v13483_v19 = vld [vmem:[%s18140_s3 + $0xd0] sm:$0xff] }
 0x416   :  { %v4330_v49 = vpack.c.bf16 %v4130_v34, %v4130_v34  ;;  %v1414_v36 = vpop.f32.mrf.mxu0  ;;  %v13475_v34 = vld [vmem:[%s18140_s3 + $0x90] sm:$0xff]  ;;  %5224 = vmatpush.bf16.msra.mxu3 %v13483_v19 }
 0x417   :  { %v3392_v21 = vpop.f32.mrf.mxu3  ;;  %v2027_v18 = vpop.f32.mrf.mxu1  ;;  %5014 = vmatpush.bf16.msra.mxu2 %v13475_v34 }
 0x418   :  { %v5410_v0 = vunpack.c.l.b16 %v4330_v49  ;;  %v3727_v17 = vadd.f32 %v3392_v21, %v2977_v10  ;;  %v2028_v52 = vadd.f32 %v2027_v18, %v1414_v36 }
 0x41a   :  { %v15142_v20 = vpack.c.b16 %v5410_v0, %v5409_v16  ;;  %v3931_v62 = vadd.f32 %v15125_v35, %v3727_v17 }
 0x41c   :  { %18266 = vst [vmem:[#allocation32_spill] sm:$0xff] %v15142_v20  ;;  %v2644_v40 = vpop.f32.mrf.mxu2  ;;  %v4131_v3 = vmax.f32 %v3931_v62, 0.0 }
 0x41d   :  { %v2978_v6 = vadd.f32 %v2644_v40, %v2023_v43 }
 0x41e   :  { %v1417_v15 = vpop.f32.mrf.mxu0 }
 0x41f   :  { %v3394_v54 = vpop.f32.mrf.mxu3  ;;  %v2030_v51 = vpop.f32.mrf.mxu1 }
 0x420   :  { %v3728_v48 = vadd.f32 %v3394_v54, %v2978_v6  ;;  %v2031_v49 = vadd.f32 %v2030_v51, %v1417_v15  ;;  %v4331_v54 = vpack.c.bf16 %v4131_v3, %v4131_v3 }
 0x421   :  { %10933 = vmatmul.msk.bf16.gmra.mxu0 %vm822_vm0, %v14982_v33  ;;  %11252 = vmatmul.msk.bf16.gmra.mxu2 %vm822_vm0, %v15131_v2 }
 0x422   :  { %v3932_v43 = vadd.f32 %v15125_v35, %v3728_v48  ;;  %11089 = vmatmul.msk.bf16.gmra.mxu1 %vm822_vm0, %v14965_v1  ;;  %v5691_v17 = vunpack.c.l.b16 %v4331_v54  ;;  %v13459_v1 = vld [vmem:[%s18140_s3 + $0x10] sm:$0xff] }
 0x423   :  { %4836 = vmatpush.bf16.msrb.mxu1 %v13459_v1 }
 0x424   :  { %11380 = vmatmul.msk.bf16.gmra.mxu3 %vm822_vm0, %v15148_v57  ;;  %v4132_v10 = vmax.f32 %v3932_v43, 0.0  ;;  %v2647_v21 = vpop.f32.mrf.mxu2  ;;  %v15174_v43 = vld [vmem:[%s18139_s0 + $0x298] sm:$0xff] }
 0x425   :  { %v2979_v36 = vadd.f32 %v2647_v21, %v2026_v59 }
 0x426   :  { %v4332_v15 = vpack.c.bf16 %v4132_v10, %v4132_v10  ;;  %v1419_v0 = vpop.f32.mrf.mxu0 }
 0x427   :  { %v3397_v16 = vpop.f32.mrf.mxu3  ;;  %v2032_v40 = vpop.f32.mrf.mxu1 }
 0x428   :  { %v5692_v18 = vunpack.c.l.b16 %v4332_v15  ;;  %v3729_v62 = vadd.f32 %v3397_v16, %v2979_v36  ;;  %v2033_v6 = vadd.f32 %v2032_v40, %v1419_v0 }
 0x42a   :  { %v15165_v48 = vpack.c.b16 %v5692_v18, %v5691_v17  ;;  %v3933_v3 = vadd.f32 %v15125_v35, %v3729_v62 }
 0x42c   :  { %18267 = vst [vmem:[#allocation33_spill] sm:$0xff] %v15165_v48  ;;  %v2649_v51 = vpop.f32.mrf.mxu2  ;;  %v4133_v54 = vmax.f32 %v3933_v3, 0.0 }
 0x42d   :  { %v2980_v34 = vadd.f32 %v2649_v51, %v2028_v52 }
 0x42e   :  { %v1422_v59 = vpop.f32.mrf.mxu0  ;;  %v4333_v52 = vpack.c.bf16 %v4133_v54, %v4133_v54  ;;  %v15191_v54 = vld [vmem:[%s18139_s0 + $0x2a0] sm:$0xff] }
 0x42f   :  { %v3399_v19 = vpop.f32.mrf.mxu3  ;;  %v2035_v21 = vpop.f32.mrf.mxu1 }
 0x430   :  { %v3730_v10 = vadd.f32 %v3399_v19, %v2980_v34  ;;  %v2036_v15 = vadd.f32 %v2035_v21, %v1422_v59  ;;  %v5411_v1 = vunpack.c.l.b16 %v4333_v52 }
 0x431   :  { %10934 = vmatmul.msk.bf16.gmra.mxu0 %vm822_vm0, %v14999_v47  ;;  %11253 = vmatmul.msk.bf16.gmra.mxu2 %vm822_vm0, %v15148_v57 }
 0x432   :  { %v3934_v36 = vadd.f32 %v15125_v35, %v3730_v10  ;;  %11090 = vmatmul.msk.bf16.gmra.mxu1 %vm822_vm0, %v14982_v33 }
 0x434   :  { %11381 = vmatmul.msk.bf16.gmra.mxu3 %vm822_vm0, %v15174_v43  ;;  %v4134_v16 = vmax.f32 %v3934_v36, 0.0  ;;  %v2652_v0 = vpop.f32.mrf.mxu2 }
 0x435   :  { %v2981_v18 = vadd.f32 %v2652_v0, %v2031_v49 }
 0x436   :  { %v4334_v17 = vpack.c.bf16 %v4134_v16, %v4134_v16  ;;  %v1424_v40 = vpop.f32.mrf.mxu0 }
 0x437   :  { %v3402_v62 = vpop.f32.mrf.mxu3  ;;  %v2037_v34 = vpop.f32.mrf.mxu1 }
 0x438   :  { %v5412_v3 = vunpack.c.l.b16 %v4334_v17  ;;  %v3731_v51 = vadd.f32 %v3402_v62, %v2981_v18  ;;  %v2038_v19 = vadd.f32 %v2037_v34, %v1424_v40 }
 0x43a   :  { %v15185_v59 = vpack.c.b16 %v5412_v3, %v5411_v1  ;;  %v3935_v10 = vadd.f32 %v15125_v35, %v3731_v51 }
 0x43c   :  { %18268 = vst [vmem:[#allocation34_spill] sm:$0xff] %v15185_v59  ;;  %v2654_v33 = vpop.f32.mrf.mxu2  ;;  %v4135_v49 = vmax.f32 %v3935_v10, 0.0 }
 0x43d   :  { %v2982_v21 = vadd.f32 %v2654_v33, %v2033_v6 }
 0x43e   :  { %v1427_v20 = vpop.f32.mrf.mxu0  ;;  %v4335_v6 = vpack.c.bf16 %v4135_v49, %v4135_v49  ;;  %v15208_v49 = vld [vmem:[%s18139_s0 + $0x2a8] sm:$0xff] }
 0x43f   :  { %v3404_v48 = vpop.f32.mrf.mxu3  ;;  %v2040_v52 = vpop.f32.mrf.mxu1 }
 0x440   :  { %v3732_v36 = vadd.f32 %v3404_v48, %v2982_v21  ;;  %v2041_v16 = vadd.f32 %v2040_v52, %v1427_v20  ;;  %v5693_v1 = vunpack.c.l.b16 %v4335_v6 }
 0x441   :  { %10935 = vmatmul.msk.bf16.gmra.mxu0 %vm822_vm0, %v15016_v50  ;;  %11254 = vmatmul.msk.bf16.gmra.mxu2 %vm822_vm0, %v15174_v43 }
 0x442   :  { %v3936_v0 = vadd.f32 %v15125_v35, %v3732_v36  ;;  %11091 = vmatmul.msk.bf16.gmra.mxu1 %vm822_vm0, %v14999_v47 }
 0x444   :  { %11382 = vmatmul.msk.bf16.gmra.mxu3 %vm822_vm0, %v15191_v54  ;;  %v4136_v17 = vmax.f32 %v3936_v0, 0.0  ;;  %v2657_v18 = vpop.f32.mrf.mxu2 }
 0x445   :  { %v2983_v62 = vadd.f32 %v2657_v18, %v2036_v15 }
 0x446   :  { %v4336_v48 = vpack.c.bf16 %v4136_v17, %v4136_v17  ;;  %v1429_v40 = vpop.f32.mrf.mxu0 }
 0x447   :  { %v3407_v20 = vpop.f32.mrf.mxu3  ;;  %v2042_v34 = vpop.f32.mrf.mxu1 }
 0x448   :  { %v5694_v3 = vunpack.c.l.b16 %v4336_v48  ;;  %v3733_v51 = vadd.f32 %v3407_v20, %v2983_v62  ;;  %v2043_v10 = vadd.f32 %v2042_v34, %v1429_v40 }
 0x44a   :  { %v15202_v33 = vpack.c.b16 %v5694_v3, %v5693_v1  ;;  %v3937_v21 = vadd.f32 %v15125_v35, %v3733_v51 }
 0x44c   :  { %18269 = vst [vmem:[#allocation35_spill] sm:$0xff] %v15202_v33  ;;  %v2659_v47 = vpop.f32.mrf.mxu2  ;;  %v4137_v15 = vmax.f32 %v3937_v21, 0.0 }
 0x44d   :  { %v2984_v36 = vadd.f32 %v2659_v47, %v2038_v19 }
 0x44e   :  { %v1432_v59 = vpop.f32.mrf.mxu0  ;;  %v4337_v19 = vpack.c.bf16 %v4137_v15, %v4137_v15  ;;  %v15225_v15 = vld [vmem:[%s18139_s0 + $0x2b0] sm:$0xff] }
 0x44f   :  { %v3409_v52 = vpop.f32.mrf.mxu3  ;;  %v2045_v6 = vpop.f32.mrf.mxu1 }
 0x450   :  { %v3734_v0 = vadd.f32 %v3409_v52, %v2984_v36  ;;  %v2046_v17 = vadd.f32 %v2045_v6, %v1432_v59  ;;  %v5933_v3 = vunpack.c.l.b16 %v4337_v19 }
 0x451   :  { %10936 = vmatmul.msk.bf16.gmra.mxu0 %vm822_vm0, %v15033_v12  ;;  %11255 = vmatmul.msk.bf16.gmra.mxu2 %vm822_vm0, %v15191_v54 }
 0x452   :  { %v3938_v18 = vadd.f32 %v15125_v35, %v3734_v0  ;;  %11092 = vmatmul.msk.bf16.gmra.mxu1 %vm822_vm0, %v15016_v50 }
 0x454   :  { %11383 = vmatmul.msk.bf16.gmra.mxu3 %vm822_vm0, %v15208_v49  ;;  %v4138_v48 = vmax.f32 %v3938_v18, 0.0  ;;  %v2662_v62 = vpop.f32.mrf.mxu2 }
 0x455   :  { %v2985_v40 = vadd.f32 %v2662_v62, %v2041_v16 }
 0x456   :  { %v4338_v20 = vpack.c.bf16 %v4138_v48, %v4138_v48  ;;  %v1434_v1 = vpop.f32.mrf.mxu0 }
 0x457   :  { %v3412_v59 = vpop.f32.mrf.mxu3  ;;  %v2047_v21 = vpop.f32.mrf.mxu1 }
 0x458   :  { %v5934_v51 = vunpack.c.l.b16 %v4338_v20  ;;  %v3735_v34 = vadd.f32 %v3412_v59, %v2985_v40  ;;  %v2048_v47 = vadd.f32 %v2047_v21, %v1434_v1 }
 0x45a   :  { %v15219_v36 = vpack.c.b16 %v5934_v51, %v5933_v3  ;;  %v3939_v52 = vadd.f32 %v15125_v35, %v3735_v34 }
 0x45c   :  { %18270 = vst [vmem:[#allocation36_spill] sm:$0xff] %v15219_v36  ;;  %v2664_v50 = vpop.f32.mrf.mxu2  ;;  %v4139_v16 = vmax.f32 %v3939_v52, 0.0 }
 0x45d   :  { %v2986_v0 = vadd.f32 %v2664_v50, %v2043_v10 }
 0x45e   :  { %v1437_v33 = vpop.f32.mrf.mxu0  ;;  %v4339_v10 = vpack.c.bf16 %v4139_v16, %v4139_v16  ;;  %v15242_v16 = vld [vmem:[%s18139_s0 + $0x2b8] sm:$0xff] }
 0x45f   :  { %v3414_v6 = vpop.f32.mrf.mxu3  ;;  %v2050_v19 = vpop.f32.mrf.mxu1 }
 0x460   :  { %v3736_v18 = vadd.f32 %v3414_v6, %v2986_v0  ;;  %v2051_v48 = vadd.f32 %v2050_v19, %v1437_v33  ;;  %v6143_v51 = vunpack.c.l.b16 %v4339_v10 }
 0x461   :  { %10937 = vmatmul.msk.bf16.gmra.mxu0 %vm822_vm0, %v15050_v38  ;;  %11256 = vmatmul.msk.bf16.gmra.mxu2 %vm822_vm0, %v15208_v49 }
 0x462   :  { %v3940_v62 = vadd.f32 %v15125_v35, %v3736_v18  ;;  %11093 = vmatmul.msk.bf16.gmra.mxu1 %vm822_vm0, %v15033_v12 }
 0x464   :  { %11384 = vmatmul.msk.bf16.gmra.mxu3 %vm822_vm0, %v15225_v15  ;;  %v4140_v20 = vmax.f32 %v3940_v62, 0.0  ;;  %v2667_v40 = vpop.f32.mrf.mxu2 }
 0x465   :  { %v2987_v1 = vadd.f32 %v2667_v40, %v2046_v17 }
 0x466   :  { %v4340_v59 = vpack.c.bf16 %v4140_v20, %v4140_v20  ;;  %v1439_v3 = vpop.f32.mrf.mxu0 }
 0x467   :  { %v3417_v33 = vpop.f32.mrf.mxu3  ;;  %v2052_v38 = vpop.f32.mrf.mxu1 }
 0x468   :  { %v6144_v34 = vunpack.c.l.b16 %v4340_v59  ;;  %v3737_v21 = vadd.f32 %v3417_v33, %v2987_v1  ;;  %v2053_v52 = vadd.f32 %v2052_v38, %v1439_v3 }
 0x46a   :  { %v15236_v50 = vpack.c.b16 %v6144_v34, %v6143_v51  ;;  %v3941_v0 = vadd.f32 %v15125_v35, %v3737_v21 }
 0x46c   :  { %18271 = vst [vmem:[#allocation37_spill] sm:$0xff] %v15236_v50  ;;  %v2669_v12 = vpop.f32.mrf.mxu2  ;;  %v4141_v17 = vmax.f32 %v3941_v0, 0.0 }
 0x46d   :  { %v2988_v6 = vadd.f32 %v2669_v12, %v2048_v47 }
 0x46e   :  { %v1442_v19 = vpop.f32.mrf.mxu0  ;;  %v4341_v47 = vpack.c.bf16 %v4141_v17, %v4141_v17  ;;  %v15259_v17 = vld [vmem:[%s18139_s0 + $0x2c0] sm:$0xff] }
 0x46f   :  { %v3419_v18 = vpop.f32.mrf.mxu3  ;;  %v2055_v10 = vpop.f32.mrf.mxu1 }
 0x470   :  { %v3738_v62 = vadd.f32 %v3419_v18, %v2988_v6  ;;  %v2056_v20 = vadd.f32 %v2055_v10, %v1442_v19  ;;  %v4743_v21 = vunpack.c.l.b16 %v4341_v47 }
 0x471   :  { %10938 = vmatmul.msk.bf16.gmra.mxu0 %vm822_vm0, %v15072_v58  ;;  %11257 = vmatmul.msk.bf16.gmra.mxu2 %vm822_vm0, %v15225_v15 }
 0x472   :  { %v3942_v40 = vadd.f32 %v15125_v35, %v3738_v62  ;;  %11094 = vmatmul.msk.bf16.gmra.mxu1 %vm822_vm0, %v15067_v37 }
 0x474   :  { %11385 = vmatmul.msk.bf16.gmra.mxu3 %vm822_vm0, %v15242_v16  ;;  %v4142_v59 = vmax.f32 %v3942_v40, 0.0  ;;  %v2672_v1 = vpop.f32.mrf.mxu2  ;;  %v15264_v40 = vld [vmem:[%s18139_s0 + $0x2c8] sm:$0xff] }
 0x475   :  { %v2989_v3 = vadd.f32 %v2672_v1, %v2051_v48 }
 0x476   :  { %v4342_v33 = vpack.c.bf16 %v4142_v59, %v4142_v59  ;;  %v1444_v34 = vpop.f32.mrf.mxu0 }
 0x477   :  { %v3422_v51 = vpop.f32.mrf.mxu3  ;;  %v2057_v12 = vpop.f32.mrf.mxu1 }
 0x478   :  { %v4744_v38 = vunpack.c.l.b16 %v4342_v33  ;;  %v3739_v0 = vadd.f32 %v3422_v51, %v2989_v3  ;;  %v2058_v6 = vadd.f32 %v2057_v12, %v1444_v34 }
 0x47a   :  { %v15253_v18 = vpack.c.b16 %v4744_v38, %v4743_v21  ;;  %v3943_v19 = vadd.f32 %v15125_v35, %v3739_v0 }
 0x47c   :  { %18272 = vst [vmem:[#allocation38_spill] sm:$0xff] %v15253_v18  ;;  %v2674_v37 = vpop.f32.mrf.mxu2  ;;  %v4143_v47 = vmax.f32 %v3943_v19, 0.0 }
 0x47d   :  { %v2990_v62 = vadd.f32 %v2674_v37, %v2053_v52 }
 0x47e   :  { %v1447_v48 = vpop.f32.mrf.mxu0  ;;  %v4343_v52 = vpack.c.bf16 %v4143_v47, %v4143_v47  ;;  %v15281_v47 = vld [vmem:[%s18139_s0 + $0x2d0] sm:$0xff] }
 0x47f   :  { %v3424_v10 = vpop.f32.mrf.mxu3  ;;  %v2060_v1 = vpop.f32.mrf.mxu1 }
 0x480   :  { %v3740_v59 = vadd.f32 %v3424_v10, %v2990_v62  ;;  %v2061_v33 = vadd.f32 %v2060_v1, %v1447_v48  ;;  %v4510_v19 = vunpack.c.l.b16 %v4343_v52 }
 0x481   :  { %10939 = vmatmul.msk.bf16.gmra.mxu0 %vm822_vm0, %v15089_v41  ;;  %11258 = vmatmul.msk.bf16.gmra.mxu2 %vm822_vm0, %v15259_v17 }
 0x482   :  { %v3944_v3 = vadd.f32 %v15125_v35, %v3740_v59  ;;  %11095 = vmatmul.msk.bf16.gmra.mxu1 %vm822_vm0, %v15072_v58 }
 0x484   :  { %11386 = vmatmul.msk.bf16.gmra.mxu3 %vm822_vm0, %v15264_v40  ;;  %v4144_v51 = vmax.f32 %v3944_v3, 0.0  ;;  %v2677_v34 = vpop.f32.mrf.mxu2 }
 0x485   :  { %v2991_v38 = vadd.f32 %v2677_v34, %v2056_v20 }
 0x486   :  { %v4344_v21 = vpack.c.bf16 %v4144_v51, %v4144_v51  ;;  %v1449_v12 = vpop.f32.mrf.mxu0 }
 0x487   :  { %v3427_v0 = vpop.f32.mrf.mxu3  ;;  %v2062_v10 = vpop.f32.mrf.mxu1 }
 0x488   :  { %v4511_v37 = vunpack.c.l.b16 %v4344_v21  ;;  %v3741_v62 = vadd.f32 %v3427_v0, %v2991_v38  ;;  %v2063_v48 = vadd.f32 %v2062_v10, %v1449_v12 }
 0x48a   :  { %v15275_v59 = vpack.c.b16 %v4511_v37, %v4510_v19  ;;  %v3945_v1 = vadd.f32 %v15125_v35, %v3741_v62 }
 0x48c   :  { %18273 = vst [vmem:[#allocation39_spill] sm:$0xff] %v15275_v59  ;;  %v2679_v58 = vpop.f32.mrf.mxu2  ;;  %v4145_v20 = vmax.f32 %v3945_v1, 0.0 }
 0x48d   :  { %v2992_v50 = vadd.f32 %v2679_v58, %v2058_v6 }
 0x48e   :  { %v1452_v18 = vpop.f32.mrf.mxu0  ;;  %v4345_v6 = vpack.c.bf16 %v4145_v20, %v4145_v20  ;;  %v15298_v20 = vld [vmem:[%s18139_s0 + $0x2d8] sm:$0xff] }
 0x48f   :  { %v3429_v36 = vpop.f32.mrf.mxu3  ;;  %v2065_v52 = vpop.f32.mrf.mxu1 }
 0x490   :  { %v3742_v3 = vadd.f32 %v3429_v36, %v2992_v50  ;;  %v2066_v51 = vadd.f32 %v2065_v52, %v1452_v18  ;;  %v4745_v12 = vunpack.c.l.b16 %v4345_v6 }
 0x491   :  { %10940 = vmatmul.msk.bf16.gmra.mxu0 %vm822_vm0, %v15109_v25  ;;  %11259 = vmatmul.msk.bf16.gmra.mxu2 %vm822_vm0, %v15264_v40 }
 0x492   :  { %v3946_v34 = vadd.f32 %v15125_v35, %v3742_v3  ;;  %11096 = vmatmul.msk.bf16.gmra.mxu1 %vm822_vm0, %v15089_v41 }
 0x494   :  { %11387 = vmatmul.msk.bf16.gmra.mxu3 %vm822_vm0, %v15281_v47  ;;  %v4146_v21 = vmax.f32 %v3946_v34, 0.0  ;;  %v2682_v38 = vpop.f32.mrf.mxu2 }
 0x495   :  { %v2993_v50 = vadd.f32 %v2682_v38, %v2061_v33 }
 0x496   :  { %v4346_v36 = vpack.c.bf16 %v4146_v21, %v4146_v21  ;;  %v1454_v0 = vpop.f32.mrf.mxu0 }
 0x497   :  { %v3432_v18 = vpop.f32.mrf.mxu3  ;;  %v2067_v62 = vpop.f32.mrf.mxu1 }
 0x498   :  { %v4746_v19 = vunpack.c.l.b16 %v4346_v36  ;;  %v3743_v37 = vadd.f32 %v3432_v18, %v2993_v50  ;;  %v2068_v10 = vadd.f32 %v2067_v62, %v1454_v0 }
 0x49a   :  { %v15292_v1 = vpack.c.b16 %v4746_v19, %v4745_v12  ;;  %v3947_v58 = vadd.f32 %v15125_v35, %v3743_v37 }
 0x49c   :  { %18274 = vst [vmem:[#allocation40_spill] sm:$0xff] %v15292_v1  ;;  %v2684_v41 = vpop.f32.mrf.mxu2  ;;  %v4147_v33 = vmax.f32 %v3947_v58, 0.0 }
 0x49d   :  { %v2994_v3 = vadd.f32 %v2684_v41, %v2063_v48 }
 0x49e   :  { %v1457_v59 = vpop.f32.mrf.mxu0  ;;  %v4347_v48 = vpack.c.bf16 %v4147_v33, %v4147_v33  ;;  %v15315_v33 = vld [vmem:[%s18139_s0 + $0x2e0] sm:$0xff] }
 0x49f   :  { %v3434_v52 = vpop.f32.mrf.mxu3  ;;  %v2070_v6 = vpop.f32.mrf.mxu1 }
 0x4a0   :  { %v3744_v34 = vadd.f32 %v3434_v52, %v2994_v3  ;;  %v2071_v21 = vadd.f32 %v2070_v6, %v1457_v59  ;;  %v4512_v19 = vunpack.c.l.b16 %v4347_v48 }
 0x4a1   :  { %10941 = vmatmul.msk.bf16.gmra.mxu0 %vm822_vm0, %v15131_v2  ;;  %11260 = vmatmul.msk.bf16.gmra.mxu2 %vm822_vm0, %v15281_v47 }
 0x4a2   :  { %v3948_v38 = vadd.f32 %v15125_v35, %v3744_v34  ;;  %11097 = vmatmul.msk.bf16.gmra.mxu1 %vm822_vm0, %v15109_v25 }
 0x4a4   :  { %11388 = vmatmul.msk.bf16.gmra.mxu3 %vm822_vm0, %v15298_v20  ;;  %v4148_v36 = vmax.f32 %v3948_v38, 0.0  ;;  %v2687_v50 = vpop.f32.mrf.mxu2 }
 0x4a5   :  { %v2995_v0 = vadd.f32 %v2687_v50, %v2066_v51 }
 0x4a6   :  { %v4348_v18 = vpack.c.bf16 %v4148_v36, %v4148_v36  ;;  %v1459_v12 = vpop.f32.mrf.mxu0 }
 0x4a7   :  { %v3437_v59 = vpop.f32.mrf.mxu3  ;;  %v2072_v58 = vpop.f32.mrf.mxu1 }
 0x4a8   :  { %v4513_v37 = vunpack.c.l.b16 %v4348_v18  ;;  %v3745_v62 = vadd.f32 %v3437_v59, %v2995_v0  ;;  %v2073_v41 = vadd.f32 %v2072_v58, %v1459_v12 }
 0x4aa   :  { %v15309_v3 = vpack.c.b16 %v4513_v37, %v4512_v19  ;;  %v3949_v52 = vadd.f32 %v15125_v35, %v3745_v62 }
 0x4ac   :  { %18275 = vst [vmem:[#allocation41_spill] sm:$0xff] %v15309_v3  ;;  %v2689_v25 = vpop.f32.mrf.mxu2  ;;  %v4149_v51 = vmax.f32 %v3949_v52, 0.0 }
 0x4ad   :  { %v2996_v34 = vadd.f32 %v2689_v25, %v2068_v10 }
 0x4ae   :  { %v1462_v1 = vpop.f32.mrf.mxu0  ;;  %v4349_v10 = vpack.c.bf16 %v4149_v51, %v4149_v51 }
 0x4af   :  { %v3439_v6 = vpop.f32.mrf.mxu3  ;;  %v2075_v48 = vpop.f32.mrf.mxu1 }
 0x4b0   :  { %v3746_v38 = vadd.f32 %v3439_v6, %v2996_v34  ;;  %v2076_v36 = vadd.f32 %v2075_v48, %v1462_v1  ;;  %v4747_v37 = vunpack.c.l.b16 %v4349_v10 }
 0x4b1   :  { %10942 = vmatmul.msk.bf16.gmra.mxu0 %vm822_vm0, %v15148_v57  ;;  %11261 = vmatmul.msk.bf16.gmra.mxu2 %vm822_vm0, %v15298_v20 }
 0x4b2   :  { %v3950_v50 = vadd.f32 %v15125_v35, %v3746_v38  ;;  %11098 = vmatmul.msk.bf16.gmra.mxu1 %vm822_vm0, %v15131_v2  ;;  %v13466_v2 = vld [vmem:[%s18140_s3 + $0x48] sm:$0xff] }
 0x4b3   :  { %4604 = vmatpush.bf16.msrb.mxu0 %v13466_v2 }
 0x4b4   :  { %11389 = vmatmul.msk.bf16.gmra.mxu3 %vm822_vm0, %v15315_v33  ;;  %v4150_v18 = vmax.f32 %v3950_v50, 0.0  ;;  %v2692_v0 = vpop.f32.mrf.mxu2  ;;  %v15335_v50 = vld [vmem:[%s18139_s0 + $0x2e8] sm:$0xff] }
 0x4b5   :  { %v2997_v12 = vadd.f32 %v2692_v0, %v2071_v21 }
 0x4b6   :  { %v4350_v59 = vpack.c.bf16 %v4150_v18, %v4150_v18  ;;  %v1464_v19 = vpop.f32.mrf.mxu0 }
 0x4b7   :  { %v3442_v1 = vpop.f32.mrf.mxu3  ;;  %v2077_v52 = vpop.f32.mrf.mxu1 }
 0x4b8   :  { %v4748_v62 = vunpack.c.l.b16 %v4350_v59  ;;  %v3747_v58 = vadd.f32 %v3442_v1, %v2997_v12  ;;  %v2078_v25 = vadd.f32 %v2077_v52, %v1464_v19 }
 0x4ba   :  { %v15326_v34 = vpack.c.b16 %v4748_v62, %v4747_v37  ;;  %v3951_v6 = vadd.f32 %v15125_v35, %v3747_v58 }
 0x4bc   :  { %18276 = vst [vmem:[#allocation42_spill] sm:$0xff] %v15326_v34  ;;  %v2694_v51 = vpop.f32.mrf.mxu2  ;;  %v4151_v10 = vmax.f32 %v3951_v6, 0.0 }
 0x4bd   :  { %v2998_v38 = vadd.f32 %v2694_v51, %v2073_v41 }
 0x4be   :  { %v1467_v21 = vpop.f32.mrf.mxu0  ;;  %v4351_v41 = vpack.c.bf16 %v4151_v10, %v4151_v10  ;;  %v15352_v10 = vld [vmem:[%s18139_s0 + $0x2f0] sm:$0xff] }
 0x4bf   :  { %v3444_v48 = vpop.f32.mrf.mxu3  ;;  %v2080_v0 = vpop.f32.mrf.mxu1 }
 0x4c0   :  { %v3748_v18 = vadd.f32 %v3444_v48, %v2998_v38  ;;  %v2081_v59 = vadd.f32 %v2080_v0, %v1467_v21  ;;  %v4514_v2 = vunpack.c.l.b16 %v4351_v41 }
 0x4c1   :  { %10943 = vmatmul.msk.bf16.gmra.mxu0 %vm822_vm0, %v15174_v43  ;;  %11262 = vmatmul.msk.bf16.gmra.mxu2 %vm822_vm0, %v15315_v33 }
 0x4c2   :  { %v3952_v12 = vadd.f32 %v15125_v35, %v3748_v18  ;;  %11099 = vmatmul.msk.bf16.gmra.mxu1 %vm822_vm0, %v15148_v57 }
 0x4c4   :  { %11390 = vmatmul.msk.bf16.gmra.mxu3 %vm822_vm0, %v15335_v50  ;;  %v4152_v1 = vmax.f32 %v3952_v12, 0.0  ;;  %v2697_v19 = vpop.f32.mrf.mxu2 }
 0x4c5   :  { %v2999_v62 = vadd.f32 %v2697_v19, %v2076_v36 }
 0x4c6   :  { %v4352_v37 = vpack.c.bf16 %v4152_v1, %v4152_v1  ;;  %v1469_v52 = vpop.f32.mrf.mxu0 }
 0x4c7   :  { %v3447_v58 = vpop.f32.mrf.mxu3  ;;  %v2082_v38 = vpop.f32.mrf.mxu1 }
 0x4c8   :  { %v4515_v6 = vunpack.c.l.b16 %v4352_v37  ;;  %v3749_v51 = vadd.f32 %v3447_v58, %v2999_v62  ;;  %v2083_v48 = vadd.f32 %v2082_v38, %v1469_v52 }
 0x4ca   :  { %v15346_v21 = vpack.c.b16 %v4515_v6, %v4514_v2  ;;  %v3953_v18 = vadd.f32 %v15125_v35, %v3749_v51 }
 0x4cc   :  { %18277 = vst [vmem:[#allocation43_spill] sm:$0xff] %v15346_v21  ;;  %v2699_v57 = vpop.f32.mrf.mxu2  ;;  %v4153_v36 = vmax.f32 %v3953_v18, 0.0 }
 0x4cd   :  { %v3000_v0 = vadd.f32 %v2699_v57, %v2078_v25 }
 0x4ce   :  { %v1472_v3 = vpop.f32.mrf.mxu0  ;;  %v4353_v25 = vpack.c.bf16 %v4153_v36, %v4153_v36  ;;  %v15369_v36 = vld [vmem:[%s18139_s0 + $0x2f8] sm:$0xff] }
 0x4cf   :  { %v3449_v34 = vpop.f32.mrf.mxu3  ;;  %v2085_v41 = vpop.f32.mrf.mxu1 }
 0x4d0   :  { %v3750_v12 = vadd.f32 %v3449_v34, %v3000_v0  ;;  %v2086_v1 = vadd.f32 %v2085_v41, %v1472_v3  ;;  %v4749_v2 = vunpack.c.l.b16 %v4353_v25 }
 0x4d1   :  { %10944 = vmatmul.msk.bf16.gmra.mxu0 %vm822_vm0, %v15191_v54  ;;  %11263 = vmatmul.msk.bf16.gmra.mxu2 %vm822_vm0, %v15335_v50 }
 0x4d2   :  { %v3954_v19 = vadd.f32 %v15125_v35, %v3750_v12  ;;  %11100 = vmatmul.msk.bf16.gmra.mxu1 %vm822_vm0, %v15174_v43 }
 0x4d4   :  { %11391 = vmatmul.msk.bf16.gmra.mxu3 %vm822_vm0, %v15352_v10  ;;  %v4154_v37 = vmax.f32 %v3954_v19, 0.0  ;;  %v2702_v62 = vpop.f32.mrf.mxu2 }
 0x4d5   :  { %v3001_v58 = vadd.f32 %v2702_v62, %v2081_v59 }
 0x4d6   :  { %v4354_v34 = vpack.c.bf16 %v4154_v37, %v4154_v37  ;;  %v1474_v52 = vpop.f32.mrf.mxu0 }
 0x4d7   :  { %v3452_v3 = vpop.f32.mrf.mxu3  ;;  %v2087_v38 = vpop.f32.mrf.mxu1 }
 0x4d8   :  { %v4750_v6 = vunpack.c.l.b16 %v4354_v34  ;;  %v3751_v51 = vadd.f32 %v3452_v3, %v3001_v58  ;;  %v2088_v18 = vadd.f32 %v2087_v38, %v1474_v52 }
 0x4da   :  { %v15363_v57 = vpack.c.b16 %v4750_v6, %v4749_v2  ;;  %v3955_v0 = vadd.f32 %v15125_v35, %v3751_v51 }
 0x4dc   :  { %18278 = vst [vmem:[#allocation44_spill] sm:$0xff] %v15363_v57  ;;  %v2704_v43 = vpop.f32.mrf.mxu2  ;;  %v4155_v59 = vmax.f32 %v3955_v0, 0.0 }
 0x4dd   :  { %v3002_v12 = vadd.f32 %v2704_v43, %v2083_v48  ;;  %v13474_v43 = vld [vmem:[%s18140_s3 + $0x88] sm:$0xff] }
 0x4de   :  { %v1477_v21 = vpop.f32.mrf.mxu0  ;;  %v4355_v48 = vpack.c.bf16 %v4155_v59, %v4155_v59  ;;  %5015 = vmatpush.bf16.msra.mxu2 %v13474_v43 }
 0x4df   :  { %v3454_v41 = vpop.f32.mrf.mxu3  ;;  %v2090_v25 = vpop.f32.mrf.mxu1 }
 0x4e0   :  { %v3752_v19 = vadd.f32 %v3454_v41, %v3002_v12  ;;  %v2091_v37 = vadd.f32 %v2090_v25, %v1477_v21  ;;  %v4516_v6 = vunpack.c.l.b16 %v4355_v48  ;;  %v15392_v48 = vld [vmem:[%s18139_s0 + $0x300] sm:$0xff] }
 0x4e1   :  { %10945 = vmatmul.msk.bf16.gmra.mxu0 %vm822_vm0, %v15208_v49  ;;  %11264 = vmatmul.msk.bf16.gmra.mxu2 %vm822_vm0, %v15352_v10 }
 0x4e2   :  { %v3956_v62 = vadd.f32 %v15125_v35, %v3752_v19  ;;  %11101 = vmatmul.msk.bf16.gmra.mxu1 %vm822_vm0, %v15191_v54  ;;  %v13482_v54 = vld [vmem:[%s18140_s3 + $0xc8] sm:$0xff] }
 0x4e3   :  { %5225 = vmatpush.bf16.msra.mxu3 %v13482_v54 }
 0x4e4   :  { %11392 = vmatmul.msk.bf16.gmra.mxu3 %vm822_vm0, %v15369_v36  ;;  %v4156_v34 = vmax.f32 %v3956_v62, 0.0  ;;  %v2707_v58 = vpop.f32.mrf.mxu2 }
 0x4e5   :  { %v3003_v52 = vadd.f32 %v2707_v58, %v2086_v1 }
 0x4e6   :  { %v4356_v3 = vpack.c.bf16 %v4156_v34, %v4156_v34  ;;  %v1479_v2 = vpop.f32.mrf.mxu0 }
 0x4e7   :  { %v3457_v21 = vpop.f32.mrf.mxu3  ;;  %v2092_v0 = vpop.f32.mrf.mxu1 }
 0x4e8   :  { %v4517_v51 = vunpack.c.l.b16 %v4356_v3  ;;  %v3753_v38 = vadd.f32 %v3457_v21, %v3003_v52  ;;  %v2093_v12 = vadd.f32 %v2092_v0, %v1479_v2  ;;  %v13458_v52 = vld [vmem:[%s18140_s3 + $0x8] sm:$0xff] }
 0x4e9   :  { %4837 = vmatpush.bf16.msrb.mxu1 %v13458_v52  ;;  %v15412_v52 = vld [vmem:[%s18139_s0 + $0x308] sm:$0xff] }
 0x4ea   :  { %v15386_v41 = vpack.c.b16 %v4517_v51, %v4516_v6  ;;  %v3957_v1 = vadd.f32 %v15125_v35, %v3753_v38 }
 0x4ec   :  { %18279 = vst [vmem:[#allocation45_spill] sm:$0xff] %v15386_v41  ;;  %v2709_v59 = vpop.f32.mrf.mxu2  ;;  %v4157_v34 = vmax.f32 %v3957_v1, 0.0 }
 0x4ed   :  { %v3004_v19 = vadd.f32 %v2709_v59, %v2088_v18 }
 0x4ee   :  { %v1482_v62 = vpop.f32.mrf.mxu0  ;;  %v4357_v18 = vpack.c.bf16 %v4157_v34, %v4157_v34 }
 0x4ef   :  { %v3459_v25 = vpop.f32.mrf.mxu3  ;;  %v2095_v3 = vpop.f32.mrf.mxu1 }
 0x4f0   :  { %v3754_v58 = vadd.f32 %v3459_v25, %v3004_v19  ;;  %v2096_v21 = vadd.f32 %v2095_v3, %v1482_v62  ;;  %v4951_v1 = vunpack.c.l.b16 %v4357_v18 }
 0x4f1   :  { %10946 = vmatmul.msk.bf16.gmra.mxu0 %vm822_vm0, %v15225_v15  ;;  %11265 = vmatmul.msk.bf16.gmra.mxu2 %vm822_vm0, %v15369_v36 }
 0x4f2   :  { %v3958_v2 = vadd.f32 %v15125_v35, %v3754_v58  ;;  %11102 = vmatmul.msk.bf16.gmra.mxu1 %vm822_vm0, %v15208_v49 }
 0x4f4   :  { %11393 = vmatmul.msk.bf16.gmra.mxu3 %vm822_vm0, %v15392_v48  ;;  %v4158_v6 = vmax.f32 %v3958_v2, 0.0  ;;  %v2712_v51 = vpop.f32.mrf.mxu2 }
 0x4f5   :  { %v3005_v0 = vadd.f32 %v2712_v51, %v2091_v37 }
 0x4f6   :  { %v4358_v38 = vpack.c.bf16 %v4158_v6, %v4158_v6  ;;  %v1484_v54 = vpop.f32.mrf.mxu0 }
 0x4f7   :  { %v3462_v43 = vpop.f32.mrf.mxu3  ;;  %v2097_v25 = vpop.f32.mrf.mxu1 }
 0x4f8   :  { %v4952_v59 = vunpack.c.l.b16 %v4358_v38  ;;  %v3755_v19 = vadd.f32 %v3462_v43, %v3005_v0  ;;  %v2098_v62 = vadd.f32 %v2097_v25, %v1484_v54 }
 0x4fa   :  { %v15406_v58 = vpack.c.b16 %v4952_v59, %v4951_v1  ;;  %v3959_v49 = vadd.f32 %v15125_v35, %v3755_v19 }
 0x4fc   :  { %18280 = vst [vmem:[#allocation46_spill] sm:$0xff] %v15406_v58  ;;  %v2714_v3 = vpop.f32.mrf.mxu2  ;;  %v4159_v37 = vmax.f32 %v3959_v49, 0.0 }
 0x4fd   :  { %v3006_v57 = vadd.f32 %v2714_v3, %v2093_v12 }
 0x4fe   :  { %v1487_v34 = vpop.f32.mrf.mxu0  ;;  %v4359_v12 = vpack.c.bf16 %v4159_v37, %v4159_v37  ;;  %v15429_v37 = vld [vmem:[%s18139_s0 + $0x310] sm:$0xff] }
 0x4ff   :  { %v3464_v41 = vpop.f32.mrf.mxu3  ;;  %v2100_v18 = vpop.f32.mrf.mxu1 }
 0x500   :  { %v3756_v2 = vadd.f32 %v3464_v41, %v3006_v57  ;;  %v2101_v6 = vadd.f32 %v2100_v18, %v1487_v34  ;;  %v5161_v1 = vunpack.c.l.b16 %v4359_v12 }
 0x501   :  { %10947 = vmatmul.msk.bf16.gmra.mxu0 %vm822_vm0, %v15242_v16  ;;  %11266 = vmatmul.msk.bf16.gmra.mxu2 %vm822_vm0, %v15392_v48 }
 0x502   :  { %v3960_v51 = vadd.f32 %v15125_v35, %v3756_v2  ;;  %11103 = vmatmul.msk.bf16.gmra.mxu1 %vm822_vm0, %v15225_v15 }
 0x504   :  { %11394 = vmatmul.msk.bf16.gmra.mxu3 %vm822_vm0, %v15412_v52  ;;  %v4160_v38 = vmax.f32 %v3960_v51, 0.0  ;;  %v2717_v0 = vpop.f32.mrf.mxu2 }
 0x505   :  { %v3007_v41 = vadd.f32 %v2717_v0, %v2096_v21 }
 0x506   :  { %v4360_v57 = vpack.c.bf16 %v4160_v38, %v4160_v38  ;;  %v1489_v54 = vpop.f32.mrf.mxu0 }
 0x507   :  { %v3467_v43 = vpop.f32.mrf.mxu3  ;;  %v2102_v16 = vpop.f32.mrf.mxu1 }
 0x508   :  { %v5162_v59 = vunpack.c.l.b16 %v4360_v57  ;;  %v3757_v19 = vadd.f32 %v3467_v43, %v3007_v41  ;;  %v2103_v25 = vadd.f32 %v2102_v16, %v1489_v54 }
 0x50a   :  { %v15423_v49 = vpack.c.b16 %v5162_v59, %v5161_v1  ;;  %v3961_v3 = vadd.f32 %v15125_v35, %v3757_v19 }
 0x50c   :  { %18281 = vst [vmem:[#allocation47_spill] sm:$0xff] %v15423_v49  ;;  %v2719_v15 = vpop.f32.mrf.mxu2  ;;  %v4161_v21 = vmax.f32 %v3961_v3, 0.0 }
 0x50d   :  { %v3008_v34 = vadd.f32 %v2719_v15, %v2098_v62 }
 0x50e   :  { %v1492_v18 = vpop.f32.mrf.mxu0  ;;  %v4361_v62 = vpack.c.bf16 %v4161_v21, %v4161_v21  ;;  %v15446_v21 = vld [vmem:[%s18139_s0 + $0x318] sm:$0xff] }
 0x50f   :  { %v3469_v2 = vpop.f32.mrf.mxu3  ;;  %v2105_v12 = vpop.f32.mrf.mxu1 }
 0x510   :  { %v3758_v51 = vadd.f32 %v3469_v2, %v3008_v34  ;;  %v2106_v38 = vadd.f32 %v2105_v12, %v1492_v18  ;;  %v5413_v19 = vunpack.c.l.b16 %v4361_v62 }
 0x511   :  { %10948 = vmatmul.msk.bf16.gmra.mxu0 %vm822_vm0, %v15264_v40  ;;  %11267 = vmatmul.msk.bf16.gmra.mxu2 %vm822_vm0, %v15412_v52 }
 0x512   :  { %v3962_v0 = vadd.f32 %v15125_v35, %v3758_v51  ;;  %11104 = vmatmul.msk.bf16.gmra.mxu1 %vm822_vm0, %v15259_v17 }
 0x514   :  { %11395 = vmatmul.msk.bf16.gmra.mxu3 %vm822_vm0, %v15429_v37  ;;  %v4162_v57 = vmax.f32 %v3962_v0, 0.0  ;;  %v2722_v41 = vpop.f32.mrf.mxu2  ;;  %v15451_v0 = vld [vmem:[%s18139_s0 + $0x320] sm:$0xff] }
 0x515   :  { %v3009_v54 = vadd.f32 %v2722_v41, %v2101_v6 }
 0x516   :  { %v4362_v43 = vpack.c.bf16 %v4162_v57, %v4162_v57  ;;  %v1494_v59 = vpop.f32.mrf.mxu0 }
 0x517   :  { %v3472_v1 = vpop.f32.mrf.mxu3  ;;  %v2107_v15 = vpop.f32.mrf.mxu1 }
 0x518   :  { %v5414_v16 = vunpack.c.l.b16 %v4362_v43  ;;  %v3759_v3 = vadd.f32 %v3472_v1, %v3009_v54  ;;  %v2108_v34 = vadd.f32 %v2107_v15, %v1494_v59 }
 0x51a   :  { %v15440_v2 = vpack.c.b16 %v5414_v16, %v5413_v19  ;;  %v3963_v18 = vadd.f32 %v15125_v35, %v3759_v3 }
 0x51c   :  { %18282 = vst [vmem:[#allocation48_spill] sm:$0xff] %v15440_v2  ;;  %v2724_v17 = vpop.f32.mrf.mxu2  ;;  %v4163_v62 = vmax.f32 %v3963_v18, 0.0 }
 0x51d   :  { %v3010_v51 = vadd.f32 %v2724_v17, %v2103_v25 }
 0x51e   :  { %v1497_v6 = vpop.f32.mrf.mxu0  ;;  %v4363_v25 = vpack.c.bf16 %v4163_v62, %v4163_v62 }
 0x51f   :  { %v3474_v12 = vpop.f32.mrf.mxu3  ;;  %v2110_v41 = vpop.f32.mrf.mxu1 }
 0x520   :  { %v3760_v57 = vadd.f32 %v3474_v12, %v3010_v51  ;;  %v2111_v43 = vadd.f32 %v2110_v41, %v1497_v6 }
 0x521   :  { %10949 = vmatmul.msk.bf16.gmra.mxu0 %vm822_vm0, %v15281_v47  ;;  %11268 = vmatmul.msk.bf16.gmra.mxu2 %vm822_vm0, %v15446_v21 }
 0x522   :  { %v3964_v54 = vadd.f32 %v15125_v35, %v3760_v57  ;;  %11105 = vmatmul.msk.bf16.gmra.mxu1 %vm822_vm0, %v15264_v40  ;;  %v5695_v35 = vunpack.c.l.b16 %v4363_v25  ;;  %v15467_v40 = vld [vmem:[%s18141_s2] ss:$0 sm:$0xff]  ;;  %v15473_v25 = vld [vmem:[%s18139_s0 + $0x328] sm:$0xff] }
 0x524   :  { %11396 = vmatmul.msk.bf16.gmra.mxu3 %vm822_vm0, %v15451_v0  ;;  %v4164_v1 = vmax.f32 %v3964_v54, 0.0  ;;  %v2727_v59 = vpop.f32.mrf.mxu2 }
 0x525   :  { %v3011_v16 = vadd.f32 %v2727_v59, %v2106_v38 }
 0x526   :  { %v4364_v19 = vpack.c.bf16 %v4164_v1, %v4164_v1  ;;  %v1499_v15 = vpop.f32.mrf.mxu0 }
 0x527   :  { %v3477_v3 = vpop.f32.mrf.mxu3  ;;  %v2112_v51 = vpop.f32.mrf.mxu1 }
 0x528   :  { %v5696_v18 = vunpack.c.l.b16 %v4364_v19  ;;  %v3761_v17 = vadd.f32 %v3477_v3, %v3011_v16  ;;  %v2113_v12 = vadd.f32 %v2112_v51, %v1499_v15 }
 0x52a   :  { %v15462_v6 = vpack.c.b16 %v5696_v18, %v5695_v35  ;;  %v3965_v62 = vadd.f32 %v15467_v40, %v3761_v17 }
 0x52c   :  { %18283 = vst [vmem:[#allocation49_spill] sm:$0xff] %v15462_v6  ;;  %v2729_v57 = vpop.f32.mrf.mxu2  ;;  %v4165_v1 = vmax.f32 %v3965_v62, 0.0 }
 0x52d   :  { %v3012_v41 = vadd.f32 %v2729_v57, %v2108_v34 }
 0x52e   :  { %v1502_v38 = vpop.f32.mrf.mxu0  ;;  %v4365_v34 = vpack.c.bf16 %v4165_v1, %v4165_v1  ;;  %v15490_v1 = vld [vmem:[%s18139_s0 + $0x330] sm:$0xff] }
 0x52f   :  { %v3479_v54 = vpop.f32.mrf.mxu3  ;;  %v2115_v19 = vpop.f32.mrf.mxu1 }
 0x530   :  { %v3762_v59 = vadd.f32 %v3479_v54, %v3012_v41  ;;  %v2116_v16 = vadd.f32 %v2115_v19, %v1502_v38  ;;  %v5415_v57 = vunpack.c.l.b16 %v4365_v34 }
 0x531   :  { %10950 = vmatmul.msk.bf16.gmra.mxu0 %vm822_vm0, %v15298_v20  ;;  %11269 = vmatmul.msk.bf16.gmra.mxu2 %vm822_vm0, %v15451_v0 }
 0x532   :  { %v3966_v3 = vadd.f32 %v15467_v40, %v3762_v59  ;;  %11106 = vmatmul.msk.bf16.gmra.mxu1 %vm822_vm0, %v15281_v47 }
 0x534   :  { %11397 = vmatmul.msk.bf16.gmra.mxu3 %vm822_vm0, %v15473_v25  ;;  %v4166_v15 = vmax.f32 %v3966_v3, 0.0  ;;  %v2732_v35 = vpop.f32.mrf.mxu2 }
 0x535   :  { %v3013_v17 = vadd.f32 %v2732_v35, %v2111_v43 }
 0x536   :  { %v4366_v18 = vpack.c.bf16 %v4166_v15, %v4166_v15  ;;  %v1504_v62 = vpop.f32.mrf.mxu0 }
 0x537   :  { %v3482_v51 = vpop.f32.mrf.mxu3  ;;  %v2117_v38 = vpop.f32.mrf.mxu1 }
 0x538   :  { %v5416_v41 = vunpack.c.l.b16 %v4366_v18  ;;  %v3763_v54 = vadd.f32 %v3482_v51, %v3013_v17  ;;  %v2118_v59 = vadd.f32 %v2117_v38, %v1504_v62 }
 0x53a   :  { %v15484_v19 = vpack.c.b16 %v5416_v41, %v5415_v57  ;;  %v3967_v6 = vadd.f32 %v15467_v40, %v3763_v54 }
 0x53c   :  { %18284 = vst [vmem:[#allocation50_spill] sm:$0xff] %v15484_v19  ;;  %v2734_v47 = vpop.f32.mrf.mxu2  ;;  %v4167_v43 = vmax.f32 %v3967_v6, 0.0 }
 0x53d   :  { %v3014_v2 = vadd.f32 %v2734_v47, %v2113_v12 }
 0x53e   :  { %v1507_v58 = vpop.f32.mrf.mxu0  ;;  %v4367_v12 = vpack.c.bf16 %v4167_v43, %v4167_v43  ;;  %v15507_v43 = vld [vmem:[%s18139_s0 + $0x338] sm:$0xff] }
 0x53f   :  { %v3484_v49 = vpop.f32.mrf.mxu3  ;;  %v2120_v34 = vpop.f32.mrf.mxu1 }
 0x540   :  { %v3764_v3 = vadd.f32 %v3484_v49, %v3014_v2  ;;  %v2121_v15 = vadd.f32 %v2120_v34, %v1507_v58  ;;  %v5697_v51 = vunpack.c.l.b16 %v4367_v12 }
 0x541   :  { %10951 = vmatmul.msk.bf16.gmra.mxu0 %vm822_vm0, %v15315_v33  ;;  %11270 = vmatmul.msk.bf16.gmra.mxu2 %vm822_vm0, %v15473_v25 }
 0x542   :  { %v3968_v35 = vadd.f32 %v15467_v40, %v3764_v3  ;;  %11107 = vmatmul.msk.bf16.gmra.mxu1 %vm822_vm0, %v15298_v20 }
 0x544   :  { %11398 = vmatmul.msk.bf16.gmra.mxu3 %vm822_vm0, %v15490_v1  ;;  %v4168_v18 = vmax.f32 %v3968_v35, 0.0  ;;  %v2737_v6 = vpop.f32.mrf.mxu2 }
 0x545   :  { %v3015_v2 = vadd.f32 %v2737_v6, %v2116_v16 }
 0x546   :  { %v4368_v49 = vpack.c.bf16 %v4168_v18, %v4168_v18  ;;  %v1509_v17 = vpop.f32.mrf.mxu0 }
 0x547   :  { %v3487_v58 = vpop.f32.mrf.mxu3  ;;  %v2122_v41 = vpop.f32.mrf.mxu1 }
 0x548   :  { %v5698_v62 = vunpack.c.l.b16 %v4368_v49  ;;  %v3765_v57 = vadd.f32 %v3487_v58, %v3015_v2  ;;  %v2123_v54 = vadd.f32 %v2122_v41, %v1509_v17 }
 0x54a   :  { %v15501_v38 = vpack.c.b16 %v5698_v62, %v5697_v51  ;;  %v3969_v47 = vadd.f32 %v15467_v40, %v3765_v57 }
 0x54c   :  { %18285 = vst [vmem:[#allocation51_spill] sm:$0xff] %v15501_v38  ;;  %v2739_v20 = vpop.f32.mrf.mxu2  ;;  %v4169_v16 = vmax.f32 %v3969_v47, 0.0 }
 0x54d   :  { %v3016_v3 = vadd.f32 %v2739_v20, %v2118_v59 }
 0x54e   :  { %v1512_v19 = vpop.f32.mrf.mxu0  ;;  %v4369_v59 = vpack.c.bf16 %v4169_v16, %v4169_v16  ;;  %v15524_v16 = vld [vmem:[%s18139_s0 + $0x340] sm:$0xff] }
 0x54f   :  { %v3489_v34 = vpop.f32.mrf.mxu3  ;;  %v2125_v12 = vpop.f32.mrf.mxu1 }
 0x550   :  { %v3766_v35 = vadd.f32 %v3489_v34, %v3016_v3  ;;  %v2126_v18 = vadd.f32 %v2125_v12, %v1512_v19  ;;  %v5417_v62 = vunpack.c.l.b16 %v4369_v59 }
 0x551   :  { %10952 = vmatmul.msk.bf16.gmra.mxu0 %vm822_vm0, %v15335_v50  ;;  %11271 = vmatmul.msk.bf16.gmra.mxu2 %vm822_vm0, %v15490_v1 }
 0x552   :  { %v3970_v6 = vadd.f32 %v15467_v40, %v3766_v35  ;;  %11108 = vmatmul.msk.bf16.gmra.mxu1 %vm822_vm0, %v15315_v33 }
 0x554   :  { %11399 = vmatmul.msk.bf16.gmra.mxu3 %vm822_vm0, %v15507_v43  ;;  %v4170_v49 = vmax.f32 %v3970_v6, 0.0  ;;  %v2742_v2 = vpop.f32.mrf.mxu2 }
 0x555   :  { %v3017_v17 = vadd.f32 %v2742_v2, %v2121_v15 }
 0x556   :  { %v4370_v58 = vpack.c.bf16 %v4170_v49, %v4170_v49  ;;  %v1514_v51 = vpop.f32.mrf.mxu0 }
 0x557   :  { %v3492_v19 = vpop.f32.mrf.mxu3  ;;  %v2127_v47 = vpop.f32.mrf.mxu1 }
 0x558   :  { %v5418_v57 = vunpack.c.l.b16 %v4370_v58  ;;  %v3767_v41 = vadd.f32 %v3492_v19, %v3017_v17  ;;  %v2128_v20 = vadd.f32 %v2127_v47, %v1514_v51 }
 0x55a   :  { %v15518_v3 = vpack.c.b16 %v5418_v57, %v5417_v62  ;;  %v3971_v34 = vadd.f32 %v15467_v40, %v3767_v41 }
 0x55c   :  { %18286 = vst [vmem:[#allocation52_spill] sm:$0xff] %v15518_v3  ;;  %v2744_v33 = vpop.f32.mrf.mxu2  ;;  %v4171_v15 = vmax.f32 %v3971_v34, 0.0 }
 0x55d   :  { %v3018_v35 = vadd.f32 %v2744_v33, %v2123_v54 }
 0x55e   :  { %v1517_v38 = vpop.f32.mrf.mxu0  ;;  %v4371_v54 = vpack.c.bf16 %v4171_v15, %v4171_v15  ;;  %v15541_v15 = vld [vmem:[%s18139_s0 + $0x348] sm:$0xff] }
 0x55f   :  { %v3494_v12 = vpop.f32.mrf.mxu3  ;;  %v2130_v59 = vpop.f32.mrf.mxu1 }
 0x560   :  { %v3768_v6 = vadd.f32 %v3494_v12, %v3018_v35  ;;  %v2131_v49 = vadd.f32 %v2130_v59, %v1517_v38  ;;  %v5699_v57 = vunpack.c.l.b16 %v4371_v54 }
 0x561   :  { %10953 = vmatmul.msk.bf16.gmra.mxu0 %vm822_vm0, %v15352_v10  ;;  %11272 = vmatmul.msk.bf16.gmra.mxu2 %vm822_vm0, %v15507_v43 }
 0x562   :  { %v3972_v2 = vadd.f32 %v15467_v40, %v3768_v6  ;;  %11109 = vmatmul.msk.bf16.gmra.mxu1 %vm822_vm0, %v15335_v50 }
 0x564   :  { %11400 = vmatmul.msk.bf16.gmra.mxu3 %vm822_vm0, %v15524_v16  ;;  %v4172_v58 = vmax.f32 %v3972_v2, 0.0  ;;  %v2747_v17 = vpop.f32.mrf.mxu2 }
 0x565   :  { %v3019_v51 = vadd.f32 %v2747_v17, %v2126_v18 }
 0x566   :  { %v4372_v19 = vpack.c.bf16 %v4172_v58, %v4172_v58  ;;  %v1519_v62 = vpop.f32.mrf.mxu0 }
 0x567   :  { %v3497_v38 = vpop.f32.mrf.mxu3  ;;  %v2132_v34 = vpop.f32.mrf.mxu1 }
 0x568   :  { %v5700_v41 = vunpack.c.l.b16 %v4372_v19  ;;  %v3769_v47 = vadd.f32 %v3497_v38, %v3019_v51  ;;  %v2133_v33 = vadd.f32 %v2132_v34, %v1519_v62 }
 0x56a   :  { %v15535_v35 = vpack.c.b16 %v5700_v41, %v5699_v57  ;;  %v3973_v12 = vadd.f32 %v15467_v40, %v3769_v47 }
 0x56c   :  { %18287 = vst [vmem:[#allocation53_spill] sm:$0xff] %v15535_v35  ;;  %v2749_v50 = vpop.f32.mrf.mxu2  ;;  %v4173_v18 = vmax.f32 %v3973_v12, 0.0 }
 0x56d   :  { %v3020_v6 = vadd.f32 %v2749_v50, %v2128_v20  ;;  %v13465_v50 = vld [vmem:[%s18140_s3 + $0x40] sm:$0xff] }
 0x56e   :  { %v1522_v3 = vpop.f32.mrf.mxu0  ;;  %v4373_v20 = vpack.c.bf16 %v4173_v18, %v4173_v18  ;;  %4605 = vmatpush.bf16.msrb.mxu0 %v13465_v50 }
 0x56f   :  { %v3499_v59 = vpop.f32.mrf.mxu3  ;;  %v2135_v54 = vpop.f32.mrf.mxu1 }
 0x570   :  { %v3770_v2 = vadd.f32 %v3499_v59, %v3020_v6  ;;  %v2136_v58 = vadd.f32 %v2135_v54, %v1522_v3  ;;  %v5419_v41 = vunpack.c.l.b16 %v4373_v20 }
 0x571   :  { %10954 = vmatmul.msk.bf16.gmra.mxu0 %vm822_vm0, %v15369_v36  ;;  %11273 = vmatmul.msk.bf16.gmra.mxu2 %vm822_vm0, %v15524_v16 }
 0x572   :  { %v3974_v17 = vadd.f32 %v15467_v40, %v3770_v2  ;;  %11110 = vmatmul.msk.bf16.gmra.mxu1 %vm822_vm0, %v15352_v10 }
 0x574   :  { %11401 = vmatmul.msk.bf16.gmra.mxu3 %vm822_vm0, %v15541_v15  ;;  %v4174_v19 = vmax.f32 %v3974_v17, 0.0  ;;  %v2752_v51 = vpop.f32.mrf.mxu2  ;;  %v15561_v17 = vld [vmem:[%s18139_s0 + $0x350] sm:$0xff] }
 0x575   :  { %v3021_v62 = vadd.f32 %v2752_v51, %v2131_v49 }
 0x576   :  { %v4374_v38 = vpack.c.bf16 %v4174_v19, %v4174_v19  ;;  %v1524_v57 = vpop.f32.mrf.mxu0 }
 0x577   :  { %v3502_v3 = vpop.f32.mrf.mxu3  ;;  %v2137_v12 = vpop.f32.mrf.mxu1 }
 0x578   :  { %v5420_v47 = vunpack.c.l.b16 %v4374_v38  ;;  %v3771_v34 = vadd.f32 %v3502_v3, %v3021_v62  ;;  %v2138_v6 = vadd.f32 %v2137_v12, %v1524_v57 }
 0x57a   :  { %v15555_v10 = vpack.c.b16 %v5420_v47, %v5419_v41  ;;  %v3975_v59 = vadd.f32 %v15467_v40, %v3771_v34 }
 0x57c   :  { %18288 = vst [vmem:[#allocation54_spill] sm:$0xff] %v15555_v10  ;;  %v2754_v18 = vpop.f32.mrf.mxu2  ;;  %v4175_v20 = vmax.f32 %v3975_v59, 0.0 }
 0x57d   :  { %v3022_v2 = vadd.f32 %v2754_v18, %v2133_v33 }
 0x57e   :  { %v1527_v49 = vpop.f32.mrf.mxu0  ;;  %v4375_v33 = vpack.c.bf16 %v4175_v20, %v4175_v20  ;;  %v15578_v20 = vld [vmem:[%s18139_s0 + $0x358] sm:$0xff] }
 0x57f   :  { %v3504_v54 = vpop.f32.mrf.mxu3  ;;  %v2140_v51 = vpop.f32.mrf.mxu1 }
 0x580   :  { %v3772_v19 = vadd.f32 %v3504_v54, %v3022_v2  ;;  %v2141_v38 = vadd.f32 %v2140_v51, %v1527_v49  ;;  %v5701_v50 = vunpack.c.l.b16 %v4375_v33 }
 0x581   :  { %10955 = vmatmul.msk.bf16.gmra.mxu0 %vm822_vm0, %v15392_v48  ;;  %11274 = vmatmul.msk.bf16.gmra.mxu2 %vm822_vm0, %v15541_v15 }
 0x582   :  { %v3976_v62 = vadd.f32 %v15467_v40, %v3772_v19  ;;  %11111 = vmatmul.msk.bf16.gmra.mxu1 %vm822_vm0, %v15369_v36 }
 0x584   :  { %11402 = vmatmul.msk.bf16.gmra.mxu3 %vm822_vm0, %v15561_v17  ;;  %v4176_v3 = vmax.f32 %v3976_v62, 0.0  ;;  %v2757_v57 = vpop.f32.mrf.mxu2 }
 0x585   :  { %v3023_v47 = vadd.f32 %v2757_v57, %v2136_v58 }
 0x586   :  { %v4376_v41 = vpack.c.bf16 %v4176_v3, %v4176_v3  ;;  %v1529_v12 = vpop.f32.mrf.mxu0 }
 0x587   :  { %v3507_v34 = vpop.f32.mrf.mxu3  ;;  %v2142_v2 = vpop.f32.mrf.mxu1 }
 0x588   :  { %v5702_v59 = vunpack.c.l.b16 %v4376_v41  ;;  %v3773_v18 = vadd.f32 %v3507_v34, %v3023_v47  ;;  %v2143_v54 = vadd.f32 %v2142_v2, %v1529_v12 }
 0x58a   :  { %v15572_v49 = vpack.c.b16 %v5702_v59, %v5701_v50  ;;  %v3977_v19 = vadd.f32 %v15467_v40, %v3773_v18 }
 0x58c   :  { %18289 = vst [vmem:[#allocation55_spill] sm:$0xff] %v15572_v49  ;;  %v2759_v36 = vpop.f32.mrf.mxu2  ;;  %v4177_v58 = vmax.f32 %v3977_v19, 0.0 }
 0x58d   :  { %v3024_v51 = vadd.f32 %v2759_v36, %v2138_v6 }
 0x58e   :  { %v1532_v35 = vpop.f32.mrf.mxu0  ;;  %v4377_v6 = vpack.c.bf16 %v4177_v58, %v4177_v58 }
 0x58f   :  { %v3509_v10 = vpop.f32.mrf.mxu3  ;;  %v2145_v33 = vpop.f32.mrf.mxu1 }
 0x590   :  { %v3774_v62 = vadd.f32 %v3509_v10, %v3024_v51  ;;  %v2146_v3 = vadd.f32 %v2145_v33, %v1532_v35  ;;  %v5935_v50 = vunpack.c.l.b16 %v4377_v6 }
 0x591   :  { %10956 = vmatmul.msk.bf16.gmra.mxu0 %vm822_vm0, %v15412_v52  ;;  %11275 = vmatmul.msk.bf16.gmra.mxu2 %vm822_vm0, %v15561_v17 }
 0x592   :  { %v3978_v57 = vadd.f32 %v15467_v40, %v3774_v62  ;;  %11112 = vmatmul.msk.bf16.gmra.mxu1 %vm822_vm0, %v15392_v48 }
 0x594   :  { %11403 = vmatmul.msk.bf16.gmra.mxu3 %vm822_vm0, %v15578_v20  ;;  %v4178_v41 = vmax.f32 %v3978_v57, 0.0  ;;  %v2762_v47 = vpop.f32.mrf.mxu2 }
 0x595   :  { %v3025_v34 = vadd.f32 %v2762_v47, %v2141_v38 }
 0x596   :  { %v4378_v10 = vpack.c.bf16 %v4178_v41, %v4178_v41  ;;  %v1534_v12 = vpop.f32.mrf.mxu0 }
 0x597   :  { %v3512_v35 = vpop.f32.mrf.mxu3  ;;  %v2147_v2 = vpop.f32.mrf.mxu1 }
 0x598   :  { %v5936_v59 = vunpack.c.l.b16 %v4378_v10  ;;  %v3775_v18 = vadd.f32 %v3512_v35, %v3025_v34  ;;  %v2148_v19 = vadd.f32 %v2147_v2, %v1534_v12 }
 0x59a   :  { %v15589_v36 = vpack.c.b16 %v5936_v59, %v5935_v50  ;;  %v3979_v51 = vadd.f32 %v15467_v40, %v3775_v18 }
 0x59c   :  { %v2764_v48 = vpop.f32.mrf.mxu2  ;;  %v4179_v58 = vmax.f32 %v3979_v51, 0.0 }
 0x59d   :  { %v3026_v62 = vadd.f32 %v2764_v48, %v2143_v54  ;;  %v15602_v54 = vld [vmem:[%s18139_s0 + $0x360] sm:$0xff] }
 0x59e   :  { %v1537_v49 = vpop.f32.mrf.mxu0 }
 0x59f   :  { %v3514_v33 = vpop.f32.mrf.mxu3  ;;  %v2150_v56 = vpop.f32.mrf.mxu1 }
 0x5a0   :  { %v3776_v57 = vadd.f32 %v3514_v33, %v3026_v62  ;;  %v2151_v41 = vadd.f32 %v2150_v56, %v1537_v49  ;;  %v4379_v56 = vpack.c.bf16 %v4179_v58, %v4179_v58 }
 0x5a1   :  { %10957 = vmatmul.msk.bf16.gmra.mxu0 %vm822_vm0, %v15429_v37  ;;  %11276 = vmatmul.msk.bf16.gmra.mxu2 %vm822_vm0, %v15578_v20 }
 0x5a2   :  { %v3980_v38 = vadd.f32 %v15467_v40, %v3776_v57  ;;  %11113 = vmatmul.msk.bf16.gmra.mxu1 %vm822_vm0, %v15412_v52  ;;  %v6145_v35 = vunpack.c.l.b16 %v4379_v56  ;;  %v13481_v56 = vld [vmem:[%s18140_s3 + $0xc0] sm:$0xff] }
 0x5a3   :  { %5226 = vmatpush.bf16.msra.mxu3 %v13481_v56 }
 0x5a4   :  { %11404 = vmatmul.msk.bf16.gmra.mxu3 %vm822_vm0, %v15602_v54  ;;  %v4180_v49 = vmax.f32 %v3980_v38, 0.0  ;;  %v2767_v6 = vpop.f32.mrf.mxu2 }
 0x5a5   :  { %v3027_v10 = vadd.f32 %v2767_v6, %v2146_v3  ;;  %v13473_v3 = vld [vmem:[%s18140_s3 + $0x80] sm:$0xff] }
 0x5a6   :  { %v4380_v47 = vpack.c.bf16 %v4180_v49, %v4180_v49  ;;  %v1539_v34 = vpop.f32.mrf.mxu0  ;;  %5016 = vmatpush.bf16.msra.mxu2 %v13473_v3 }
 0x5a7   :  { %v3517_v37 = vpop.f32.mrf.mxu3  ;;  %v2152_v59 = vpop.f32.mrf.mxu1 }
 0x5a8   :  { %v6146_v12 = vunpack.c.l.b16 %v4380_v47  ;;  %v3777_v50 = vadd.f32 %v3517_v37, %v3027_v10  ;;  %v2153_v52 = vadd.f32 %v2152_v59, %v1539_v34 }
 0x5aa   :  { %v15606_v18 = vpack.c.b16 %v6146_v12, %v6145_v35  ;;  %v3981_v2 = vadd.f32 %v15467_v40, %v3777_v50 }
 0x5ac   :  { %v2769_v51 = vpop.f32.mrf.mxu2  ;;  %v4181_v58 = vmax.f32 %v3981_v2, 0.0 }
 0x5ad   :  { %v3028_v48 = vadd.f32 %v2769_v51, %v2148_v19  ;;  %v13834_v19 = vld [vmem:[%s18139_s0 + $0x368] sm:$0xff] }
 0x5ae   :  { %v1542_v33 = vpop.f32.mrf.mxu0  ;;  %v4381_v47 = vpack.c.bf16 %v4181_v58, %v4181_v58 }
 0x5af   :  { %v3519_v62 = vpop.f32.mrf.mxu3  ;;  %v2155_v38 = vpop.f32.mrf.mxu1 }
 0x5b0   :  { %v3778_v57 = vadd.f32 %v3519_v62, %v3028_v48  ;;  %v2156_v49 = vadd.f32 %v2155_v38, %v1542_v33  ;;  %v6349_v59 = vunpack.c.l.b16 %v4381_v47 }
 0x5b1   :  { %10958 = vmatmul.msk.bf16.gmra.mxu0 %vm822_vm0, %v15451_v0  ;;  %11277 = vmatmul.msk.bf16.gmra.mxu2 %vm822_vm0, %v15602_v54 }
 0x5b2   :  { %v3982_v6 = vadd.f32 %v15467_v40, %v3778_v57  ;;  %11114 = vmatmul.msk.bf16.gmra.mxu1 %vm822_vm0, %v15446_v21  ;;  %v13457_v21 = vld [vmem:[%s18140_s3] sm:$0xff] }
 0x5b3   :  { %4838 = vmatpush.bf16.msrb.mxu1 %v13457_v21 }
 0x5b4   :  { %11405 = vmatmul.msk.bf16.gmra.mxu3 %vm822_vm0, %v13834_v19  ;;  %v4182_v10 = vmax.f32 %v3982_v6, 0.0  ;;  %v2772_v37 = vpop.f32.mrf.mxu2  ;;  %v13431_v6 = vld [vmem:[%s18139_s0 + $0x378] sm:$0xff] }
 0x5b5   :  { %v3029_v35 = vadd.f32 %v2772_v37, %v2151_v41  ;;  %v13430_v41 = vld [vmem:[%s18139_s0 + $0x370] sm:$0xff] }
 0x5b6   :  { %v4382_v34 = vpack.c.bf16 %v4182_v10, %v4182_v10  ;;  %v1544_v50 = vpop.f32.mrf.mxu0 }
 0x5b7   :  { %v3522_v12 = vpop.f32.mrf.mxu3  ;;  %v2157_v48 = vpop.f32.mrf.mxu1 }
 0x5b8   :  { %v6350_v2 = vunpack.c.l.b16 %v4382_v34  ;;  %v3779_v51 = vadd.f32 %v3522_v12, %v3029_v35  ;;  %v2158_v62 = vadd.f32 %v2157_v48, %v1544_v50 }
 0x5ba   :  { %v15629_v33 = vpack.c.b16 %v6350_v2, %v6349_v59  ;;  %v3983_v58 = vadd.f32 %v15467_v40, %v3779_v51 }
 0x5bc   :  { %18290 = vst [vmem:[#allocation56_spill] sm:$0xff] %v15629_v33  ;;  %v2774_v57 = vpop.f32.mrf.mxu2  ;;  %v4183_v19 = vmax.f32 %v3983_v58, 0.0  ;;  %v18325_v33 = vld [vmem:[#allocation4_spill] sm:$0xff] }
 0x5bd   :  { %v3030_v38 = vadd.f32 %v2774_v57, %v2153_v52 }
 0x5be   :  { %v1547_v56 = vpop.f32.mrf.mxu0  ;;  %v4383_v52 = vpack.c.bf16 %v4183_v19, %v4183_v19  ;;  %v13432_v19 = vld [vmem:[%s18139_s0 + $0x380] sm:$0xff] }
 0x5bf   :  { %v3524_v3 = vpop.f32.mrf.mxu3  ;;  %v2160_v10 = vpop.f32.mrf.mxu1 }
 0x5c0   :  { %v3780_v47 = vadd.f32 %v3524_v3, %v3030_v38  ;;  %v2161_v37 = vadd.f32 %v2160_v10, %v1547_v56  ;;  %v6559_v48 = vunpack.c.l.b16 %v4383_v52 }
 0x5c1   :  { %10959 = vmatmul.msk.bf16.gmra.mxu0 %vm822_vm0, %v15473_v25  ;;  %11278 = vmatmul.msk.bf16.gmra.mxu2 %vm822_vm0, %v13430_v41 }
 0x5c2   :  { %v3984_v34 = vadd.f32 %v15467_v40, %v3780_v47  ;;  %11115 = vmatmul.msk.bf16.gmra.mxu1 %vm822_vm0, %v15451_v0 }
 0x5c4   :  { %11406 = vmatmul.msk.bf16.gmra.mxu3 %vm822_vm0, %v13431_v6  ;;  %v4184_v35 = vmax.f32 %v3984_v34, 0.0  ;;  %v2777_v12 = vpop.f32.mrf.mxu2 }
 0x5c5   :  { %v3031_v59 = vadd.f32 %v2777_v12, %v2156_v49 }
 0x5c6   :  { %v4384_v50 = vpack.c.bf16 %v4184_v35, %v4184_v35  ;;  %v1549_v51 = vpop.f32.mrf.mxu0 }
 0x5c7   :  { %v3527_v2 = vpop.f32.mrf.mxu3  ;;  %v2162_v57 = vpop.f32.mrf.mxu1 }
 0x5c8   :  { %v6560_v21 = vunpack.c.l.b16 %v4384_v50  ;;  %v3781_v58 = vadd.f32 %v3527_v2, %v3031_v59  ;;  %v2163_v38 = vadd.f32 %v2162_v57, %v1549_v51 }
 0x5ca   :  { %v15645_v3 = vpack.c.b16 %v6560_v21, %v6559_v48  ;;  %v3985_v41 = vadd.f32 %v15467_v40, %v3781_v58 }
 0x5cc   :  { %18291 = vst [vmem:[#allocation57_spill] sm:$0xff] %v15645_v3  ;;  %v2779_v56 = vpop.f32.mrf.mxu2  ;;  %v4185_v49 = vmax.f32 %v3985_v41, 0.0  ;;  %v18324_v3 = vld [vmem:[#allocation46_spill] sm:$0xff] }
 0x5cd   :  { %v3032_v0 = vadd.f32 %v2779_v56, %v2158_v62 }
 0x5ce   :  { %v1552_v10 = vpop.f32.mrf.mxu0  ;;  %v4385_v62 = vpack.c.bf16 %v4185_v49, %v4185_v49  ;;  %v13433_v49 = vld [vmem:[%s18139_s0 + $0x388] sm:$0xff] }
 0x5cf   :  { %v3529_v47 = vpop.f32.mrf.mxu3  ;;  %v2165_v35 = vpop.f32.mrf.mxu1 }
 0x5d0   :  { %v3782_v34 = vadd.f32 %v3529_v47, %v3032_v0  ;;  %v2166_v52 = vadd.f32 %v2165_v35, %v1552_v10  ;;  %v6351_v58 = vunpack.c.l.b16 %v4385_v62 }
 0x5d1   :  { %10960 = vmatmul.msk.bf16.gmra.mxu0 %vm822_vm0, %v15490_v1  ;;  %11279 = vmatmul.msk.bf16.gmra.mxu2 %vm822_vm0, %v13431_v6 }
 0x5d2   :  { %v3986_v12 = vadd.f32 %v15467_v40, %v3782_v34  ;;  %11116 = vmatmul.msk.bf16.gmra.mxu1 %vm822_vm0, %v15473_v25 }
 0x5d4   :  { %11407 = vmatmul.msk.bf16.gmra.mxu3 %vm822_vm0, %v13432_v19  ;;  %v4186_v50 = vmax.f32 %v3986_v12, 0.0  ;;  %v2782_v59 = vpop.f32.mrf.mxu2 }
 0x5d5   :  { %v3033_v51 = vadd.f32 %v2782_v59, %v2161_v37 }
 0x5d6   :  { %v4386_v2 = vpack.c.bf16 %v4186_v50, %v4186_v50  ;;  %v1554_v21 = vpop.f32.mrf.mxu0 }
 0x5d7   :  { %v3532_v48 = vpop.f32.mrf.mxu3  ;;  %v2167_v56 = vpop.f32.mrf.mxu1 }
 0x5d8   :  { %v6352_v57 = vunpack.c.l.b16 %v4386_v2  ;;  %v3783_v41 = vadd.f32 %v3532_v48, %v3033_v51  ;;  %v2168_v0 = vadd.f32 %v2167_v56, %v1554_v21 }
 0x5da   :  { %v15658_v47 = vpack.c.b16 %v6352_v57, %v6351_v58  ;;  %v3987_v6 = vadd.f32 %v15467_v40, %v3783_v41 }
 0x5dc   :  { %18292 = vst [vmem:[#allocation58_spill] sm:$0xff] %v15658_v47  ;;  %v2784_v10 = vpop.f32.mrf.mxu2  ;;  %v4187_v37 = vmax.f32 %v3987_v6, 0.0 }
 0x5dd   :  { %v3034_v25 = vadd.f32 %v2784_v10, %v2163_v38 }
 0x5de   :  { %v1557_v35 = vpop.f32.mrf.mxu0  ;;  %v4387_v38 = vpack.c.bf16 %v4187_v37, %v4187_v37  ;;  %v13434_v37 = vld [vmem:[%s18139_s0 + $0x390] sm:$0xff] }
 0x5df   :  { %v3534_v34 = vpop.f32.mrf.mxu3  ;;  %v2170_v50 = vpop.f32.mrf.mxu1 }
 0x5e0   :  { %v3784_v12 = vadd.f32 %v3534_v34, %v3034_v25  ;;  %v2171_v62 = vadd.f32 %v2170_v50, %v1557_v35  ;;  %v6561_v41 = vunpack.c.l.b16 %v4387_v38 }
 0x5e1   :  { %10961 = vmatmul.msk.bf16.gmra.mxu0 %vm822_vm0, %v15507_v43  ;;  %11280 = vmatmul.msk.bf16.gmra.mxu2 %vm822_vm0, %v13432_v19 }
 0x5e2   :  { %v3988_v59 = vadd.f32 %v15467_v40, %v3784_v12  ;;  %11117 = vmatmul.msk.bf16.gmra.mxu1 %vm822_vm0, %v15490_v1 }
 0x5e4   :  { %11408 = vmatmul.msk.bf16.gmra.mxu3 %vm822_vm0, %v13433_v49  ;;  %v4188_v2 = vmax.f32 %v3988_v59, 0.0  ;;  %v2787_v51 = vpop.f32.mrf.mxu2 }
 0x5e5   :  { %v3035_v21 = vadd.f32 %v2787_v51, %v2166_v52 }
 0x5e6   :  { %v4388_v48 = vpack.c.bf16 %v4188_v2, %v4188_v2  ;;  %v1559_v57 = vpop.f32.mrf.mxu0 }
 0x5e7   :  { %v3537_v58 = vpop.f32.mrf.mxu3  ;;  %v2172_v10 = vpop.f32.mrf.mxu1 }
 0x5e8   :  { %v6562_v56 = vunpack.c.l.b16 %v4388_v48  ;;  %v3785_v6 = vadd.f32 %v3537_v58, %v3035_v21  ;;  %v2173_v25 = vadd.f32 %v2172_v10, %v1559_v57 }
 0x5ea   :  { %v15671_v34 = vpack.c.b16 %v6562_v56, %v6561_v41  ;;  %v3989_v19 = vadd.f32 %v15467_v40, %v3785_v6 }
 0x5ec   :  { %18293 = vst [vmem:[#allocation59_spill] sm:$0xff] %v15671_v34  ;;  %v2789_v35 = vpop.f32.mrf.mxu2  ;;  %v4189_v52 = vmax.f32 %v3989_v19, 0.0 }
 0x5ed   :  { %v3036_v1 = vadd.f32 %v2789_v35, %v2168_v0 }
 0x5ee   :  { %v1562_v50 = vpop.f32.mrf.mxu0  ;;  %v4389_v0 = vpack.c.bf16 %v4189_v52, %v4189_v52  ;;  %v13435_v52 = vld [vmem:[%s18139_s0 + $0x398] sm:$0xff] }
 0x5ef   :  { %v3539_v12 = vpop.f32.mrf.mxu3  ;;  %v2175_v2 = vpop.f32.mrf.mxu1 }
 0x5f0   :  { %v3786_v59 = vadd.f32 %v3539_v12, %v3036_v1  ;;  %v2176_v38 = vadd.f32 %v2175_v2, %v1562_v50  ;;  %v6353_v6 = vunpack.c.l.b16 %v4389_v0 }
 0x5f1   :  { %10962 = vmatmul.msk.bf16.gmra.mxu0 %vm822_vm0, %v15524_v16  ;;  %11281 = vmatmul.msk.bf16.gmra.mxu2 %vm822_vm0, %v13433_v49 }
 0x5f2   :  { %v3990_v51 = vadd.f32 %v15467_v40, %v3786_v59  ;;  %11118 = vmatmul.msk.bf16.gmra.mxu1 %vm822_vm0, %v15507_v43 }
 0x5f4   :  { %11409 = vmatmul.msk.bf16.gmra.mxu3 %vm822_vm0, %v13434_v37  ;;  %v4190_v48 = vmax.f32 %v3990_v51, 0.0  ;;  %v2792_v21 = vpop.f32.mrf.mxu2 }
 0x5f5   :  { %v3037_v57 = vadd.f32 %v2792_v21, %v2171_v62 }
 0x5f6   :  { %v4390_v58 = vpack.c.bf16 %v4190_v48, %v4190_v48  ;;  %v1564_v56 = vpop.f32.mrf.mxu0 }
 0x5f7   :  { %v3542_v41 = vpop.f32.mrf.mxu3  ;;  %v2177_v35 = vpop.f32.mrf.mxu1 }
 0x5f8   :  { %v6354_v10 = vunpack.c.l.b16 %v4390_v58  ;;  %v3787_v19 = vadd.f32 %v3542_v41, %v3037_v57  ;;  %v2178_v1 = vadd.f32 %v2177_v35, %v1564_v56 }
 0x5fa   :  { %v15684_v12 = vpack.c.b16 %v6354_v10, %v6353_v6  ;;  %v3991_v49 = vadd.f32 %v15467_v40, %v3787_v19 }
 0x5fc   :  { %18294 = vst [vmem:[#allocation60_spill] sm:$0xff] %v15684_v12  ;;  %v2794_v50 = vpop.f32.mrf.mxu2  ;;  %v4191_v62 = vmax.f32 %v3991_v49, 0.0 }
 0x5fd   :  { %v3038_v43 = vadd.f32 %v2794_v50, %v2173_v25 }
 0x5fe   :  { %v1567_v2 = vpop.f32.mrf.mxu0  ;;  %v4391_v25 = vpack.c.bf16 %v4191_v62, %v4191_v62  ;;  %v13436_v62 = vld [vmem:[%s18139_s0 + $0x3a0] sm:$0xff] }
 0x5ff   :  { %v3544_v59 = vpop.f32.mrf.mxu3  ;;  %v2180_v48 = vpop.f32.mrf.mxu1 }
 0x600   :  { %v3788_v51 = vadd.f32 %v3544_v59, %v3038_v43  ;;  %v2181_v0 = vadd.f32 %v2180_v48, %v1567_v2  ;;  %v6563_v19 = vunpack.c.l.b16 %v4391_v25 }
 0x601   :  { %10963 = vmatmul.msk.bf16.gmra.mxu0 %vm822_vm0, %v15541_v15  ;;  %11282 = vmatmul.msk.bf16.gmra.mxu2 %vm822_vm0, %v13434_v37 }
 0x602   :  { %v3992_v21 = vadd.f32 %v15467_v40, %v3788_v51  ;;  %11119 = vmatmul.msk.bf16.gmra.mxu1 %vm822_vm0, %v15524_v16 }
 0x604   :  { %11410 = vmatmul.msk.bf16.gmra.mxu3 %vm822_vm0, %v13435_v52  ;;  %v4192_v58 = vmax.f32 %v3992_v21, 0.0  ;;  %v2797_v57 = vpop.f32.mrf.mxu2 }
 0x605   :  { %v3039_v56 = vadd.f32 %v2797_v57, %v2176_v38 }
 0x606   :  { %v4392_v41 = vpack.c.bf16 %v4192_v58, %v4192_v58  ;;  %v1569_v10 = vpop.f32.mrf.mxu0 }
 0x607   :  { %v3547_v6 = vpop.f32.mrf.mxu3  ;;  %v2182_v50 = vpop.f32.mrf.mxu1 }
 0x608   :  { %v6564_v35 = vunpack.c.l.b16 %v4392_v41  ;;  %v3789_v49 = vadd.f32 %v3547_v6, %v3039_v56  ;;  %v2183_v43 = vadd.f32 %v2182_v50, %v1569_v10 }
 0x60a   :  { %v15697_v59 = vpack.c.b16 %v6564_v35, %v6563_v19  ;;  %v3993_v37 = vadd.f32 %v15467_v40, %v3789_v49 }
 0x60c   :  { %18295 = vst [vmem:[#allocation61_spill] sm:$0xff] %v15697_v59  ;;  %v2799_v2 = vpop.f32.mrf.mxu2  ;;  %v4193_v38 = vmax.f32 %v3993_v37, 0.0 }
 0x60d   :  { %v3040_v16 = vadd.f32 %v2799_v2, %v2178_v1 }
 0x60e   :  { %v1572_v48 = vpop.f32.mrf.mxu0  ;;  %v4393_v1 = vpack.c.bf16 %v4193_v38, %v4193_v38  ;;  %v13437_v38 = vld [vmem:[%s18139_s0 + $0x3a8] sm:$0xff] }
 0x60f   :  { %v3549_v51 = vpop.f32.mrf.mxu3  ;;  %v2185_v58 = vpop.f32.mrf.mxu1 }
 0x610   :  { %v3790_v21 = vadd.f32 %v3549_v51, %v3040_v16  ;;  %v2186_v25 = vadd.f32 %v2185_v58, %v1572_v48  ;;  %v6355_v49 = vunpack.c.l.b16 %v4393_v1 }
 0x611   :  { %10964 = vmatmul.msk.bf16.gmra.mxu0 %vm822_vm0, %v15561_v17  ;;  %11283 = vmatmul.msk.bf16.gmra.mxu2 %vm822_vm0, %v13435_v52 }
 0x612   :  { %v3994_v57 = vadd.f32 %v15467_v40, %v3790_v21  ;;  %11120 = vmatmul.msk.bf16.gmra.mxu1 %vm822_vm0, %v15541_v15 }
 0x614   :  { %11411 = vmatmul.msk.bf16.gmra.mxu3 %vm822_vm0, %v13436_v62  ;;  %v4194_v41 = vmax.f32 %v3994_v57, 0.0  ;;  %v2802_v56 = vpop.f32.mrf.mxu2 }
 0x615   :  { %v3041_v10 = vadd.f32 %v2802_v56, %v2181_v0 }
 0x616   :  { %v4394_v6 = vpack.c.bf16 %v4194_v41, %v4194_v41  ;;  %v1574_v35 = vpop.f32.mrf.mxu0 }
 0x617   :  { %v3552_v19 = vpop.f32.mrf.mxu3  ;;  %v2187_v2 = vpop.f32.mrf.mxu1 }
 0x618   :  { %v6356_v50 = vunpack.c.l.b16 %v4394_v6  ;;  %v3791_v37 = vadd.f32 %v3552_v19, %v3041_v10  ;;  %v2188_v16 = vadd.f32 %v2187_v2, %v1574_v35 }
 0x61a   :  { %v15710_v51 = vpack.c.b16 %v6356_v50, %v6355_v49  ;;  %v3995_v52 = vadd.f32 %v15467_v40, %v3791_v37 }
 0x61c   :  { %18296 = vst [vmem:[#allocation62_spill] sm:$0xff] %v15710_v51  ;;  %v2804_v48 = vpop.f32.mrf.mxu2  ;;  %v4195_v0 = vmax.f32 %v3995_v52, 0.0 }
 0x61d   :  { %v3042_v15 = vadd.f32 %v2804_v48, %v2183_v43 }
 0x61e   :  { %v1577_v58 = vpop.f32.mrf.mxu0  ;;  %v4395_v43 = vpack.c.bf16 %v4195_v0, %v4195_v0  ;;  %v13438_v0 = vld [vmem:[%s18139_s0 + $0x3b0] sm:$0xff] }
 0x61f   :  { %v3554_v21 = vpop.f32.mrf.mxu3  ;;  %v2190_v41 = vpop.f32.mrf.mxu1 }
 0x620   :  { %v3792_v57 = vadd.f32 %v3554_v21, %v3042_v15  ;;  %v2191_v1 = vadd.f32 %v2190_v41, %v1577_v58  ;;  %v6565_v37 = vunpack.c.l.b16 %v4395_v43 }
 0x621   :  { %10965 = vmatmul.msk.bf16.gmra.mxu0 %vm822_vm0, %v15578_v20  ;;  %11284 = vmatmul.msk.bf16.gmra.mxu2 %vm822_vm0, %v13436_v62 }
 0x622   :  { %v3996_v56 = vadd.f32 %v15467_v40, %v3792_v57  ;;  %11121 = vmatmul.msk.bf16.gmra.mxu1 %vm822_vm0, %v15561_v17 }
 0x624   :  { %11412 = vmatmul.msk.bf16.gmra.mxu3 %vm822_vm0, %v13437_v38  ;;  %v4196_v6 = vmax.f32 %v3996_v56, 0.0  ;;  %v2807_v10 = vpop.f32.mrf.mxu2 }
 0x625   :  { %v3043_v35 = vadd.f32 %v2807_v10, %v2186_v25 }
 0x626   :  { %v4396_v19 = vpack.c.bf16 %v4196_v6, %v4196_v6  ;;  %v1579_v50 = vpop.f32.mrf.mxu0 }
 0x627   :  { %v3557_v49 = vpop.f32.mrf.mxu3  ;;  %v2192_v48 = vpop.f32.mrf.mxu1 }
 0x628   :  { %v6566_v2 = vunpack.c.l.b16 %v4396_v19  ;;  %v3793_v52 = vadd.f32 %v3557_v49, %v3043_v35  ;;  %v2193_v15 = vadd.f32 %v2192_v48, %v1579_v50 }
 0x62a   :  { %v15723_v21 = vpack.c.b16 %v6566_v2, %v6565_v37  ;;  %v3997_v62 = vadd.f32 %v15467_v40, %v3793_v52 }
 0x62c   :  { %18297 = vst [vmem:[#allocation63_spill] sm:$0xff] %v15723_v21  ;;  %v2809_v58 = vpop.f32.mrf.mxu2  ;;  %v4197_v25 = vmax.f32 %v3997_v62, 0.0 }
 0x62d   :  { %v3044_v17 = vadd.f32 %v2809_v58, %v2188_v16 }
 0x62e   :  { %v1582_v41 = vpop.f32.mrf.mxu0  ;;  %v4397_v16 = vpack.c.bf16 %v4197_v25, %v4197_v25  ;;  %v13439_v25 = vld [vmem:[%s18139_s0 + $0x3b8] sm:$0xff] }
 0x62f   :  { %v3559_v57 = vpop.f32.mrf.mxu3  ;;  %v2195_v6 = vpop.f32.mrf.mxu1 }
 0x630   :  { %v3794_v56 = vadd.f32 %v3559_v57, %v3044_v17  ;;  %v2196_v43 = vadd.f32 %v2195_v6, %v1582_v41  ;;  %v6763_v52 = vunpack.c.l.b16 %v4397_v16  ;;  %v13496_v16 = vld [vmem:[%s18140_s3 + $0x138] sm:$0xff] }
 0x631   :  { %10966 = vmatmul.msk.bf16.gmra.mxu0 %vm822_vm0, %v15602_v54  ;;  %11285 = vmatmul.msk.bf16.gmra.mxu2 %vm822_vm0, %v13437_v38 }
 0x632   :  { %v3998_v10 = vadd.f32 %v15467_v40, %v3794_v56  ;;  %11122 = vmatmul.msk.bf16.gmra.mxu1 %vm822_vm0, %v15578_v20  ;;  %5501 = vmatpush.bf16.msra.mxu0 %v13496_v16 }
 0x634   :  { %11413 = vmatmul.msk.bf16.gmra.mxu3 %vm822_vm0, %v13438_v0  ;;  %v4198_v19 = vmax.f32 %v3998_v10, 0.0  ;;  %v2812_v35 = vpop.f32.mrf.mxu2 }
 0x635   :  { %v3045_v50 = vadd.f32 %v2812_v35, %v2191_v1 }
 0x636   :  { %v4398_v49 = vpack.c.bf16 %v4198_v19, %v4198_v19  ;;  %v1584_v2 = vpop.f32.mrf.mxu0 }
 0x637   :  { %v3562_v37 = vpop.f32.mrf.mxu3  ;;  %v2197_v58 = vpop.f32.mrf.mxu1 }
 0x638   :  { %v6764_v48 = vunpack.c.l.b16 %v4398_v49  ;;  %v3795_v62 = vadd.f32 %v3562_v37, %v3045_v50  ;;  %v2198_v17 = vadd.f32 %v2197_v58, %v1584_v2 }
 0x63a   :  { %v15736_v54 = vpack.c.b16 %v6764_v48, %v6763_v52  ;;  %v3999_v38 = vadd.f32 %v15467_v40, %v3795_v62 }
 0x63c   :  { %18298 = vst [vmem:[#allocation64_spill] sm:$0xff] %v15736_v54  ;;  %v2814_v57 = vpop.f32.mrf.mxu2  ;;  %v4199_v1 = vmax.f32 %v3999_v38, 0.0  ;;  %v13506_v54 = vld [vmem:[%s18140_s3 + $0x188] sm:$0xff] }
 0x63d   :  { %v3046_v20 = vadd.f32 %v2814_v57, %v2193_v15 }
 0x63e   :  { %v1587_v56 = vpop.f32.mrf.mxu0  ;;  %v4399_v15 = vpack.c.bf16 %v4199_v1, %v4199_v1  ;;  %v13440_v1 = vld [vmem:[%s18139_s0 + $0x3c0] sm:$0xff] }
 0x63f   :  { %v3564_v41 = vpop.f32.mrf.mxu3  ;;  %v2200_v10 = vpop.f32.mrf.mxu1 }
 0x640   :  { %v3796_v6 = vadd.f32 %v3564_v41, %v3046_v20  ;;  %v2201_v19 = vadd.f32 %v2200_v10, %v1587_v56  ;;  %v6955_v62 = vunpack.c.l.b16 %v4399_v15 }
 0x641   :  { %11286 = vmatmul.msk.bf16.gmra.mxu2 %vm822_vm0, %v13438_v0  ;;  %4606 = vmatmul.bf16.vlgmr.msrb.gmra.mxu0 %v14150_v61  ;;  %v15755_v61 = vld [vmem:[%s18141_s2] ss:$0 sm:$0xff] }
 0x642   :  { %v4000_v35 = vadd.f32 %v15467_v40, %v3796_v6  ;;  %4839 = vmatmul.bf16.vlgmr.msrb.gmra.mxu1 %v14128_v28 }
 0x644   :  { %11414 = vmatmul.msk.bf16.gmra.mxu3 %vm822_vm0, %v13439_v25  ;;  %v4200_v49 = vmax.f32 %v4000_v35, 0.0  ;;  %v2817_v50 = vpop.f32.mrf.mxu2 }
 0x645   :  { %v3047_v2 = vadd.f32 %v2817_v50, %v2196_v43 }
 0x646   :  { %v4400_v37 = vpack.c.bf16 %v4200_v49, %v4200_v49  ;;  %v1589_v48 = vpop.f32.mrf.mxu0 }
 0x647   :  { %v3567_v52 = vpop.f32.mrf.mxu3  ;;  %v2202_v40 = vpop.f32.mrf.mxu1 }
 0x648   :  { %v6956_v58 = vunpack.c.l.b16 %v4400_v37  ;;  %v3797_v38 = vadd.f32 %v3567_v52, %v3047_v2  ;;  %v2203_v57 = vadd.f32 %v2202_v40, %v1589_v48 }
 0x64a   :  { %v15750_v0 = vpack.c.b16 %v6956_v58, %v6955_v62  ;;  %v4001_v28 = vadd.f32 %v15755_v61, %v3797_v38 }
 0x64c   :  { %18299 = vst [vmem:[#allocation65_spill] sm:$0xff] %v15750_v0  ;;  %v2819_v20 = vpop.f32.mrf.mxu2  ;;  %v4201_v6 = vmax.f32 %v4001_v28, 0.0 }
 0x64d   :  { %v3048_v41 = vadd.f32 %v2819_v20, %v2198_v17 }
 0x64e   :  { %v1592_v43 = vpop.f32.mrf.mxu0  ;;  %v4401_v17 = vpack.c.bf16 %v4201_v6, %v4201_v6 }
 0x64f   :  { %v3569_v56 = vpop.f32.mrf.mxu3  ;;  %v2205_v16 = vpop.f32.mrf.mxu1 }
 0x650   :  { %v3798_v10 = vadd.f32 %v3569_v56, %v3048_v41  ;;  %v2206_v35 = vadd.f32 %v2205_v16, %v1592_v43  ;;  %v7153_v62 = vunpack.c.l.b16 %v4401_v17 }
 0x651   :  { %11287 = vmatmul.msk.bf16.gmra.mxu2 %vm822_vm0, %v13439_v25  ;;  %4611 = vmatmul.bf16.gmra.mxu0 %v14187_v60 }
 0x652   :  { %v4002_v15 = vadd.f32 %v15755_v61, %v3798_v10  ;;  %4844 = vmatmul.bf16.gmra.mxu1 %v14170_v27 }
 0x654   :  { %11415 = vmatmul.msk.bf16.gmra.mxu3 %vm822_vm0, %v13440_v1  ;;  %v4202_v49 = vmax.f32 %v4002_v15, 0.0  ;;  %v2822_v50 = vpop.f32.mrf.mxu2 }
 0x655   :  { %v3049_v2 = vadd.f32 %v2822_v50, %v2201_v19  ;;  %v13495_v19 = vld [vmem:[%s18140_s3 + $0x130] sm:$0xff] }
 0x656   :  { %v4402_v37 = vpack.c.bf16 %v4202_v49, %v4202_v49  ;;  %v1594_v48 = vpop.f32.mrf.mxu0  ;;  %5502 = vmatpush.bf16.msra.mxu0 %v13495_v19 }
 0x657   :  { %v3572_v52 = vpop.f32.mrf.mxu3  ;;  %v2207_v40 = vpop.f32.mrf.mxu1 }
 0x658   :  { %v7154_v58 = vunpack.c.l.b16 %v4402_v37  ;;  %v3799_v38 = vadd.f32 %v3572_v52, %v3049_v2  ;;  %v2208_v28 = vadd.f32 %v2207_v40, %v1594_v48 }
 0x65a   :  { %v15766_v20 = vpack.c.b16 %v7154_v58, %v7153_v62  ;;  %v4003_v25 = vadd.f32 %v15755_v61, %v3799_v38 }
 0x65c   :  { %18300 = vst [vmem:[#allocation66_spill] sm:$0xff] %v15766_v20  ;;  %v2824_v41 = vpop.f32.mrf.mxu2  ;;  %v4203_v6 = vmax.f32 %v4003_v25, 0.0 }
 0x65d   :  { %v3050_v56 = vadd.f32 %v2824_v41, %v2203_v57 }
 0x65e   :  { %v1597_v1 = vpop.f32.mrf.mxu0  ;;  %v4403_v57 = vpack.c.bf16 %v4203_v6, %v4203_v6 }
 0x65f   :  { %v3574_v43 = vpop.f32.mrf.mxu3  ;;  %v2210_v16 = vpop.f32.mrf.mxu1 }
 0x660   :  { %v3800_v10 = vadd.f32 %v3574_v43, %v3050_v56  ;;  %v2211_v15 = vadd.f32 %v2210_v16, %v1597_v1  ;;  %v7363_v62 = vunpack.c.l.b16 %v4403_v57 }
 0x661   :  { %4616 = vmatmul.bf16.gmra.mxu0 %v14227_v23  ;;  %5017 = vmatmul.bf16.vlgmr.msra.gmra.mxu2 %v14170_v27 }
 0x662   :  { %v4004_v17 = vadd.f32 %v15755_v61, %v3800_v10  ;;  %4849 = vmatmul.bf16.gmra.mxu1 %v14204_v24 }
 0x664   :  { %5227 = vmatmul.bf16.vlgmr.msra.gmra.mxu3 %v14187_v60  ;;  %v4204_v49 = vmax.f32 %v4004_v17, 0.0  ;;  %v2827_v50 = vpop.f32.mrf.mxu2 }
 0x665   :  { %v3051_v2 = vadd.f32 %v2827_v50, %v2206_v35 }
 0x666   :  { %v4404_v37 = vpack.c.bf16 %v4204_v49, %v4204_v49  ;;  %v1599_v48 = vpop.f32.mrf.mxu0 }
 0x667   :  { %v3577_v52 = vpop.f32.mrf.mxu3  ;;  %v2212_v40 = vpop.f32.mrf.mxu1 }
 0x668   :  { %v7364_v58 = vunpack.c.l.b16 %v4404_v37  ;;  %v3801_v38 = vadd.f32 %v3577_v52, %v3051_v2  ;;  %v2213_v25 = vadd.f32 %v2212_v40, %v1599_v48 }
 0x66a   :  { %v15777_v41 = vpack.c.b16 %v7364_v58, %v7363_v62  ;;  %v4005_v27 = vadd.f32 %v15755_v61, %v3801_v38  ;;  %v13512_v38 = vld [vmem:[%s18140_s3 + $0x1b8] sm:$0xff] }
 0x66b   :  { %5993 = vmatpush.bf16.msrb.mxu2 %v13512_v38 }
 0x66c   :  { %18301 = vst [vmem:[#allocation67_spill] sm:$0xff] %v15777_v41  ;;  %v2829_v56 = vpop.f32.mrf.mxu2  ;;  %v4205_v6 = vmax.f32 %v4005_v27, 0.0 }
 0x66d   :  { %v3052_v43 = vadd.f32 %v2829_v56, %v2208_v28 }
 0x66e   :  { %v1602_v1 = vpop.f32.mrf.mxu0  ;;  %v4405_v17 = vpack.c.bf16 %v4205_v6, %v4205_v6 }
 0x66f   :  { %v3579_v60 = vpop.f32.mrf.mxu3  ;;  %v2215_v16 = vpop.f32.mrf.mxu1 }
 0x670   :  { %v3802_v10 = vadd.f32 %v3579_v60, %v3052_v43  ;;  %v2216_v19 = vadd.f32 %v2215_v16, %v1602_v1  ;;  %v7155_v52 = vunpack.c.l.b16 %v4405_v17 }
 0x671   :  { %4621 = vmatmul.bf16.gmra.mxu0 %v14264_v4  ;;  %5022 = vmatmul.bf16.gmra.mxu2 %v14204_v24  ;;  %v13520_v24 = vld [vmem:[%s18140_s3 + $0x1f8] sm:$0xff] }
 0x672   :  { %v4006_v35 = vadd.f32 %v15755_v61, %v3802_v10  ;;  %4854 = vmatmul.bf16.gmra.mxu1 %v14247_v22  ;;  %6203 = vmatpush.bf16.msrb.mxu3 %v13520_v24 }
 0x674   :  { %5232 = vmatmul.bf16.gmra.mxu3 %v14227_v23  ;;  %v4206_v57 = vmax.f32 %v4006_v35, 0.0  ;;  %v2832_v49 = vpop.f32.mrf.mxu2  ;;  %v13504_v23 = vld [vmem:[%s18140_s3 + $0x178] sm:$0xff]  ;;  %v13494_v35 = vld [vmem:[%s18140_s3 + $0x128] sm:$0xff] }
 0x675   :  { %v3053_v50 = vadd.f32 %v2832_v49, %v2211_v15  ;;  %5783 = vmatpush.bf16.msra.mxu1 %v13504_v23  ;;  %5503 = vmatpush.bf16.msra.mxu0 %v13494_v35 }
 0x676   :  { %v4406_v28 = vpack.c.bf16 %v4206_v57, %v4206_v57  ;;  %v1604_v2 = vpop.f32.mrf.mxu0 }
 0x677   :  { %v3582_v37 = vpop.f32.mrf.mxu3  ;;  %v2217_v58 = vpop.f32.mrf.mxu1 }
 0x678   :  { %v7156_v48 = vunpack.c.l.b16 %v4406_v28  ;;  %v3803_v62 = vadd.f32 %v3582_v37, %v3053_v50  ;;  %v2218_v40 = vadd.f32 %v2217_v58, %v1604_v2 }
 0x67a   :  { %v15794_v15 = vpack.c.b16 %v7156_v48, %v7155_v52  ;;  %v4007_v27 = vadd.f32 %v15755_v61, %v3803_v62 }
 0x67c   :  { %18302 = vst [vmem:[#allocation68_spill] sm:$0xff] %v15794_v15  ;;  %v2834_v56 = vpop.f32.mrf.mxu2  ;;  %v4207_v6 = vmax.f32 %v4007_v27, 0.0 }
 0x67d   :  { %v3054_v43 = vadd.f32 %v2834_v56, %v2213_v25 }
 0x67e   :  { %v1607_v1 = vpop.f32.mrf.mxu0  ;;  %v4407_v25 = vpack.c.bf16 %v4207_v6, %v4207_v6 }
 0x67f   :  { %v3584_v60 = vpop.f32.mrf.mxu3  ;;  %v2220_v16 = vpop.f32.mrf.mxu1 }
 0x680   :  { %v3804_v10 = vadd.f32 %v3584_v60, %v3054_v43  ;;  %v2221_v17 = vadd.f32 %v2220_v16, %v1607_v1  ;;  %v7365_v48 = vunpack.c.l.b16 %v4407_v25 }
 0x681   :  { %4626 = vmatmul.bf16.gmra.mxu0 %v14529_v14  ;;  %5027 = vmatmul.bf16.gmra.mxu2 %v14247_v22 }
 0x682   :  { %v4008_v57 = vadd.f32 %v15755_v61, %v3804_v10  ;;  %4859 = vmatmul.bf16.gmra.mxu1 %v14507_v45 }
 0x684   :  { %5237 = vmatmul.bf16.gmra.mxu3 %v14264_v4  ;;  %v4208_v49 = vmax.f32 %v4008_v57, 0.0  ;;  %v2837_v28 = vpop.f32.mrf.mxu2 }
 0x685   :  { %v3055_v37 = vadd.f32 %v2837_v28, %v2216_v19 }
 0x686   :  { %v4408_v50 = vpack.c.bf16 %v4208_v49, %v4208_v49  ;;  %v1609_v52 = vpop.f32.mrf.mxu0 }
 0x687   :  { %v3587_v2 = vpop.f32.mrf.mxu3  ;;  %v2222_v38 = vpop.f32.mrf.mxu1 }
 0x688   :  { %v7366_v62 = vunpack.c.l.b16 %v4408_v50  ;;  %v3805_v58 = vadd.f32 %v3587_v2, %v3055_v37  ;;  %v2223_v24 = vadd.f32 %v2222_v38, %v1609_v52 }
 0x68a   :  { %v15805_v23 = vpack.c.b16 %v7366_v62, %v7365_v48  ;;  %v4009_v22 = vadd.f32 %v15755_v61, %v3805_v58  ;;  %v13511_v48 = vld [vmem:[%s18140_s3 + $0x1b0] sm:$0xff] }
 0x68b   :  { %5994 = vmatpush.bf16.msrb.mxu2 %v13511_v48 }
 0x68c   :  { %18303 = vst [vmem:[#allocation69_spill] sm:$0xff] %v15805_v23  ;;  %v2839_v27 = vpop.f32.mrf.mxu2  ;;  %v4209_v60 = vmax.f32 %v4009_v22, 0.0 }
 0x68d   :  { %v3056_v56 = vadd.f32 %v2839_v27, %v2218_v40 }
 0x68e   :  { %v1612_v43 = vpop.f32.mrf.mxu0  ;;  %v4409_v16 = vpack.c.bf16 %v4209_v60, %v4209_v60 }
 0x68f   :  { %v3589_v4 = vpop.f32.mrf.mxu3  ;;  %v2225_v6 = vpop.f32.mrf.mxu1 }
 0x690   :  { %v3806_v1 = vadd.f32 %v3589_v4, %v3056_v56  ;;  %v2226_v10 = vadd.f32 %v2225_v6, %v1612_v43  ;;  %v7157_v50 = vunpack.c.l.b16 %v4409_v16 }
 0x691   :  { %4631 = vmatmul.bf16.gmra.mxu0 %v14563_v29  ;;  %5032 = vmatmul.bf16.gmra.mxu2 %v14281_v42  ;;  %v13519_v42 = vld [vmem:[%s18140_s3 + $0x1f0] sm:$0xff] }
 0x692   :  { %v4010_v19 = vadd.f32 %v15755_v61, %v3806_v1  ;;  %4864 = vmatmul.bf16.gmra.mxu1 %v14546_v44  ;;  %6204 = vmatpush.bf16.msrb.mxu3 %v13519_v42  ;;  %v13493_v1 = vld [vmem:[%s18140_s3 + $0x120] sm:$0xff] }
 0x693   :  { %5504 = vmatpush.bf16.msra.mxu0 %v13493_v1 }
 0x694   :  { %5242 = vmatmul.bf16.gmra.mxu3 %v14298_v9  ;;  %v4210_v35 = vmax.f32 %v4010_v19, 0.0  ;;  %v2842_v57 = vpop.f32.mrf.mxu2  ;;  %v13503_v9 = vld [vmem:[%s18140_s3 + $0x170] sm:$0xff] }
 0x695   :  { %v3057_v25 = vadd.f32 %v2842_v57, %v2221_v17  ;;  %5784 = vmatpush.bf16.msra.mxu1 %v13503_v9 }
 0x696   :  { %v4410_v40 = vpack.c.bf16 %v4210_v35, %v4210_v35  ;;  %v1614_v28 = vpop.f32.mrf.mxu0 }
 0x697   :  { %v3592_v49 = vpop.f32.mrf.mxu3  ;;  %v2227_v52 = vpop.f32.mrf.mxu1 }
 0x698   :  { %v7158_v37 = vunpack.c.l.b16 %v4410_v40  ;;  %v3807_v2 = vadd.f32 %v3592_v49, %v3057_v25  ;;  %v2228_v62 = vadd.f32 %v2227_v52, %v1614_v28 }
 0x69a   :  { %v15822_v17 = vpack.c.b16 %v7158_v37, %v7157_v50  ;;  %v4011_v58 = vadd.f32 %v15755_v61, %v3807_v2 }
 0x69c   :  { %18304 = vst [vmem:[#allocation70_spill] sm:$0xff] %v15822_v17  ;;  %v2844_v38 = vpop.f32.mrf.mxu2  ;;  %v4211_v4 = vmax.f32 %v4011_v58, 0.0  ;;  %v18319_v17 = vld [vmem:[#allocation42_spill] sm:$0xff] }
 0x69d   :  { %v3058_v22 = vadd.f32 %v2844_v38, %v2223_v24 }
 0x69e   :  { %v1617_v56 = vpop.f32.mrf.mxu0  ;;  %v4411_v24 = vpack.c.bf16 %v4211_v4, %v4211_v4 }
 0x69f   :  { %v3594_v27 = vpop.f32.mrf.mxu3  ;;  %v2230_v60 = vpop.f32.mrf.mxu1 }
 0x6a0   :  { %v3808_v43 = vadd.f32 %v3594_v27, %v3058_v22  ;;  %v2231_v6 = vadd.f32 %v2230_v60, %v1617_v56  ;;  %v7367_v28 = vunpack.c.l.b16 %v4411_v24 }
 0x6a1   :  { %4636 = vmatmul.bf16.gmra.mxu0 %v14597_v55  ;;  %5037 = vmatmul.bf16.gmra.mxu2 %v14546_v44 }
 0x6a2   :  { %v4012_v19 = vadd.f32 %v15755_v61, %v3808_v43  ;;  %4869 = vmatmul.bf16.gmra.mxu1 %v14580_v63 }
 0x6a4   :  { %5247 = vmatmul.bf16.gmra.mxu3 %v14563_v29  ;;  %v4212_v16 = vmax.f32 %v4012_v19, 0.0  ;;  %v2847_v35 = vpop.f32.mrf.mxu2 }
 0x6a5   :  { %v3059_v40 = vadd.f32 %v2847_v35, %v2226_v10 }
 0x6a6   :  { %v4412_v57 = vpack.c.bf16 %v4212_v16, %v4212_v16  ;;  %v1619_v49 = vpop.f32.mrf.mxu0 }
 0x6a7   :  { %v3597_v25 = vpop.f32.mrf.mxu3  ;;  %v2232_v2 = vpop.f32.mrf.mxu1 }
 0x6a8   :  { %v7368_v50 = vunpack.c.l.b16 %v4412_v57  ;;  %v3809_v37 = vadd.f32 %v3597_v25, %v3059_v40  ;;  %v2233_v52 = vadd.f32 %v2232_v2, %v1619_v49 }
 0x6aa   :  { %v15833_v48 = vpack.c.b16 %v7368_v50, %v7367_v28  ;;  %v4013_v42 = vadd.f32 %v15755_v61, %v3809_v37  ;;  %v13510_v28 = vld [vmem:[%s18140_s3 + $0x1a8] sm:$0xff] }
 0x6ab   :  { %v13518_v50 = vld [vmem:[%s18140_s3 + $0x1e8] sm:$0xff]  ;;  %5995 = vmatpush.bf16.msrb.mxu2 %v13510_v28 }
 0x6ac   :  { %18305 = vst [vmem:[#allocation71_spill] sm:$0xff] %v15833_v48  ;;  %v2849_v9 = vpop.f32.mrf.mxu2  ;;  %v4213_v27 = vmax.f32 %v4013_v42, 0.0  ;;  %v13502_v37 = vld [vmem:[%s18140_s3 + $0x168] sm:$0xff]  ;;  %6205 = vmatpush.bf16.msrb.mxu3 %v13518_v50 }
 0x6ad   :  { %v3060_v58 = vadd.f32 %v2849_v9, %v2228_v62  ;;  %5785 = vmatpush.bf16.msra.mxu1 %v13502_v37  ;;  %v13498_v48 = vld [vmem:[%s18140_s3 + $0x148] sm:$0xff] }
 0x6ae   :  { %v1622_v22 = vpop.f32.mrf.mxu0  ;;  %v4413_v60 = vpack.c.bf16 %v4213_v27, %v4213_v27 }
 0x6af   :  { %v3599_v38 = vpop.f32.mrf.mxu3  ;;  %v2235_v4 = vpop.f32.mrf.mxu1 }
 0x6b0   :  { %v3810_v56 = vadd.f32 %v3599_v38, %v3060_v58  ;;  %v2236_v43 = vadd.f32 %v2235_v4, %v1622_v22  ;;  %v7159_v57 = vunpack.c.l.b16 %v4413_v60 }
 0x6b1   :  { %4641 = vmatmul.bf16.gmra.mxu0 %v14634_v32  ;;  %5042 = vmatmul.bf16.gmra.mxu2 %v14580_v63 }
 0x6b2   :  { %v4014_v10 = vadd.f32 %v15755_v61, %v3810_v56  ;;  %4874 = vmatmul.bf16.gmra.mxu1 %v14614_v39 }
 0x6b4   :  { %5252 = vmatmul.bf16.gmra.mxu3 %v14597_v55  ;;  %v4214_v1 = vmax.f32 %v4014_v10, 0.0  ;;  %v2852_v19 = vpop.f32.mrf.mxu2  ;;  %v13492_v10 = vld [vmem:[%s18140_s3 + $0x118] sm:$0xff] }
 0x6b5   :  { %v3061_v24 = vadd.f32 %v2852_v19, %v2231_v6  ;;  %5505 = vmatpush.bf16.msra.mxu0 %v13492_v10  ;;  %v13509_v10 = vld [vmem:[%s18140_s3 + $0x1a0] sm:$0xff] }
 0x6b6   :  { %v4414_v62 = vpack.c.bf16 %v4214_v1, %v4214_v1  ;;  %v1624_v35 = vpop.f32.mrf.mxu0  ;;  %5996 = vmatpush.bf16.msrb.mxu2 %v13509_v10 }
 0x6b7   :  { %v3602_v16 = vpop.f32.mrf.mxu3  ;;  %v2237_v49 = vpop.f32.mrf.mxu1 }
 0x6b8   :  { %v7160_v40 = vunpack.c.l.b16 %v4414_v62  ;;  %v3811_v25 = vadd.f32 %v3602_v16, %v3061_v24  ;;  %v2238_v2 = vadd.f32 %v2237_v49, %v1624_v35 }
 0x6ba   :  { %v15850_v6 = vpack.c.b16 %v7160_v40, %v7159_v57  ;;  %v4015_v42 = vadd.f32 %v15755_v61, %v3811_v25 }
 0x6bc   :  { %18306 = vst [vmem:[#allocation72_spill] sm:$0xff] %v15850_v6  ;;  %v2854_v9 = vpop.f32.mrf.mxu2  ;;  %v4215_v27 = vmax.f32 %v4015_v42, 0.0  ;;  %v13489_v6 = vld [vmem:[%s18140_s3 + $0x100] sm:$0xff] }
 0x6bd   :  { %v3062_v58 = vadd.f32 %v2854_v9, %v2233_v52 }
 0x6be   :  { %v4607_v22 = vpop.f32.mrf.mxu0  ;;  %v4415_v52 = vpack.c.bf16 %v4215_v27, %v4215_v27 }
 0x6bf   :  { %v3604_v38 = vpop.f32.mrf.mxu3  ;;  %v4840_v4 = vpop.f32.mrf.mxu1 }
 0x6c0   :  { %v3812_v56 = vadd.f32 %v3604_v38, %v3062_v58  ;;  %v15856_v60 = vadd.f32 %v4840_v4, %v4607_v22  ;;  %v7369_v40 = vunpack.c.l.b16 %v4415_v52 }
 0x6c1   :  { %4646 = vmatmul.bf16.gmra.mxu0 %v14899_v11  ;;  %5047 = vmatmul.bf16.gmra.mxu2 %v14614_v39 }
 0x6c2   :  { %v4016_v1 = vadd.f32 %v15755_v61, %v3812_v56  ;;  %4879 = vmatmul.bf16.gmra.mxu1 %v14877_v8 }
 0x6c4   :  { %5257 = vmatmul.bf16.gmra.mxu3 %v14634_v32  ;;  %v4216_v19 = vmax.f32 %v4016_v1, 0.0  ;;  %v2857_v62 = vpop.f32.mrf.mxu2  ;;  %v13517_v1 = vld [vmem:[%s18140_s3 + $0x1e0] sm:$0xff] }
 0x6c5   :  { %v3063_v16 = vadd.f32 %v2857_v62, %v2236_v43  ;;  %6206 = vmatpush.bf16.msrb.mxu3 %v13517_v1 }
 0x6c6   :  { %v4416_v24 = vpack.c.bf16 %v4216_v19, %v4216_v19  ;;  %v4609_v57 = vpop.f32.mrf.mxu0 }
 0x6c7   :  { %v3607_v35 = vpop.f32.mrf.mxu3  ;;  %v4842_v28 = vpop.f32.mrf.mxu1 }
 0x6c8   :  { %v7370_v25 = vunpack.c.l.b16 %v4416_v24  ;;  %v3813_v49 = vadd.f32 %v3607_v35, %v3063_v16  ;;  %v15863_v50 = vadd.f32 %v4842_v28, %v4609_v57 }
 0x6ca   :  { %v15865_v37 = vpack.c.b16 %v7370_v25, %v7369_v40  ;;  %v4017_v42 = vadd.f32 %v15755_v61, %v3813_v49 }
 0x6cc   :  { %18307 = vst [vmem:[#allocation73_spill] sm:$0xff] %v15865_v37  ;;  %v2859_v9 = vpop.f32.mrf.mxu2  ;;  %v4217_v27 = vmax.f32 %v4017_v42, 0.0 }
 0x6cd   :  { %v3064_v58 = vadd.f32 %v2859_v9, %v2238_v2  ;;  %v13501_v2 = vld [vmem:[%s18140_s3 + $0x160] sm:$0xff] }
 0x6ce   :  { %v4612_v22 = vpop.f32.mrf.mxu0  ;;  %v4417_v19 = vpack.c.bf16 %v4217_v27, %v4217_v27  ;;  %5786 = vmatpush.bf16.msra.mxu1 %v13501_v2 }
 0x6cf   :  { %v3609_v38 = vpop.f32.mrf.mxu3  ;;  %v4845_v4 = vpop.f32.mrf.mxu1 }
 0x6d0   :  { %v3814_v56 = vadd.f32 %v3609_v38, %v3064_v58  ;;  %v15868_v43 = vadd.f32 %v4845_v4, %v4612_v22  ;;  %v7567_v25 = vunpack.c.l.b16 %v4417_v19  ;;  %v13491_v58 = vld [vmem:[%s18140_s3 + $0x110] sm:$0xff] }
 0x6d1   :  { %4651 = vmatmul.bf16.gmra.mxu0 %v14942_v30  ;;  %5052 = vmatmul.bf16.gmra.mxu2 %v14651_v13 }
 0x6d2   :  { %v4018_v52 = vadd.f32 %v15755_v61, %v3814_v56  ;;  %4884 = vmatmul.bf16.gmra.mxu1 %v14916_v7  ;;  %5506 = vmatpush.bf16.msra.mxu0 %v13491_v58 }
 0x6d4   :  { %5262 = vmatmul.bf16.gmra.mxu3 %v14668_v26  ;;  %v4218_v62 = vmax.f32 %v4018_v52, 0.0  ;;  %v2862_v24 = vpop.f32.mrf.mxu2 }
 0x6d5   :  { %v3065_v35 = vadd.f32 %v2862_v24, %v14090_v46 }
 0x6d6   :  { %v4418_v16 = vpack.c.bf16 %v4218_v62, %v4218_v62  ;;  %v4614_v40 = vpop.f32.mrf.mxu0 }
 0x6d7   :  { %v3612_v57 = vpop.f32.mrf.mxu3  ;;  %v4847_v42 = vpop.f32.mrf.mxu1 }
 0x6d8   :  { %v7568_v49 = vunpack.c.l.b16 %v4418_v16  ;;  %v3815_v28 = vadd.f32 %v3612_v57, %v3065_v35  ;;  %v4848_v9 = vadd.f32 %v4847_v42, %v4614_v40 }
 0x6da   :  { %v15888_v38 = vpack.c.b16 %v7568_v49, %v7567_v25  ;;  %v4019_v22 = vadd.f32 %v15755_v61, %v3815_v28 }
 0x6dc   :  { %18308 = vst [vmem:[#allocation74_spill] sm:$0xff] %v15888_v38  ;;  %v2864_v27 = vpop.f32.mrf.mxu2  ;;  %v4219_v10 = vmax.f32 %v4019_v22, 0.0  ;;  %v13507_v38 = vld [vmem:[%s18140_s3 + $0x190] sm:$0xff] }
 0x6dd   :  { %v3066_v56 = vadd.f32 %v2864_v27, %v14095_v53 }
 0x6de   :  { %v4617_v4 = vpop.f32.mrf.mxu0  ;;  %v4419_v62 = vpack.c.bf16 %v4219_v10, %v4219_v10 }
 0x6df   :  { %v3614_v46 = vpop.f32.mrf.mxu3  ;;  %v4850_v52 = vpop.f32.mrf.mxu1 }
 0x6e0   :  { %v3816_v1 = vadd.f32 %v3614_v46, %v3066_v56  ;;  %v4851_v2 = vadd.f32 %v4850_v52, %v4617_v4  ;;  %v7759_v25 = vunpack.c.l.b16 %v4419_v62  ;;  %v13516_v52 = vld [vmem:[%s18140_s3 + $0x1d8] sm:$0xff]  ;;  %v18311_v62 = vld [vmem:[#allocation24_spill] sm:$0xff] }
 0x6e1   :  { %4656 = vmatmul.bf16.gmra.mxu0 %v14976_v5  ;;  %5057 = vmatmul.bf16.gmra.mxu2 %v14916_v7 }
 0x6e2   :  { %v4020_v19 = vadd.f32 %v15755_v61, %v3816_v1  ;;  %4889 = vmatmul.bf16.gmra.mxu1 %v14959_v31  ;;  %6207 = vmatpush.bf16.msrb.mxu3 %v13516_v52  ;;  %v18313_v52 = vld [vmem:[#allocation38_spill] sm:$0xff] }
 0x6e4   :  { %5267 = vmatmul.bf16.gmra.mxu3 %v14942_v30  ;;  %v4220_v24 = vmax.f32 %v4020_v19, 0.0  ;;  %v5018_v16 = vpop.f32.mrf.mxu2  ;;  %v18310_v19 = vld [vmem:[#allocation25_spill] sm:$0xff] }
 0x6e5   :  { %v5098_v35 = vadd.f32 %v5018_v16, %v15856_v60  ;;  %v13508_v60 = vld [vmem:[%s18140_s3 + $0x198] sm:$0xff] }
 0x6e6   :  { %v4420_v53 = vpack.c.bf16 %v4220_v24, %v4220_v24  ;;  %v4619_v40 = vpop.f32.mrf.mxu0  ;;  %5997 = vmatpush.bf16.msrb.mxu2 %v13508_v60 }
 0x6e7   :  { %v5228_v57 = vpop.f32.mrf.mxu3  ;;  %v4852_v61 = vpop.f32.mrf.mxu1 }
 0x6e8   :  { %v7760_v49 = vunpack.c.l.b16 %v4420_v53  ;;  %v15898_v28 = vadd.f32 %v5228_v57, %v5098_v35  ;;  %v4853_v42 = vadd.f32 %v4852_v61, %v4619_v40 }
 0x6ea   :  { %v15900_v58 = vpack.c.b16 %v7760_v49, %v7759_v25  ;;  %v13490_v49 = vld [vmem:[%s18140_s3 + $0x108] sm:$0xff]  ;;  %5998 = vmatpush.bf16.msrb.mxu2 %v13507_v38 }
 0x6eb   :  { %5507 = vmatpush.bf16.msra.mxu0 %v13490_v49 }
 0x6ec   :  { %18309 = vst [vmem:[#allocation75_spill] sm:$0xff] %v15900_v58  ;;  %v5020_v22 = vpop.f32.mrf.mxu2 }
 0x6ed   :  { %v5099_v27 = vadd.f32 %v5020_v22, %v15863_v50  ;;  %v13500_v50 = vld [vmem:[%s18140_s3 + $0x158] sm:$0xff] }
 0x6ee   :  { %v4622_v46 = vpop.f32.mrf.mxu0  ;;  %5787 = vmatpush.bf16.msra.mxu1 %v13500_v50  ;;  %5999 = vmatpush.bf16.msrb.mxu2 %v13506_v54  ;;  %v13505_v54 = vld [vmem:[%s18140_s3 + $0x180] sm:$0xff] }
 0x6ef   :  { %v5230_v56 = vpop.f32.mrf.mxu3  ;;  %v4855_v10 = vpop.f32.mrf.mxu1  ;;  %5508 = vmatpush.bf16.msra.mxu0 %v13489_v6 }
 0x6f0   :  { %v15903_v4 = vadd.f32 %v5230_v56, %v5099_v27  ;;  %v4856_v1 = vadd.f32 %v4855_v10, %v4622_v46 }
 0x6f1   :  { %4661 = vmatmul.bf16.gmra.mxu0 %v18310_v19  ;;  %5062 = vmatmul.bf16.gmra.mxu2 %v14959_v31 }
 0x6f2   :  { %4894 = vmatmul.bf16.gmra.mxu1 %v18311_v62  ;;  %6000 = vmatpush.bf16.msrb.mxu2 %v13505_v54 }
 0x6f4   :  { %5272 = vmatmul.bf16.gmra.mxu3 %v14976_v5  ;;  %v5023_v24 = vpop.f32.mrf.mxu2  ;;  %v18340_v5 = vld [vmem:[#allocation18_spill] sm:$0xff] }
 0x6f5   :  { %v5100_v16 = vadd.f32 %v5023_v24, %v15868_v43  ;;  %v18312_v43 = vld [vmem:[#allocation39_spill] sm:$0xff] }
 0x6f6   :  { %v4624_v35 = vpop.f32.mrf.mxu0 }
 0x6f7   :  { %v5233_v53 = vpop.f32.mrf.mxu3  ;;  %v4857_v40 = vpop.f32.mrf.mxu1 }
 0x6f8   :  { %v15919_v57 = vadd.f32 %v5233_v53, %v5100_v16  ;;  %v4858_v25 = vadd.f32 %v4857_v40, %v4624_v35 }
 0x6fc   :  { %v5025_v61 = vpop.f32.mrf.mxu2 }
 0x6fd   :  { %v5101_v22 = vadd.f32 %v5025_v61, %v4848_v9 }
 0x6fe   :  { %v4627_v56 = vpop.f32.mrf.mxu0 }
 0x6ff   :  { %v5235_v27 = vpop.f32.mrf.mxu3  ;;  %v4860_v10 = vpop.f32.mrf.mxu1 }
 0x700   :  { %v15924_v46 = vadd.f32 %v5235_v27, %v5101_v22  ;;  %v4861_v60 = vadd.f32 %v4860_v10, %v4627_v56 }
 0x701   :  { %4666 = vmatmul.bf16.gmra.mxu0 %v18312_v43  ;;  %5067 = vmatmul.bf16.gmra.mxu2 %v18311_v62 }
 0x702   :  { %4899 = vmatmul.bf16.gmra.mxu1 %v18313_v52 }
 0x704   :  { %5277 = vmatmul.bf16.gmra.mxu3 %v18310_v19  ;;  %v5028_v50 = vpop.f32.mrf.mxu2 }
 0x705   :  { %v5102_v24 = vadd.f32 %v5028_v50, %v4851_v2  ;;  %v13515_v2 = vld [vmem:[%s18140_s3 + $0x1d0] sm:$0xff]  ;;  %v18314_v50 = vld [vmem:[#allocation41_spill] sm:$0xff] }
 0x706   :  { %v4629_v53 = vpop.f32.mrf.mxu0  ;;  %6208 = vmatpush.bf16.msrb.mxu3 %v13515_v2 }
 0x707   :  { %v5238_v16 = vpop.f32.mrf.mxu3  ;;  %v4862_v9 = vpop.f32.mrf.mxu1 }
 0x708   :  { %v15930_v35 = vadd.f32 %v5238_v16, %v5102_v24  ;;  %v4863_v40 = vadd.f32 %v4862_v9, %v4629_v53  ;;  %v18315_v24 = vld [vmem:[#allocation26_spill] sm:$0xff]  ;;  %v18316_v16 = vld [vmem:[#allocation40_spill] sm:$0xff] }
 0x709   :  { %v13499_v53 = vld [vmem:[%s18140_s3 + $0x150] sm:$0xff] }
 0x70a   :  { %5788 = vmatpush.bf16.msra.mxu1 %v13499_v53 }
 0x70c   :  { %v5030_v49 = vpop.f32.mrf.mxu2 }
 0x70d   :  { %v5103_v61 = vadd.f32 %v5030_v49, %v4853_v42  ;;  %v18317_v42 = vld [vmem:[#allocation27_spill] sm:$0xff] }
 0x70e   :  { %v4632_v27 = vpop.f32.mrf.mxu0  ;;  %5789 = vmatpush.bf16.msra.mxu1 %v13498_v48 }
 0x70f   :  { %v5240_v22 = vpop.f32.mrf.mxu3  ;;  %v4865_v10 = vpop.f32.mrf.mxu1 }
 0x710   :  { %v15932_v56 = vadd.f32 %v5240_v22, %v5103_v61  ;;  %v4866_v58 = vadd.f32 %v4865_v10, %v4632_v27 }
 0x711   :  { %4671 = vmatmul.bf16.gmra.mxu0 %v18314_v50  ;;  %5072 = vmatmul.bf16.gmra.mxu2 %v18315_v24 }
 0x712   :  { %4904 = vmatmul.bf16.gmra.mxu1 %v18316_v16 }
 0x714   :  { %5282 = vmatmul.bf16.gmra.mxu3 %v18317_v42  ;;  %v5033_v9 = vpop.f32.mrf.mxu2 }
 0x715   :  { %v5104_v49 = vadd.f32 %v5033_v9, %v4856_v1  ;;  %v13497_v1 = vld [vmem:[%s18140_s3 + $0x140] sm:$0xff] }
 0x716   :  { %v4634_v22 = vpop.f32.mrf.mxu0  ;;  %5790 = vmatpush.bf16.msra.mxu1 %v13497_v1 }
 0x717   :  { %v5243_v61 = vpop.f32.mrf.mxu3  ;;  %v4867_v10 = vpop.f32.mrf.mxu1 }
 0x718   :  { %v15947_v27 = vadd.f32 %v5243_v61, %v5104_v49  ;;  %v4868_v37 = vadd.f32 %v4867_v10, %v4634_v22  ;;  %v18318_v10 = vld [vmem:[#allocation43_spill] sm:$0xff] }
 0x71c   :  { %v5035_v38 = vpop.f32.mrf.mxu2 }
 0x71d   :  { %v5105_v2 = vadd.f32 %v5035_v38, %v4858_v25 }
 0x71e   :  { %v4637_v9 = vpop.f32.mrf.mxu0 }
 0x71f   :  { %v5245_v53 = vpop.f32.mrf.mxu3  ;;  %v4870_v61 = vpop.f32.mrf.mxu1 }
 0x720   :  { %v15958_v49 = vadd.f32 %v5245_v53, %v5105_v2  ;;  %v4871_v22 = vadd.f32 %v4870_v61, %v4637_v9 }
 0x721   :  { %4676 = vmatmul.bf16.gmra.mxu0 %v18318_v10  ;;  %5077 = vmatmul.bf16.gmra.mxu2 %v18316_v16 }
 0x722   :  { %4909 = vmatmul.bf16.gmra.mxu1 %v18319_v17 }
 0x724   :  { %5287 = vmatmul.bf16.gmra.mxu3 %v18314_v50  ;;  %v5038_v48 = vpop.f32.mrf.mxu2 }
 0x725   :  { %v5106_v6 = vadd.f32 %v5038_v48, %v4861_v60  ;;  %v13514_v60 = vld [vmem:[%s18140_s3 + $0x1c8] sm:$0xff]  ;;  %v18320_v48 = vld [vmem:[#allocation45_spill] sm:$0xff] }
 0x726   :  { %v4639_v38 = vpop.f32.mrf.mxu0  ;;  %6209 = vmatpush.bf16.msrb.mxu3 %v13514_v60 }
 0x727   :  { %v5248_v25 = vpop.f32.mrf.mxu3  ;;  %v4872_v15 = vpop.f32.mrf.mxu1 }
 0x728   :  { %v15964_v23 = vadd.f32 %v5248_v25, %v5106_v6  ;;  %v4873_v2 = vadd.f32 %v4872_v15, %v4639_v38  ;;  %v18321_v15 = vld [vmem:[#allocation44_spill] sm:$0xff] }
 0x72c   :  { %v5040_v53 = vpop.f32.mrf.mxu2 }
 0x72d   :  { %v5107_v41 = vadd.f32 %v5040_v53, %v4863_v40 }
 0x72e   :  { %v4642_v9 = vpop.f32.mrf.mxu0 }
 0x72f   :  { %v5250_v1 = vpop.f32.mrf.mxu3  ;;  %v4875_v20 = vpop.f32.mrf.mxu1 }
 0x730   :  { %v15966_v61 = vadd.f32 %v5250_v1, %v5107_v41  ;;  %v4876_v0 = vadd.f32 %v4875_v20, %v4642_v9  ;;  %v13528_v1 = vld [vmem:[%s18140_s3 + $0x238] sm:$0xff] }
 0x731   :  { %4681 = vmatmul.bf16.gmra.mxu0 %v18320_v48  ;;  %5082 = vmatmul.bf16.gmra.mxu2 %v18319_v17 }
 0x732   :  { %4914 = vmatmul.bf16.gmra.mxu1 %v18321_v15  ;;  %6413 = vmatpush.bf16.msrb.mxu0 %v13528_v1 }
 0x734   :  { %5292 = vmatmul.bf16.gmra.mxu3 %v18318_v10  ;;  %v5043_v41 = vpop.f32.mrf.mxu2 }
 0x735   :  { %v5108_v20 = vadd.f32 %v5043_v41, %v4866_v58  ;;  %v13513_v58 = vld [vmem:[%s18140_s3 + $0x1c0] sm:$0xff] }
 0x736   :  { %v4644_v6 = vpop.f32.mrf.mxu0  ;;  %6210 = vmatpush.bf16.msrb.mxu3 %v13513_v58 }
 0x737   :  { %v5253_v40 = vpop.f32.mrf.mxu3  ;;  %v4877_v38 = vpop.f32.mrf.mxu1 }
 0x738   :  { %v15978_v25 = vadd.f32 %v5253_v40, %v5108_v20  ;;  %v4878_v53 = vadd.f32 %v4877_v38, %v4644_v6  ;;  %v18322_v6 = vld [vmem:[#allocation2_spill] sm:$0xff] }
 0x73c   :  { %v5045_v9 = vpop.f32.mrf.mxu2 }
 0x73d   :  { %v5109_v21 = vadd.f32 %v5045_v9, %v4868_v37  ;;  %v18323_v37 = vld [vmem:[#allocation3_spill] sm:$0xff] }
 0x73e   :  { %v4647_v60 = vpop.f32.mrf.mxu0 }
 0x73f   :  { %v5255_v51 = vpop.f32.mrf.mxu3  ;;  %v4880_v20 = vpop.f32.mrf.mxu1 }
 0x740   :  { %v15989_v41 = vadd.f32 %v5255_v51, %v5109_v21  ;;  %v4881_v40 = vadd.f32 %v4880_v20, %v4647_v60 }
 0x741   :  { %5087 = vmatmul.bf16.gmra.mxu2 %v18321_v15  ;;  %5509 = vmatmul.bf16.vlgmr.msra.gmra.mxu0 %v18322_v6 }
 0x742   :  { %5791 = vmatmul.bf16.vlgmr.msra.gmra.mxu1 %v18323_v37  ;;  %v18326_v37 = vld [vmem:[#allocation47_spill] sm:$0xff] }
 0x744   :  { %5297 = vmatmul.bf16.gmra.mxu3 %v18320_v48  ;;  %v5048_v38 = vpop.f32.mrf.mxu2 }
 0x745   :  { %v5110_v1 = vadd.f32 %v5048_v38, %v4871_v22  ;;  %v18327_v22 = vld [vmem:[#allocation5_spill] sm:$0xff] }
 0x746   :  { %v4649_v59 = vpop.f32.mrf.mxu0 }
 0x747   :  { %v5258_v9 = vpop.f32.mrf.mxu3  ;;  %v4882_v51 = vpop.f32.mrf.mxu1 }
 0x748   :  { %v15995_v12 = vadd.f32 %v5258_v9, %v5110_v1  ;;  %v4883_v21 = vadd.f32 %v4882_v51, %v4649_v59 }
 0x74c   :  { %v5050_v34 = vpop.f32.mrf.mxu2 }
 0x74d   :  { %v5111_v54 = vadd.f32 %v5050_v34, %v4873_v2 }
 0x74e   :  { %v4652_v60 = vpop.f32.mrf.mxu0 }
 0x74f   :  { %v5260_v58 = vpop.f32.mrf.mxu3  ;;  %v4885_v47 = vpop.f32.mrf.mxu1 }
 0x750   :  { %v15997_v20 = vadd.f32 %v5260_v58, %v5111_v54  ;;  %v4886_v6 = vadd.f32 %v4885_v47, %v4652_v60  ;;  %v13527_v47 = vld [vmem:[%s18140_s3 + $0x230] sm:$0xff] }
 0x751   :  { %5092 = vmatmul.bf16.gmra.mxu2 %v18324_v3  ;;  %5514 = vmatmul.bf16.gmra.mxu0 %v18325_v33 }
 0x752   :  { %5796 = vmatmul.bf16.gmra.mxu1 %v18327_v22  ;;  %6414 = vmatpush.bf16.msrb.mxu0 %v13527_v47 }
 0x754   :  { %5302 = vmatmul.bf16.gmra.mxu3 %v18326_v37  ;;  %v5053_v38 = vpop.f32.mrf.mxu2 }
 0x755   :  { %v5112_v1 = vadd.f32 %v5053_v38, %v4876_v0  ;;  %v18328_v0 = vld [vmem:[#allocation6_spill] sm:$0xff]  ;;  %v18329_v38 = vld [vmem:[#allocation7_spill] sm:$0xff] }
 0x756   :  { %v4654_v59 = vpop.f32.mrf.mxu0 }
 0x757   :  { %v5263_v9 = vpop.f32.mrf.mxu3  ;;  %v4887_v34 = vpop.f32.mrf.mxu1 }
 0x758   :  { %v16003_v51 = vadd.f32 %v5263_v9, %v5112_v1  ;;  %v4888_v2 = vadd.f32 %v4887_v34, %v4654_v59 }
 0x75c   :  { %v5055_v54 = vpop.f32.mrf.mxu2 }
 0x75d   :  { %v5113_v58 = vadd.f32 %v5055_v54, %v4878_v53 }
 0x75e   :  { %v4657_v3 = vpop.f32.mrf.mxu0 }
 0x75f   :  { %v5265_v60 = vpop.f32.mrf.mxu3  ;;  %v4890_v48 = vpop.f32.mrf.mxu1 }
 0x760   :  { %v16008_v37 = vadd.f32 %v5265_v60, %v5113_v58  ;;  %v4891_v15 = vadd.f32 %v4890_v48, %v4657_v3 }
 0x761   :  { %5519 = vmatmul.bf16.gmra.mxu0 %v18328_v0  ;;  %6001 = vmatmul.bf16.vlgmr.msrb.gmra.mxu2 %v18325_v33 }
 0x762   :  { %5801 = vmatmul.bf16.gmra.mxu1 %v18329_v38 }
 0x764   :  { %6211 = vmatmul.bf16.vlgmr.msrb.gmra.mxu3 %v18327_v22  ;;  %v5058_v1 = vpop.f32.mrf.mxu2  ;;  %v13544_v22 = vld [vmem:[%s18140_s3 + $0x2b8] sm:$0xff] }
 0x765   :  { %v5114_v9 = vadd.f32 %v5058_v1, %v4881_v40  ;;  %v13552_v40 = vld [vmem:[%s18140_s3 + $0x2f8] sm:$0xff]  ;;  %v18330_v1 = vld [vmem:[#allocation8_spill] sm:$0xff]  ;;  %6815 = vmatpush.bf16.msra.mxu2 %v13544_v22 }
 0x766   :  { %v4659_v34 = vpop.f32.mrf.mxu0  ;;  %7007 = vmatpush.bf16.msra.mxu3 %v13552_v40 }
 0x767   :  { %v5268_v59 = vpop.f32.mrf.mxu3  ;;  %v4892_v53 = vpop.f32.mrf.mxu1 }
 0x768   :  { %v16014_v47 = vadd.f32 %v5268_v59, %v5114_v9  ;;  %v4893_v54 = vadd.f32 %v4892_v53, %v4659_v34  ;;  %v18331_v9 = vld [vmem:[#allocation9_spill] sm:$0xff] }
 0x76c   :  { %v5060_v58 = vpop.f32.mrf.mxu2 }
 0x76d   :  { %v5115_v60 = vadd.f32 %v5060_v58, %v4883_v21 }
 0x76e   :  { %v4662_v3 = vpop.f32.mrf.mxu0 }
 0x76f   :  { %v5270_v10 = vpop.f32.mrf.mxu3  ;;  %v4895_v17 = vpop.f32.mrf.mxu1 }
 0x770   :  { %v16016_v48 = vadd.f32 %v5270_v10, %v5115_v60  ;;  %v4896_v33 = vadd.f32 %v4895_v17, %v4662_v3  ;;  %v13536_v17 = vld [vmem:[%s18140_s3 + $0x278] sm:$0xff] }
 0x771   :  { %5524 = vmatmul.bf16.gmra.mxu0 %v18330_v1  ;;  %6006 = vmatmul.bf16.gmra.mxu2 %v18328_v0  ;;  %v13526_v0 = vld [vmem:[%s18140_s3 + $0x228] sm:$0xff] }
 0x772   :  { %5806 = vmatmul.bf16.gmra.mxu1 %v18331_v9  ;;  %6415 = vmatpush.bf16.msrb.mxu0 %v13526_v0 }
 0x773   :  { %6623 = vmatpush.bf16.msrb.mxu1 %v13536_v17 }
 0x774   :  { %6216 = vmatmul.bf16.gmra.mxu3 %v18329_v38  ;;  %v5063_v10 = vpop.f32.mrf.mxu2 }
 0x775   :  { %v5116_v21 = vadd.f32 %v5063_v10, %v4886_v6  ;;  %v18332_v6 = vld [vmem:[#allocation12_spill] sm:$0xff]  ;;  %v18333_v10 = vld [vmem:[#allocation13_spill] sm:$0xff] }
 0x776   :  { %v4664_v34 = vpop.f32.mrf.mxu0 }
 0x777   :  { %v5273_v59 = vpop.f32.mrf.mxu3  ;;  %v4897_v58 = vpop.f32.mrf.mxu1 }
 0x778   :  { %v16031_v53 = vadd.f32 %v5273_v59, %v5116_v21  ;;  %v4898_v60 = vadd.f32 %v4897_v58, %v4664_v34 }
 0x77c   :  { %v5065_v38 = vpop.f32.mrf.mxu2 }
 0x77d   :  { %v5117_v3 = vadd.f32 %v5065_v38, %v4888_v2 }
 0x77e   :  { %v4667_v50 = vpop.f32.mrf.mxu0 }
 0x77f   :  { %v5275_v42 = vpop.f32.mrf.mxu3  ;;  %v4900_v40 = vpop.f32.mrf.mxu1 }
 0x780   :  { %v16036_v22 = vadd.f32 %v5275_v42, %v5117_v3  ;;  %v4901_v17 = vadd.f32 %v4900_v40, %v4667_v50 }
 0x781   :  { %5529 = vmatmul.bf16.gmra.mxu0 %v18332_v6  ;;  %6011 = vmatmul.bf16.gmra.mxu2 %v18330_v1 }
 0x782   :  { %5811 = vmatmul.bf16.gmra.mxu1 %v18333_v10 }
 0x784   :  { %6221 = vmatmul.bf16.gmra.mxu3 %v18331_v9  ;;  %v5068_v21 = vpop.f32.mrf.mxu2  ;;  %v13543_v9 = vld [vmem:[%s18140_s3 + $0x2b0] sm:$0xff] }
 0x785   :  { %v5118_v59 = vadd.f32 %v5068_v21, %v4891_v15  ;;  %v13551_v15 = vld [vmem:[%s18140_s3 + $0x2f0] sm:$0xff]  ;;  %v18334_v21 = vld [vmem:[#allocation14_spill] sm:$0xff]  ;;  %6816 = vmatpush.bf16.msra.mxu2 %v13543_v9 }
 0x786   :  { %v4669_v58 = vpop.f32.mrf.mxu0  ;;  %7008 = vmatpush.bf16.msra.mxu3 %v13551_v15 }
 0x787   :  { %v5278_v34 = vpop.f32.mrf.mxu3  ;;  %v4902_v2 = vpop.f32.mrf.mxu1 }
 0x788   :  { %v16042_v0 = vadd.f32 %v5278_v34, %v5118_v59  ;;  %v4903_v38 = vadd.f32 %v4902_v2, %v4669_v58  ;;  %v18335_v59 = vld [vmem:[#allocation10_spill] sm:$0xff]  ;;  %v18336_v34 = vld [vmem:[#allocation15_spill] sm:$0xff] }
 0x78c   :  { %v5070_v42 = vpop.f32.mrf.mxu2 }
 0x78d   :  { %v5119_v3 = vadd.f32 %v5070_v42, %v4893_v54  ;;  %v18337_v54 = vld [vmem:[#allocation11_spill] sm:$0xff] }
 0x78e   :  { %v4672_v50 = vpop.f32.mrf.mxu0 }
 0x78f   :  { %v5280_v24 = vpop.f32.mrf.mxu3  ;;  %v4905_v6 = vpop.f32.mrf.mxu1 }
 0x790   :  { %v16044_v40 = vadd.f32 %v5280_v24, %v5119_v3  ;;  %v4906_v1 = vadd.f32 %v4905_v6, %v4672_v50  ;;  %v13535_v24 = vld [vmem:[%s18140_s3 + $0x270] sm:$0xff] }
 0x791   :  { %5534 = vmatmul.bf16.gmra.mxu0 %v18334_v21  ;;  %6016 = vmatmul.bf16.gmra.mxu2 %v18335_v59  ;;  %v13525_v59 = vld [vmem:[%s18140_s3 + $0x220] sm:$0xff] }
 0x792   :  { %5816 = vmatmul.bf16.gmra.mxu1 %v18336_v34  ;;  %6416 = vmatpush.bf16.msrb.mxu0 %v13525_v59 }
 0x793   :  { %6624 = vmatpush.bf16.msrb.mxu1 %v13535_v24 }
 0x794   :  { %6226 = vmatmul.bf16.gmra.mxu3 %v18337_v54  ;;  %v5073_v6 = vpop.f32.mrf.mxu2 }
 0x795   :  { %v5120_v58 = vadd.f32 %v5073_v6, %v4896_v33  ;;  %v18338_v33 = vld [vmem:[#allocation16_spill] sm:$0xff]  ;;  %v18339_v6 = vld [vmem:[#allocation17_spill] sm:$0xff] }
 0x796   :  { %v4674_v42 = vpop.f32.mrf.mxu0 }
 0x797   :  { %v5283_v2 = vpop.f32.mrf.mxu3  ;;  %v4907_v50 = vpop.f32.mrf.mxu1 }
 0x798   :  { %v16059_v3 = vadd.f32 %v5283_v2, %v5120_v58  ;;  %v4908_v10 = vadd.f32 %v4907_v50, %v4674_v42 }
 0x79c   :  { %v5075_v54 = vpop.f32.mrf.mxu2 }
 0x79d   :  { %v5121_v16 = vadd.f32 %v5075_v54, %v4898_v60 }
 0x79e   :  { %v4677_v52 = vpop.f32.mrf.mxu0 }
 0x79f   :  { %v5285_v43 = vpop.f32.mrf.mxu3  ;;  %v4910_v15 = vpop.f32.mrf.mxu1 }
 0x7a0   :  { %v16064_v9 = vadd.f32 %v5285_v43, %v5121_v16  ;;  %v4911_v24 = vadd.f32 %v4910_v15, %v4677_v52 }
 0x7a1   :  { %5539 = vmatmul.bf16.gmra.mxu0 %v18338_v33  ;;  %6021 = vmatmul.bf16.gmra.mxu2 %v18334_v21 }
 0x7a2   :  { %5821 = vmatmul.bf16.gmra.mxu1 %v18339_v6 }
 0x7a4   :  { %6231 = vmatmul.bf16.gmra.mxu3 %v18336_v34  ;;  %v5078_v58 = vpop.f32.mrf.mxu2 }
 0x7a5   :  { %v5122_v2 = vadd.f32 %v5078_v58, %v4901_v17  ;;  %v13542_v17 = vld [vmem:[%s18140_s3 + $0x2a8] sm:$0xff] }
 0x7a6   :  { %v4679_v50 = vpop.f32.mrf.mxu0  ;;  %v13550_v58 = vld [vmem:[%s18140_s3 + $0x2e8] sm:$0xff]  ;;  %6817 = vmatpush.bf16.msra.mxu2 %v13542_v17 }
 0x7a7   :  { %v5288_v42 = vpop.f32.mrf.mxu3  ;;  %v4912_v60 = vpop.f32.mrf.mxu1  ;;  %7009 = vmatpush.bf16.msra.mxu3 %v13550_v58 }
 0x7a8   :  { %v16070_v59 = vadd.f32 %v5288_v42, %v5122_v2  ;;  %v4913_v54 = vadd.f32 %v4912_v60, %v4679_v50  ;;  %v18341_v2 = vld [vmem:[#allocation19_spill] sm:$0xff] }
 0x7ac   :  { %v5080_v43 = vpop.f32.mrf.mxu2 }
 0x7ad   :  { %v5123_v16 = vadd.f32 %v5080_v43, %v4903_v38 }
 0x7ae   :  { %v4682_v52 = vpop.f32.mrf.mxu0 }
 0x7af   :  { %v5290_v19 = vpop.f32.mrf.mxu3  ;;  %v4915_v62 = vpop.f32.mrf.mxu1 }
 0x7b0   :  { %v16072_v15 = vadd.f32 %v5290_v19, %v5123_v16  ;;  %v4916_v21 = vadd.f32 %v4915_v62, %v4682_v52  ;;  %v13534_v19 = vld [vmem:[%s18140_s3 + $0x268] sm:$0xff]  ;;  %v13524_v52 = vld [vmem:[%s18140_s3 + $0x218] sm:$0xff] }
 0x7b1   :  { %5544 = vmatmul.bf16.gmra.mxu0 %v18340_v5  ;;  %6026 = vmatmul.bf16.gmra.mxu2 %v18338_v33 }
 0x7b2   :  { %5826 = vmatmul.bf16.gmra.mxu1 %v18341_v2  ;;  %6417 = vmatpush.bf16.msrb.mxu0 %v13524_v52 }
 0x7b3   :  { %6625 = vmatpush.bf16.msrb.mxu1 %v13534_v19 }
 0x7b4   :  { %6236 = vmatmul.bf16.gmra.mxu3 %v18339_v6  ;;  %v5083_v62 = vpop.f32.mrf.mxu2 }
 0x7b5   :  { %v5124_v38 = vadd.f32 %v5083_v62, %v4906_v1  ;;  %v18343_v62 = vld [vmem:[#allocation28_spill] sm:$0xff] }
 0x7b6   :  { %v4684_v50 = vpop.f32.mrf.mxu0 }
 0x7b7   :  { %v5293_v42 = vpop.f32.mrf.mxu3  ;;  %v4917_v43 = vpop.f32.mrf.mxu1 }
 0x7b8   :  { %v16087_v60 = vadd.f32 %v5293_v42, %v5124_v38  ;;  %v4918_v16 = vadd.f32 %v4917_v43, %v4684_v50  ;;  %v18344_v38 = vld [vmem:[#allocation29_spill] sm:$0xff] }
 0x7bc   :  { %v5085_v6 = vpop.f32.mrf.mxu2 }
 0x7bd   :  { %v5125_v33 = vadd.f32 %v5085_v6, %v4908_v10 }
 0x7be   :  { %v5510_v31 = vpop.f32.mrf.mxu0 }
 0x7bf   :  { %v5295_v34 = vpop.f32.mrf.mxu3  ;;  %v5590_v58 = vadd.f32 %v5510_v31, %v15898_v28  ;;  %v5792_v1 = vpop.f32.mrf.mxu1 }
 0x7c0   :  { %v16092_v17 = vadd.f32 %v5295_v34, %v5125_v33 }
 0x7c1   :  { %v5872_v19 = vadd.f32 %v5792_v1, %v5590_v58  ;;  %5549 = vmatmul.bf16.gmra.mxu0 %v18343_v62  ;;  %6031 = vmatmul.bf16.gmra.mxu2 %v18340_v5 }
 0x7c2   :  { %18342 = vst [vmem:[#allocation2_spill] sm:$0xff] %v16092_v17  ;;  %5831 = vmatmul.bf16.gmra.mxu1 %v18344_v38  ;;  %v18345_v17 = vld [vmem:[#allocation30_spill] sm:$0xff] }
 0x7c4   :  { %6241 = vmatmul.bf16.gmra.mxu3 %v18341_v2  ;;  %v5088_v42 = vpop.f32.mrf.mxu2 }
 0x7c5   :  { %v5126_v50 = vadd.f32 %v5088_v42, %v4911_v24  ;;  %v18346_v24 = vld [vmem:[#allocation20_spill] sm:$0xff]  ;;  %v18347_v42 = vld [vmem:[#allocation31_spill] sm:$0xff] }
 0x7c6   :  { %v5512_v10 = vpop.f32.mrf.mxu0 }
 0x7c7   :  { %v5298_v43 = vpop.f32.mrf.mxu3  ;;  %v5591_v34 = vadd.f32 %v5512_v10, %v15903_v4  ;;  %v5794_v33 = vpop.f32.mrf.mxu1  ;;  %v13541_v4 = vld [vmem:[%s18140_s3 + $0x2a0] sm:$0xff] }
 0x7c8   :  { %v16099_v6 = vadd.f32 %v5298_v43, %v5126_v50  ;;  %v18348_v50 = vld [vmem:[#allocation21_spill] sm:$0xff]  ;;  %6818 = vmatpush.bf16.msra.mxu2 %v13541_v4 }
 0x7c9   :  { %v5873_v31 = vadd.f32 %v5794_v33, %v5591_v34 }
 0x7cc   :  { %v5090_v28 = vpop.f32.mrf.mxu2 }
 0x7cd   :  { %v5127_v52 = vadd.f32 %v5090_v28, %v4913_v54  ;;  %v13549_v54 = vld [vmem:[%s18140_s3 + $0x2e0] sm:$0xff] }
 0x7ce   :  { %v5515_v1 = vpop.f32.mrf.mxu0  ;;  %7010 = vmatpush.bf16.msra.mxu3 %v13549_v54 }
 0x7cf   :  { %v5300_v58 = vpop.f32.mrf.mxu3  ;;  %v5592_v38 = vadd.f32 %v5515_v1, %v15919_v57  ;;  %v5797_v5 = vpop.f32.mrf.mxu1 }
 0x7d0   :  { %v16102_v62 = vadd.f32 %v5300_v58, %v5127_v52  ;;  %v13523_v58 = vld [vmem:[%s18140_s3 + $0x210] sm:$0xff] }
 0x7d1   :  { %v5874_v2 = vadd.f32 %v5797_v5, %v5592_v38  ;;  %5554 = vmatmul.bf16.gmra.mxu0 %v18345_v17  ;;  %6036 = vmatmul.bf16.gmra.mxu2 %v18346_v24  ;;  %v13533_v5 = vld [vmem:[%s18140_s3 + $0x260] sm:$0xff] }
 0x7d2   :  { %5836 = vmatmul.bf16.gmra.mxu1 %v18347_v42  ;;  %6418 = vmatpush.bf16.msrb.mxu0 %v13523_v58 }
 0x7d3   :  { %6626 = vmatpush.bf16.msrb.mxu1 %v13533_v5 }
 0x7d4   :  { %6246 = vmatmul.bf16.gmra.mxu3 %v18348_v50  ;;  %v5093_v57 = vpop.f32.mrf.mxu2 }
 0x7d5   :  { %v5128_v38 = vadd.f32 %v5093_v57, %v4916_v21 }
 0x7d6   :  { %v5517_v10 = vpop.f32.mrf.mxu0 }
 0x7d7   :  { %v5303_v43 = vpop.f32.mrf.mxu3  ;;  %v5593_v33 = vadd.f32 %v5517_v10, %v15924_v46  ;;  %v5799_v28 = vpop.f32.mrf.mxu1  ;;  %v18352_v46 = vld [vmem:[#allocation33_spill] sm:$0xff] }
 0x7d8   :  { %v16118_v34 = vadd.f32 %v5303_v43, %v5128_v38  ;;  %v18351_v38 = vld [vmem:[#allocation32_spill] sm:$0xff] }
 0x7d9   :  { %v5875_v52 = vadd.f32 %v5799_v28, %v5593_v33 }
 0x7da   :  { %18349 = vst [vmem:[#allocation3_spill] sm:$0xff] %v16118_v34  ;;  %v18353_v34 = vld [vmem:[#allocation34_spill] sm:$0xff] }
 0x7dc   :  { %v5095_v1 = vpop.f32.mrf.mxu2 }
 0x7dd   :  { %v5129_v50 = vadd.f32 %v5095_v1, %v4918_v16 }
 0x7de   :  { %v5520_v54 = vpop.f32.mrf.mxu0 }
 0x7df   :  { %v5305_v4 = vpop.f32.mrf.mxu3  ;;  %v5594_v21 = vadd.f32 %v5520_v54, %v15930_v35  ;;  %v5802_v5 = vpop.f32.mrf.mxu1 }
 0x7e0   :  { %v16124_v24 = vadd.f32 %v5305_v4, %v5129_v50 }
 0x7e1   :  { %v5876_v57 = vadd.f32 %v5802_v5, %v5594_v21  ;;  %5559 = vmatmul.bf16.gmra.mxu0 %v18351_v38  ;;  %6041 = vmatmul.bf16.gmra.mxu2 %v18345_v17 }
 0x7e2   :  { %18350 = vst [vmem:[#allocation4_spill] sm:$0xff] %v16124_v24  ;;  %5841 = vmatmul.bf16.gmra.mxu1 %v18352_v46 }
 0x7e4   :  { %6251 = vmatmul.bf16.gmra.mxu3 %v18347_v42  ;;  %v6002_v43 = vpop.f32.mrf.mxu2 }
 0x7e5   :  { %v6082_v10 = vadd.f32 %v6002_v43, %v5872_v19  ;;  %v13548_v19 = vld [vmem:[%s18140_s3 + $0x2d8] sm:$0xff] }
 0x7e6   :  { %v5522_v16 = vpop.f32.mrf.mxu0  ;;  %7011 = vmatpush.bf16.msra.mxu3 %v13548_v19 }
 0x7e7   :  { %v6212_v33 = vpop.f32.mrf.mxu3  ;;  %v5595_v50 = vadd.f32 %v5522_v16, %v15932_v56  ;;  %v5804_v58 = vpop.f32.mrf.mxu1  ;;  %v13540_v56 = vld [vmem:[%s18140_s3 + $0x298] sm:$0xff] }
 0x7e8   :  { %v16131_v28 = vadd.f32 %v6212_v33, %v6082_v10  ;;  %6819 = vmatpush.bf16.msra.mxu2 %v13540_v56 }
 0x7e9   :  { %v5877_v35 = vadd.f32 %v5804_v58, %v5595_v50 }
 0x7ec   :  { %v6004_v1 = vpop.f32.mrf.mxu2 }
 0x7ed   :  { %v6083_v4 = vadd.f32 %v6004_v1, %v5873_v31  ;;  %v18354_v31 = vld [vmem:[#allocation35_spill] sm:$0xff] }
 0x7ee   :  { %v5525_v21 = vpop.f32.mrf.mxu0  ;;  %v13522_v1 = vld [vmem:[%s18140_s3 + $0x208] sm:$0xff] }
 0x7ef   :  { %v6214_v54 = vpop.f32.mrf.mxu3  ;;  %v5596_v17 = vadd.f32 %v5525_v21, %v15947_v27  ;;  %v5807_v24 = vpop.f32.mrf.mxu1  ;;  %v13532_v27 = vld [vmem:[%s18140_s3 + $0x258] sm:$0xff]  ;;  %6419 = vmatpush.bf16.msrb.mxu0 %v13522_v1 }
 0x7f0   :  { %v16134_v5 = vadd.f32 %v6214_v54, %v6083_v4  ;;  %6627 = vmatpush.bf16.msrb.mxu1 %v13532_v27 }
 0x7f1   :  { %v5878_v42 = vadd.f32 %v5807_v24, %v5596_v17  ;;  %5564 = vmatmul.bf16.gmra.mxu0 %v18353_v34  ;;  %6046 = vmatmul.bf16.gmra.mxu2 %v18351_v38  ;;  %v18363_v38 = vld [vmem:[#allocation54_spill] sm:$0xff] }
 0x7f2   :  { %5846 = vmatmul.bf16.gmra.mxu1 %v18354_v31 }
 0x7f4   :  { %6256 = vmatmul.bf16.gmra.mxu3 %v18352_v46  ;;  %v6007_v17 = vpop.f32.mrf.mxu2 }
 0x7f5   :  { %v6084_v24 = vadd.f32 %v6007_v17, %v5874_v2 }
 0x7f6   :  { %v5527_v10 = vpop.f32.mrf.mxu0 }
 0x7f7   :  { %v6217_v43 = vpop.f32.mrf.mxu3  ;;  %v5597_v16 = vadd.f32 %v5527_v10, %v15958_v49  ;;  %v5809_v50 = vpop.f32.mrf.mxu1  ;;  %v18356_v49 = vld [vmem:[#allocation49_spill] sm:$0xff] }
 0x7f8   :  { %v16150_v33 = vadd.f32 %v6217_v43, %v6084_v24  ;;  %v18355_v24 = vld [vmem:[#allocation48_spill] sm:$0xff] }
 0x7f9   :  { %v5879_v58 = vadd.f32 %v5809_v50, %v5597_v16 }
 0x7fc   :  { %v6009_v4 = vpop.f32.mrf.mxu2 }
 0x7fd   :  { %v6085_v54 = vadd.f32 %v6009_v4, %v5875_v52 }
 0x7fe   :  { %v5530_v56 = vpop.f32.mrf.mxu0 }
 0x7ff   :  { %v6219_v21 = vpop.f32.mrf.mxu3  ;;  %v5598_v2 = vadd.f32 %v5530_v56, %v15964_v23  ;;  %v5812_v27 = vpop.f32.mrf.mxu1 }
 0x800   :  { %v16156_v19 = vadd.f32 %v6219_v21, %v6085_v54 }
 0x801   :  { %v5880_v17 = vadd.f32 %v5812_v27, %v5598_v2  ;;  %5569 = vmatmul.bf16.gmra.mxu0 %v18355_v24  ;;  %6051 = vmatmul.bf16.gmra.mxu2 %v18353_v34  ;;  %v18357_v34 = vld [vmem:[#allocation50_spill] sm:$0xff] }
 0x802   :  { %5851 = vmatmul.bf16.gmra.mxu1 %v18356_v49 }
 0x804   :  { %6261 = vmatmul.bf16.gmra.mxu3 %v18354_v31  ;;  %v6012_v43 = vpop.f32.mrf.mxu2 }
 0x805   :  { %v6086_v10 = vadd.f32 %v6012_v43, %v5876_v57  ;;  %v18358_v57 = vld [vmem:[#allocation36_spill] sm:$0xff]  ;;  %v18359_v43 = vld [vmem:[#allocation51_spill] sm:$0xff] }
 0x806   :  { %v5532_v52 = vpop.f32.mrf.mxu0 }
 0x807   :  { %v6222_v16 = vpop.f32.mrf.mxu3  ;;  %v5599_v1 = vadd.f32 %v5532_v52, %v15966_v61  ;;  %v5814_v4 = vpop.f32.mrf.mxu1  ;;  %v13539_v61 = vld [vmem:[%s18140_s3 + $0x290] sm:$0xff] }
 0x808   :  { %v16163_v50 = vadd.f32 %v6222_v16, %v6086_v10  ;;  %v18360_v10 = vld [vmem:[#allocation37_spill] sm:$0xff]  ;;  %6820 = vmatpush.bf16.msra.mxu2 %v13539_v61 }
 0x809   :  { %v5881_v23 = vadd.f32 %v5814_v4, %v5599_v1 }
 0x80c   :  { %v6014_v54 = vpop.f32.mrf.mxu2 }
 0x80d   :  { %v6087_v21 = vadd.f32 %v6014_v54, %v5877_v35  ;;  %v13547_v35 = vld [vmem:[%s18140_s3 + $0x2d0] sm:$0xff] }
 0x80e   :  { %v5535_v2 = vpop.f32.mrf.mxu0  ;;  %7012 = vmatpush.bf16.msra.mxu3 %v13547_v35 }
 0x80f   :  { %v6224_v56 = vpop.f32.mrf.mxu3  ;;  %v5600_v49 = vadd.f32 %v5535_v2, %v15978_v25  ;;  %v5817_v24 = vpop.f32.mrf.mxu1  ;;  %v13531_v25 = vld [vmem:[%s18140_s3 + $0x250] sm:$0xff]  ;;  %v13530_v2 = vld [vmem:[%s18140_s3 + $0x248] sm:$0xff] }
 0x810   :  { %v16166_v27 = vadd.f32 %v6224_v56, %v6087_v21  ;;  %6628 = vmatpush.bf16.msrb.mxu1 %v13531_v25  ;;  %v13521_v56 = vld [vmem:[%s18140_s3 + $0x200] sm:$0xff] }
 0x811   :  { %v5882_v31 = vadd.f32 %v5817_v24, %v5600_v49  ;;  %5574 = vmatmul.bf16.gmra.mxu0 %v18357_v34  ;;  %6056 = vmatmul.bf16.gmra.mxu2 %v18358_v57  ;;  %v13529_v25 = vld [vmem:[%s18140_s3 + $0x240] sm:$0xff] }
 0x812   :  { %5856 = vmatmul.bf16.gmra.mxu1 %v18359_v43  ;;  %6420 = vmatpush.bf16.msrb.mxu0 %v13521_v56 }
 0x814   :  { %6266 = vmatmul.bf16.gmra.mxu3 %v18360_v10  ;;  %v6017_v24 = vpop.f32.mrf.mxu2  ;;  %6629 = vmatpush.bf16.msrb.mxu1 %v13530_v2 }
 0x815   :  { %v6088_v49 = vadd.f32 %v6017_v24, %v5878_v42 }
 0x816   :  { %v5537_v52 = vpop.f32.mrf.mxu0 }
 0x817   :  { %v6227_v16 = vpop.f32.mrf.mxu3  ;;  %v5601_v4 = vadd.f32 %v5537_v52, %v15989_v41  ;;  %v5819_v54 = vpop.f32.mrf.mxu1 }
 0x818   :  { %v16182_v1 = vadd.f32 %v6227_v16, %v6088_v49  ;;  %6630 = vmatpush.bf16.msrb.mxu1 %v13529_v25 }
 0x819   :  { %v5883_v21 = vadd.f32 %v5819_v54, %v5601_v4  ;;  %v18361_v4 = vld [vmem:[#allocation52_spill] sm:$0xff]  ;;  %v18362_v54 = vld [vmem:[#allocation53_spill] sm:$0xff] }
 0x81c   :  { %v6019_v61 = vpop.f32.mrf.mxu2 }
 0x81d   :  { %v6089_v42 = vadd.f32 %v6019_v61, %v5879_v58 }
 0x81e   :  { %v5540_v41 = vpop.f32.mrf.mxu0 }
 0x81f   :  { %v6229_v35 = vpop.f32.mrf.mxu3  ;;  %v5602_v49 = vadd.f32 %v5540_v41, %v15995_v12  ;;  %v5822_v16 = vpop.f32.mrf.mxu1 }
 0x820   :  { %v16194_v24 = vadd.f32 %v6229_v35, %v6089_v42 }
 0x821   :  { %v5884_v52 = vadd.f32 %v5822_v16, %v5602_v49  ;;  %5579 = vmatmul.bf16.gmra.mxu0 %v18361_v4  ;;  %6061 = vmatmul.bf16.gmra.mxu2 %v18357_v34 }
 0x822   :  { %5861 = vmatmul.bf16.gmra.mxu1 %v18362_v54 }
 0x824   :  { %6271 = vmatmul.bf16.gmra.mxu3 %v18359_v43  ;;  %v6022_v58 = vpop.f32.mrf.mxu2 }
 0x825   :  { %v6090_v56 = vadd.f32 %v6022_v58, %v5880_v17  ;;  %v13546_v17 = vld [vmem:[%s18140_s3 + $0x2c8] sm:$0xff] }
 0x826   :  { %v5542_v61 = vpop.f32.mrf.mxu0  ;;  %7013 = vmatpush.bf16.msra.mxu3 %v13546_v17 }
 0x827   :  { %v6232_v2 = vpop.f32.mrf.mxu3  ;;  %v5603_v42 = vadd.f32 %v5542_v61, %v15997_v20  ;;  %v5824_v12 = vpop.f32.mrf.mxu1  ;;  %v13538_v20 = vld [vmem:[%s18140_s3 + $0x288] sm:$0xff] }
 0x828   :  { %v16201_v10 = vadd.f32 %v6232_v2, %v6090_v56  ;;  %6821 = vmatpush.bf16.msra.mxu2 %v13538_v20 }
 0x829   :  { %v5885_v35 = vadd.f32 %v5824_v12, %v5603_v42  ;;  %v13560_v12 = vld [vmem:[%s18140_s3 + $0x338] sm:$0xff] }
 0x82a   :  { %7217 = vmatpush.bf16.msra.mxu0 %v13560_v12 }
 0x82c   :  { %v6024_v25 = vpop.f32.mrf.mxu2 }
 0x82d   :  { %v6091_v41 = vadd.f32 %v6024_v25, %v5881_v23  ;;  %v18364_v23 = vld [vmem:[#allocation55_spill] sm:$0xff] }
 0x82e   :  { %v5545_v16 = vpop.f32.mrf.mxu0 }
 0x82f   :  { %v6234_v49 = vpop.f32.mrf.mxu3  ;;  %v5604_v34 = vadd.f32 %v5545_v16, %v16003_v51  ;;  %v5827_v46 = vpop.f32.mrf.mxu1  ;;  %v13545_v16 = vld [vmem:[%s18140_s3 + $0x2c0] sm:$0xff] }
 0x830   :  { %v16204_v57 = vadd.f32 %v6234_v49, %v6091_v41  ;;  %7014 = vmatpush.bf16.msra.mxu3 %v13545_v16 }
 0x831   :  { %v5886_v43 = vadd.f32 %v5827_v46, %v5604_v34  ;;  %5584 = vmatmul.bf16.gmra.mxu0 %v18363_v38  ;;  %6066 = vmatmul.bf16.gmra.mxu2 %v18361_v4 }
 0x832   :  { %5866 = vmatmul.bf16.gmra.mxu1 %v18364_v23 }
 0x834   :  { %6276 = vmatmul.bf16.gmra.mxu3 %v18362_v54  ;;  %v6027_v51 = vpop.f32.mrf.mxu2 }
 0x835   :  { %v6092_v34 = vadd.f32 %v6027_v51, %v5882_v31  ;;  %v13537_v31 = vld [vmem:[%s18140_s3 + $0x280] sm:$0xff] }
 0x836   :  { %v5547_v58 = vpop.f32.mrf.mxu0  ;;  %6822 = vmatpush.bf16.msra.mxu2 %v13537_v31 }
 0x837   :  { %v6237_v46 = vpop.f32.mrf.mxu3  ;;  %v5605_v2 = vadd.f32 %v5547_v58, %v16008_v37  ;;  %v5829_v61 = vpop.f32.mrf.mxu1 }
 0x838   :  { %v16217_v56 = vadd.f32 %v6237_v46, %v6092_v34 }
 0x839   :  { %v5887_v42 = vadd.f32 %v5829_v61, %v5605_v2 }
 0x83c   :  { %v6029_v25 = vpop.f32.mrf.mxu2 }
 0x83d   :  { %v6093_v41 = vadd.f32 %v6029_v25, %v5883_v21 }
 0x83e   :  { %v5550_v20 = vpop.f32.mrf.mxu0 }
 0x83f   :  { %v6239_v49 = vpop.f32.mrf.mxu3  ;;  %v5606_v17 = vadd.f32 %v5550_v20, %v16014_v47  ;;  %v5832_v51 = vpop.f32.mrf.mxu1 }
 0x840   :  { %v16229_v37 = vadd.f32 %v6239_v49, %v6093_v41 }
 0x841   :  { %v5888_v34 = vadd.f32 %v5832_v51, %v5606_v17  ;;  %6071 = vmatmul.bf16.gmra.mxu2 %v18363_v38  ;;  %6421 = vmatmul.bf16.vlgmr.msrb.gmra.mxu0 %v14507_v45 }
 0x842   :  { %6631 = vmatmul.bf16.vlgmr.msrb.gmra.mxu1 %v14529_v14 }
 0x844   :  { %6281 = vmatmul.bf16.gmra.mxu3 %v18364_v23  ;;  %v6032_v21 = vpop.f32.mrf.mxu2 }
 0x845   :  { %v6094_v46 = vadd.f32 %v6032_v21, %v5884_v52 }
 0x846   :  { %v5552_v2 = vpop.f32.mrf.mxu0 }
 0x847   :  { %v6242_v58 = vpop.f32.mrf.mxu3  ;;  %v5607_v47 = vadd.f32 %v5552_v2, %v16016_v48  ;;  %v5834_v12 = vpop.f32.mrf.mxu1  ;;  %v13559_v2 = vld [vmem:[%s18140_s3 + $0x330] sm:$0xff] }
 0x848   :  { %v16236_v61 = vadd.f32 %v6242_v58, %v6094_v46  ;;  %7218 = vmatpush.bf16.msra.mxu0 %v13559_v2 }
 0x849   :  { %v5889_v25 = vadd.f32 %v5834_v12, %v5607_v47 }
 0x84c   :  { %v6034_v41 = vpop.f32.mrf.mxu2 }
 0x84d   :  { %v6095_v49 = vadd.f32 %v6034_v41, %v5885_v35 }
 0x84e   :  { %v5555_v16 = vpop.f32.mrf.mxu0 }
 0x84f   :  { %v6244_v31 = vpop.f32.mrf.mxu3  ;;  %v5608_v45 = vadd.f32 %v5555_v16, %v16031_v53  ;;  %v5837_v17 = vpop.f32.mrf.mxu1 }
 0x850   :  { %v16239_v20 = vadd.f32 %v6244_v31, %v6095_v49 }
 0x851   :  { %v5890_v14 = vadd.f32 %v5837_v17, %v5608_v45  ;;  %6076 = vmatmul.bf16.gmra.mxu2 %v15589_v36  ;;  %6426 = vmatmul.bf16.gmra.mxu0 %v14546_v44 }
 0x852   :  { %6636 = vmatmul.bf16.gmra.mxu1 %v14563_v29 }
 0x854   :  { %6286 = vmatmul.bf16.gmra.mxu3 %v15606_v18  ;;  %v6037_v48 = vpop.f32.mrf.mxu2 }
 0x855   :  { %v6096_v52 = vadd.f32 %v6037_v48, %v5886_v43 }
 0x856   :  { %v5557_v35 = vpop.f32.mrf.mxu0 }
 0x857   :  { %v6247_v51 = vpop.f32.mrf.mxu3  ;;  %v5609_v46 = vadd.f32 %v5557_v35, %v16036_v22  ;;  %v5839_v58 = vpop.f32.mrf.mxu1 }
 0x858   :  { %v16246_v21 = vadd.f32 %v6247_v51, %v6096_v52 }
 0x859   :  { %v5891_v53 = vadd.f32 %v5839_v58, %v5609_v46 }
 0x85c   :  { %v6039_v47 = vpop.f32.mrf.mxu2 }
 0x85d   :  { %v6097_v12 = vadd.f32 %v6039_v47, %v5887_v42 }
 0x85e   :  { %v5560_v49 = vpop.f32.mrf.mxu0 }
 0x85f   :  { %v6249_v41 = vpop.f32.mrf.mxu3  ;;  %v5610_v43 = vadd.f32 %v5560_v49, %v16042_v0  ;;  %v5842_v16 = vpop.f32.mrf.mxu1 }
 0x860   :  { %v16252_v31 = vadd.f32 %v6249_v41, %v6097_v12 }
 0x861   :  { %v5892_v45 = vadd.f32 %v5842_v16, %v5610_v43  ;;  %6431 = vmatmul.bf16.gmra.mxu0 %v14580_v63  ;;  %6823 = vmatmul.bf16.vlgmr.msra.gmra.mxu2 %v14546_v44 }
 0x862   :  { %6641 = vmatmul.bf16.gmra.mxu1 %v14597_v55 }
 0x864   :  { %7015 = vmatmul.bf16.vlgmr.msra.gmra.mxu3 %v14563_v29  ;;  %v6042_v22 = vpop.f32.mrf.mxu2 }
 0x865   :  { %v6098_v17 = vadd.f32 %v6042_v22, %v5888_v34  ;;  %v13584_v34 = vld [vmem:[%s18140_s3 + $0x3f8] sm:$0xff] }
 0x866   :  { %v5562_v42 = vpop.f32.mrf.mxu0  ;;  %7811 = vmatpush.bf16.msrb.mxu3 %v13584_v34 }
 0x867   :  { %v6252_v48 = vpop.f32.mrf.mxu3  ;;  %v5611_v51 = vadd.f32 %v5562_v42, %v16044_v40  ;;  %v5844_v35 = vpop.f32.mrf.mxu1  ;;  %v13576_v40 = vld [vmem:[%s18140_s3 + $0x3b8] sm:$0xff] }
 0x868   :  { %v16259_v52 = vadd.f32 %v6252_v48, %v6098_v17  ;;  %7619 = vmatpush.bf16.msrb.mxu2 %v13576_v40 }
 0x869   :  { %v5893_v0 = vadd.f32 %v5844_v35, %v5611_v51 }
 0x86c   :  { %v6044_v46 = vpop.f32.mrf.mxu2 }
 0x86d   :  { %v6099_v58 = vadd.f32 %v6044_v46, %v5889_v25 }
 0x86e   :  { %v5565_v47 = vpop.f32.mrf.mxu0 }
 0x86f   :  { %v6254_v2 = vpop.f32.mrf.mxu3  ;;  %v5612_v44 = vadd.f32 %v5565_v47, %v16059_v3  ;;  %v5847_v41 = vpop.f32.mrf.mxu1  ;;  %v13568_v3 = vld [vmem:[%s18140_s3 + $0x378] sm:$0xff] }
 0x870   :  { %v16262_v12 = vadd.f32 %v6254_v2, %v6099_v58  ;;  %7427 = vmatpush.bf16.msra.mxu1 %v13568_v3 }
 0x871   :  { %v5894_v29 = vadd.f32 %v5847_v41, %v5612_v44  ;;  %6436 = vmatmul.bf16.gmra.mxu0 %v14614_v39  ;;  %6828 = vmatmul.bf16.gmra.mxu2 %v14580_v63 }
 0x872   :  { %6646 = vmatmul.bf16.gmra.mxu1 %v14634_v32 }
 0x874   :  { %7020 = vmatmul.bf16.gmra.mxu3 %v14597_v55  ;;  %v6047_v25 = vpop.f32.mrf.mxu2  ;;  %v13558_v55 = vld [vmem:[%s18140_s3 + $0x328] sm:$0xff] }
 0x875   :  { %v6100_v63 = vadd.f32 %v6047_v25, %v5890_v14  ;;  %7219 = vmatpush.bf16.msra.mxu0 %v13558_v55 }
 0x876   :  { %v5567_v43 = vpop.f32.mrf.mxu0 }
 0x877   :  { %v6257_v49 = vpop.f32.mrf.mxu3  ;;  %v5613_v22 = vadd.f32 %v5567_v43, %v16064_v9  ;;  %v5849_v17 = vpop.f32.mrf.mxu1 }
 0x878   :  { %v16278_v16 = vadd.f32 %v6257_v49, %v6100_v63 }
 0x879   :  { %v5895_v48 = vadd.f32 %v5849_v17, %v5613_v22 }
 0x87c   :  { %v6049_v42 = vpop.f32.mrf.mxu2 }
 0x87d   :  { %v6101_v51 = vadd.f32 %v6049_v42, %v5891_v53  ;;  %v18365_v42 = vld [vmem:[#allocation2_spill] sm:$0xff] }
 0x87e   :  { %v5570_v46 = vpop.f32.mrf.mxu0 }
 0x87f   :  { %v6259_v35 = vpop.f32.mrf.mxu3  ;;  %v5614_v14 = vadd.f32 %v5570_v46, %v16070_v59  ;;  %v5852_v2 = vpop.f32.mrf.mxu1 }
 0x880   :  { %v16284_v58 = vadd.f32 %v6259_v35, %v6101_v51 }
 0x881   :  { %v5896_v47 = vadd.f32 %v5852_v2, %v5614_v14  ;;  %6441 = vmatmul.bf16.gmra.mxu0 %v14877_v8  ;;  %6833 = vmatmul.bf16.gmra.mxu2 %v14614_v39 }
 0x882   :  { %6651 = vmatmul.bf16.gmra.mxu1 %v14899_v11 }
 0x884   :  { %7025 = vmatmul.bf16.gmra.mxu3 %v14634_v32  ;;  %v6052_v9 = vpop.f32.mrf.mxu2 }
 0x885   :  { %v6102_v44 = vadd.f32 %v6052_v9, %v5892_v45  ;;  %v13583_v45 = vld [vmem:[%s18140_s3 + $0x3f0] sm:$0xff] }
 0x886   :  { %v5572_v53 = vpop.f32.mrf.mxu0  ;;  %7812 = vmatpush.bf16.msrb.mxu3 %v13583_v45 }
 0x887   :  { %v6262_v41 = vpop.f32.mrf.mxu3  ;;  %v5615_v34 = vadd.f32 %v5572_v53, %v16072_v15  ;;  %v5854_v3 = vpop.f32.mrf.mxu1  ;;  %v13575_v15 = vld [vmem:[%s18140_s3 + $0x3b0] sm:$0xff] }
 0x888   :  { %v16291_v40 = vadd.f32 %v6262_v41, %v6102_v44  ;;  %7620 = vmatpush.bf16.msrb.mxu2 %v13575_v15 }
 0x889   :  { %v5897_v59 = vadd.f32 %v5854_v3, %v5615_v34  ;;  %v18366_v3 = vld [vmem:[#allocation22_spill] sm:$0xff] }
 0x88c   :  { %v6054_v25 = vpop.f32.mrf.mxu2 }
 0x88d   :  { %v6103_v63 = vadd.f32 %v6054_v25, %v5893_v0  ;;  %v18367_v25 = vld [vmem:[#allocation23_spill] sm:$0xff] }
 0x88e   :  { %v5575_v8 = vpop.f32.mrf.mxu0 }
 0x88f   :  { %v6264_v49 = vpop.f32.mrf.mxu3  ;;  %v5616_v39 = vadd.f32 %v5575_v8, %v16087_v60  ;;  %v5857_v11 = vpop.f32.mrf.mxu1  ;;  %v13567_v60 = vld [vmem:[%s18140_s3 + $0x370] sm:$0xff] }
 0x890   :  { %v16294_v43 = vadd.f32 %v6264_v49, %v6103_v63  ;;  %7428 = vmatpush.bf16.msra.mxu1 %v13567_v60 }
 0x891   :  { %v5898_v32 = vadd.f32 %v5857_v11, %v5616_v39  ;;  %6446 = vmatmul.bf16.gmra.mxu0 %v14916_v7  ;;  %6838 = vmatmul.bf16.gmra.mxu2 %v14651_v13 }
 0x892   :  { %6656 = vmatmul.bf16.gmra.mxu1 %v14942_v30 }
 0x894   :  { %7030 = vmatmul.bf16.gmra.mxu3 %v14668_v26  ;;  %v6057_v0 = vpop.f32.mrf.mxu2  ;;  %v13557_v26 = vld [vmem:[%s18140_s3 + $0x320] sm:$0xff] }
 0x895   :  { %v6104_v13 = vadd.f32 %v6057_v0, %v5894_v29  ;;  %7220 = vmatpush.bf16.msra.mxu0 %v13557_v26 }
 0x896   :  { %v5577_v17 = vpop.f32.mrf.mxu0 }
 0x897   :  { %v6267_v22 = vpop.f32.mrf.mxu3  ;;  %v5617_v51 = vadd.f32 %v5577_v17, %v18365_v42  ;;  %v5859_v35 = vpop.f32.mrf.mxu1 }
 0x898   :  { %v16310_v55 = vadd.f32 %v6267_v22, %v6104_v13 }
 0x899   :  { %v5899_v46 = vadd.f32 %v5859_v35, %v5617_v51  ;;  %v18369_v51 = vld [vmem:[#allocation24_spill] sm:$0xff]  ;;  %v13566_v35 = vld [vmem:[%s18140_s3 + $0x368] sm:$0xff] }
 0x89a   :  { %7429 = vmatpush.bf16.msra.mxu1 %v13566_v35 }
 0x89c   :  { %v6059_v14 = vpop.f32.mrf.mxu2 }
 0x89d   :  { %v6105_v2 = vadd.f32 %v6059_v14, %v5895_v48 }
 0x89e   :  { %v5580_v44 = vpop.f32.mrf.mxu0 }
 0x89f   :  { %v6269_v9 = vpop.f32.mrf.mxu3  ;;  %v5618_v29 = vadd.f32 %v5580_v44, %v16099_v6  ;;  %v5862_v53 = vpop.f32.mrf.mxu1 }
 0x8a0   :  { %v16316_v41 = vadd.f32 %v6269_v9, %v6105_v2 }
 0x8a1   :  { %v5900_v34 = vadd.f32 %v5862_v53, %v5618_v29  ;;  %6451 = vmatmul.bf16.gmra.mxu0 %v18366_v3  ;;  %6843 = vmatmul.bf16.gmra.mxu2 %v14916_v7  ;;  %v18368_v7 = vld [vmem:[#allocation3_spill] sm:$0xff]  ;;  %v18371_v29 = vld [vmem:[#allocation4_spill] sm:$0xff] }
 0x8a2   :  { %6661 = vmatmul.bf16.gmra.mxu1 %v18367_v25 }
 0x8a4   :  { %7035 = vmatmul.bf16.gmra.mxu3 %v14942_v30  ;;  %v6062_v63 = vpop.f32.mrf.mxu2 }
 0x8a5   :  { %v6106_v49 = vadd.f32 %v6062_v63, %v5896_v47  ;;  %v13582_v47 = vld [vmem:[%s18140_s3 + $0x3e8] sm:$0xff] }
 0x8a6   :  { %v5582_v48 = vpop.f32.mrf.mxu0  ;;  %7813 = vmatpush.bf16.msrb.mxu3 %v13582_v47 }
 0x8a7   :  { %v6272_v8 = vpop.f32.mrf.mxu3  ;;  %v5619_v11 = vadd.f32 %v5582_v48, %v16102_v62  ;;  %v5864_v15 = vpop.f32.mrf.mxu1  ;;  %v13574_v62 = vld [vmem:[%s18140_s3 + $0x3a8] sm:$0xff] }
 0x8a8   :  { %v16323_v39 = vadd.f32 %v6272_v8, %v6106_v49  ;;  %7621 = vmatpush.bf16.msrb.mxu2 %v13574_v62 }
 0x8a9   :  { %v5901_v6 = vadd.f32 %v5864_v15, %v5619_v11 }
 0x8ac   :  { %v6064_v45 = vpop.f32.mrf.mxu2 }
 0x8ad   :  { %v6107_v60 = vadd.f32 %v6064_v45, %v5897_v59  ;;  %v18370_v59 = vld [vmem:[#allocation25_spill] sm:$0xff] }
 0x8ae   :  { %v5585_v13 = vpop.f32.mrf.mxu0 }
 0x8af   :  { %v6274_v0 = vpop.f32.mrf.mxu3  ;;  %v5620_v17 = vadd.f32 %v5585_v13, %v18368_v7  ;;  %v5867_v42 = vpop.f32.mrf.mxu1  ;;  %v18373_v13 = vld [vmem:[#allocation39_spill] sm:$0xff] }
 0x8b0   :  { %v16326_v22 = vadd.f32 %v6274_v0, %v6107_v60  ;;  %v18372_v0 = vld [vmem:[#allocation38_spill] sm:$0xff] }
 0x8b1   :  { %v5902_v30 = vadd.f32 %v5867_v42, %v5620_v17  ;;  %6456 = vmatmul.bf16.gmra.mxu0 %v18369_v51  ;;  %6848 = vmatmul.bf16.gmra.mxu2 %v18366_v3 }
 0x8b2   :  { %6666 = vmatmul.bf16.gmra.mxu1 %v18370_v59 }
 0x8b4   :  { %7040 = vmatmul.bf16.gmra.mxu3 %v18367_v25  ;;  %v6067_v26 = vpop.f32.mrf.mxu2  ;;  %v13556_v25 = vld [vmem:[%s18140_s3 + $0x318] sm:$0xff] }
 0x8b5   :  { %v6108_v14 = vadd.f32 %v6067_v26, %v5898_v32  ;;  %7221 = vmatpush.bf16.msra.mxu0 %v13556_v25  ;;  %v18376_v25 = vld [vmem:[#allocation41_spill] sm:$0xff] }
 0x8b6   :  { %v5587_v9 = vpop.f32.mrf.mxu0 }
 0x8b7   :  { %v6277_v2 = vpop.f32.mrf.mxu3  ;;  %v5621_v53 = vadd.f32 %v5587_v9, %v18371_v29  ;;  %v5869_v3 = vpop.f32.mrf.mxu1 }
 0x8b8   :  { %v16342_v44 = vadd.f32 %v6277_v2, %v6108_v14 }
 0x8b9   :  { %v5903_v63 = vadd.f32 %v5869_v3, %v5621_v53  ;;  %v18374_v3 = vld [vmem:[#allocation40_spill] sm:$0xff] }
 0x8bc   :  { %v6069_v49 = vpop.f32.mrf.mxu2 }
 0x8bd   :  { %v6109_v8 = vadd.f32 %v6069_v49, %v5899_v46  ;;  %v18377_v49 = vld [vmem:[#allocation27_spill] sm:$0xff] }
 0x8be   :  { %v6422_v11 = vpop.f32.mrf.mxu0 }
 0x8bf   :  { %v6279_v48 = vpop.f32.mrf.mxu3  ;;  %v6502_v32 = vadd.f32 %v6422_v11, %v16131_v28  ;;  %v6632_v45 = vpop.f32.mrf.mxu1 }
 0x8c0   :  { %v16348_v15 = vadd.f32 %v6279_v48, %v6109_v8 }
 0x8c1   :  { %v6712_v60 = vadd.f32 %v6632_v45, %v6502_v32  ;;  %6461 = vmatmul.bf16.gmra.mxu0 %v18372_v0  ;;  %6853 = vmatmul.bf16.gmra.mxu2 %v18369_v51 }
 0x8c2   :  { %6671 = vmatmul.bf16.gmra.mxu1 %v18373_v13 }
 0x8c4   :  { %7045 = vmatmul.bf16.gmra.mxu3 %v18370_v59  ;;  %v6072_v7 = vpop.f32.mrf.mxu2 }
 0x8c5   :  { %v6110_v17 = vadd.f32 %v6072_v7, %v5900_v34  ;;  %v18375_v34 = vld [vmem:[#allocation26_spill] sm:$0xff] }
 0x8c6   :  { %v6424_v46 = vpop.f32.mrf.mxu0 }
 0x8c7   :  { %v6282_v42 = vpop.f32.mrf.mxu3  ;;  %v6503_v47 = vadd.f32 %v6424_v46, %v16134_v5  ;;  %v6634_v35 = vpop.f32.mrf.mxu1  ;;  %v13573_v5 = vld [vmem:[%s18140_s3 + $0x3a0] sm:$0xff] }
 0x8c8   :  { %v16355_v62 = vadd.f32 %v6282_v42, %v6110_v17  ;;  %7622 = vmatpush.bf16.msrb.mxu2 %v13573_v5  ;;  %v13555_v17 = vld [vmem:[%s18140_s3 + $0x310] sm:$0xff] }
 0x8c9   :  { %v6713_v28 = vadd.f32 %v6634_v35, %v6503_v47  ;;  %7222 = vmatpush.bf16.msra.mxu0 %v13555_v17 }
 0x8cc   :  { %v6074_v26 = vpop.f32.mrf.mxu2 }
 0x8cd   :  { %v6111_v14 = vadd.f32 %v6074_v26, %v5901_v6  ;;  %v13581_v6 = vld [vmem:[%s18140_s3 + $0x3e0] sm:$0xff] }
 0x8ce   :  { %v6427_v9 = vpop.f32.mrf.mxu0  ;;  %7814 = vmatpush.bf16.msrb.mxu3 %v13581_v6 }
 0x8cf   :  { %v6284_v2 = vpop.f32.mrf.mxu3  ;;  %v6504_v51 = vadd.f32 %v6427_v9, %v16150_v33  ;;  %v6637_v53 = vpop.f32.mrf.mxu1  ;;  %v13565_v33 = vld [vmem:[%s18140_s3 + $0x360] sm:$0xff] }
 0x8d0   :  { %v16358_v29 = vadd.f32 %v6284_v2, %v6111_v14  ;;  %7430 = vmatpush.bf16.msra.mxu1 %v13565_v33  ;;  %v18378_v9 = vld [vmem:[#allocation42_spill] sm:$0xff] }
 0x8d1   :  { %v6714_v59 = vadd.f32 %v6637_v53, %v6504_v51  ;;  %6466 = vmatmul.bf16.gmra.mxu0 %v18374_v3  ;;  %6858 = vmatmul.bf16.gmra.mxu2 %v18375_v34 }
 0x8d2   :  { %6676 = vmatmul.bf16.gmra.mxu1 %v18376_v25 }
 0x8d4   :  { %7050 = vmatmul.bf16.gmra.mxu3 %v18377_v49  ;;  %v6077_v8 = vpop.f32.mrf.mxu2 }
 0x8d5   :  { %v6112_v48 = vadd.f32 %v6077_v8, %v5902_v30 }
 0x8d6   :  { %v6429_v32 = vpop.f32.mrf.mxu0 }
 0x8d7   :  { %v6287_v11 = vpop.f32.mrf.mxu3  ;;  %v6505_v0 = vadd.f32 %v6429_v32, %v16156_v19  ;;  %v6639_v13 = vpop.f32.mrf.mxu1  ;;  %v18379_v19 = vld [vmem:[#allocation43_spill] sm:$0xff] }
 0x8d8   :  { %v16374_v45 = vadd.f32 %v6287_v11, %v6112_v48 }
 0x8d9   :  { %v6715_v7 = vadd.f32 %v6639_v13, %v6505_v0  ;;  %v18380_v13 = vld [vmem:[#allocation44_spill] sm:$0xff] }
 0x8dc   :  { %v6079_v42 = vpop.f32.mrf.mxu2 }
 0x8dd   :  { %v6113_v46 = vadd.f32 %v6079_v42, %v5903_v63 }
 0x8de   :  { %v6432_v35 = vpop.f32.mrf.mxu0 }
 0x8df   :  { %v6289_v47 = vpop.f32.mrf.mxu3  ;;  %v6506_v30 = vadd.f32 %v6432_v35, %v16163_v50  ;;  %v6642_v14 = vpop.f32.mrf.mxu1 }
 0x8e0   :  { %v16380_v26 = vadd.f32 %v6289_v47, %v6113_v46 }
 0x8e1   :  { %v6716_v2 = vadd.f32 %v6642_v14, %v6506_v30  ;;  %6471 = vmatmul.bf16.gmra.mxu0 %v18378_v9  ;;  %6863 = vmatmul.bf16.gmra.mxu2 %v18374_v3 }
 0x8e2   :  { %6681 = vmatmul.bf16.gmra.mxu1 %v18379_v19 }
 0x8e4   :  { %7055 = vmatmul.bf16.gmra.mxu3 %v18376_v25  ;;  %v6824_v51 = vpop.f32.mrf.mxu2 }
 0x8e5   :  { %v6904_v53 = vadd.f32 %v6824_v51, %v6712_v60  ;;  %v13580_v60 = vld [vmem:[%s18140_s3 + $0x3d8] sm:$0xff] }
 0x8e6   :  { %v6434_v63 = vpop.f32.mrf.mxu0  ;;  %7815 = vmatpush.bf16.msrb.mxu3 %v13580_v60 }
 0x8e7   :  { %v7016_v34 = vpop.f32.mrf.mxu3  ;;  %v6507_v6 = vadd.f32 %v6434_v63, %v16166_v27  ;;  %v6644_v49 = vpop.f32.mrf.mxu1  ;;  %v13572_v27 = vld [vmem:[%s18140_s3 + $0x398] sm:$0xff] }
 0x8e8   :  { %v16387_v5 = vadd.f32 %v7016_v34, %v6904_v53  ;;  %7623 = vmatpush.bf16.msrb.mxu2 %v13572_v27 }
 0x8e9   :  { %v6717_v50 = vadd.f32 %v6644_v49, %v6507_v6 }
 0x8ec   :  { %v6826_v33 = vpop.f32.mrf.mxu2 }
 0x8ed   :  { %v6905_v8 = vadd.f32 %v6826_v33, %v6713_v28  ;;  %v18381_v28 = vld [vmem:[#allocation45_spill] sm:$0xff] }
 0x8ee   :  { %v6437_v11 = vpop.f32.mrf.mxu0 }
 0x8ef   :  { %v7018_v48 = vpop.f32.mrf.mxu3  ;;  %v6508_v3 = vadd.f32 %v6437_v11, %v16182_v1  ;;  %v6647_v0 = vpop.f32.mrf.mxu1  ;;  %v13564_v1 = vld [vmem:[%s18140_s3 + $0x358] sm:$0xff] }
 0x8f0   :  { %v16390_v32 = vadd.f32 %v7018_v48, %v6905_v8  ;;  %7431 = vmatpush.bf16.msra.mxu1 %v13564_v1  ;;  %v18382_v8 = vld [vmem:[#allocation56_spill] sm:$0xff] }
 0x8f1   :  { %v6718_v25 = vadd.f32 %v6647_v0, %v6508_v3  ;;  %6476 = vmatmul.bf16.gmra.mxu0 %v18380_v13  ;;  %6868 = vmatmul.bf16.gmra.mxu2 %v18378_v9 }
 0x8f2   :  { %6686 = vmatmul.bf16.gmra.mxu1 %v18381_v28 }
 0x8f4   :  { %7060 = vmatmul.bf16.gmra.mxu3 %v18379_v19  ;;  %v6829_v17 = vpop.f32.mrf.mxu2  ;;  %v13554_v19 = vld [vmem:[%s18140_s3 + $0x308] sm:$0xff] }
 0x8f5   :  { %v6906_v42 = vadd.f32 %v6829_v17, %v6714_v59  ;;  %7223 = vmatpush.bf16.msra.mxu0 %v13554_v19  ;;  %v18386_v19 = vld [vmem:[#allocation59_spill] sm:$0xff] }
 0x8f6   :  { %v6439_v47 = vpop.f32.mrf.mxu0 }
 0x8f7   :  { %v7021_v46 = vpop.f32.mrf.mxu3  ;;  %v6509_v30 = vadd.f32 %v6439_v47, %v16194_v24  ;;  %v6649_v14 = vpop.f32.mrf.mxu1  ;;  %v18383_v24 = vld [vmem:[#allocation57_spill] sm:$0xff] }
 0x8f8   :  { %v16406_v35 = vadd.f32 %v7021_v46, %v6906_v42 }
 0x8f9   :  { %v6719_v9 = vadd.f32 %v6649_v14, %v6509_v30  ;;  %v18384_v14 = vld [vmem:[#allocation58_spill] sm:$0xff] }
 0x8fc   :  { %v6831_v51 = vpop.f32.mrf.mxu2 }
 0x8fd   :  { %v6907_v53 = vadd.f32 %v6831_v51, %v6715_v7  ;;  %v18387_v51 = vld [vmem:[#allocation47_spill] sm:$0xff] }
 0x8fe   :  { %v6442_v63 = vpop.f32.mrf.mxu0 }
 0x8ff   :  { %v7023_v34 = vpop.f32.mrf.mxu3  ;;  %v6510_v59 = vadd.f32 %v6442_v63, %v16201_v10  ;;  %v6652_v49 = vpop.f32.mrf.mxu1 }
 0x900   :  { %v16412_v6 = vadd.f32 %v7023_v34, %v6907_v53 }
 0x901   :  { %v6720_v33 = vadd.f32 %v6652_v49, %v6510_v59  ;;  %6481 = vmatmul.bf16.gmra.mxu0 %v18382_v8  ;;  %6873 = vmatmul.bf16.gmra.mxu2 %v18380_v13 }
 0x902   :  { %6691 = vmatmul.bf16.gmra.mxu1 %v18383_v24 }
 0x904   :  { %7065 = vmatmul.bf16.gmra.mxu3 %v18381_v28  ;;  %v6834_v48 = vpop.f32.mrf.mxu2 }
 0x905   :  { %v6908_v11 = vadd.f32 %v6834_v48, %v6716_v2  ;;  %v18385_v2 = vld [vmem:[#allocation46_spill] sm:$0xff] }
 0x906   :  { %v6444_v7 = vpop.f32.mrf.mxu0 }
 0x907   :  { %v7026_v3 = vpop.f32.mrf.mxu3  ;;  %v6511_v27 = vadd.f32 %v6444_v7, %v16204_v57  ;;  %v6654_v60 = vpop.f32.mrf.mxu1  ;;  %v13571_v57 = vld [vmem:[%s18140_s3 + $0x390] sm:$0xff] }
 0x908   :  { %v16419_v0 = vadd.f32 %v7026_v3, %v6908_v11  ;;  %7624 = vmatpush.bf16.msrb.mxu2 %v13571_v57  ;;  %v13553_v11 = vld [vmem:[%s18140_s3 + $0x300] sm:$0xff]  ;;  %v13562_v3 = vld [vmem:[%s18140_s3 + $0x348] sm:$0xff] }
 0x909   :  { %v6721_v10 = vadd.f32 %v6654_v60, %v6511_v27  ;;  %7224 = vmatpush.bf16.msra.mxu0 %v13553_v11  ;;  %v13561_v60 = vld [vmem:[%s18140_s3 + $0x340] sm:$0xff] }
 0x90c   :  { %v6836_v1 = vpop.f32.mrf.mxu2 }
 0x90d   :  { %v6909_v17 = vadd.f32 %v6836_v1, %v6717_v50  ;;  %v13579_v50 = vld [vmem:[%s18140_s3 + $0x3d0] sm:$0xff] }
 0x90e   :  { %v6447_v46 = vpop.f32.mrf.mxu0  ;;  %7816 = vmatpush.bf16.msrb.mxu3 %v13579_v50 }
 0x90f   :  { %v7028_v42 = vpop.f32.mrf.mxu3  ;;  %v6512_v13 = vadd.f32 %v6447_v46, %v16217_v56  ;;  %v6657_v30 = vpop.f32.mrf.mxu1  ;;  %v13563_v56 = vld [vmem:[%s18140_s3 + $0x350] sm:$0xff] }
 0x910   :  { %v16422_v47 = vadd.f32 %v7028_v42, %v6909_v17  ;;  %7432 = vmatpush.bf16.msra.mxu1 %v13563_v56 }
 0x911   :  { %v6722_v28 = vadd.f32 %v6657_v30, %v6512_v13  ;;  %6486 = vmatmul.bf16.gmra.mxu0 %v18384_v14  ;;  %6878 = vmatmul.bf16.gmra.mxu2 %v18385_v2  ;;  %v18388_v13 = vld [vmem:[#allocation60_spill] sm:$0xff]  ;;  %v18389_v30 = vld [vmem:[#allocation61_spill] sm:$0xff] }
 0x912   :  { %6696 = vmatmul.bf16.gmra.mxu1 %v18386_v19 }
 0x914   :  { %7070 = vmatmul.bf16.gmra.mxu3 %v18387_v51  ;;  %v6839_v53 = vpop.f32.mrf.mxu2  ;;  %7433 = vmatpush.bf16.msra.mxu1 %v13562_v3  ;;  %v18390_v3 = vld [vmem:[#allocation62_spill] sm:$0xff] }
 0x915   :  { %v6910_v34 = vadd.f32 %v6839_v53, %v6718_v25 }
 0x916   :  { %v6449_v59 = vpop.f32.mrf.mxu0 }
 0x917   :  { %v7031_v63 = vpop.f32.mrf.mxu3  ;;  %v6513_v8 = vadd.f32 %v6449_v59, %v16229_v37  ;;  %v6659_v24 = vpop.f32.mrf.mxu1 }
 0x918   :  { %v16438_v49 = vadd.f32 %v7031_v63, %v6910_v34  ;;  %7434 = vmatpush.bf16.msra.mxu1 %v13561_v60 }
 0x919   :  { %v6723_v48 = vadd.f32 %v6659_v24, %v6513_v8 }
 0x91c   :  { %v6841_v7 = vpop.f32.mrf.mxu2 }
 0x91d   :  { %v6911_v25 = vadd.f32 %v6841_v7, %v6719_v9 }
 0x91e   :  { %v6452_v37 = vpop.f32.mrf.mxu0 }
 0x91f   :  { %v7033_v27 = vpop.f32.mrf.mxu3  ;;  %v6514_v17 = vadd.f32 %v6452_v37, %v16236_v61  ;;  %v6662_v42 = vpop.f32.mrf.mxu1 }
 0x920   :  { %v16450_v1 = vadd.f32 %v7033_v27, %v6911_v25 }
 0x921   :  { %v6724_v46 = vadd.f32 %v6662_v42, %v6514_v17  ;;  %6491 = vmatmul.bf16.gmra.mxu0 %v18388_v13  ;;  %6883 = vmatmul.bf16.gmra.mxu2 %v18384_v14 }
 0x922   :  { %6701 = vmatmul.bf16.gmra.mxu1 %v18389_v30 }
 0x924   :  { %7075 = vmatmul.bf16.gmra.mxu3 %v18386_v19  ;;  %v6844_v9 = vpop.f32.mrf.mxu2 }
 0x925   :  { %v6912_v2 = vadd.f32 %v6844_v9, %v6720_v33  ;;  %v13578_v33 = vld [vmem:[%s18140_s3 + $0x3c8] sm:$0xff] }
 0x926   :  { %v6454_v50 = vpop.f32.mrf.mxu0  ;;  %7817 = vmatpush.bf16.msrb.mxu3 %v13578_v33 }
 0x927   :  { %v7036_v57 = vpop.f32.mrf.mxu3  ;;  %v6515_v56 = vadd.f32 %v6454_v50, %v16239_v20  ;;  %v6664_v61 = vpop.f32.mrf.mxu1  ;;  %v13570_v20 = vld [vmem:[%s18140_s3 + $0x388] sm:$0xff] }
 0x928   :  { %v16457_v51 = vadd.f32 %v7036_v57, %v6912_v2  ;;  %7625 = vmatpush.bf16.msrb.mxu2 %v13570_v20  ;;  %v13577_v57 = vld [vmem:[%s18140_s3 + $0x3c0] sm:$0xff] }
 0x929   :  { %v6725_v53 = vadd.f32 %v6664_v61, %v6515_v56 }
 0x92a   :  { %7818 = vmatpush.bf16.msrb.mxu3 %v13577_v57 }
 0x92c   :  { %v6846_v34 = vpop.f32.mrf.mxu2 }
 0x92d   :  { %v6913_v63 = vadd.f32 %v6846_v34, %v6721_v10  ;;  %v18391_v10 = vld [vmem:[#allocation63_spill] sm:$0xff] }
 0x92e   :  { %v6457_v8 = vpop.f32.mrf.mxu0 }
 0x92f   :  { %v7038_v59 = vpop.f32.mrf.mxu3  ;;  %v6516_v14 = vadd.f32 %v6457_v8, %v16246_v21  ;;  %v6667_v11 = vpop.f32.mrf.mxu1 }
 0x930   :  { %v16460_v24 = vadd.f32 %v7038_v59, %v6913_v63  ;;  %v18393_v63 = vld [vmem:[#allocation13_spill] sm:$0xff] }
 0x931   :  { %v6726_v19 = vadd.f32 %v6667_v11, %v6516_v14  ;;  %6496 = vmatmul.bf16.gmra.mxu0 %v18390_v3  ;;  %6888 = vmatmul.bf16.gmra.mxu2 %v18388_v13  ;;  %v13600_v13 = vld [vmem:[%s18142_s5 + $0x78] sm:$0xff] }
 0x932   :  { %6706 = vmatmul.bf16.gmra.mxu1 %v18391_v10  ;;  %8137 = vmatpush.bf16.msrb.mxu0 %v13600_v13 }
 0x934   :  { %7080 = vmatmul.bf16.gmra.mxu3 %v18389_v30  ;;  %v6849_v21 = vpop.f32.mrf.mxu2 }
 0x935   :  { %v6914_v7 = vadd.f32 %v6849_v21, %v6722_v28  ;;  %v13569_v28 = vld [vmem:[%s18140_s3 + $0x380] sm:$0xff] }
 0x936   :  { %v6459_v27 = vpop.f32.mrf.mxu0  ;;  %7626 = vmatpush.bf16.msrb.mxu2 %v13569_v28 }
 0x937   :  { %v7041_v25 = vpop.f32.mrf.mxu3  ;;  %v6517_v37 = vadd.f32 %v6459_v27, %v16252_v31  ;;  %v6669_v17 = vpop.f32.mrf.mxu1 }
 0x938   :  { %v16473_v60 = vadd.f32 %v7041_v25, %v6914_v7 }
 0x939   :  { %v6727_v42 = vadd.f32 %v6669_v17, %v6517_v37 }
 0x93c   :  { %v6851_v9 = vpop.f32.mrf.mxu2 }
 0x93d   :  { %v6915_v2 = vadd.f32 %v6851_v9, %v6723_v48  ;;  %v18392_v48 = vld [vmem:[#allocation12_spill] sm:$0xff] }
 0x93e   :  { %v6462_v50 = vpop.f32.mrf.mxu0  ;;  %v18394_v9 = vld [vmem:[#allocation64_spill] sm:$0xff] }
 0x93f   :  { %v7043_v30 = vpop.f32.mrf.mxu3  ;;  %v6518_v56 = vadd.f32 %v6462_v50, %v16259_v52  ;;  %v6672_v61 = vpop.f32.mrf.mxu1 }
 0x940   :  { %v16485_v31 = vadd.f32 %v7043_v30, %v6915_v2  ;;  %v18396_v2 = vld [vmem:[#allocation65_spill] sm:$0xff]  ;;  %v18397_v30 = vld [vmem:[#allocation15_spill] sm:$0xff] }
 0x941   :  { %v6728_v34 = vadd.f32 %v6672_v61, %v6518_v56  ;;  %6893 = vmatmul.bf16.gmra.mxu2 %v18390_v3  ;;  %7225 = vmatmul.bf16.vlgmr.msra.gmra.mxu0 %v18392_v48  ;;  %v13599_v48 = vld [vmem:[%s18142_s5 + $0x70] sm:$0xff] }
 0x942   :  { %7435 = vmatmul.bf16.vlgmr.msra.gmra.mxu1 %v18393_v63  ;;  %8138 = vmatpush.bf16.msrb.mxu0 %v13599_v48 }
 0x944   :  { %7085 = vmatmul.bf16.gmra.mxu3 %v18391_v10  ;;  %v6854_v59 = vpop.f32.mrf.mxu2 }
 0x945   :  { %v6916_v8 = vadd.f32 %v6854_v59, %v6724_v46  ;;  %v18395_v46 = vld [vmem:[#allocation14_spill] sm:$0xff] }
 0x946   :  { %v6464_v11 = vpop.f32.mrf.mxu0 }
 0x947   :  { %v7046_v14 = vpop.f32.mrf.mxu3  ;;  %v6519_v52 = vadd.f32 %v6464_v11, %v16262_v12  ;;  %v6674_v33 = vpop.f32.mrf.mxu1 }
 0x948   :  { %v16492_v20 = vadd.f32 %v7046_v14, %v6916_v8 }
 0x949   :  { %v6729_v21 = vadd.f32 %v6674_v33, %v6519_v52 }
 0x94c   :  { %v6856_v7 = vpop.f32.mrf.mxu2 }
 0x94d   :  { %v6917_v25 = vadd.f32 %v6856_v7, %v6725_v53  ;;  %v18398_v7 = vld [vmem:[#allocation16_spill] sm:$0xff] }
 0x94e   :  { %v6467_v3 = vpop.f32.mrf.mxu0 }
 0x94f   :  { %v7048_v27 = vpop.f32.mrf.mxu3  ;;  %v6520_v10 = vadd.f32 %v6467_v3, %v16278_v16  ;;  %v6677_v17 = vpop.f32.mrf.mxu1 }
 0x950   :  { %v16495_v37 = vadd.f32 %v7048_v27, %v6917_v25 }
 0x951   :  { %v6730_v13 = vadd.f32 %v6677_v17, %v6520_v10  ;;  %6898 = vmatmul.bf16.gmra.mxu2 %v18394_v9  ;;  %7230 = vmatmul.bf16.gmra.mxu0 %v18395_v46 }
 0x952   :  { %7440 = vmatmul.bf16.gmra.mxu1 %v18397_v30 }
 0x954   :  { %7090 = vmatmul.bf16.gmra.mxu3 %v18396_v2  ;;  %v6859_v12 = vpop.f32.mrf.mxu2 }
 0x955   :  { %v6918_v28 = vadd.f32 %v6859_v12, %v6726_v19 }
 0x956   :  { %v6469_v53 = vpop.f32.mrf.mxu0 }
 0x957   :  { %v7051_v57 = vpop.f32.mrf.mxu3  ;;  %v6521_v56 = vadd.f32 %v6469_v53, %v16284_v58  ;;  %v6679_v61 = vpop.f32.mrf.mxu1  ;;  %v18399_v58 = vld [vmem:[#allocation17_spill] sm:$0xff] }
 0x958   :  { %v16502_v50 = vadd.f32 %v7051_v57, %v6918_v28 }
 0x959   :  { %v6731_v16 = vadd.f32 %v6679_v61, %v6521_v56  ;;  %v18400_v61 = vld [vmem:[#allocation18_spill] sm:$0xff] }
 0x95c   :  { %v6861_v63 = vpop.f32.mrf.mxu2 }
 0x95d   :  { %v6919_v59 = vadd.f32 %v6861_v63, %v6727_v42 }
 0x95e   :  { %v6472_v14 = vpop.f32.mrf.mxu0 }
 0x95f   :  { %v7053_v8 = vpop.f32.mrf.mxu3  ;;  %v6522_v19 = vadd.f32 %v6472_v14, %v16291_v40  ;;  %v6682_v52 = vpop.f32.mrf.mxu1 }
 0x960   :  { %v16508_v11 = vadd.f32 %v7053_v8, %v6919_v59 }
 0x961   :  { %v6732_v33 = vadd.f32 %v6682_v52, %v6522_v19  ;;  %7235 = vmatmul.bf16.gmra.mxu0 %v18398_v7  ;;  %7627 = vmatmul.bf16.vlgmr.msrb.gmra.mxu2 %v18395_v46 }
 0x962   :  { %7445 = vmatmul.bf16.gmra.mxu1 %v18399_v58 }
 0x964   :  { %7819 = vmatmul.bf16.vlgmr.msrb.gmra.mxu3 %v18397_v30  ;;  %v6864_v25 = vpop.f32.mrf.mxu2 }
 0x965   :  { %v6920_v27 = vadd.f32 %v6864_v25, %v6728_v34  ;;  %v13616_v34 = vld [vmem:[%s18142_s5 + $0xf8] sm:$0xff] }
 0x966   :  { %v6474_v42 = vpop.f32.mrf.mxu0  ;;  %8446 = vmatpush.bf16.msra.mxu3 %v13616_v34 }
 0x967   :  { %v7056_v3 = vpop.f32.mrf.mxu3  ;;  %v6523_v17 = vadd.f32 %v6474_v42, %v16294_v43  ;;  %v6684_v9 = vpop.f32.mrf.mxu1  ;;  %v13608_v43 = vld [vmem:[%s18142_s5 + $0xb8] sm:$0xff] }
 0x968   :  { %v16515_v10 = vadd.f32 %v7056_v3, %v6920_v27  ;;  %8332 = vmatpush.bf16.msra.mxu2 %v13608_v43 }
 0x969   :  { %v6733_v40 = vadd.f32 %v6684_v9, %v6523_v17 }
 0x96c   :  { %v6866_v2 = vpop.f32.mrf.mxu2 }
 0x96d   :  { %v6921_v12 = vadd.f32 %v6866_v2, %v6729_v21  ;;  %v18401_v21 = vld [vmem:[#allocation19_spill] sm:$0xff] }
 0x96e   :  { %v6477_v57 = vpop.f32.mrf.mxu0 }
 0x96f   :  { %v7058_v28 = vpop.f32.mrf.mxu3  ;;  %v6524_v46 = vadd.f32 %v6477_v57, %v16310_v55  ;;  %v6687_v56 = vpop.f32.mrf.mxu1  ;;  %v13592_v55 = vld [vmem:[%s18142_s5 + $0x38] sm:$0xff] }
 0x970   :  { %v16518_v53 = vadd.f32 %v7058_v28, %v6921_v12  ;;  %8226 = vmatpush.bf16.msrb.mxu1 %v13592_v55  ;;  %v18402_v12 = vld [vmem:[#allocation28_spill] sm:$0xff] }
 0x971   :  { %v6734_v30 = vadd.f32 %v6687_v56, %v6524_v46  ;;  %7240 = vmatmul.bf16.gmra.mxu0 %v18400_v61  ;;  %7632 = vmatmul.bf16.gmra.mxu2 %v18398_v7 }
 0x972   :  { %7450 = vmatmul.bf16.gmra.mxu1 %v18401_v21 }
 0x974   :  { %7824 = vmatmul.bf16.gmra.mxu3 %v18399_v58  ;;  %v6869_v48 = vpop.f32.mrf.mxu2  ;;  %v13598_v58 = vld [vmem:[%s18142_s5 + $0x68] sm:$0xff] }
 0x975   :  { %v6922_v63 = vadd.f32 %v6869_v48, %v6730_v13  ;;  %8139 = vmatpush.bf16.msrb.mxu0 %v13598_v58  ;;  %v18406_v58 = vld [vmem:[#allocation31_spill] sm:$0xff] }
 0x976   :  { %v6479_v8 = vpop.f32.mrf.mxu0 }
 0x977   :  { %v7061_v59 = vpop.f32.mrf.mxu3  ;;  %v6525_v19 = vadd.f32 %v6479_v8, %v16316_v41  ;;  %v6689_v52 = vpop.f32.mrf.mxu1  ;;  %v18403_v41 = vld [vmem:[#allocation29_spill] sm:$0xff] }
 0x978   :  { %v16534_v14 = vadd.f32 %v7061_v59, %v6922_v63 }
 0x979   :  { %v6735_v7 = vadd.f32 %v6689_v52, %v6525_v19  ;;  %v18404_v52 = vld [vmem:[#allocation30_spill] sm:$0xff] }
 0x97c   :  { %v6871_v25 = vpop.f32.mrf.mxu2 }
 0x97d   :  { %v6923_v27 = vadd.f32 %v6871_v25, %v6731_v16  ;;  %v18407_v25 = vld [vmem:[#allocation21_spill] sm:$0xff] }
 0x97e   :  { %v6482_v42 = vpop.f32.mrf.mxu0 }
 0x97f   :  { %v7063_v3 = vpop.f32.mrf.mxu3  ;;  %v6526_v13 = vadd.f32 %v6482_v42, %v16323_v39  ;;  %v6692_v9 = vpop.f32.mrf.mxu1 }
 0x980   :  { %v16540_v17 = vadd.f32 %v7063_v3, %v6923_v27 }
 0x981   :  { %v6736_v2 = vadd.f32 %v6692_v9, %v6526_v13  ;;  %7245 = vmatmul.bf16.gmra.mxu0 %v18402_v12  ;;  %7637 = vmatmul.bf16.gmra.mxu2 %v18400_v61 }
 0x982   :  { %7455 = vmatmul.bf16.gmra.mxu1 %v18403_v41 }
 0x984   :  { %7829 = vmatmul.bf16.gmra.mxu3 %v18401_v21  ;;  %v6874_v28 = vpop.f32.mrf.mxu2 }
 0x985   :  { %v6924_v57 = vadd.f32 %v6874_v28, %v6732_v33  ;;  %v18405_v33 = vld [vmem:[#allocation20_spill] sm:$0xff] }
 0x986   :  { %v6484_v16 = vpop.f32.mrf.mxu0 }
 0x987   :  { %v7066_v46 = vpop.f32.mrf.mxu3  ;;  %v6527_v43 = vadd.f32 %v6484_v16, %v16326_v22  ;;  %v6694_v34 = vpop.f32.mrf.mxu1  ;;  %v13607_v22 = vld [vmem:[%s18142_s5 + $0xb0] sm:$0xff] }
 0x988   :  { %v16547_v56 = vadd.f32 %v7066_v46, %v6924_v57  ;;  %8333 = vmatpush.bf16.msra.mxu2 %v13607_v22  ;;  %v13597_v57 = vld [vmem:[%s18142_s5 + $0x60] sm:$0xff] }
 0x989   :  { %v6737_v39 = vadd.f32 %v6694_v34, %v6527_v43  ;;  %8140 = vmatpush.bf16.msrb.mxu0 %v13597_v57 }
 0x98c   :  { %v6876_v55 = vpop.f32.mrf.mxu2 }
 0x98d   :  { %v6925_v48 = vadd.f32 %v6876_v55, %v6733_v40  ;;  %v13615_v40 = vld [vmem:[%s18142_s5 + $0xf0] sm:$0xff] }
 0x98e   :  { %v6487_v59 = vpop.f32.mrf.mxu0  ;;  %8447 = vmatpush.bf16.msra.mxu3 %v13615_v40 }
 0x98f   :  { %v7068_v63 = vpop.f32.mrf.mxu3  ;;  %v6528_v61 = vadd.f32 %v6487_v59, %v16342_v44  ;;  %v6697_v19 = vpop.f32.mrf.mxu1  ;;  %v13591_v44 = vld [vmem:[%s18142_s5 + $0x30] sm:$0xff] }
 0x990   :  { %v16550_v8 = vadd.f32 %v7068_v63, %v6925_v48  ;;  %8227 = vmatpush.bf16.msrb.mxu1 %v13591_v44  ;;  %v18408_v59 = vld [vmem:[#allocation32_spill] sm:$0xff] }
 0x991   :  { %v6738_v21 = vadd.f32 %v6697_v19, %v6528_v61  ;;  %7250 = vmatmul.bf16.gmra.mxu0 %v18404_v52  ;;  %7642 = vmatmul.bf16.gmra.mxu2 %v18405_v33 }
 0x992   :  { %7460 = vmatmul.bf16.gmra.mxu1 %v18406_v58 }
 0x994   :  { %7834 = vmatmul.bf16.gmra.mxu3 %v18407_v25  ;;  %v6879_v27 = vpop.f32.mrf.mxu2 }
 0x995   :  { %v6926_v3 = vadd.f32 %v6879_v27, %v6734_v30 }
 0x996   :  { %v6489_v13 = vpop.f32.mrf.mxu0 }
 0x997   :  { %v7071_v42 = vpop.f32.mrf.mxu3  ;;  %v6529_v12 = vadd.f32 %v6489_v13, %v16348_v15  ;;  %v6699_v41 = vpop.f32.mrf.mxu1  ;;  %v18409_v15 = vld [vmem:[#allocation33_spill] sm:$0xff] }
 0x998   :  { %v16566_v9 = vadd.f32 %v7071_v42, %v6926_v3 }
 0x999   :  { %v6739_v28 = vadd.f32 %v6699_v41, %v6529_v12  ;;  %v18410_v41 = vld [vmem:[#allocation34_spill] sm:$0xff] }
 0x99c   :  { %v6881_v46 = vpop.f32.mrf.mxu2 }
 0x99d   :  { %v6927_v16 = vadd.f32 %v6881_v46, %v6735_v7 }
 0x99e   :  { %v6492_v34 = vpop.f32.mrf.mxu0 }
 0x99f   :  { %v7073_v43 = vpop.f32.mrf.mxu3  ;;  %v6530_v30 = vadd.f32 %v6492_v34, %v16355_v62  ;;  %v6702_v48 = vpop.f32.mrf.mxu1 }
 0x9a0   :  { %v16572_v55 = vadd.f32 %v7073_v43, %v6927_v16 }
 0x9a1   :  { %v6740_v63 = vadd.f32 %v6702_v48, %v6530_v30  ;;  %7255 = vmatmul.bf16.gmra.mxu0 %v18408_v59  ;;  %7647 = vmatmul.bf16.gmra.mxu2 %v18404_v52 }
 0x9a2   :  { %7465 = vmatmul.bf16.gmra.mxu1 %v18409_v15 }
 0x9a4   :  { %7839 = vmatmul.bf16.gmra.mxu3 %v18406_v58  ;;  %v6884_v61 = vpop.f32.mrf.mxu2 }
 0x9a5   :  { %v6928_v19 = vadd.f32 %v6884_v61, %v6736_v2  ;;  %v13614_v2 = vld [vmem:[%s18142_s5 + $0xe8] sm:$0xff] }
 0x9a6   :  { %v6494_v7 = vpop.f32.mrf.mxu0  ;;  %8448 = vmatpush.bf16.msra.mxu3 %v13614_v2 }
 0x9a7   :  { %v7076_v33 = vpop.f32.mrf.mxu3  ;;  %v6531_v40 = vadd.f32 %v6494_v7, %v16358_v29  ;;  %v6704_v25 = vpop.f32.mrf.mxu1  ;;  %v13606_v29 = vld [vmem:[%s18142_s5 + $0xa8] sm:$0xff] }
 0x9a8   :  { %v16579_v22 = vadd.f32 %v7076_v33, %v6928_v19  ;;  %8334 = vmatpush.bf16.msra.mxu2 %v13606_v29 }
 0x9a9   :  { %v6741_v62 = vadd.f32 %v6704_v25, %v6531_v40 }
 0x9ac   :  { %v6886_v44 = vpop.f32.mrf.mxu2 }
 0x9ad   :  { %v6929_v27 = vadd.f32 %v6886_v44, %v6737_v39  ;;  %v18411_v39 = vld [vmem:[#allocation35_spill] sm:$0xff] }
 0x9ae   :  { %v6497_v42 = vpop.f32.mrf.mxu0 }
 0x9af   :  { %v7078_v3 = vpop.f32.mrf.mxu3  ;;  %v6532_v52 = vadd.f32 %v6497_v42, %v16374_v45  ;;  %v6707_v12 = vpop.f32.mrf.mxu1  ;;  %v13590_v45 = vld [vmem:[%s18142_s5 + $0x28] sm:$0xff] }
 0x9b0   :  { %v16582_v13 = vadd.f32 %v7078_v3, %v6929_v27  ;;  %8228 = vmatpush.bf16.msrb.mxu1 %v13590_v45  ;;  %v18412_v27 = vld [vmem:[#allocation48_spill] sm:$0xff] }
 0x9b1   :  { %v6742_v58 = vadd.f32 %v6707_v12, %v6532_v52  ;;  %7260 = vmatmul.bf16.gmra.mxu0 %v18410_v41  ;;  %7652 = vmatmul.bf16.gmra.mxu2 %v18408_v59 }
 0x9b2   :  { %7470 = vmatmul.bf16.gmra.mxu1 %v18411_v39 }
 0x9b4   :  { %7844 = vmatmul.bf16.gmra.mxu3 %v18409_v15  ;;  %v6889_v57 = vpop.f32.mrf.mxu2  ;;  %v13596_v15 = vld [vmem:[%s18142_s5 + $0x58] sm:$0xff] }
 0x9b5   :  { %v6930_v46 = vadd.f32 %v6889_v57, %v6738_v21  ;;  %8141 = vmatpush.bf16.msrb.mxu0 %v13596_v15  ;;  %v18417_v15 = vld [vmem:[#allocation37_spill] sm:$0xff] }
 0x9b6   :  { %v6499_v43 = vpop.f32.mrf.mxu0 }
 0x9b7   :  { %v7081_v16 = vpop.f32.mrf.mxu3  ;;  %v6533_v30 = vadd.f32 %v6499_v43, %v16380_v26  ;;  %v6709_v48 = vpop.f32.mrf.mxu1  ;;  %v18413_v26 = vld [vmem:[#allocation49_spill] sm:$0xff] }
 0x9b8   :  { %v16598_v34 = vadd.f32 %v7081_v16, %v6930_v46 }
 0x9b9   :  { %v6743_v59 = vadd.f32 %v6709_v48, %v6533_v30  ;;  %v18416_v48 = vld [vmem:[#allocation51_spill] sm:$0xff] }
 0x9bc   :  { %v6891_v61 = vpop.f32.mrf.mxu2 }
 0x9bd   :  { %v6931_v19 = vadd.f32 %v6891_v61, %v6739_v28 }
 0x9be   :  { %v7226_v7 = vpop.f32.mrf.mxu0 }
 0x9bf   :  { %v7083_v33 = vpop.f32.mrf.mxu3  ;;  %v7306_v21 = vadd.f32 %v7226_v7, %v16387_v5  ;;  %v7436_v25 = vpop.f32.mrf.mxu1 }
 0x9c0   :  { %v16604_v40 = vadd.f32 %v7083_v33, %v6931_v19 }
 0x9c1   :  { %v7516_v44 = vadd.f32 %v7436_v25, %v7306_v21  ;;  %7265 = vmatmul.bf16.gmra.mxu0 %v18412_v27  ;;  %7657 = vmatmul.bf16.gmra.mxu2 %v18410_v41  ;;  %v13613_v25 = vld [vmem:[%s18142_s5 + $0xe0] sm:$0xff] }
 0x9c2   :  { %7475 = vmatmul.bf16.gmra.mxu1 %v18413_v26  ;;  %8449 = vmatpush.bf16.msra.mxu3 %v13613_v25 }
 0x9c4   :  { %7849 = vmatmul.bf16.gmra.mxu3 %v18411_v39  ;;  %v6894_v3 = vpop.f32.mrf.mxu2  ;;  %v18414_v39 = vld [vmem:[#allocation50_spill] sm:$0xff] }
 0x9c5   :  { %v6932_v42 = vadd.f32 %v6894_v3, %v6740_v63  ;;  %v18415_v63 = vld [vmem:[#allocation36_spill] sm:$0xff] }
 0x9c6   :  { %v7228_v28 = vpop.f32.mrf.mxu0 }
 0x9c7   :  { %v7086_v52 = vpop.f32.mrf.mxu3  ;;  %v7307_v29 = vadd.f32 %v7228_v28, %v16390_v32  ;;  %v7438_v2 = vpop.f32.mrf.mxu1 }
 0x9c8   :  { %v16611_v12 = vadd.f32 %v7086_v52, %v6932_v42 }
 0x9c9   :  { %v7517_v5 = vadd.f32 %v7438_v2, %v7307_v29  ;;  %v13595_v29 = vld [vmem:[%s18142_s5 + $0x50] sm:$0xff] }
 0x9ca   :  { %8142 = vmatpush.bf16.msrb.mxu0 %v13595_v29 }
 0x9cc   :  { %v6896_v45 = vpop.f32.mrf.mxu2 }
 0x9cd   :  { %v6933_v57 = vadd.f32 %v6896_v45, %v6741_v62 }
 0x9ce   :  { %v7231_v16 = vpop.f32.mrf.mxu0 }
 0x9cf   :  { %v7088_v46 = vpop.f32.mrf.mxu3  ;;  %v7308_v41 = vadd.f32 %v7231_v16, %v16406_v35  ;;  %v7441_v30 = vpop.f32.mrf.mxu1  ;;  %v13605_v35 = vld [vmem:[%s18142_s5 + $0xa0] sm:$0xff] }
 0x9d0   :  { %v16614_v43 = vadd.f32 %v7088_v46, %v6933_v57  ;;  %8335 = vmatpush.bf16.msra.mxu2 %v13605_v35  ;;  %v16654_v46 = vld [vmem:[%s18143_s4] ss:$0 sm:$0xff] }
 0x9d1   :  { %7270 = vmatmul.bf16.gmra.mxu0 %v18414_v39  ;;  %7662 = vmatmul.bf16.gmra.mxu2 %v18415_v63 }
 0x9d2   :  { %7480 = vmatmul.bf16.gmra.mxu1 %v18416_v48 }
 0x9d4   :  { %7854 = vmatmul.bf16.gmra.mxu3 %v18417_v15  ;;  %v6899_v32 = vpop.f32.mrf.mxu2 }
 0x9d5   :  { %v6934_v61 = vadd.f32 %v6899_v32, %v6742_v58  ;;  %v13589_v58 = vld [vmem:[%s18142_s5 + $0x20] sm:$0xff] }
 0x9d6   :  { %v7233_v33 = vpop.f32.mrf.mxu0  ;;  %8229 = vmatpush.bf16.msrb.mxu1 %v13589_v58 }
 0x9d7   :  { %v7091_v19 = vpop.f32.mrf.mxu3  ;;  %v16624_v7 = vadd.f32 %v7233_v33, %v16412_v6  ;;  %v16626_v21 = vpop.f32.mrf.mxu1 }
 0x9d8   :  { %v16621_v62 = vadd.f32 %v7091_v19, %v6934_v61 }
 0x9dc   :  { %v6901_v27 = vpop.f32.mrf.mxu2 }
 0x9dd   :  { %v6935_v6 = vadd.f32 %v6901_v27, %v6743_v59 }
 0x9de   :  { %v7236_v3 = vpop.f32.mrf.mxu0 }
 0x9df   :  { %v7093_v26 = vpop.f32.mrf.mxu3  ;;  %v16640_v52 = vadd.f32 %v7236_v3, %v16419_v0  ;;  %v16642_v28 = vpop.f32.mrf.mxu1 }
 0x9e0   :  { %v16637_v42 = vadd.f32 %v7093_v26, %v6935_v6 }
 0x9e1   :  { %7275 = vmatmul.bf16.gmra.mxu0 %v18361_v4  ;;  %7667 = vmatmul.bf16.gmra.mxu2 %v18414_v39 }
 0x9e2   :  { %7485 = vmatmul.bf16.gmra.mxu1 %v18362_v54 }
 0x9e4   :  { %7859 = vmatmul.bf16.gmra.mxu3 %v18416_v48  ;;  %v7628_v59 = vpop.f32.mrf.mxu2 }
 0x9e5   :  { %v7708_v2 = vadd.f32 %v7628_v59, %v7516_v44 }
 0x9e6   :  { %v7238_v0 = vpop.f32.mrf.mxu0 }
 0x9e7   :  { %v7820_v45 = vpop.f32.mrf.mxu3  ;;  %v16657_v16 = vadd.f32 %v7238_v0, %v16422_v47  ;;  %v16659_v63 = vpop.f32.mrf.mxu1  ;;  %v7518_v47 = vadd.f32 %v7441_v30, %v7308_v41  ;;  %v13588_v41 = vld [vmem:[%s18142_s5 + $0x18] sm:$0xff] }
 0x9e8   :  { %v7900_v57 = vadd.f32 %v7820_v45, %v7708_v2  ;;  %8230 = vmatpush.bf16.msrb.mxu1 %v13588_v41 }
 0x9ea   :  { %v7936_v39 = vadd.f32 %v16654_v46, %v7900_v57 }
 0x9ec   :  { %v7630_v15 = vpop.f32.mrf.mxu2  ;;  %v7968_v44 = vmax.f32 %v7936_v39, 0.0 }
 0x9ed   :  { %v7709_v48 = vadd.f32 %v7630_v15, %v7517_v5 }
 0x9ee   :  { %v7241_v61 = vpop.f32.mrf.mxu0  ;;  %v8000_v5 = vpack.c.bf16 %v7968_v44, %v7968_v44 }
 0x9ef   :  { %v7822_v32 = vpop.f32.mrf.mxu3  ;;  %v7312_v33 = vadd.f32 %v7241_v61, %v16438_v49  ;;  %v7451_v35 = vpop.f32.mrf.mxu1 }
 0x9f0   :  { %v7901_v19 = vadd.f32 %v7822_v32, %v7709_v48  ;;  %v8170_v59 = vunpack.c.l.b16 %v8000_v5 }
 0x9f1   :  { %v16664_v58 = vadd.f32 %v7451_v35, %v7312_v33  ;;  %7280 = vmatmul.bf16.gmra.mxu0 %v18363_v38  ;;  %7672 = vmatmul.bf16.gmra.mxu2 %v18361_v4  ;;  %v13604_v4 = vld [vmem:[%s18142_s5 + $0x98] sm:$0xff] }
 0x9f2   :  { %v7937_v25 = vadd.f32 %v16654_v46, %v7901_v19  ;;  %7490 = vmatmul.bf16.gmra.mxu1 %v18364_v23  ;;  %8336 = vmatpush.bf16.msra.mxu2 %v13604_v4 }
 0x9f4   :  { %7864 = vmatmul.bf16.gmra.mxu3 %v18362_v54  ;;  %v7969_v27 = vmax.f32 %v7937_v25, 0.0  ;;  %v7633_v6 = vpop.f32.mrf.mxu2  ;;  %v13612_v54 = vld [vmem:[%s18142_s5 + $0xd8] sm:$0xff] }
 0x9f5   :  { %v7710_v3 = vadd.f32 %v7633_v6, %v7518_v47  ;;  %8450 = vmatpush.bf16.msra.mxu3 %v13612_v54  ;;  %v13594_v47 = vld [vmem:[%s18142_s5 + $0x48] sm:$0xff] }
 0x9f6   :  { %v8001_v26 = vpack.c.bf16 %v7969_v27, %v7969_v27  ;;  %v7243_v29 = vpop.f32.mrf.mxu0  ;;  %8143 = vmatpush.bf16.msrb.mxu0 %v13594_v47 }
 0x9f7   :  { %v7825_v49 = vpop.f32.mrf.mxu3  ;;  %v7313_v0 = vadd.f32 %v7243_v29, %v16450_v1  ;;  %v7453_v57 = vpop.f32.mrf.mxu1  ;;  %v7519_v1 = vadd.f32 %v16626_v21, %v16624_v7  ;;  %v18418_v7 = vld [vmem:[#allocation66_spill] sm:$0xff]  ;;  %v18419_v21 = vld [vmem:[#allocation67_spill] sm:$0xff] }
 0x9f8   :  { %v8171_v2 = vunpack.c.l.b16 %v8001_v26  ;;  %v7902_v45 = vadd.f32 %v7825_v49, %v7710_v3 }
 0x9f9   :  { %v16682_v39 = vadd.f32 %v7453_v57, %v7313_v0 }
 0x9fa   :  { %v16680_v30 = vpack.c.b16 %v8171_v2, %v8170_v59  ;;  %v7938_v15 = vadd.f32 %v16654_v46, %v7902_v45 }
 0x9fc   :  { %v7635_v48 = vpop.f32.mrf.mxu2  ;;  %v7970_v19 = vmax.f32 %v7938_v15, 0.0 }
 0x9fd   :  { %v7711_v32 = vadd.f32 %v7635_v48, %v7519_v1 }
 0x9fe   :  { %v7246_v44 = vpop.f32.mrf.mxu0  ;;  %v8002_v27 = vpack.c.bf16 %v7970_v19, %v7970_v19 }
 0x9ff   :  { %v7827_v61 = vpop.f32.mrf.mxu3  ;;  %v16688_v35 = vadd.f32 %v7246_v44, %v16457_v51  ;;  %v16690_v25 = vpop.f32.mrf.mxu1  ;;  %v7520_v51 = vadd.f32 %v16642_v28, %v16640_v52  ;;  %v7521_v52 = vadd.f32 %v16659_v63, %v16657_v16  ;;  %v18420_v44 = vld [vmem:[#allocation68_spill] sm:$0xff]  ;;  %v18421_v16 = vld [vmem:[#allocation69_spill] sm:$0xff] }
 0xa00   :  { %v7903_v33 = vadd.f32 %v7827_v61, %v7711_v32  ;;  %v8073_v2 = vunpack.c.l.b16 %v8002_v27 }
 0xa01   :  { %7285 = vmatmul.bf16.gmra.mxu0 %v18418_v7  ;;  %7677 = vmatmul.bf16.gmra.mxu2 %v18363_v38  ;;  %v13587_v7 = vld [vmem:[%s18142_s5 + $0x10] sm:$0xff] }
 0xa02   :  { %v7939_v5 = vadd.f32 %v16654_v46, %v7903_v33  ;;  %7495 = vmatmul.bf16.gmra.mxu1 %v18419_v21 }
 0xa03   :  { %8231 = vmatpush.bf16.msrb.mxu1 %v13587_v7 }
 0xa04   :  { %7869 = vmatmul.bf16.gmra.mxu3 %v18364_v23  ;;  %v7971_v6 = vmax.f32 %v7939_v5, 0.0  ;;  %v7638_v26 = vpop.f32.mrf.mxu2 }
 0xa05   :  { %v7712_v49 = vadd.f32 %v7638_v26, %v7520_v51  ;;  %v13586_v26 = vld [vmem:[%s18142_s5 + $0x8] sm:$0xff] }
 0xa06   :  { %v8003_v3 = vpack.c.bf16 %v7971_v6, %v7971_v6  ;;  %v7248_v59 = vpop.f32.mrf.mxu0 }
 0xa07   :  { %v7830_v29 = vpop.f32.mrf.mxu3  ;;  %v16703_v38 = vadd.f32 %v7248_v59, %v16460_v24  ;;  %v16705_v57 = vpop.f32.mrf.mxu1  ;;  %8232 = vmatpush.bf16.msrb.mxu1 %v13586_v26 }
 0xa08   :  { %v8074_v45 = vunpack.c.l.b16 %v8003_v3  ;;  %v7904_v0 = vadd.f32 %v7830_v29, %v7712_v49 }
 0xa0a   :  { %v16707_v23 = vpack.c.b16 %v8074_v45, %v8073_v2  ;;  %v7940_v28 = vadd.f32 %v16654_v46, %v7904_v0  ;;  %v13593_v45 = vld [vmem:[%s18142_s5 + $0x40] sm:$0xff] }
 0xa0b   :  { %v13585_v0 = vld [vmem:[%s18142_s5] sm:$0xff]  ;;  %8144 = vmatpush.bf16.msrb.mxu0 %v13593_v45  ;;  %v18424_v45 = vld [vmem:[#allocation72_spill] sm:$0xff] }
 0xa0c   :  { %v7640_v4 = vpop.f32.mrf.mxu2  ;;  %v7972_v15 = vmax.f32 %v7940_v28, 0.0  ;;  %8233 = vmatpush.bf16.msrb.mxu1 %v13585_v0 }
 0xa0d   :  { %v7713_v54 = vadd.f32 %v7640_v4, %v7521_v52 }
 0xa0e   :  { %v7251_v1 = vpop.f32.mrf.mxu0  ;;  %v8004_v63 = vpack.c.bf16 %v7972_v15, %v7972_v15  ;;  %v18423_v15 = vld [vmem:[#allocation71_spill] sm:$0xff] }
 0xa0f   :  { %v7832_v41 = vpop.f32.mrf.mxu3  ;;  %v16713_v32 = vadd.f32 %v7251_v1, %v16473_v60  ;;  %v16715_v24 = vpop.f32.mrf.mxu1  ;;  %v18422_v1 = vld [vmem:[#allocation70_spill] sm:$0xff] }
 0xa10   :  { %v7905_v48 = vadd.f32 %v7832_v41, %v7713_v54  ;;  %v8075_v51 = vunpack.c.l.b16 %v8004_v63 }
 0xa11   :  { %7290 = vmatmul.bf16.gmra.mxu0 %v18420_v44  ;;  %7682 = vmatmul.bf16.gmra.mxu2 %v15589_v36 }
 0xa12   :  { %v7941_v61 = vadd.f32 %v16654_v46, %v7905_v48  ;;  %7500 = vmatmul.bf16.gmra.mxu1 %v18421_v16  ;;  %v7524_v48 = vadd.f32 %v16690_v25, %v16688_v35 }
 0xa14   :  { %7874 = vmatmul.bf16.gmra.mxu3 %v15606_v18  ;;  %v7973_v19 = vmax.f32 %v7941_v61, 0.0  ;;  %v7643_v33 = vpop.f32.mrf.mxu2  ;;  %v13603_v18 = vld [vmem:[%s18142_s5 + $0x90] sm:$0xff] }
 0xa15   :  { %v7714_v5 = vadd.f32 %v7643_v33, %v16664_v58  ;;  %v13611_v58 = vld [vmem:[%s18142_s5 + $0xd0] sm:$0xff]  ;;  %8337 = vmatpush.bf16.msra.mxu2 %v13603_v18 }
 0xa16   :  { %v8005_v47 = vpack.c.bf16 %v7973_v19, %v7973_v19  ;;  %v16726_v21 = vpop.f32.mrf.mxu0  ;;  %8451 = vmatpush.bf16.msra.mxu3 %v13611_v58 }
 0xa17   :  { %v7835_v60 = vpop.f32.mrf.mxu3  ;;  %v16728_v6 = vpop.f32.mrf.mxu1 }
 0xa18   :  { %v8076_v27 = vunpack.c.l.b16 %v8005_v47  ;;  %v7906_v36 = vadd.f32 %v7835_v60, %v7714_v5 }
 0xa1a   :  { %v16739_v3 = vpack.c.b16 %v8076_v27, %v8075_v51  ;;  %v7942_v49 = vadd.f32 %v16654_v46, %v7906_v36 }
 0xa1c   :  { %v7645_v29 = vpop.f32.mrf.mxu2  ;;  %v7974_v28 = vmax.f32 %v7942_v49, 0.0 }
 0xa1d   :  { %v7715_v59 = vadd.f32 %v7645_v29, %v16682_v39 }
 0xa1e   :  { %v7256_v52 = vpop.f32.mrf.mxu0  ;;  %v8006_v61 = vpack.c.bf16 %v7974_v28, %v7974_v28 }
 0xa1f   :  { %v7837_v2 = vpop.f32.mrf.mxu3  ;;  %v16750_v54 = vadd.f32 %v7256_v52, %v16492_v20  ;;  %v16752_v41 = vpop.f32.mrf.mxu1 }
 0xa20   :  { %v7907_v4 = vadd.f32 %v7837_v2, %v7715_v59  ;;  %v8276_v60 = vunpack.c.l.b16 %v8006_v61 }
 0xa21   :  { %7295 = vmatmul.bf16.gmra.mxu0 %v18422_v1  ;;  %7687 = vmatmul.bf16.gmra.mxu2 %v18420_v44 }
 0xa22   :  { %v7943_v39 = vadd.f32 %v16654_v46, %v7907_v4  ;;  %7505 = vmatmul.bf16.gmra.mxu1 %v18423_v15 }
 0xa24   :  { %7879 = vmatmul.bf16.gmra.mxu3 %v18421_v16  ;;  %v7975_v20 = vmax.f32 %v7943_v39, 0.0  ;;  %v7648_v63 = vpop.f32.mrf.mxu2  ;;  %v7525_v16 = vadd.f32 %v16705_v57, %v16703_v38  ;;  %v18425_v38 = vld [vmem:[#allocation73_spill] sm:$0xff]  ;;  %v7526_v57 = vadd.f32 %v16715_v24, %v16713_v32  ;;  %v13602_v32 = vld [vmem:[%s18142_s5 + $0x88] sm:$0xff] }
 0xa25   :  { %v7716_v33 = vadd.f32 %v7648_v63, %v7524_v48  ;;  %v7317_v48 = vadd.f32 %v16726_v21, %v16485_v31  ;;  %v13610_v24 = vld [vmem:[%s18142_s5 + $0xc8] sm:$0xff]  ;;  %8338 = vmatpush.bf16.msra.mxu2 %v13602_v32 }
 0xa26   :  { %v8007_v19 = vpack.c.bf16 %v7975_v20, %v7975_v20  ;;  %v16761_v5 = vpop.f32.mrf.mxu0  ;;  %8452 = vmatpush.bf16.msra.mxu3 %v13610_v24  ;;  %v13621_v24 = vld [vmem:[%s18142_s5 + $0x120] sm:$0xff] }
 0xa27   :  { %v7840_v47 = vpop.f32.mrf.mxu3  ;;  %v16763_v27 = vpop.f32.mrf.mxu1  ;;  %v7527_v31 = vadd.f32 %v16728_v6, %v7317_v48 }
 0xa28   :  { %v8277_v7 = vunpack.c.l.b16 %v8007_v19  ;;  %v7908_v51 = vadd.f32 %v7840_v47, %v7716_v33 }
 0xa2a   :  { %v16765_v44 = vpack.c.b16 %v8277_v7, %v8276_v60  ;;  %v7944_v35 = vadd.f32 %v16654_v46, %v7908_v51  ;;  %v13601_v7 = vld [vmem:[%s18142_s5 + $0x80] sm:$0xff] }
 0xa2b   :  { %v13609_v51 = vld [vmem:[%s18142_s5 + $0xc0] sm:$0xff]  ;;  %8339 = vmatpush.bf16.msra.mxu2 %v13601_v7 }
 0xa2c   :  { %v7650_v25 = vpop.f32.mrf.mxu2  ;;  %v7976_v26 = vmax.f32 %v7944_v35, 0.0  ;;  %8453 = vmatpush.bf16.msra.mxu3 %v13609_v51  ;;  %v18426_v7 = vld [vmem:[#allocation74_spill] sm:$0xff]  ;;  %v13620_v51 = vld [vmem:[%s18142_s5 + $0x118] sm:$0xff] }
 0xa2d   :  { %v7717_v36 = vadd.f32 %v7650_v25, %v7525_v16 }
 0xa2e   :  { %v7261_v58 = vpop.f32.mrf.mxu0  ;;  %v8008_v0 = vpack.c.bf16 %v7976_v26, %v7976_v26  ;;  %v7528_v26 = vadd.f32 %v16752_v41, %v16750_v54  ;;  %v7319_v54 = vadd.f32 %v16761_v5, %v16495_v37 }
 0xa2f   :  { %v7842_v18 = vpop.f32.mrf.mxu3  ;;  %v16771_v29 = vadd.f32 %v7261_v58, %v16502_v50  ;;  %v16773_v59 = vpop.f32.mrf.mxu1  ;;  %v13632_v58 = vld [vmem:[%s18142_s5 + $0x178] sm:$0xff] }
 0xa30   :  { %v7909_v49 = vadd.f32 %v7842_v18, %v7717_v36  ;;  %v8172_v20 = vunpack.c.l.b16 %v8008_v0  ;;  %v13624_v36 = vld [vmem:[%s18142_s5 + $0x138] sm:$0xff]  ;;  %8662 = vmatpush.bf16.msra.mxu1 %v13632_v58 }
 0xa31   :  { %7300 = vmatmul.bf16.gmra.mxu0 %v18424_v45  ;;  %7692 = vmatmul.bf16.gmra.mxu2 %v18422_v1 }
 0xa32   :  { %v7945_v2 = vadd.f32 %v16654_v46, %v7909_v49  ;;  %7510 = vmatmul.bf16.gmra.mxu1 %v18425_v38  ;;  %8554 = vmatpush.bf16.msra.mxu0 %v13624_v36  ;;  %v7530_v36 = vadd.f32 %v16773_v59, %v16771_v29 }
 0xa34   :  { %7884 = vmatmul.bf16.gmra.mxu3 %v18423_v15  ;;  %v7977_v52 = vmax.f32 %v7945_v2, 0.0  ;;  %v7653_v28 = vpop.f32.mrf.mxu2 }
 0xa35   :  { %v7718_v4 = vadd.f32 %v7653_v28, %v7526_v57  ;;  %v13623_v28 = vld [vmem:[%s18142_s5 + $0x130] sm:$0xff] }
 0xa36   :  { %v8009_v50 = vpack.c.bf16 %v7977_v52, %v7977_v52  ;;  %v7263_v61 = vpop.f32.mrf.mxu0  ;;  %8555 = vmatpush.bf16.msra.mxu0 %v13623_v28 }
 0xa37   :  { %v7845_v39 = vpop.f32.mrf.mxu3  ;;  %v16785_v19 = vadd.f32 %v7263_v61, %v16508_v11  ;;  %v16787_v15 = vpop.f32.mrf.mxu1  ;;  %v13622_v61 = vld [vmem:[%s18142_s5 + $0x128] sm:$0xff] }
 0xa38   :  { %v8173_v63 = vunpack.c.l.b16 %v8009_v50  ;;  %v7910_v1 = vadd.f32 %v7845_v39, %v7718_v4 }
 0xa3a   :  { %v16795_v33 = vpack.c.b16 %v8173_v63, %v8172_v20  ;;  %v7946_v21 = vadd.f32 %v16654_v46, %v7910_v1  ;;  %v13630_v20 = vld [vmem:[%s18142_s5 + $0x168] sm:$0xff]  ;;  %v7529_v63 = vadd.f32 %v16763_v27, %v7319_v54  ;;  %8556 = vmatpush.bf16.msra.mxu0 %v13622_v61 }
 0xa3b   :  { %v13618_v54 = vld [vmem:[%s18142_s5 + $0x108] sm:$0xff] }
 0xa3c   :  { %v7655_v11 = vpop.f32.mrf.mxu2  ;;  %v7978_v35 = vmax.f32 %v7946_v21, 0.0 }
 0xa3d   :  { %v7719_v47 = vadd.f32 %v7655_v11, %v7527_v31  ;;  %v13629_v31 = vld [vmem:[%s18142_s5 + $0x160] sm:$0xff] }
 0xa3e   :  { %v16805_v16 = vpop.f32.mrf.mxu0  ;;  %v8010_v49 = vpack.c.bf16 %v7978_v35, %v7978_v35  ;;  %8557 = vmatpush.bf16.msra.mxu0 %v13621_v24  ;;  %v13628_v35 = vld [vmem:[%s18142_s5 + $0x158] sm:$0xff] }
 0xa3f   :  { %v7847_v60 = vpop.f32.mrf.mxu3  ;;  %v16807_v6 = vpop.f32.mrf.mxu1 }
 0xa40   :  { %v7911_v25 = vadd.f32 %v7847_v60, %v7719_v47  ;;  %v8077_v41 = vunpack.c.l.b16 %v8010_v49 }
 0xa41   :  { %7697 = vmatmul.bf16.gmra.mxu2 %v18424_v45  ;;  %8145 = vmatmul.bf16.vlgmr.msrb.gmra.mxu0 %v16707_v23 }
 0xa42   :  { %v7947_v18 = vadd.f32 %v16654_v46, %v7911_v25  ;;  %8234 = vmatmul.bf16.vlgmr.msrb.gmra.mxu1 %v16680_v30  ;;  %v18427_v25 = vld [vmem:[#allocation75_spill] sm:$0xff]  ;;  %8558 = vmatpush.bf16.msra.mxu0 %v13620_v51 }
 0xa44   :  { %7889 = vmatmul.bf16.gmra.mxu3 %v18425_v38  ;;  %v7979_v2 = vmax.f32 %v7947_v18, 0.0  ;;  %v7658_v57 = vpop.f32.mrf.mxu2  ;;  %v13631_v38 = vld [vmem:[%s18142_s5 + $0x170] sm:$0xff] }
 0xa45   :  { %v7720_v45 = vadd.f32 %v7658_v57, %v7528_v26  ;;  %8663 = vmatpush.bf16.msra.mxu1 %v13631_v38 }
 0xa46   :  { %v8011_v0 = vpack.c.bf16 %v7979_v2, %v7979_v2  ;;  %v16828_v30 = vpop.f32.mrf.mxu0 }
 0xa47   :  { %v7850_v52 = vpop.f32.mrf.mxu3  ;;  %v16832_v39 = vpop.f32.mrf.mxu1 }
 0xa48   :  { %v8078_v50 = vunpack.c.l.b16 %v8011_v0  ;;  %v7912_v4 = vadd.f32 %v7850_v52, %v7720_v45  ;;  %v13619_v0 = vld [vmem:[%s18142_s5 + $0x110] sm:$0xff] }
 0xa49   :  { %8664 = vmatpush.bf16.msra.mxu1 %v13630_v20  ;;  %v13627_v45 = vld [vmem:[%s18142_s5 + $0x150] sm:$0xff]  ;;  %8559 = vmatpush.bf16.msra.mxu0 %v13619_v0 }
 0xa4a   :  { %v16834_v48 = vpack.c.b16 %v8078_v50, %v8077_v41  ;;  %v7948_v37 = vadd.f32 %v16654_v46, %v7912_v4  ;;  %v13626_v41 = vld [vmem:[%s18142_s5 + $0x148] sm:$0xff]  ;;  %v7531_v50 = vadd.f32 %v16787_v15, %v16785_v19  ;;  %v7322_v19 = vadd.f32 %v16805_v16, %v16515_v10  ;;  %v13648_v10 = vld [vmem:[%s18142_s5 + $0x1f8] sm:$0xff] }
 0xa4b   :  { %8884 = vmatpush.bf16.msrb.mxu3 %v13648_v10 }
 0xa4c   :  { %v7660_v5 = vpop.f32.mrf.mxu2  ;;  %v7980_v11 = vmax.f32 %v7948_v37, 0.0  ;;  %v13617_v37 = vld [vmem:[%s18142_s5 + $0x100] sm:$0xff]  ;;  %v7532_v16 = vadd.f32 %v16807_v6, %v7322_v19 }
 0xa4d   :  { %v7721_v1 = vadd.f32 %v7660_v5, %v7529_v63  ;;  %8665 = vmatpush.bf16.msra.mxu1 %v13629_v31  ;;  %8560 = vmatpush.bf16.msra.mxu0 %v13618_v54  ;;  %v13625_v5 = vld [vmem:[%s18142_s5 + $0x140] sm:$0xff] }
 0xa4e   :  { %v16850_v21 = vpop.f32.mrf.mxu0  ;;  %v8012_v18 = vpack.c.bf16 %v7980_v11, %v7980_v11  ;;  %v13640_v11 = vld [vmem:[%s18142_s5 + $0x1b8] sm:$0xff]  ;;  %v13645_v54 = vld [vmem:[%s18142_s5 + $0x1e0] sm:$0xff] }
 0xa4f   :  { %v7852_v32 = vpop.f32.mrf.mxu3  ;;  %v16852_v27 = vpop.f32.mrf.mxu1  ;;  %8776 = vmatpush.bf16.msrb.mxu2 %v13640_v11  ;;  %v13643_v11 = vld [vmem:[%s18142_s5 + $0x1d0] sm:$0xff] }
 0xa50   :  { %v7913_v47 = vadd.f32 %v7852_v32, %v7721_v1  ;;  %v8079_v52 = vunpack.c.l.b16 %v8012_v18 }
 0xa51   :  { %7702 = vmatmul.bf16.gmra.mxu2 %v18426_v7  ;;  %8150 = vmatmul.bf16.gmra.mxu0 %v16739_v3 }
 0xa52   :  { %v7949_v60 = vadd.f32 %v16654_v46, %v7913_v47  ;;  %8239 = vmatmul.bf16.gmra.mxu1 %v16707_v23  ;;  %8561 = vmatpush.bf16.msra.mxu0 %v13617_v37 }
 0xa53   :  { %8666 = vmatpush.bf16.msra.mxu1 %v13628_v35 }
 0xa54   :  { %7894 = vmatmul.bf16.gmra.mxu3 %v18427_v25  ;;  %v7981_v58 = vmax.f32 %v7949_v60, 0.0  ;;  %v7663_v26 = vpop.f32.mrf.mxu2  ;;  %v13639_v25 = vld [vmem:[%s18142_s5 + $0x1b0] sm:$0xff] }
 0xa55   :  { %v7722_v2 = vadd.f32 %v7663_v26, %v7530_v36  ;;  %v13647_v36 = vld [vmem:[%s18142_s5 + $0x1f0] sm:$0xff]  ;;  %8777 = vmatpush.bf16.msrb.mxu2 %v13639_v25 }
 0xa56   :  { %v8013_v49 = vpack.c.bf16 %v7981_v58, %v7981_v58  ;;  %v16873_v23 = vpop.f32.mrf.mxu0  ;;  %8885 = vmatpush.bf16.msrb.mxu3 %v13647_v36 }
 0xa57   :  { %v7855_v57 = vpop.f32.mrf.mxu3  ;;  %v16875_v28 = vpop.f32.mrf.mxu1  ;;  %8667 = vmatpush.bf16.msra.mxu1 %v13627_v45 }
 0xa58   :  { %v8080_v29 = vunpack.c.l.b16 %v8013_v49  ;;  %v7914_v59 = vadd.f32 %v7855_v57, %v7722_v2  ;;  %v13638_v2 = vld [vmem:[%s18142_s5 + $0x1a8] sm:$0xff] }
 0xa59   :  { %v13646_v57 = vld [vmem:[%s18142_s5 + $0x1e8] sm:$0xff]  ;;  %8778 = vmatpush.bf16.msrb.mxu2 %v13638_v2 }
 0xa5a   :  { %v16877_v38 = vpack.c.b16 %v8080_v29, %v8079_v52  ;;  %v7950_v4 = vadd.f32 %v16654_v46, %v7914_v59  ;;  %8886 = vmatpush.bf16.msrb.mxu3 %v13646_v57  ;;  %v13637_v59 = vld [vmem:[%s18142_s5 + $0x1a0] sm:$0xff] }
 0xa5b   :  { %8668 = vmatpush.bf16.msra.mxu1 %v13626_v41 }
 0xa5c   :  { %v7665_v61 = vpop.f32.mrf.mxu2  ;;  %v7982_v15 = vmax.f32 %v7950_v4, 0.0 }
 0xa5d   :  { %v7723_v20 = vadd.f32 %v7665_v61, %v7531_v50  ;;  %8779 = vmatpush.bf16.msrb.mxu2 %v13637_v59 }
 0xa5e   :  { %v16894_v1 = vpop.f32.mrf.mxu0  ;;  %v8014_v47 = vpack.c.bf16 %v7982_v15, %v7982_v15  ;;  %8887 = vmatpush.bf16.msrb.mxu3 %v13645_v54 }
 0xa5f   :  { %v7857_v63 = vpop.f32.mrf.mxu3  ;;  %v16898_v24 = vpop.f32.mrf.mxu1  ;;  %8669 = vmatpush.bf16.msra.mxu1 %v13625_v5 }
 0xa60   :  { %v7915_v32 = vadd.f32 %v7857_v63, %v7723_v20  ;;  %v8278_v6 = vunpack.c.l.b16 %v8014_v47  ;;  %v13636_v63 = vld [vmem:[%s18142_s5 + $0x198] sm:$0xff] }
 0xa61   :  { %8155 = vmatmul.bf16.gmra.mxu0 %v16834_v48  ;;  %8340 = vmatmul.bf16.vlgmr.msra.gmra.mxu2 %v16739_v3 }
 0xa62   :  { %v7951_v31 = vadd.f32 %v16654_v46, %v7915_v32  ;;  %8244 = vmatmul.bf16.gmra.mxu1 %v16795_v33  ;;  %8780 = vmatpush.bf16.msrb.mxu2 %v13636_v63 }
 0xa64   :  { %8454 = vmatmul.bf16.vlgmr.msra.gmra.mxu3 %v16795_v33  ;;  %v7983_v60 = vmax.f32 %v7951_v31, 0.0  ;;  %v7668_v7 = vpop.f32.mrf.mxu2  ;;  %v7323_v33 = vadd.f32 %v16828_v30, %v16518_v53  ;;  %v13635_v31 = vld [vmem:[%s18142_s5 + $0x190] sm:$0xff] }
 0xa65   :  { %v7724_v51 = vadd.f32 %v7668_v7, %v7532_v16 }
 0xa66   :  { %v8015_v3 = vpack.c.bf16 %v7983_v60, %v7983_v60  ;;  %v16918_v18 = vpop.f32.mrf.mxu0  ;;  %v7533_v45 = vadd.f32 %v16832_v39, %v7323_v33  ;;  %v7324_v39 = vadd.f32 %v16850_v21, %v16534_v14  ;;  %v13644_v14 = vld [vmem:[%s18142_s5 + $0x1d8] sm:$0xff]  ;;  %8781 = vmatpush.bf16.msrb.mxu2 %v13635_v31 }
 0xa67   :  { %v7860_v35 = vpop.f32.mrf.mxu3  ;;  %v16922_v49 = vpop.f32.mrf.mxu1  ;;  %8888 = vmatpush.bf16.msrb.mxu3 %v13644_v14 }
 0xa68   :  { %v8279_v58 = vunpack.c.l.b16 %v8015_v3  ;;  %v7916_v26 = vadd.f32 %v7860_v35, %v7724_v51  ;;  %v7534_v21 = vadd.f32 %v16852_v27, %v7324_v39  ;;  %v7325_v27 = vadd.f32 %v16873_v23, %v16540_v17  ;;  %v13634_v51 = vld [vmem:[%s18142_s5 + $0x188] sm:$0xff] }
 0xa69   :  { %v13642_v35 = vld [vmem:[%s18142_s5 + $0x1c8] sm:$0xff] }
 0xa6a   :  { %v16930_v0 = vpack.c.b16 %v8279_v58, %v8278_v6  ;;  %v7952_v53 = vadd.f32 %v16654_v46, %v7916_v26  ;;  %v7535_v25 = vadd.f32 %v16875_v28, %v7325_v27  ;;  %8782 = vmatpush.bf16.msrb.mxu2 %v13634_v51  ;;  %v13633_v6 = vld [vmem:[%s18142_s5 + $0x180] sm:$0xff]  ;;  %v7326_v28 = vadd.f32 %v16894_v1, %v16547_v56 }
 0xa6b   :  { %8889 = vmatpush.bf16.msrb.mxu3 %v13643_v11  ;;  %v13641_v58 = vld [vmem:[%s18142_s5 + $0x1c0] sm:$0xff] }
 0xa6c   :  { %v7670_v30 = vpop.f32.mrf.mxu2  ;;  %v7984_v50 = vmax.f32 %v7952_v53, 0.0  ;;  %v13656_v53 = vld [vmem:[%s18142_s5 + $0x238] sm:$0xff]  ;;  %v7536_v56 = vadd.f32 %v16898_v24, %v7326_v28  ;;  %v13650_v28 = vld [vmem:[%s18142_s5 + $0x208] sm:$0xff] }
 0xa6d   :  { %v7725_v52 = vadd.f32 %v7670_v30, %v7533_v45  ;;  %8992 = vmatpush.bf16.msrb.mxu0 %v13656_v53 }
 0xa6e   :  { %v16940_v41 = vpop.f32.mrf.mxu0  ;;  %v8016_v37 = vpack.c.bf16 %v7984_v50, %v7984_v50  ;;  %8783 = vmatpush.bf16.msrb.mxu2 %v13633_v6  ;;  %v13655_v50 = vld [vmem:[%s18142_s5 + $0x230] sm:$0xff] }
 0xa6f   :  { %v7862_v29 = vpop.f32.mrf.mxu3  ;;  %v16944_v61 = vpop.f32.mrf.mxu1  ;;  %8890 = vmatpush.bf16.msrb.mxu3 %v13642_v35  ;;  %v7328_v31 = vadd.f32 %v16940_v41, %v16566_v9 }
 0xa70   :  { %v7917_v4 = vadd.f32 %v7862_v29, %v7725_v52  ;;  %v8390_v16 = vunpack.c.l.b16 %v8016_v37  ;;  %v13654_v37 = vld [vmem:[%s18142_s5 + $0x228] sm:$0xff] }
 0xa71   :  { %8160 = vmatmul.bf16.gmra.mxu0 %v16877_v38  ;;  %8345 = vmatmul.bf16.gmra.mxu2 %v16765_v44  ;;  %v7538_v9 = vadd.f32 %v16944_v61, %v7328_v31 }
 0xa72   :  { %v7953_v20 = vadd.f32 %v16654_v46, %v7917_v4  ;;  %8249 = vmatmul.bf16.gmra.mxu1 %v16834_v48  ;;  %8993 = vmatpush.bf16.msrb.mxu0 %v13655_v50 }
 0xa73   :  { %8891 = vmatpush.bf16.msrb.mxu3 %v13641_v58 }
 0xa74   :  { %8459 = vmatmul.bf16.gmra.mxu3 %v16834_v48  ;;  %v7985_v5 = vmax.f32 %v7953_v20, 0.0  ;;  %v7673_v19 = vpop.f32.mrf.mxu2 }
 0xa75   :  { %v7726_v15 = vadd.f32 %v7673_v19, %v7534_v21 }
 0xa76   :  { %v8017_v44 = vpack.c.bf16 %v7985_v5, %v7985_v5  ;;  %v16964_v10 = vpop.f32.mrf.mxu0  ;;  %8994 = vmatpush.bf16.msrb.mxu0 %v13654_v37 }
 0xa77   :  { %v7865_v32 = vpop.f32.mrf.mxu3  ;;  %v16968_v7 = vpop.f32.mrf.mxu1 }
 0xa78   :  { %v8391_v47 = vunpack.c.l.b16 %v8017_v44  ;;  %v7918_v60 = vadd.f32 %v7865_v32, %v7726_v15 }
 0xa7a   :  { %v16970_v3 = vpack.c.b16 %v8391_v47, %v8390_v16  ;;  %v7954_v17 = vadd.f32 %v16654_v46, %v7918_v60  ;;  %v13652_v47 = vld [vmem:[%s18142_s5 + $0x218] sm:$0xff] }
 0xa7c   :  { %v7675_v23 = vpop.f32.mrf.mxu2  ;;  %v7986_v2 = vmax.f32 %v7954_v17, 0.0 }
 0xa7d   :  { %v7727_v36 = vadd.f32 %v7675_v23, %v7535_v25 }
 0xa7e   :  { %v16986_v26 = vpop.f32.mrf.mxu0  ;;  %v8018_v1 = vpack.c.bf16 %v7986_v2, %v7986_v2 }
 0xa7f   :  { %v7867_v33 = vpop.f32.mrf.mxu3  ;;  %v16990_v45 = vpop.f32.mrf.mxu1 }
 0xa80   :  { %v7919_v57 = vadd.f32 %v7867_v33, %v7727_v36  ;;  %v8392_v20 = vunpack.c.l.b16 %v8018_v1  ;;  %v7329_v36 = vadd.f32 %v16964_v10, %v16572_v55  ;;  %v13649_v10 = vld [vmem:[%s18142_s5 + $0x200] sm:$0xff]  ;;  %v7330_v1 = vadd.f32 %v16986_v26, %v16579_v22 }
 0xa81   :  { %8350 = vmatmul.bf16.gmra.mxu2 %v16877_v38  ;;  %8562 = vmatmul.bf16.vlgmr.msra.gmra.mxu0 %v16834_v48  ;;  %v7327_v48 = vadd.f32 %v16918_v18, %v16550_v8  ;;  %v13653_v18 = vld [vmem:[%s18142_s5 + $0x220] sm:$0xff] }
 0xa82   :  { %v7955_v30 = vadd.f32 %v16654_v46, %v7919_v57  ;;  %8670 = vmatmul.bf16.vlgmr.msra.gmra.mxu1 %v16877_v38  ;;  %8995 = vmatpush.bf16.msrb.mxu0 %v13653_v18  ;;  %v7539_v2 = vadd.f32 %v16968_v7, %v7329_v36 }
 0xa83   :  { %v7537_v5 = vadd.f32 %v16922_v49, %v7327_v48 }
 0xa84   :  { %8464 = vmatmul.bf16.gmra.mxu3 %v16970_v3  ;;  %v7987_v52 = vmax.f32 %v7955_v30, 0.0  ;;  %v7678_v29 = vpop.f32.mrf.mxu2 }
 0xa85   :  { %v7728_v54 = vadd.f32 %v7678_v29, %v7536_v56 }
 0xa86   :  { %v8019_v59 = vpack.c.bf16 %v7987_v52, %v7987_v52  ;;  %v17004_v4 = vpop.f32.mrf.mxu0  ;;  %8996 = vmatpush.bf16.msrb.mxu0 %v13652_v47 }
 0xa87   :  { %v7870_v39 = vpop.f32.mrf.mxu3  ;;  %v17008_v24 = vpop.f32.mrf.mxu1 }
 0xa88   :  { %v8393_v63 = vunpack.c.l.b16 %v8019_v59  ;;  %v7920_v14 = vadd.f32 %v7870_v39, %v7728_v54  ;;  %v7540_v54 = vadd.f32 %v16990_v45, %v7330_v1 }
 0xa8a   :  { %v17010_v21 = vpack.c.b16 %v8393_v63, %v8392_v20  ;;  %v7956_v19 = vadd.f32 %v16654_v46, %v7920_v14  ;;  %v7331_v14 = vadd.f32 %v17004_v4, %v16582_v13 }
 0xa8c   :  { %v7680_v44 = vpop.f32.mrf.mxu2  ;;  %v7988_v11 = vmax.f32 %v7956_v19, 0.0 }
 0xa8d   :  { %v7729_v15 = vadd.f32 %v7680_v44, %v7537_v5 }
 0xa8e   :  { %v17020_v32 = vpop.f32.mrf.mxu0  ;;  %v8020_v41 = vpack.c.bf16 %v7988_v11, %v7988_v11 }
 0xa8f   :  { %v7872_v8 = vpop.f32.mrf.mxu3  ;;  %v17024_v16 = vpop.f32.mrf.mxu1 }
 0xa90   :  { %v7921_v27 = vadd.f32 %v7872_v8, %v7729_v15  ;;  %v8502_v33 = vunpack.c.l.b16 %v8020_v41  ;;  %v7541_v15 = vadd.f32 %v17008_v24, %v7331_v14 }
 0xa91   :  { %8355 = vmatmul.bf16.gmra.mxu2 %v16930_v0  ;;  %8567 = vmatmul.bf16.gmra.mxu0 %v16877_v38  ;;  %v13651_v38 = vld [vmem:[%s18142_s5 + $0x210] sm:$0xff] }
 0xa92   :  { %v7957_v49 = vadd.f32 %v16654_v46, %v7921_v27  ;;  %8675 = vmatmul.bf16.gmra.mxu1 %v16930_v0  ;;  %8997 = vmatpush.bf16.msrb.mxu0 %v13651_v38  ;;  %v7332_v27 = vadd.f32 %v17020_v32, %v16598_v34 }
 0xa94   :  { %8469 = vmatmul.bf16.gmra.mxu3 %v17010_v21  ;;  %v7989_v60 = vmax.f32 %v7957_v49, 0.0  ;;  %v7683_v51 = vpop.f32.mrf.mxu2  ;;  %v7542_v24 = vadd.f32 %v17024_v16, %v7332_v27 }
 0xa95   :  { %v7730_v25 = vadd.f32 %v7683_v51, %v7538_v9 }
 0xa96   :  { %v8021_v35 = vpack.c.bf16 %v7989_v60, %v7989_v60  ;;  %v17038_v23 = vpop.f32.mrf.mxu0  ;;  %8998 = vmatpush.bf16.msrb.mxu0 %v13650_v28 }
 0xa97   :  { %v7875_v17 = vpop.f32.mrf.mxu3  ;;  %v17042_v61 = vpop.f32.mrf.mxu1 }
 0xa98   :  { %v8503_v0 = vunpack.c.l.b16 %v8021_v35  ;;  %v7922_v6 = vadd.f32 %v7875_v17, %v7730_v25  ;;  %v7333_v25 = vadd.f32 %v17038_v23, %v16604_v40 }
 0xa9a   :  { %v17044_v58 = vpack.c.b16 %v8503_v0, %v8502_v33  ;;  %v7958_v57 = vadd.f32 %v16654_v46, %v7922_v6  ;;  %8999 = vmatpush.bf16.msrb.mxu0 %v13649_v10  ;;  %v7543_v0 = vadd.f32 %v17042_v61, %v7333_v25 }
 0xa9c   :  { %v7685_v53 = vpop.f32.mrf.mxu2  ;;  %v7990_v52 = vmax.f32 %v7958_v57, 0.0 }
 0xa9d   :  { %v7731_v30 = vadd.f32 %v7685_v53, %v7539_v2 }
 0xa9e   :  { %v7296_v56 = vpop.f32.mrf.mxu0  ;;  %v8022_v39 = vpack.c.bf16 %v7990_v52, %v7990_v52 }
 0xa9f   :  { %v7877_v55 = vpop.f32.mrf.mxu3  ;;  %v17056_v59 = vpop.f32.mrf.mxu1  ;;  %v7334_v53 = vadd.f32 %v7296_v56, %v16611_v12 }
 0xaa0   :  { %v7923_v29 = vadd.f32 %v7877_v55, %v7731_v30  ;;  %v8610_v37 = vunpack.c.l.b16 %v8022_v39 }
 0xaa1   :  { %8572 = vmatmul.bf16.gmra.mxu0 %v17010_v21  ;;  %8784 = vmatmul.bf16.vlgmr.msrb.gmra.mxu2 %v16970_v3  ;;  %v7544_v23 = vadd.f32 %v17056_v59, %v7334_v53 }
 0xaa2   :  { %v7959_v7 = vadd.f32 %v16654_v46, %v7923_v29  ;;  %8680 = vmatmul.bf16.gmra.mxu1 %v17044_v58 }
 0xaa4   :  { %8892 = vmatmul.bf16.vlgmr.msrb.gmra.mxu3 %v17010_v21  ;;  %v7991_v50 = vmax.f32 %v7959_v7, 0.0  ;;  %v7688_v22 = vpop.f32.mrf.mxu2 }
 0xaa5   :  { %v7732_v48 = vadd.f32 %v7688_v22, %v7540_v54 }
 0xaa6   :  { %v8023_v26 = vpack.c.bf16 %v7991_v50, %v7991_v50  ;;  %v7298_v63 = vpop.f32.mrf.mxu0 }
 0xaa7   :  { %v7880_v20 = vpop.f32.mrf.mxu3  ;;  %v7508_v3 = vpop.f32.mrf.mxu1  ;;  %v7335_v12 = vadd.f32 %v7298_v63, %v16614_v43 }
 0xaa8   :  { %v8611_v5 = vunpack.c.l.b16 %v8023_v26  ;;  %v7924_v19 = vadd.f32 %v7880_v20, %v7732_v48 }
 0xaa9   :  { %v7545_v20 = vadd.f32 %v7508_v3, %v7335_v12 }
 0xaaa   :  { %v17066_v44 = vpack.c.b16 %v8611_v5, %v8610_v37  ;;  %v7960_v45 = vadd.f32 %v16654_v46, %v7924_v19 }
 0xaac   :  { %v7690_v8 = vpop.f32.mrf.mxu2  ;;  %v7992_v49 = vmax.f32 %v7960_v45, 0.0 }
 0xaad   :  { %v7733_v18 = vadd.f32 %v7690_v8, %v7541_v15 }
 0xaae   :  { %v7301_v11 = vpop.f32.mrf.mxu0  ;;  %v8024_v9 = vpack.c.bf16 %v7992_v49, %v7992_v49 }
 0xaaf   :  { %v7882_v31 = vpop.f32.mrf.mxu3  ;;  %v17072_v13 = vpop.f32.mrf.mxu1  ;;  %v7336_v15 = vadd.f32 %v7301_v11, %v16621_v62 }
 0xab0   :  { %v7925_v47 = vadd.f32 %v7882_v31, %v7733_v18  ;;  %v8720_v17 = vunpack.c.l.b16 %v8024_v9 }
 0xab1   :  { %8577 = vmatmul.bf16.gmra.mxu0 %v17044_v58  ;;  %8789 = vmatmul.bf16.gmra.mxu2 %v17010_v21  ;;  %v7546_v3 = vadd.f32 %v17072_v13, %v7336_v15  ;;  %v12730_v15 = vld [vmem:[%s18145_s7 + $0x1e0] sm:$0xf] }
 0xab2   :  { %v7961_v4 = vadd.f32 %v16654_v46, %v7925_v47  ;;  %8685 = vmatmul.bf16.gmra.mxu1 %v17066_v44 }
 0xab4   :  { %8897 = vmatmul.bf16.gmra.mxu3 %v17044_v58  ;;  %v7993_v41 = vmax.f32 %v7961_v4, 0.0  ;;  %v7693_v60 = vpop.f32.mrf.mxu2 }
 0xab5   :  { %v7734_v32 = vadd.f32 %v7693_v60, %v7542_v24 }
 0xab6   :  { %v8025_v34 = vpack.c.bf16 %v7993_v41, %v7993_v41  ;;  %v7303_v35 = vpop.f32.mrf.mxu0 }
 0xab7   :  { %v7885_v51 = vpop.f32.mrf.mxu3  ;;  %v7513_v21 = vpop.f32.mrf.mxu1  ;;  %v7337_v62 = vadd.f32 %v7303_v35, %v16637_v42 }
 0xab8   :  { %v8721_v38 = vunpack.c.l.b16 %v8025_v34  ;;  %v7926_v36 = vadd.f32 %v7885_v51, %v7734_v32 }
 0xab9   :  { %v7547_v51 = vadd.f32 %v7513_v21, %v7337_v62  ;;  %v13715_v62 = vld [vmem:[%s18145_s7 + $0x1cc] sm:$0xf0] }
 0xaba   :  { %v8724_v33 = vpack.c.b16 %v8721_v38, %v8720_v17  ;;  %v7962_v6 = vadd.f32 %v16654_v46, %v7926_v36 }
 0xabc   :  { %v7695_v16 = vpop.f32.mrf.mxu2  ;;  %v7994_v30 = vmax.f32 %v7962_v6, 0.0 }
 0xabd   :  { %v7735_v28 = vadd.f32 %v7695_v16, %v7543_v0 }
 0xabe   :  { %v8146_v57 = vpop.f32.mrf.mxu0  ;;  %v8026_v61 = vpack.c.bf16 %v7994_v30, %v7994_v30 }
 0xabf   :  { %v7887_v2 = vpop.f32.mrf.mxu3  ;;  %v8235_v10 = vpop.f32.mrf.mxu1 }
 0xac0   :  { %v7927_v55 = vadd.f32 %v7887_v2, %v7735_v28  ;;  %v17085_v1 = vadd.f32 %v8235_v10, %v8146_v57  ;;  %v8722_v56 = vunpack.c.l.b16 %v8026_v61 }
 0xac1   :  { %8794 = vmatmul.bf16.gmra.mxu2 %v8724_v33  ;;  %9000 = vmatmul.bf16.vlgmr.msrb.gmra.mxu0 %v17044_v58  ;;  %v13836_v58 = vld [vmem:[%s18143_s4] ss:$0 sm:$0xff] }
 0xac2   :  { %v7963_v40 = vadd.f32 %v16654_v46, %v7927_v55 }
 0xac4   :  { %v7995_v52 = vmax.f32 %v7963_v40, 0.0  ;;  %v7698_v29 = vpop.f32.mrf.mxu2 }
 0xac5   :  { %v7736_v54 = vadd.f32 %v7698_v29, %v7544_v23 }
 0xac6   :  { %v8027_v7 = vpack.c.bf16 %v7995_v52, %v7995_v52  ;;  %v17090_v50 = vpop.f32.mrf.mxu0 }
 0xac7   :  { %v7890_v39 = vpop.f32.mrf.mxu3  ;;  %v17093_v48 = vpop.f32.mrf.mxu1 }
 0xac8   :  { %v8723_v22 = vunpack.c.l.b16 %v8027_v7  ;;  %v7928_v26 = vadd.f32 %v7890_v39, %v7736_v54 }
 0xaca   :  { %v8725_v46 = vpack.c.b16 %v8723_v22, %v8722_v56  ;;  %v7964_v59 = vadd.f32 %v13836_v58, %v7928_v26 }
 0xacc   :  { %8902 = vmatmul.bf16.gmra.mxu3 %v8725_v46  ;;  %v7700_v14 = vpop.f32.mrf.mxu2  ;;  %v7996_v43 = vmax.f32 %v7964_v59, 0.0 }
 0xacd   :  { %v7737_v37 = vadd.f32 %v7700_v14, %v7545_v20 }
 0xace   :  { %v8151_v19 = vpop.f32.mrf.mxu0  ;;  %v8028_v31 = vpack.c.bf16 %v7996_v43, %v7996_v43  ;;  %v13719_v43 = vld [vmem:[%s18145_s7 + $0x1ec] sm:$0xf0] }
 0xacf   :  { %v7892_v5 = vpop.f32.mrf.mxu3  ;;  %v8240_v45 = vpop.f32.mrf.mxu1 }
 0xad0   :  { %v7929_v63 = vadd.f32 %v7892_v5, %v7737_v37  ;;  %v8241_v8 = vadd.f32 %v8240_v45, %v8151_v19  ;;  %v8832_v11 = vunpack.c.l.b16 %v8028_v31  ;;  %v12731_v45 = vor.u32 %v13719_v43, %v12730_v15 }
 0xad1   :  { %8799 = vmatmul.bf16.gmra.mxu2 %v8725_v46  ;;  %9005 = vmatmul.bf16.gmra.mxu0 %v17066_v44 }
 0xad2   :  { %v7965_v18 = vadd.f32 %v13836_v58, %v7929_v63  ;;  %v13717_v63 = vld [vmem:[%s18145_s7 + $0x1e4] sm:$0xf]  ;;  %9288 = vmatpush.bf16.msrb.mxu1 %v12731_v45  ;;  %v13676_v45 = vld [vmem:[%s18145_s7 + $0x94] sm:$0xf0] }
 0xad4   :  { %v7997_v27 = vmax.f32 %v7965_v18, 0.0  ;;  %v7703_v49 = vpop.f32.mrf.mxu2  ;;  %v12738_v18 = vld [vmem:[%s18145_s7 + $0x1e8] sm:$0xf] }
 0xad5   :  { %v7738_v4 = vadd.f32 %v7703_v49, %v7546_v3  ;;  %v13720_v3 = vld [vmem:[%s18145_s7 + $0x1f4] sm:$0xf0]  ;;  %v12866_v49 = vld [vmem:[%s18145_s7 + $0xe8] sm:$0xf] }
 0xad6   :  { %v8029_v47 = vpack.c.bf16 %v7997_v27, %v7997_v27  ;;  %v17101_v9 = vpop.f32.mrf.mxu0  ;;  %v12739_v27 = vor.u32 %v13720_v3, %v12738_v18 }
 0xad7   :  { %v7895_v24 = vpop.f32.mrf.mxu3  ;;  %v17104_v34 = vpop.f32.mrf.mxu1 }
 0xad8   :  { %v8833_v41 = vunpack.c.l.b16 %v8029_v47  ;;  %v7930_v60 = vadd.f32 %v7895_v24, %v7738_v4  ;;  %v13688_v47 = vld [vmem:[%s18145_s7 + $0xf4] sm:$0xf0]  ;;  %9316 = vmatpush.bf16.msra.mxu3 %v12739_v27  ;;  %v12714_v24 = vld [vmem:[%s18145_s7 + $0x1c0] sm:$0xf]  ;;  %v13703_v27 = vld [vmem:[%s18145_s7 + $0x16c] sm:$0xf0] }
 0xad9   :  { %v12867_v4 = vor.u32 %v13688_v47, %v12866_v49  ;;  %v13701_v49 = vld [vmem:[%s18145_s7 + $0x164] sm:$0xf] }
 0xada   :  { %v8834_v32 = vpack.c.b16 %v8833_v41, %v8832_v11  ;;  %v7966_v44 = vadd.f32 %v13836_v58, %v7930_v60  ;;  %v13713_v11 = vld [vmem:[%s18145_s7 + $0x1c4] sm:$0xf]  ;;  %v12715_v60 = vor.u32 %v13715_v62, %v12714_v24  ;;  %v12674_v24 = vld [vmem:[%s18145_s7 + $0x168] sm:$0xf]  ;;  %v13704_v62 = vld [vmem:[%s18145_s7 + $0x174] sm:$0xf0] }
 0xadb   :  { %9538 = vmatpush.bf16.msra.mxu0 %v12867_v4  ;;  %v12668_v4 = vld [vmem:[%s18145_s7 + $0x170] sm:$0xf0] }
 0xadc   :  { %8907 = vmatmul.bf16.gmra.mxu3 %v8834_v32  ;;  %v7705_v13 = vpop.f32.mrf.mxu2  ;;  %v7998_v36 = vmax.f32 %v7966_v44, 0.0  ;;  %v13716_v44 = vld [vmem:[%s18145_s7 + $0x1d4] sm:$0xf0]  ;;  %9289 = vmatpush.bf16.msrb.mxu1 %v12715_v60  ;;  %v12675_v60 = vor.u32 %v13704_v62, %v12674_v24  ;;  %v12740_v24 = vld [vmem:[%s18145_s7 + $0x1f8] sm:$0xf0] }
 0xadd   :  { %v7739_v25 = vadd.f32 %v7705_v13, %v7547_v51  ;;  %v12722_v51 = vld [vmem:[%s18145_s7 + $0x1c8] sm:$0xf]  ;;  %v12858_v62 = vld [vmem:[%s18145_s7 + $0xe0] sm:$0xf] }
 0xade   :  { %v8156_v38 = vpop.f32.mrf.mxu0  ;;  %v8030_v42 = vpack.c.bf16 %v7998_v36, %v7998_v36  ;;  %v13684_v36 = vld [vmem:[%s18145_s7 + $0xd4] sm:$0xf0] }
 0xadf   :  { %v7897_v17 = vpop.f32.mrf.mxu3  ;;  %v8245_v0 = vpop.f32.mrf.mxu1 }
 0xae0   :  { %v7931_v33 = vadd.f32 %v7897_v17, %v7739_v25  ;;  %v8246_v6 = vadd.f32 %v8245_v0, %v8156_v38  ;;  %v8940_v30 = vunpack.c.l.b16 %v8030_v42  ;;  %v12723_v17 = vor.u32 %v13716_v44, %v12722_v51  ;;  %v12850_v38 = vld [vmem:[%s18145_s7 + $0xc8] sm:$0xf]  ;;  %v13711_v42 = vld [vmem:[%s18145_s7 + $0x1ac] sm:$0xf0]  ;;  %v13672_v51 = vld [vmem:[%s18145_s7 + $0x74] sm:$0xf0] }
 0xae1   :  { %9010 = vmatmul.bf16.gmra.mxu0 %v8834_v32  ;;  %v12716_v32 = vld [vmem:[%s18145_s7 + $0x1d0] sm:$0xf0]  ;;  %v12851_v0 = vor.u32 %v13684_v36, %v12850_v38  ;;  %v13697_v38 = vld [vmem:[%s18145_s7 + $0x144] sm:$0xf] }
 0xae2   :  { %v7967_v16 = vadd.f32 %v13836_v58, %v7931_v33  ;;  %v12719_v25 = vor.u32 %v13713_v11, %v12716_v32  ;;  %9317 = vmatpush.bf16.msra.mxu3 %v12723_v17  ;;  %v12671_v11 = vor.u32 %v13701_v49, %v12668_v4  ;;  %v12802_v32 = vld [vmem:[%s18145_s7 + $0x68] sm:$0xf]  ;;  %v13699_v17 = vld [vmem:[%s18145_s7 + $0x14c] sm:$0xf0]  ;;  %v13718_v4 = vld [vmem:[%s18145_s7 + $0x1ec] sm:$0xf] }
 0xae3   :  { %9539 = vmatpush.bf16.msra.mxu0 %v12851_v0  ;;  %v12803_v44 = vor.u32 %v13672_v51, %v12802_v32  ;;  %v12658_v0 = vld [vmem:[%s18145_s7 + $0x148] sm:$0xf]  ;;  %v13687_v32 = vld [vmem:[%s18145_s7 + $0xec] sm:$0xf0]  ;;  %v13685_v51 = vld [vmem:[%s18145_s7 + $0xe4] sm:$0xf] }
 0xae4   :  { %v7999_v35 = vmax.f32 %v7967_v16, 0.0  ;;  %v8341_v28 = vpop.f32.mrf.mxu2  ;;  %v12698_v16 = vld [vmem:[%s18145_s7 + $0x1a0] sm:$0xf] }
 0xae5   :  { %v8361_v57 = vadd.f32 %v8341_v28, %v17085_v1  ;;  %v12699_v28 = vor.u32 %v13711_v42, %v12698_v16  ;;  %v13700_v16 = vld [vmem:[%s18145_s7 + $0x154] sm:$0xf0] }
 0xae6   :  { %v8031_v2 = vpack.c.bf16 %v7999_v35, %v7999_v35  ;;  %v17107_v21 = vpop.f32.mrf.mxu0  ;;  %v13709_v35 = vld [vmem:[%s18145_s7 + $0x1a4] sm:$0xf] }
 0xae7   :  { %v8455_v53 = vpop.f32.mrf.mxu3  ;;  %v17109_v40 = vpop.f32.mrf.mxu1  ;;  %9290 = vmatpush.bf16.msrb.mxu1 %v12699_v28  ;;  %v12786_v28 = vld [vmem:[%s18145_s7 + $0x48] sm:$0xf] }
 0xae8   :  { %v8941_v55 = vunpack.c.l.b16 %v8031_v2  ;;  %v8475_v10 = vadd.f32 %v8455_v53, %v8361_v57  ;;  %v12700_v2 = vld [vmem:[%s18145_s7 + $0x1b0] sm:$0xf0]  ;;  %v12706_v57 = vld [vmem:[%s18145_s7 + $0x1a8] sm:$0xf]  ;;  %v13712_v53 = vld [vmem:[%s18145_s7 + $0x1b4] sm:$0xf0] }
 0xaea   :  { %v8942_v23 = vpack.c.b16 %v8941_v55, %v8940_v30  ;;  %v12703_v30 = vor.u32 %v13709_v35, %v12700_v2  ;;  %v12707_v55 = vor.u32 %v13712_v53, %v12706_v57  ;;  %v12659_v35 = vor.u32 %v13700_v16, %v12658_v0  ;;  %v13668_v2 = vld [vmem:[%s18145_s7 + $0x54] sm:$0xf0] }
 0xaeb   :  { %v12787_v53 = vor.u32 %v13668_v2, %v12786_v28  ;;  %v13752_v16 = vld [vmem:[%s18145_s7 + $0x2f4] sm:$0xf0] }
 0xaec   :  { %v17111_v61 = vpop.f32.mrf.mxu2  ;;  %9318 = vmatpush.bf16.msra.mxu3 %v12707_v55 }
 0xaee   :  { %v8161_v29 = vpop.f32.mrf.mxu0 }
 0xaef   :  { %v17113_v52 = vpop.f32.mrf.mxu3  ;;  %v8250_v7 = vpop.f32.mrf.mxu1 }
 0xaf0   :  { %v17115_v54 = vadd.f32 %v8250_v7, %v8161_v29  ;;  %v12682_v7 = vld [vmem:[%s18145_s7 + $0x180] sm:$0xf] }
 0xaf1   :  { %9015 = vmatmul.bf16.gmra.mxu0 %v8942_v23  ;;  %v13680_v23 = vld [vmem:[%s18145_s7 + $0xb4] sm:$0xf0] }
 0xaf4   :  { %v8346_v39 = vpop.f32.mrf.mxu2 }
 0xaf5   :  { %v8363_v1 = vadd.f32 %v8346_v39, %v8241_v8  ;;  %v12732_v8 = vld [vmem:[%s18145_s7 + $0x1f0] sm:$0xf0]  ;;  %v13707_v39 = vld [vmem:[%s18145_s7 + $0x18c] sm:$0xf0] }
 0xaf6   :  { %v17117_v56 = vpop.f32.mrf.mxu0  ;;  %v12735_v31 = vor.u32 %v13717_v63, %v12732_v8  ;;  %v12818_v63 = vld [vmem:[%s18145_s7 + $0x88] sm:$0xf] }
 0xaf7   :  { %v8460_v12 = vpop.f32.mrf.mxu3  ;;  %v12819_v3 = vor.u32 %v13676_v45, %v12818_v63  ;;  %v13689_v63 = vld [vmem:[%s18145_s7 + $0x104] sm:$0xf] }
 0xaf8   :  { %v8477_v22 = vadd.f32 %v8460_v12, %v8363_v1  ;;  %9302 = vmatpush.bf16.msra.mxu2 %v12735_v31  ;;  %v13705_v1 = vld [vmem:[%s18145_s7 + $0x184] sm:$0xf] }
 0xafc   :  { %v17119_v26 = vpop.f32.mrf.mxu2  ;;  %9303 = vmatpush.bf16.msra.mxu2 %v12719_v25  ;;  %v12650_v25 = vld [vmem:[%s18145_s7 + $0x140] sm:$0xf] }
 0xafd   :  { %v12651_v36 = vor.u32 %v13699_v17, %v12650_v25  ;;  %v12859_v25 = vor.u32 %v13687_v32, %v12858_v62  ;;  %v12692_v32 = vld [vmem:[%s18145_s7 + $0x198] sm:$0xf0] }
 0xafe   :  { %v8563_v20 = vpop.f32.mrf.mxu0 }
 0xaff   :  { %v17121_v46 = vpop.f32.mrf.mxu3  ;;  %v17123_v58 = vadd.f32 %v8563_v20, %v8475_v10  ;;  %v12834_v10 = vld [vmem:[%s18145_s7 + $0xa8] sm:$0xf]  ;;  %v12684_v20 = vld [vmem:[%s18145_s7 + $0x190] sm:$0xf0] }
 0xb00   :  { %v12835_v29 = vor.u32 %v13680_v23, %v12834_v10  ;;  %9304 = vmatpush.bf16.msra.mxu2 %v12703_v30  ;;  %v12687_v15 = vor.u32 %v13705_v1, %v12684_v20  ;;  %v17284_v30 = vpop.f32.mrf.mxu1  ;;  %v12634_v10 = vld [vmem:[%s18145_s7 + $0x120] sm:$0xf]  ;;  %v13695_v23 = vld [vmem:[%s18145_s7 + $0x12c] sm:$0xf0]  ;;  %v12642_v1 = vld [vmem:[%s18145_s7 + $0x128] sm:$0xf] }
 0xb01   :  { %v12770_v20 = vld [vmem:[%s18145_s7 + $0x28] sm:$0xf] }
 0xb02   :  { %9540 = vmatpush.bf16.msra.mxu0 %v12835_v29 }
 0xb04   :  { %v8351_v59 = vpop.f32.mrf.mxu2  ;;  %9305 = vmatpush.bf16.msra.mxu2 %v12687_v15  ;;  %v12618_v15 = vld [vmem:[%s18145_s7 + $0x100] sm:$0xf] }
 0xb05   :  { %v8365_v14 = vadd.f32 %v8351_v59, %v8246_v6  ;;  %v12690_v59 = vld [vmem:[%s18145_s7 + $0x188] sm:$0xf] }
 0xb06   :  { %v17125_v5 = vpop.f32.mrf.mxu0  ;;  %9541 = vmatpush.bf16.msra.mxu0 %v12819_v3  ;;  %v12620_v3 = vld [vmem:[%s18145_s7 + $0x110] sm:$0xf0] }
 0xb07   :  { %v8465_v37 = vpop.f32.mrf.mxu3  ;;  %v12623_v49 = vor.u32 %v13689_v63, %v12620_v3  ;;  %v13677_v63 = vld [vmem:[%s18145_s7 + $0xa4] sm:$0xf] }
 0xb08   :  { %v17127_v19 = vadd.f32 %v8465_v37, %v8365_v14  ;;  %v13708_v14 = vld [vmem:[%s18145_s7 + $0x194] sm:$0xf0]  ;;  %9306 = vmatpush.bf16.msra.mxu2 %v12671_v11  ;;  %v17373_v28 = vpop.f32.mrf.mxu1 }
 0xb09   :  { %v12691_v43 = vor.u32 %v13708_v14, %v12690_v59  ;;  %v13664_v59 = vld [vmem:[%s18145_s7 + $0x34] sm:$0xf0] }
 0xb0a   :  { %9542 = vmatpush.bf16.msra.mxu0 %v12803_v44  ;;  %v12860_v44 = vld [vmem:[%s18145_s7 + $0xf0] sm:$0xf0] }
 0xb0b   :  { %9319 = vmatpush.bf16.msra.mxu3 %v12691_v43  ;;  %v13691_v43 = vld [vmem:[%s18145_s7 + $0x10c] sm:$0xf0]  ;;  %v12863_v17 = vor.u32 %v13685_v51, %v12860_v44  ;;  %v12810_v51 = vld [vmem:[%s18145_s7 + $0x80] sm:$0xf] }
 0xb0c   :  { %v17162_v41 = vpop.f32.mrf.mxu2 }
 0xb0e   :  { %v8568_v33 = vpop.f32.mrf.mxu0  ;;  %9543 = vmatpush.bf16.msra.mxu0 %v12787_v53  ;;  %v12842_v53 = vld [vmem:[%s18145_s7 + $0xc0] sm:$0xf] }
 0xb0f   :  { %v17173_v13 = vpop.f32.mrf.mxu3  ;;  %v17181_v6 = vadd.f32 %v8568_v33, %v8477_v22  ;;  %v12683_v22 = vor.u32 %v13707_v39, %v12682_v7  ;;  %9320 = vmatpush.bf16.msra.mxu3 %v12675_v60  ;;  %v12652_v33 = vld [vmem:[%s18145_s7 + $0x150] sm:$0xf0]  ;;  %v12635_v7 = vor.u32 %v13695_v23, %v12634_v10  ;;  %v13693_v39 = vld [vmem:[%s18145_s7 + $0x124] sm:$0xf]  ;;  %v12743_v60 = vor.u32 %v13718_v4, %v12740_v24  ;;  %v13683_v10 = vld [vmem:[%s18145_s7 + $0xcc] sm:$0xf0] }
 0xb10   :  { %v12655_v42 = vor.u32 %v13697_v38, %v12652_v33  ;;  %v12754_v38 = vld [vmem:[%s18145_s7 + $0x8] sm:$0xf]  ;;  %v13681_v23 = vld [vmem:[%s18145_s7 + $0xc4] sm:$0xf]  ;;  %v13744_v4 = vld [vmem:[%s18145_s7 + $0x2b4] sm:$0xf0] }
 0xb11   :  { %9291 = vmatpush.bf16.msrb.mxu1 %v12683_v22  ;;  %v13696_v22 = vld [vmem:[%s18145_s7 + $0x134] sm:$0xf0]  ;;  %v13026_v33 = vld [vmem:[%s18145_s7 + $0x2e8] sm:$0xf] }
 0xb12   :  { %9307 = vmatpush.bf16.msra.mxu2 %v12655_v42  ;;  %v12643_v14 = vor.u32 %v13696_v22, %v12642_v1  ;;  %v13714_v42 = vld [vmem:[%s18145_s7 + $0x1cc] sm:$0xf]  ;;  %v13027_v2 = vor.u32 %v13752_v16, %v13026_v33  ;;  %v13010_v1 = vld [vmem:[%s18145_s7 + $0x2c8] sm:$0xf]  ;;  %v8238_v16 = vadd.f32 %v17093_v48, %v17090_v50 }
 0xb13   :  { %9321 = vmatpush.bf16.msra.mxu3 %v12659_v35  ;;  %v12724_v35 = vld [vmem:[%s18145_s7 + $0x1d8] sm:$0xf0]  ;;  %v12978_v33 = vld [vmem:[%s18145_s7 + $0x288] sm:$0xf] }
 0xb14   :  { %v8356_v12 = vpop.f32.mrf.mxu2  ;;  %v8362_v50 = vadd.f32 %v17111_v61, %v8238_v16  ;;  %v12962_v61 = vld [vmem:[%s18145_s7 + $0x268] sm:$0xf] }
 0xb15   :  { %v8367_v37 = vadd.f32 %v8356_v12, %v17115_v54  ;;  %v12666_v54 = vld [vmem:[%s18145_s7 + $0x160] sm:$0xf] }
 0xb16   :  { %v17232_v18 = vpop.f32.mrf.mxu0  ;;  %v12667_v47 = vor.u32 %v13703_v27, %v12666_v54  ;;  %v12626_v54 = vld [vmem:[%s18145_s7 + $0x108] sm:$0xf]  ;;  %v13692_v27 = vld [vmem:[%s18145_s7 + $0x114] sm:$0xf0] }
 0xb17   :  { %v8470_v8 = vpop.f32.mrf.mxu3  ;;  %9322 = vmatpush.bf16.msra.mxu3 %v12643_v14  ;;  %v12708_v14 = vld [vmem:[%s18145_s7 + $0x1b8] sm:$0xf0] }
 0xb18   :  { %v17234_v31 = vadd.f32 %v8470_v8, %v8367_v37  ;;  %9292 = vmatpush.bf16.msrb.mxu1 %v12667_v47  ;;  %v12771_v37 = vor.u32 %v13664_v59, %v12770_v20  ;;  %v12619_v8 = vor.u32 %v13691_v43, %v12618_v15  ;;  %v12627_v47 = vor.u32 %v13692_v27, %v12626_v54  ;;  %v13710_v59 = vld [vmem:[%s18145_s7 + $0x1ac] sm:$0xf]  ;;  %v13679_v43 = vld [vmem:[%s18145_s7 + $0xac] sm:$0xf0] }
 0xb19   :  { %v12711_v15 = vor.u32 %v13710_v59, %v12708_v14  ;;  %v8691_v59 = vadd.f32 %v17373_v28, %v17123_v58 }
 0xb1a   :  { %9544 = vmatpush.bf16.msra.mxu0 %v12771_v37  ;;  %v12826_v37 = vld [vmem:[%s18145_s7 + $0xa0] sm:$0xf] }
 0xb1b   :  { %9323 = vmatpush.bf16.msra.mxu3 %v12627_v47  ;;  %v12827_v27 = vor.u32 %v13679_v43, %v12826_v37  ;;  %v12994_v47 = vld [vmem:[%s18145_s7 + $0x2a8] sm:$0xf]  ;;  %v12660_v43 = vld [vmem:[%s18145_s7 + $0x158] sm:$0xf0] }
 0xb1c   :  { %9293 = vmatpush.bf16.msrb.mxu1 %v12651_v36  ;;  %v17295_v29 = vpop.f32.mrf.mxu2  ;;  %v13660_v36 = vld [vmem:[%s18145_s7 + $0x14] sm:$0xf0]  ;;  %v12995_v62 = vor.u32 %v13744_v4, %v12994_v47 }
 0xb1d   :  { %v12755_v0 = vor.u32 %v13660_v36, %v12754_v38 }
 0xb1e   :  { %v8573_v57 = vpop.f32.mrf.mxu0 }
 0xb1f   :  { %v17287_v55 = vadd.f32 %v8573_v57, %v17127_v19  ;;  %v12636_v19 = vld [vmem:[%s18145_s7 + $0x130] sm:$0xf0]  ;;  %v17324_v45 = vpop.f32.mrf.mxu3  ;;  %9524 = vmatpush.bf16.msrb.mxu3 %v12863_v17  ;;  %v12727_v57 = vor.u32 %v13714_v42, %v12724_v35  ;;  %9545 = vmatpush.bf16.msra.mxu0 %v12755_v0  ;;  %v13740_v0 = vld [vmem:[%s18145_s7 + $0x294] sm:$0xf0]  ;;  %v8673_v42 = vpop.f32.mrf.mxu1 }
 0xb20   :  { %v12639_v12 = vor.u32 %v13693_v39, %v12636_v19  ;;  %9294 = vmatpush.bf16.msrb.mxu1 %v12635_v7  ;;  %v12843_v39 = vor.u32 %v13683_v10, %v12842_v53  ;;  %v12844_v19 = vld [vmem:[%s18145_s7 + $0xd0] sm:$0xf0]  ;;  %v12979_v35 = vor.u32 %v13740_v0, %v12978_v33  ;;  %v12676_v53 = vld [vmem:[%s18145_s7 + $0x178] sm:$0xf0]  ;;  %v12794_v10 = vld [vmem:[%s18145_s7 + $0x60] sm:$0xf] }
 0xb21   :  { %v12847_v22 = vor.u32 %v13681_v23, %v12844_v19  ;;  %v12812_v17 = vld [vmem:[%s18145_s7 + $0x90] sm:$0xf0]  ;;  %v13671_v23 = vld [vmem:[%s18145_s7 + $0x6c] sm:$0xf0] }
 0xb22   :  { %9308 = vmatpush.bf16.msra.mxu2 %v12639_v12  ;;  %v13748_v12 = vld [vmem:[%s18145_s7 + $0x2d4] sm:$0xf0]  ;;  %v12796_v19 = vld [vmem:[%s18145_s7 + $0x70] sm:$0xf0] }
 0xb23   :  { %9793 = vmatpush.bf16.msrb.mxu0 %v13027_v2  ;;  %v13011_v20 = vor.u32 %v13748_v12, %v13010_v1  ;;  %9525 = vmatpush.bf16.msrb.mxu3 %v12847_v22  ;;  %v12795_v12 = vor.u32 %v13671_v23, %v12794_v10  ;;  %v13690_v23 = vld [vmem:[%s18145_s7 + $0x10c] sm:$0xf] }
 0xb24   :  { %9295 = vmatpush.bf16.msrb.mxu1 %v12619_v8  ;;  %v17384_v7 = vpop.f32.mrf.mxu2  ;;  %v12828_v8 = vld [vmem:[%s18145_s7 + $0xb0] sm:$0xf0] }
 0xb25   :  { %v8805_v58 = vadd.f32 %v17384_v7, %v8691_v59  ;;  %v13732_v7 = vld [vmem:[%s18145_s7 + $0x254] sm:$0xf0] }
 0xb26   :  { %v17344_v11 = vpop.f32.mrf.mxu0  ;;  %9309 = vmatpush.bf16.msra.mxu2 %v12623_v49  ;;  %v12831_v49 = vor.u32 %v13677_v63, %v12828_v8  ;;  %v12778_v63 = vld [vmem:[%s18145_s7 + $0x40] sm:$0xf]  ;;  %v8476_v8 = vadd.f32 %v17113_v52, %v8362_v50  ;;  %v12946_v52 = vld [vmem:[%s18145_s7 + $0x248] sm:$0xf] }
 0xb27   :  { %v17413_v3 = vpop.f32.mrf.mxu3  ;;  %9794 = vmatpush.bf16.msrb.mxu0 %v13011_v20  ;;  %v13736_v20 = vld [vmem:[%s18145_s7 + $0x274] sm:$0xf0]  ;;  %v17538_v50 = vld [vmem:[%s18144_s6] ss:$0 sm:$0xff] }
 0xb28   :  { %9330 = vmatpush.bf16.msra.mxu1 %v12743_v60  ;;  %v13706_v60 = vld [vmem:[%s18145_s7 + $0x18c] sm:$0xf]  ;;  %9526 = vmatpush.bf16.msrb.mxu3 %v12831_v49  ;;  %v12963_v14 = vor.u32 %v13736_v20, %v12962_v61  ;;  %v12780_v49 = vld [vmem:[%s18145_s7 + $0x50] sm:$0xf0]  ;;  %v13657_v61 = vld [vmem:[%s18145_s7 + $0x4] sm:$0xf] }
 0xb29   :  { %v12695_v44 = vor.u32 %v13706_v60, %v12692_v32  ;;  %v12947_v60 = vor.u32 %v13732_v7, %v12946_v52  ;;  %v13694_v32 = vld [vmem:[%s18145_s7 + $0x12c] sm:$0xf]  ;;  %v12748_v20 = vld [vmem:[%s18145_s7 + $0x10] sm:$0xf0] }
 0xb2a   :  { %9510 = vmatpush.bf16.msrb.mxu2 %v12859_v25  ;;  %v13673_v25 = vld [vmem:[%s18145_s7 + $0x84] sm:$0xf] }
 0xb2b   :  { %v12815_v36 = vor.u32 %v13673_v25, %v12812_v17  ;;  %9795 = vmatpush.bf16.msrb.mxu0 %v12995_v62  ;;  %v8584_v62 = vadd.f32 %v17125_v5, %v8476_v8  ;;  %v8913_v25 = vadd.f32 %v17413_v3, %v8805_v58  ;;  %v13663_v17 = vld [vmem:[%s18145_s7 + $0x2c] sm:$0xf0]  ;;  %v12930_v3 = vld [vmem:[%s18145_s7 + $0x228] sm:$0xf]  ;;  %v13724_v8 = vld [vmem:[%s18145_s7 + $0x214] sm:$0xf0] }
 0xb2c   :  { %9331 = vmatpush.bf16.msra.mxu1 %v12727_v57  ;;  %v17450_v2 = vpop.f32.mrf.mxu2  ;;  %v13702_v57 = vld [vmem:[%s18145_s7 + $0x16c] sm:$0xf] }
 0xb2d   :  { %9527 = vmatpush.bf16.msrb.mxu3 %v12815_v36  ;;  %v12679_v48 = vor.u32 %v13702_v57, %v12676_v53  ;;  %v12764_v36 = vld [vmem:[%s18145_s7 + $0x30] sm:$0xf0]  ;;  %v13728_v57 = vld [vmem:[%s18145_s7 + $0x234] sm:$0xf0]  ;;  %v8692_v53 = vadd.f32 %v8673_v42, %v8584_v62  ;;  %v12746_v42 = vld [vmem:[%s18145_s7] sm:$0xf] }
 0xb2e   :  { %9511 = vmatpush.bf16.msrb.mxu2 %v12843_v39  ;;  %v8578_v54 = vpop.f32.mrf.mxu0  ;;  %v13669_v39 = vld [vmem:[%s18145_s7 + $0x64] sm:$0xf] }
 0xb2f   :  { %v17422_v24 = vadd.f32 %v8578_v54, %v17234_v31  ;;  %v13675_v31 = vld [vmem:[%s18145_s7 + $0x8c] sm:$0xf0]  ;;  %v12799_v22 = vor.u32 %v13669_v39, %v12796_v19  ;;  %9796 = vmatpush.bf16.msrb.mxu0 %v12979_v35  ;;  %v17481_v37 = vpop.f32.mrf.mxu3  ;;  %v12628_v39 = vld [vmem:[%s18145_s7 + $0x118] sm:$0xf0]  ;;  %v8806_v19 = vadd.f32 %v17450_v2, %v8692_v53  ;;  %v8243_v2 = vadd.f32 %v17104_v34, %v17101_v9 }
 0xb30   :  { %9332 = vmatpush.bf16.msra.mxu1 %v12711_v15  ;;  %v12811_v38 = vor.u32 %v13675_v31, %v12810_v51  ;;  %v13698_v15 = vld [vmem:[%s18145_s7 + $0x14c] sm:$0xf]  ;;  %v13667_v54 = vld [vmem:[%s18145_s7 + $0x4c] sm:$0xf0]  ;;  %v12644_v51 = vld [vmem:[%s18145_s7 + $0x138] sm:$0xf0]  ;;  %v8676_v31 = vpop.f32.mrf.mxu1 }
 0xb31   :  { %9528 = vmatpush.bf16.msrb.mxu3 %v12799_v22  ;;  %v12663_v28 = vor.u32 %v13698_v15, %v12660_v43  ;;  %v12779_v47 = vor.u32 %v13667_v54, %v12778_v63  ;;  %v12647_v5 = vor.u32 %v13694_v32, %v12644_v51  ;;  %v13659_v22 = vld [vmem:[%s18145_s7 + $0xc] sm:$0xf0]  ;;  %v12751_v15 = vor.u32 %v13657_v61, %v12748_v20  ;;  %v12914_v63 = vld [vmem:[%s18145_s7 + $0x208] sm:$0xf] }
 0xb32   :  { %9512 = vmatpush.bf16.msrb.mxu2 %v12827_v27  ;;  %v13665_v27 = vld [vmem:[%s18145_s7 + $0x44] sm:$0xf]  ;;  %v8364_v58 = vadd.f32 %v17119_v26, %v8243_v2  ;;  %v12915_v9 = vor.u32 %v13724_v8, %v12914_v63  ;;  %v8693_v34 = vadd.f32 %v8676_v31, %v17181_v6  ;;  %v13186_v6 = vld [vmem:[%s18145_s7 + $0x3e8] sm:$0xf]  ;;  %v13784_v31 = vld [vmem:[%s18145_s7 + $0x3f4] sm:$0xf0] }
 0xb33   :  { %v12783_v4 = vor.u32 %v13665_v27, %v12780_v49  ;;  %9797 = vmatpush.bf16.msrb.mxu0 %v12963_v14  ;;  %v12747_v14 = vor.u32 %v13659_v22, %v12746_v42  ;;  %v13776_v42 = vld [vmem:[%s18145_s7 + $0x3b4] sm:$0xf0] }
 0xb34   :  { %9333 = vmatpush.bf16.msra.mxu1 %v12695_v44  ;;  %v12762_v44 = vld [vmem:[%s18145_s7 + $0x20] sm:$0xf]  ;;  %v8790_v33 = vpop.f32.mrf.mxu2  ;;  %v8478_v52 = vadd.f32 %v17121_v46, %v8364_v58 }
 0xb35   :  { %9529 = vmatpush.bf16.msrb.mxu3 %v12783_v4  ;;  %v12763_v16 = vor.u32 %v13663_v17, %v12762_v44  ;;  %v8807_v7 = vadd.f32 %v8790_v33, %v8693_v34 }
 0xb36   :  { %9513 = vmatpush.bf16.msrb.mxu2 %v12811_v38  ;;  %v17471_v1 = vpop.f32.mrf.mxu0  ;;  %v13661_v38 = vld [vmem:[%s18145_s7 + $0x24] sm:$0xf]  ;;  %v8586_v26 = vadd.f32 %v17232_v18, %v8478_v52 }
 0xb37   :  { %v12767_v35 = vor.u32 %v13661_v38, %v12764_v36  ;;  %9798 = vmatpush.bf16.msrb.mxu0 %v12947_v60  ;;  %v8898_v59 = vpop.f32.mrf.mxu3  ;;  %v13187_v36 = vor.u32 %v13784_v31, %v13186_v6  ;;  %v13682_v31 = vld [vmem:[%s18145_s7 + $0xcc] sm:$0xf] }
 0xb38   :  { %9334 = vmatpush.bf16.msra.mxu1 %v12679_v48  ;;  %v12931_v48 = vor.u32 %v13728_v57, %v12930_v3  ;;  %v8678_v27 = vpop.f32.mrf.mxu1  ;;  %v8915_v51 = vadd.f32 %v8898_v59, %v8807_v7 }
 0xb39   :  { %9530 = vmatpush.bf16.msrb.mxu3 %v12767_v35  ;;  %v8694_v46 = vadd.f32 %v8678_v27, %v8586_v26  ;;  %v13780_v35 = vld [vmem:[%s18145_s7 + $0x3d4] sm:$0xf0] }
 0xb3a   :  { %9514 = vmatpush.bf16.msrb.mxu2 %v12795_v12  ;;  %v12631_v12 = vor.u32 %v13690_v23, %v12628_v39  ;;  %v13154_v39 = vld [vmem:[%s18145_s7 + $0x3a8] sm:$0xf]  ;;  %v13768_v26 = vld [vmem:[%s18145_s7 + $0x374] sm:$0xf0] }
 0xb3b   :  { %9799 = vmatpush.bf16.msrb.mxu0 %v12931_v48  ;;  %v8248_v48 = vadd.f32 %v17109_v40, %v17107_v21  ;;  %v13155_v20 = vor.u32 %v13776_v42, %v13154_v39  ;;  %v13138_v21 = vld [vmem:[%s18145_s7 + $0x388] sm:$0xf]  ;;  %v13772_v40 = vld [vmem:[%s18145_s7 + $0x394] sm:$0xf0]  ;;  %v13678_v39 = vld [vmem:[%s18145_s7 + $0xac] sm:$0xf] }
 0xb3c   :  { %9335 = vmatpush.bf16.msra.mxu1 %v12663_v28  ;;  %v8914_v28 = vadd.f32 %v17481_v37, %v8806_v19  ;;  %v8792_v4 = vpop.f32.mrf.mxu2  ;;  %v13139_v58 = vor.u32 %v13772_v40, %v13138_v21  ;;  %v13760_v40 = vld [vmem:[%s18145_s7 + $0x334] sm:$0xf0] }
 0xb3d   :  { %9531 = vmatpush.bf16.msrb.mxu3 %v12751_v15  ;;  %v8808_v33 = vadd.f32 %v8792_v4, %v8694_v46  ;;  %v13020_v4 = vld [vmem:[%s18145_s7 + $0x2f0] sm:$0xf0]  ;;  %v13002_v46 = vld [vmem:[%s18145_s7 + $0x2c0] sm:$0xf] }
 0xb3e   :  { %9515 = vmatpush.bf16.msrb.mxu2 %v12779_v47  ;;  %v9001_v0 = vpop.f32.mrf.mxu0 }
 0xb3f   :  { %v9021_v10 = vadd.f32 %v9001_v0, %v8913_v25  ;;  %9800 = vmatpush.bf16.msrb.mxu0 %v12915_v9  ;;  %v8900_v32 = vpop.f32.mrf.mxu3  ;;  %v13686_v9 = vld [vmem:[%s18145_s7 + $0xec] sm:$0xf] }
 0xb40   :  { %9336 = vmatpush.bf16.msra.mxu1 %v12647_v5  ;;  %v8681_v18 = vpop.f32.mrf.mxu1  ;;  %v8916_v23 = vadd.f32 %v8900_v32, %v8808_v33  ;;  %v13106_v33 = vld [vmem:[%s18145_s7 + $0x348] sm:$0xf] }
 0xb41   :  { %v9033_v43 = vadd.f32 %v17538_v50, %v9021_v10 }
 0xb42   :  { %9516 = vmatpush.bf16.msrb.mxu2 %v12763_v16  ;;  %v13170_v16 = vld [vmem:[%s18145_s7 + $0x3c8] sm:$0xf] }
 0xb43   :  { %v9041_v49 = vmax.f32 %v9033_v43, 0.0  ;;  %v13171_v10 = vor.u32 %v13780_v35, %v13170_v16  ;;  %v13764_v16 = vld [vmem:[%s18145_s7 + $0x354] sm:$0xf0]  ;;  %v8253_v35 = vadd.f32 %v17284_v30, %v17117_v56  ;;  %v12836_v56 = vld [vmem:[%s18145_s7 + $0xb8] sm:$0xf0] }
 0xb44   :  { %9337 = vmatpush.bf16.msra.mxu1 %v12631_v12  ;;  %v8795_v3 = vpop.f32.mrf.mxu2  ;;  %v8366_v12 = vadd.f32 %v17162_v41, %v8248_v48  ;;  %v12986_v30 = vld [vmem:[%s18145_s7 + $0x2a0] sm:$0xf] }
 0xb45   :  { %v9049_v60 = vpack.c.bf16 %v9041_v49, %v9041_v49  ;;  %v8368_v42 = vadd.f32 %v17295_v29, %v8253_v35  ;;  %v13090_v29 = vld [vmem:[%s18145_s7 + $0x328] sm:$0xf] }
 0xb46   :  { %9517 = vmatpush.bf16.msrb.mxu2 %v12747_v14  ;;  %v9003_v54 = vpop.f32.mrf.mxu0  ;;  %v8695_v14 = vadd.f32 %v8681_v18, %v17287_v55  ;;  %v8480_v15 = vadd.f32 %v17173_v13, %v8366_v12  ;;  %v12868_v55 = vld [vmem:[%s18145_s7 + $0xf8] sm:$0xf0]  ;;  %v13018_v13 = vld [vmem:[%s18145_s7 + $0x2e0] sm:$0xf] }
 0xb47   :  { %v9022_v47 = vadd.f32 %v9003_v54, %v8914_v28  ;;  %v9346_v5 = vunpack.c.l.b16 %v9049_v60 }
 0xb48   :  { %v8683_v2 = vpop.f32.mrf.mxu1  ;;  %v8809_v63 = vadd.f32 %v8795_v3, %v8695_v14  ;;  %v8588_v28 = vadd.f32 %v17344_v11, %v8480_v15  ;;  %v13751_v11 = vld [vmem:[%s18145_s7 + $0x2ec] sm:$0xf0] }
 0xb49   :  { %v9034_v62 = vadd.f32 %v17538_v50, %v9022_v47  ;;  %v13749_v47 = vld [vmem:[%s18145_s7 + $0x2e4] sm:$0xf] }
 0xb4a   :  { %v8696_v32 = vadd.f32 %v8683_v2, %v8588_v28  ;;  %v13023_v6 = vor.u32 %v13749_v47, %v13020_v4  ;;  %v12839_v2 = vor.u32 %v13678_v39, %v12836_v56  ;;  %v12970_v28 = vld [vmem:[%s18145_s7 + $0x280] sm:$0xf]  ;;  %v13731_v39 = vld [vmem:[%s18145_s7 + $0x24c] sm:$0xf0]  ;;  %v13729_v56 = vld [vmem:[%s18145_s7 + $0x244] sm:$0xf] }
 0xb4b   :  { %v9042_v37 = vmax.f32 %v9034_v62, 0.0  ;;  %v13122_v62 = vld [vmem:[%s18145_s7 + $0x368] sm:$0xf] }
 0xb4c   :  { %v8797_v8 = vpop.f32.mrf.mxu2 }
 0xb4d   :  { %v9050_v44 = vpack.c.bf16 %v9042_v37, %v9042_v37  ;;  %v12871_v37 = vor.u32 %v13686_v9, %v12868_v55  ;;  %v8810_v18 = vadd.f32 %v8797_v8, %v8696_v32  ;;  %v13674_v8 = vld [vmem:[%s18145_s7 + $0x8c] sm:$0xf]  ;;  %v13739_v55 = vld [vmem:[%s18145_s7 + $0x28c] sm:$0xf0] }
 0xb4e   :  { %v9006_v25 = vpop.f32.mrf.mxu0 }
 0xb4f   :  { %v9347_v17 = vunpack.c.l.b16 %v9050_v44  ;;  %v9023_v38 = vadd.f32 %v9006_v25, %v8915_v51  ;;  %v8903_v53 = vpop.f32.mrf.mxu3  ;;  %v13019_v44 = vor.u32 %v13751_v11, %v13018_v13  ;;  %v12852_v25 = vld [vmem:[%s18145_s7 + $0xd8] sm:$0xf0]  ;;  %v13737_v13 = vld [vmem:[%s18145_s7 + $0x284] sm:$0xf] }
 0xb50   :  { %v8917_v34 = vadd.f32 %v8903_v53, %v8809_v63  ;;  %v8686_v53 = vpop.f32.mrf.mxu1 }
 0xb51   :  { %v17580_v0 = vpack.c.b16 %v9347_v17, %v9346_v5  ;;  %v9035_v57 = vadd.f32 %v17538_v50, %v9023_v38  ;;  %v13747_v5 = vld [vmem:[%s18145_s7 + $0x2cc] sm:$0xf0]  ;;  %v13745_v17 = vld [vmem:[%s18145_s7 + $0x2c4] sm:$0xf]  ;;  %v13004_v38 = vld [vmem:[%s18145_s7 + $0x2d0] sm:$0xf0]  ;;  %v8697_v9 = vadd.f32 %v8686_v53, %v17422_v24 }
 0xb52   :  { %v13003_v48 = vor.u32 %v13747_v5, %v13002_v46  ;;  %v13756_v24 = vld [vmem:[%s18145_s7 + $0x314] sm:$0xf0]  ;;  %v12788_v53 = vld [vmem:[%s18145_s7 + $0x58] sm:$0xf0] }
 0xb53   :  { %9546 = vmatmul.bf16.vlgmr.msra.gmra.mxu0 %v17580_v0  ;;  %v9043_v22 = vmax.f32 %v9035_v57, 0.0  ;;  %v12855_v57 = vor.u32 %v13682_v31, %v12852_v25  ;;  %v13733_v31 = vld [vmem:[%s18145_s7 + $0x264] sm:$0xf]  ;;  %v12956_v25 = vld [vmem:[%s18145_s7 + $0x270] sm:$0xf0] }
 0xb54   :  { %10056 = vmatpush.bf16.msra.mxu0 %v13187_v36  ;;  %v13123_v36 = vor.u32 %v13768_v26, %v13122_v62  ;;  %v12971_v62 = vor.u32 %v13739_v55, %v12970_v28  ;;  %v13723_v55 = vld [vmem:[%s18145_s7 + $0x20c] sm:$0xf0] }
 0xb55   :  { %v9051_v41 = vpack.c.bf16 %v9043_v22, %v9043_v22  ;;  %v13743_v22 = vld [vmem:[%s18145_s7 + $0x2ac] sm:$0xf0] }
 0xb56   :  { %v9008_v19 = vpop.f32.mrf.mxu0 }
 0xb57   :  { %v9024_v61 = vadd.f32 %v9008_v19, %v8916_v23  ;;  %v8905_v27 = vpop.f32.mrf.mxu3  ;;  %v9124_v52 = vunpack.c.l.b16 %v9051_v41  ;;  %v13007_v23 = vor.u32 %v13745_v17, %v13004_v38  ;;  %v8800_v19 = vpop.f32.mrf.mxu2 }
 0xb58   :  { %10057 = vmatpush.bf16.msra.mxu0 %v13171_v10  ;;  %v8918_v10 = vadd.f32 %v8905_v27, %v8810_v18  ;;  %v13091_v27 = vor.u32 %v13760_v40, %v13090_v29  ;;  %v8811_v47 = vadd.f32 %v8800_v19, %v8697_v9  ;;  %v8688_v17 = vpop.f32.mrf.mxu1  ;;  %v13727_v40 = vld [vmem:[%s18145_s7 + $0x22c] sm:$0xf0]  ;;  %v12906_v9 = vld [vmem:[%s18145_s7 + $0x200] sm:$0xf] }
 0xb59   :  { %v9036_v59 = vadd.f32 %v17538_v50, %v9024_v61  ;;  %v13741_v61 = vld [vmem:[%s18145_s7 + $0x2a4] sm:$0xf] }
 0xb5b   :  { %v9044_v43 = vmax.f32 %v9036_v59, 0.0  ;;  %v13107_v59 = vor.u32 %v13764_v16, %v13106_v33 }
 0xb5c   :  { %10058 = vmatpush.bf16.msra.mxu0 %v13155_v20  ;;  %v12988_v20 = vld [vmem:[%s18145_s7 + $0x2b0] sm:$0xf0] }
 0xb5d   :  { %v9052_v54 = vpack.c.bf16 %v9044_v43, %v9044_v43  ;;  %v12987_v43 = vor.u32 %v13743_v22, %v12986_v30  ;;  %v12991_v63 = vor.u32 %v13741_v61, %v12988_v20  ;;  %v12940_v30 = vld [vmem:[%s18145_s7 + $0x250] sm:$0xf0] }
 0xb5e   :  { %v9011_v49 = vpop.f32.mrf.mxu0  ;;  %v12943_v20 = vor.u32 %v13729_v56, %v12940_v30  ;;  %v13738_v56 = vld [vmem:[%s18145_s7 + $0x28c] sm:$0xf]  ;;  %v12980_v30 = vld [vmem:[%s18145_s7 + $0x298] sm:$0xf0] }
 0xb5f   :  { %v9125_v7 = vunpack.c.l.b16 %v9052_v54  ;;  %v9025_v60 = vadd.f32 %v9011_v49, %v8917_v34  ;;  %v8908_v14 = vpop.f32.mrf.mxu3  ;;  %v8482_v54 = vadd.f32 %v17324_v45, %v8368_v42  ;;  %v12972_v34 = vld [vmem:[%s18145_s7 + $0x290] sm:$0xf0]  ;;  %v13074_v45 = vld [vmem:[%s18145_s7 + $0x308] sm:$0xf]  ;;  %v8802_v38 = vpop.f32.mrf.mxu2 }
 0xb60   :  { %10059 = vmatpush.bf16.msra.mxu0 %v13139_v58  ;;  %v12820_v58 = vld [vmem:[%s18145_s7 + $0x98] sm:$0xf0]  ;;  %v12975_v26 = vor.u32 %v13737_v13, %v12972_v34  ;;  %v8919_v32 = vadd.f32 %v8908_v14, %v8811_v47  ;;  %v13075_v46 = vor.u32 %v13756_v24, %v13074_v45  ;;  %v13725_v14 = vld [vmem:[%s18145_s7 + $0x224] sm:$0xf]  ;;  %v13750_v34 = vld [vmem:[%s18145_s7 + $0x2ec] sm:$0xf] }
 0xb61   :  { %v17633_v51 = vpack.c.b16 %v9125_v7, %v9124_v52  ;;  %v9037_v3 = vadd.f32 %v17538_v50, %v9025_v60  ;;  %v8590_v11 = vadd.f32 %v17471_v1, %v8482_v54  ;;  %v12823_v52 = vor.u32 %v13674_v8, %v12820_v58  ;;  %v13670_v60 = vld [vmem:[%s18145_s7 + $0x6c] sm:$0xf]  ;;  %v12954_v1 = vld [vmem:[%s18145_s7 + $0x260] sm:$0xf]  ;;  %v12756_v8 = vld [vmem:[%s18145_s7 + $0x18] sm:$0xf0] }
 0xb62   :  { %v13721_v13 = vld [vmem:[%s18145_s7 + $0x204] sm:$0xf]  ;;  %v13178_v45 = vld [vmem:[%s18145_s7 + $0x3e0] sm:$0xf]  ;;  %v13783_v24 = vld [vmem:[%s18145_s7 + $0x3ec] sm:$0xf0] }
 0xb63   :  { %9296 = vmatmul.bf16.vlgmr.msrb.gmra.mxu1 %v17633_v51  ;;  %9310 = vmatmul.bf16.vlgmr.msra.gmra.mxu2 %v17633_v51  ;;  %v9045_v15 = vmax.f32 %v9037_v3, 0.0  ;;  %v8698_v16 = vadd.f32 %v8688_v17, %v8590_v11  ;;  %v12959_v3 = vor.u32 %v13733_v31, %v12956_v25  ;;  %v13162_v31 = vld [vmem:[%s18145_s7 + $0x3c0] sm:$0xf]  ;;  %v13164_v17 = vld [vmem:[%s18145_s7 + $0x3d0] sm:$0xf0] }
 0xb64   :  { %9324 = vmatmul.bf16.vlgmr.msra.gmra.mxu3 %v17633_v51  ;;  %9552 = vmatpush.bf16.msrb.mxu1 %v12871_v37  ;;  %v12804_v37 = vld [vmem:[%s18145_s7 + $0x78] sm:$0xf0] }
 0xb65   :  { %9765 = vmatpush.bf16.msra.mxu2 %v13019_v44  ;;  %9779 = vmatpush.bf16.msra.mxu3 %v13023_v6  ;;  %v9053_v4 = vpack.c.bf16 %v9045_v15, %v9045_v15  ;;  %v13735_v6 = vld [vmem:[%s18145_s7 + $0x26c] sm:$0xf0]  ;;  %v12807_v33 = vor.u32 %v13670_v60, %v12804_v37  ;;  %v8812_v42 = vadd.f32 %v8802_v38, %v8698_v16  ;;  %v12924_v15 = vld [vmem:[%s18145_s7 + $0x230] sm:$0xf0]  ;;  %v13742_v16 = vld [vmem:[%s18145_s7 + $0x2ac] sm:$0xf] }
 0xb66   :  { %v9013_v12 = vpop.f32.mrf.mxu0  ;;  %10060 = vmatpush.bf16.msra.mxu0 %v13123_v36  ;;  %v12955_v35 = vor.u32 %v13735_v6, %v12954_v1  ;;  %v12927_v54 = vor.u32 %v13725_v14, %v12924_v15  ;;  %v13179_v37 = vor.u32 %v13783_v24, %v13178_v45  ;;  %v13012_v6 = vld [vmem:[%s18145_s7 + $0x2d8] sm:$0xf0]  ;;  %v13765_v14 = vld [vmem:[%s18145_s7 + $0x364] sm:$0xf]  ;;  %v13116_v15 = vld [vmem:[%s18145_s7 + $0x370] sm:$0xf0] }
 0xb67   :  { %v9026_v21 = vadd.f32 %v9013_v12, %v8918_v10  ;;  %v9601_v36 = vunpack.c.l.b16 %v9053_v4  ;;  %v12938_v10 = vld [vmem:[%s18145_s7 + $0x240] sm:$0xf]  ;;  %v13781_v4 = vld [vmem:[%s18145_s7 + $0x3e4] sm:$0xf]  ;;  %v13759_v45 = vld [vmem:[%s18145_s7 + $0x32c] sm:$0xf0] }
 0xb68   :  { %9553 = vmatpush.bf16.msrb.mxu1 %v12855_v57  ;;  %v13666_v57 = vld [vmem:[%s18145_s7 + $0x4c] sm:$0xf]  ;;  %v12939_v61 = vor.u32 %v13731_v39, %v12938_v10  ;;  %v13757_v24 = vld [vmem:[%s18145_s7 + $0x324] sm:$0xf] }
 0xb69   :  { %v9038_v41 = vadd.f32 %v17538_v50, %v9026_v21  ;;  %9766 = vmatpush.bf16.msra.mxu2 %v13003_v48  ;;  %9780 = vmatpush.bf16.msra.mxu3 %v13007_v23  ;;  %v8910_v48 = vpop.f32.mrf.mxu3  ;;  %v12791_v12 = vor.u32 %v13666_v57, %v12788_v53  ;;  %v12922_v21 = vld [vmem:[%s18145_s7 + $0x220] sm:$0xf]  ;;  %v13773_v57 = vld [vmem:[%s18145_s7 + $0x3a4] sm:$0xf]  ;;  %v13148_v53 = vld [vmem:[%s18145_s7 + $0x3b0] sm:$0xf0] }
 0xb6a   :  { %10061 = vmatpush.bf16.msra.mxu0 %v13107_v59  ;;  %v8920_v22 = vadd.f32 %v8910_v48, %v8812_v42  ;;  %v13662_v59 = vld [vmem:[%s18145_s7 + $0x2c] sm:$0xf]  ;;  %v12923_v28 = vor.u32 %v13727_v40, %v12922_v21  ;;  %v13151_v39 = vor.u32 %v13773_v57, %v13148_v53  ;;  %v13130_v42 = vld [vmem:[%s18145_s7 + $0x380] sm:$0xf]  ;;  %v12964_v21 = vld [vmem:[%s18145_s7 + $0x278] sm:$0xf0] }
 0xb6b   :  { %v9046_v49 = vmax.f32 %v9038_v41, 0.0  ;;  %v13767_v40 = vld [vmem:[%s18145_s7 + $0x36c] sm:$0xf0]  ;;  %v13124_v57 = vld [vmem:[%s18145_s7 + $0x378] sm:$0xf0] }
 0xb6c   :  { %9554 = vmatpush.bf16.msrb.mxu1 %v12839_v2 }
 0xb6d   :  { %v9054_v7 = vpack.c.bf16 %v9046_v49, %v9046_v49  ;;  %9767 = vmatpush.bf16.msra.mxu2 %v12987_v43  ;;  %9781 = vmatpush.bf16.msra.mxu3 %v12991_v63  ;;  %v13658_v63 = vld [vmem:[%s18145_s7 + $0xc] sm:$0xf] }
 0xb6e   :  { %v9016_v44 = vpop.f32.mrf.mxu0  ;;  %10062 = vmatpush.bf16.msra.mxu0 %v13091_v27  ;;  %v13028_v27 = vld [vmem:[%s18145_s7 + $0x2f8] sm:$0xf0]  ;;  %v12759_v47 = vor.u32 %v13658_v63, %v12756_v8  ;;  %v13730_v63 = vld [vmem:[%s18145_s7 + $0x24c] sm:$0xf] }
 0xb6f   :  { %v9602_v5 = vunpack.c.l.b16 %v9054_v7  ;;  %v9027_v18 = vadd.f32 %v9016_v44, %v8919_v32  ;;  %v13031_v60 = vor.u32 %v13750_v34, %v13028_v27  ;;  %v13746_v44 = vld [vmem:[%s18145_s7 + $0x2cc] sm:$0xf]  ;;  %v12948_v8 = vld [vmem:[%s18145_s7 + $0x258] sm:$0xf0] }
 0xb70   :  { %9555 = vmatpush.bf16.msrb.mxu1 %v12823_v52  ;;  %v13180_v52 = vld [vmem:[%s18145_s7 + $0x3f0] sm:$0xf0]  ;;  %v13726_v34 = vld [vmem:[%s18145_s7 + $0x22c] sm:$0xf]  ;;  %v12932_v27 = vld [vmem:[%s18145_s7 + $0x238] sm:$0xf0] }
 0xb71   :  { %9768 = vmatpush.bf16.msra.mxu2 %v12971_v62  ;;  %9782 = vmatpush.bf16.msra.mxu3 %v12975_v26  ;;  %v17745_v23 = vpack.c.b16 %v9602_v5, %v9601_v36  ;;  %v9039_v19 = vadd.f32 %v17538_v50, %v9027_v18  ;;  %v12907_v62 = vor.u32 %v13723_v55, %v12906_v9  ;;  %v13777_v5 = vld [vmem:[%s18145_s7 + $0x3c4] sm:$0xf]  ;;  %v13100_v9 = vld [vmem:[%s18145_s7 + $0x350] sm:$0xf0] }
 0xb72   :  { %10063 = vmatpush.bf16.msra.mxu0 %v13075_v46  ;;  %v13183_v32 = vor.u32 %v13781_v4, %v13180_v52  ;;  %v13779_v46 = vld [vmem:[%s18145_s7 + $0x3cc] sm:$0xf0]  ;;  %v13015_v36 = vor.u32 %v13746_v44, %v13012_v6  ;;  %v12951_v55 = vor.u32 %v13730_v63, %v12948_v8  ;;  %v13188_v44 = vld [vmem:[%s18145_s7 + $0x3f8] sm:$0xf0] }
 0xb73   :  { %9338 = vmatmul.bf16.vlgmr.msra.gmra.mxu1 %v17633_v51  ;;  %9518 = vmatmul.bf16.vlgmr.msrb.gmra.mxu2 %v17580_v0  ;;  %v12772_v51 = vld [vmem:[%s18145_s7 + $0x38] sm:$0xf0]  ;;  %v9047_v41 = vmax.f32 %v9039_v19, 0.0  ;;  %v13163_v18 = vor.u32 %v13779_v46, %v13162_v31  ;;  %v13771_v19 = vld [vmem:[%s18145_s7 + $0x38c] sm:$0xf0] }
 0xb74   :  { %9532 = vmatmul.bf16.vlgmr.msrb.gmra.mxu3 %v17580_v0  ;;  %9556 = vmatpush.bf16.msrb.mxu1 %v12807_v33  ;;  %v12775_v43 = vor.u32 %v13662_v59, %v12772_v51  ;;  %v13167_v33 = vor.u32 %v13777_v5, %v13164_v17  ;;  %v13734_v51 = vld [vmem:[%s18145_s7 + $0x26c] sm:$0xf]  ;;  %v13172_v17 = vld [vmem:[%s18145_s7 + $0x3d8] sm:$0xf0] }
 0xb75   :  { %9769 = vmatpush.bf16.msra.mxu2 %v12955_v35  ;;  %9783 = vmatpush.bf16.msra.mxu3 %v12959_v3  ;;  %v9055_v11 = vpack.c.bf16 %v9047_v41, %v9047_v41  ;;  %v12996_v35 = vld [vmem:[%s18145_s7 + $0x2b8] sm:$0xf0]  ;;  %v13146_v3 = vld [vmem:[%s18145_s7 + $0x3a0] sm:$0xf]  ;;  %v13778_v5 = vld [vmem:[%s18145_s7 + $0x3cc] sm:$0xf] }
 0xb76   :  { %9801 = vmatmul.bf16.vlgmr.msrb.gmra.mxu0 %v17745_v23  ;;  %v9018_v29 = vpop.f32.mrf.mxu0  ;;  %v12999_v10 = vor.u32 %v13742_v16, %v12996_v35  ;;  %v13770_v35 = vld [vmem:[%s18145_s7 + $0x38c] sm:$0xf]  ;;  %v13792_v8 = vld [vmem:[%s18146_s9 + $0x38] sm:$0xff] }
 0xb77   :  { %v9028_v2 = vadd.f32 %v9018_v29, %v8920_v22  ;;  %v9864_v25 = vunpack.c.l.b16 %v9055_v11  ;;  %v13132_v22 = vld [vmem:[%s18145_s7 + $0x390] sm:$0xf0]  ;;  %v13114_v29 = vld [vmem:[%s18145_s7 + $0x360] sm:$0xf] }
 0xb78   :  { %9557 = vmatpush.bf16.msrb.mxu1 %v12791_v12  ;;  %v13769_v12 = vld [vmem:[%s18145_s7 + $0x384] sm:$0xf]  ;;  %v13115_v41 = vor.u32 %v13767_v40, %v13114_v29  ;;  %v13084_v11 = vld [vmem:[%s18145_s7 + $0x330] sm:$0xf0] }
 0xb79   :  { %v9040_v58 = vadd.f32 %v17538_v50, %v9028_v2  ;;  %9770 = vmatpush.bf16.msra.mxu2 %v12939_v61  ;;  %9784 = vmatpush.bf16.msra.mxu3 %v12943_v20  ;;  %v12908_v50 = vld [vmem:[%s18145_s7 + $0x210] sm:$0xf0]  ;;  %v12983_v61 = vor.u32 %v13738_v56, %v12980_v30  ;;  %v13131_v20 = vor.u32 %v13771_v19, %v13130_v42  ;;  %v13758_v56 = vld [vmem:[%s18145_s7 + $0x32c] sm:$0xf]  ;;  %v13092_v30 = vld [vmem:[%s18145_s7 + $0x338] sm:$0xf0] }
 0xb7a   :  { %v12911_v26 = vor.u32 %v13721_v13, %v12908_v50  ;;  %v13135_v59 = vor.u32 %v13769_v12, %v13132_v22  ;;  %v12967_v2 = vor.u32 %v13734_v51, %v12964_v21  ;;  %v13087_v52 = vor.u32 %v13757_v24, %v13084_v11  ;;  %v13754_v19 = vld [vmem:[%s18145_s7 + $0x30c] sm:$0xf]  ;;  %v13076_v12 = vld [vmem:[%s18145_s7 + $0x318] sm:$0xf0]  ;;  %v13805_v51 = vld [vmem:[%s18146_s9 + $0xa0] sm:$0xff] }
 0xb7b   :  { %v9048_v49 = vmax.f32 %v9040_v58, 0.0  ;;  %v13098_v58 = vld [vmem:[%s18145_s7 + $0x340] sm:$0xf]  ;;  %v13095_v42 = vor.u32 %v13758_v56, %v13092_v30  ;;  %v13079_v22 = vor.u32 %v13754_v19, %v13076_v12  ;;  %v13804_v21 = vld [vmem:[%s18146_s9 + $0x98] sm:$0xff]  ;;  %v13803_v29 = vld [vmem:[%s18146_s9 + $0x90] sm:$0xff] }
 0xb7c   :  { %9558 = vmatpush.bf16.msrb.mxu1 %v12775_v43  ;;  %v13119_v43 = vor.u32 %v13765_v14, %v13116_v15  ;;  %v13789_v24 = vld [vmem:[%s18146_s9 + $0x20] sm:$0xff]  ;;  %v13814_v30 = vld [vmem:[%s18146_s9 + $0xe8] sm:$0xff]  ;;  %v13812_v12 = vld [vmem:[%s18146_s9 + $0xd8] sm:$0xff] }
 0xb7d   :  { %v9056_v7 = vpack.c.bf16 %v9048_v49, %v9048_v49  ;;  %9771 = vmatpush.bf16.msra.mxu2 %v12923_v28  ;;  %9785 = vmatpush.bf16.msra.mxu3 %v12927_v54  ;;  %v13763_v28 = vld [vmem:[%s18145_s7 + $0x34c] sm:$0xf0]  ;;  %v13761_v54 = vld [vmem:[%s18145_s7 + $0x344] sm:$0xf]  ;;  %v13082_v49 = vld [vmem:[%s18145_s7 + $0x320] sm:$0xf] }
 0xb7e   :  { %v13099_v13 = vor.u32 %v13763_v28, %v13098_v58  ;;  %v13103_v50 = vor.u32 %v13761_v54, %v13100_v9  ;;  %v13083_v4 = vor.u32 %v13759_v45, %v13082_v49  ;;  %v13800_v58 = vld [vmem:[%s18146_s9 + $0x78] sm:$0xff]  ;;  %v13791_v9 = vld [vmem:[%s18146_s9 + $0x30] sm:$0xff]  ;;  %v13797_v11 = vld [vmem:[%s18146_s9 + $0x60] sm:$0xff] }
 0xb7f   :  { %v9865_v1 = vunpack.c.l.b16 %v9056_v7  ;;  %v13722_v7 = vld [vmem:[%s18145_s7 + $0x20c] sm:$0xf] }
 0xb80   :  { %9559 = vmatpush.bf16.msrb.mxu1 %v12759_v47  ;;  %v12935_v47 = vor.u32 %v13726_v34, %v12932_v27  ;;  %v13790_v34 = vld [vmem:[%s18146_s9 + $0x28] sm:$0xff] }
 0xb81   :  { %9772 = vmatpush.bf16.msra.mxu2 %v12907_v62  ;;  %9786 = vmatpush.bf16.msra.mxu3 %v12911_v26  ;;  %v17834_v38 = vpack.c.b16 %v9865_v1, %v9864_v25  ;;  %v12916_v62 = vld [vmem:[%s18145_s7 + $0x218] sm:$0xf0]  ;;  %v13066_v26 = vld [vmem:[%s18145_s7 + $0x300] sm:$0xf]  ;;  %v13068_v1 = vld [vmem:[%s18145_s7 + $0x310] sm:$0xf0] }
 0xb82   :  { %v12919_v6 = vor.u32 %v13722_v7, %v12916_v62  ;;  %v13798_v27 = vld [vmem:[%s18146_s9 + $0x68] sm:$0xff]  ;;  %v18065_v7 = vld [vmem:[%s18147_s8] sm:$0xf]  ;;  %v13788_v62 = vld [vmem:[%s18146_s9 + $0x18] sm:$0xff] }
 0xb83   :  { %9560 = vmatmul.bf16.vlgmr.msrb.gmra.mxu1 %v17580_v0  ;;  %v13775_v0 = vld [vmem:[%s18145_s7 + $0x3ac] sm:$0xf0] }
 0xb84   :  { %9807 = vmatpush.bf16.msra.mxu1 %v13031_v60  ;;  %9773 = vmatmul.bf16.vlgmr.msra.gmra.mxu2 %v17745_v23  ;;  %v13147_v48 = vor.u32 %v13775_v0, %v13146_v3  ;;  %v13755_v60 = vld [vmem:[%s18145_s7 + $0x30c] sm:$0xf0]  ;;  %v13766_v0 = vld [vmem:[%s18145_s7 + $0x36c] sm:$0xf] }
 0xb85   :  { %10028 = vmatpush.bf16.msrb.mxu2 %v13179_v37  ;;  %10042 = vmatpush.bf16.msrb.mxu3 %v13183_v32  ;;  %v13753_v37 = vld [vmem:[%s18145_s7 + $0x304] sm:$0xf]  ;;  %v13782_v32 = vld [vmem:[%s18145_s7 + $0x3ec] sm:$0xf]  ;;  %v13067_v31 = vor.u32 %v13755_v60, %v13066_v26  ;;  %v13127_v53 = vor.u32 %v13766_v0, %v13124_v57  ;;  %v13796_v26 = vld [vmem:[%s18146_s9 + $0x58] sm:$0xff] }
 0xb86   :  { %9787 = vmatmul.bf16.vlgmr.msra.gmra.mxu3 %v17745_v23  ;;  %10064 = vmatmul.bf16.vlgmr.msra.gmra.mxu0 %v17834_v38  ;;  %v13071_v25 = vor.u32 %v13753_v37, %v13068_v1  ;;  %v13191_v46 = vor.u32 %v13782_v32, %v13188_v44  ;;  %v10096_v32 = vperm.slane %v18065_v7, 2  ;;  %v13815_v57 = vld [vmem:[%s18146_s9 + $0xf0] sm:$0xff] }
 0xb88   :  { %9808 = vmatpush.bf16.msra.mxu1 %v13015_v36  ;;  %v13175_v36 = vor.u32 %v13778_v5, %v13172_v17 }
 0xb89   :  { %10029 = vmatpush.bf16.msrb.mxu2 %v13163_v18  ;;  %10043 = vmatpush.bf16.msrb.mxu3 %v13167_v33  ;;  %v13774_v18 = vld [vmem:[%s18145_s7 + $0x3ac] sm:$0xf]  ;;  %v13156_v33 = vld [vmem:[%s18145_s7 + $0x3b8] sm:$0xf0] }
 0xb8a   :  { %v13159_v16 = vor.u32 %v13774_v18, %v13156_v33  ;;  %v13816_v18 = vld [vmem:[%s18146_s9 + $0xf8] sm:$0xff]  ;;  %v13786_v33 = vld [vmem:[%s18146_s9 + $0x8] sm:$0xff] }
 0xb8c   :  { %9809 = vmatpush.bf16.msra.mxu1 %v12999_v10  ;;  %v13762_v10 = vld [vmem:[%s18145_s7 + $0x34c] sm:$0xf] }
 0xb8d   :  { %10030 = vmatpush.bf16.msrb.mxu2 %v13147_v48  ;;  %10044 = vmatpush.bf16.msrb.mxu3 %v13151_v39  ;;  %v13108_v48 = vld [vmem:[%s18145_s7 + $0x358] sm:$0xf0] }
 0xb8e   :  { %v13111_v39 = vor.u32 %v13762_v10, %v13108_v48  ;;  %v13793_v10 = vld [vmem:[%s18146_s9 + $0x40] sm:$0xff] }
 0xb90   :  { %9810 = vmatpush.bf16.msra.mxu1 %v12983_v61  ;;  %v13808_v61 = vld [vmem:[%s18146_s9 + $0xb8] sm:$0xff] }
 0xb91   :  { %10031 = vmatpush.bf16.msrb.mxu2 %v13131_v20  ;;  %10045 = vmatpush.bf16.msrb.mxu3 %v13135_v59  ;;  %v13807_v20 = vld [vmem:[%s18146_s9 + $0xb0] sm:$0xff]  ;;  %v13806_v59 = vld [vmem:[%s18146_s9 + $0xa8] sm:$0xff] }
 0xb92   :  { %10410 = vmatpush.bf16.msrb.mxu0 %v13808_v61 }
 0xb94   :  { %9811 = vmatpush.bf16.msra.mxu1 %v12967_v2  ;;  %v13802_v2 = vld [vmem:[%s18146_s9 + $0x88] sm:$0xff] }
 0xb95   :  { %10032 = vmatpush.bf16.msrb.mxu2 %v13115_v41  ;;  %10046 = vmatpush.bf16.msrb.mxu3 %v13119_v43  ;;  %v13801_v41 = vld [vmem:[%s18146_s9 + $0x80] sm:$0xff] }
 0xb96   :  { %10411 = vmatpush.bf16.msrb.mxu0 %v13807_v20  ;;  %v13811_v20 = vld [vmem:[%s18146_s9 + $0xd0] sm:$0xff] }
 0xb98   :  { %9812 = vmatpush.bf16.msra.mxu1 %v12951_v55  ;;  %v13799_v55 = vld [vmem:[%s18146_s9 + $0x70] sm:$0xff] }
 0xb99   :  { %10033 = vmatpush.bf16.msrb.mxu2 %v13099_v13  ;;  %10047 = vmatpush.bf16.msrb.mxu3 %v13103_v50 }
 0xb9a   :  { %10412 = vmatpush.bf16.msrb.mxu0 %v13806_v59 }
 0xb9c   :  { %9813 = vmatpush.bf16.msra.mxu1 %v12935_v47 }
 0xb9d   :  { %10034 = vmatpush.bf16.msrb.mxu2 %v13083_v4  ;;  %10048 = vmatpush.bf16.msrb.mxu3 %v13087_v52 }
 0xb9e   :  { %10413 = vmatpush.bf16.msrb.mxu0 %v13805_v51  ;;  %v13810_v51 = vld [vmem:[%s18146_s9 + $0xc8] sm:$0xff] }
 0xba0   :  { %9814 = vmatpush.bf16.msra.mxu1 %v12919_v6 }
 0xba1   :  { %10035 = vmatpush.bf16.msrb.mxu2 %v13067_v31  ;;  %10049 = vmatpush.bf16.msrb.mxu3 %v13071_v25  ;;  %v13787_v31 = vld [vmem:[%s18146_s9 + $0x10] sm:$0xff] }
 0xba2   :  { %10414 = vmatpush.bf16.msrb.mxu0 %v13804_v21  ;;  %v13795_v25 = vld [vmem:[%s18146_s9 + $0x50] sm:$0xff] }
 0xba3   :  { %9815 = vmatmul.bf16.vlgmr.msra.gmra.mxu1 %v17745_v23  ;;  %v13140_v23 = vld [vmem:[%s18145_s7 + $0x398] sm:$0xf0] }
 0xba4   :  { %10070 = vmatpush.bf16.msrb.mxu1 %v13191_v46  ;;  %10036 = vmatmul.bf16.vlgmr.msrb.gmra.mxu2 %v17834_v38  ;;  %v13143_v3 = vor.u32 %v13770_v35, %v13140_v23 }
 0xba5   :  { %10050 = vmatmul.bf16.vlgmr.msrb.gmra.mxu3 %v17834_v38  ;;  %10382 = vmatpush.bf16.msra.mxu2 %v13792_v8 }
 0xba6   :  { %10415 = vmatpush.bf16.msrb.mxu0 %v13803_v29  ;;  %10396 = vmatpush.bf16.msra.mxu3 %v13800_v58 }
 0xba8   :  { %10071 = vmatpush.bf16.msrb.mxu1 %v13175_v36 }
 0xba9   :  { %10383 = vmatpush.bf16.msra.mxu2 %v13791_v9  ;;  %v10094_v9 = vperm.slane %v18065_v7, 0 }
 0xbaa   :  { %10416 = vmatpush.bf16.msrb.mxu0 %v13802_v2  ;;  %10397 = vmatpush.bf16.msra.mxu3 %v13799_v55 }
 0xbac   :  { %10072 = vmatpush.bf16.msrb.mxu1 %v13159_v16  ;;  %v13794_v16 = vld [vmem:[%s18146_s9 + $0x48] sm:$0xff] }
 0xbad   :  { %10384 = vmatpush.bf16.msra.mxu2 %v13790_v34 }
 0xbae   :  { %10417 = vmatpush.bf16.msrb.mxu0 %v13801_v41  ;;  %10398 = vmatpush.bf16.msra.mxu3 %v13798_v27  ;;  %v13809_v41 = vld [vmem:[%s18146_s9 + $0xc0] sm:$0xff] }
 0xbb0   :  { %10073 = vmatpush.bf16.msrb.mxu1 %v13143_v3 }
 0xbb1   :  { %10385 = vmatpush.bf16.msra.mxu2 %v13789_v24 }
 0xbb2   :  { %10399 = vmatpush.bf16.msra.mxu3 %v13797_v11 }
 0xbb4   :  { %10074 = vmatpush.bf16.msrb.mxu1 %v13127_v53  ;;  %v13785_v53 = vld [vmem:[%s18146_s9] sm:$0xff] }
 0xbb5   :  { %10386 = vmatpush.bf16.msra.mxu2 %v13788_v62 }
 0xbb6   :  { %10400 = vmatpush.bf16.msra.mxu3 %v13796_v26 }
 0xbb8   :  { %10075 = vmatpush.bf16.msrb.mxu1 %v13111_v39 }
 0xbb9   :  { %10387 = vmatpush.bf16.msra.mxu2 %v13787_v31 }
 0xbba   :  { %10401 = vmatpush.bf16.msra.mxu3 %v13795_v25 }
 0xbbc   :  { %10076 = vmatpush.bf16.msrb.mxu1 %v13095_v42  ;;  %v13813_v42 = vld [vmem:[%s18146_s9 + $0xe0] sm:$0xff] }
 0xbbd   :  { %10388 = vmatpush.bf16.msra.mxu2 %v13786_v33 }
 0xbbe   :  { %10402 = vmatpush.bf16.msra.mxu3 %v13794_v16 }
 0xbc0   :  { %10077 = vmatpush.bf16.msrb.mxu1 %v13079_v22 }
 0xbc1   :  { %10389 = vmatpush.bf16.msra.mxu2 %v13785_v53 }
 0xbc2   :  { %10403 = vmatpush.bf16.msra.mxu3 %v13793_v10 }
 0xbc3   :  { %10078 = vmatmul.bf16.vlgmr.msrb.gmra.mxu1 %v17834_v38 }
 0xbc4   :  { %10424 = vmatpush.bf16.msra.mxu1 %v13816_v18 }
 0xbc8   :  { %10425 = vmatpush.bf16.msra.mxu1 %v13815_v57 }
 0xbcc   :  { %10426 = vmatpush.bf16.msra.mxu1 %v13814_v30 }
 0xbd0   :  { %v9547_v38 = vpop.f32.mrf.mxu0  ;;  %10427 = vmatpush.bf16.msra.mxu1 %v13813_v42 }
 0xbd4   :  { %10428 = vmatpush.bf16.msra.mxu1 %v13812_v12 }
 0xbd8   :  { %v9549_v40 = vpop.f32.mrf.mxu0  ;;  %10429 = vmatpush.bf16.msra.mxu1 %v13811_v20 }
 0xbdc   :  { %10430 = vmatpush.bf16.msra.mxu1 %v13810_v51 }
 0xbe0   :  { %v18026_v43 = vpop.f32.mrf.mxu1  ;;  %10431 = vmatpush.bf16.msra.mxu1 %v13809_v41 }
 0xbe6   :  { %v18018_v14 = vpop.f32.mrf.mxu2 }
 0xbe7   :  { %v9325_v15 = vpop.f32.mrf.mxu3 }
 0xbe8   :  { %v18042_v13 = vpop.f32.mrf.mxu1  ;;  %v9548_v4 = vadd.f32 %v9547_v38, %v9325_v15 }
 0xbee   :  { %v18034_v28 = vpop.f32.mrf.mxu2 }
 0xbef   :  { %v9327_v54 = vpop.f32.mrf.mxu3 }
 0xbf0   :  { %v18060_v52 = vpop.f32.mrf.mxu1  ;;  %v9550_v37 = vadd.f32 %v9549_v40, %v9327_v54 }
 0xbf3   :  { %v9802_v63 = vpop.f32.mrf.mxu0 }
 0xbf4   :  { %v9823_v60 = vadd.f32 %v9802_v63, %v9548_v4 }
 0xbf6   :  { %v18050_v49 = vpop.f32.mrf.mxu2 }
 0xbf7   :  { %v18052_v45 = vpop.f32.mrf.mxu3  ;;  %v9520_v29 = vadd.f32 %v18050_v49, %v18026_v43  ;;  %v10095_v43 = vperm.slane %v18065_v7, 1 }
 0xbf8   :  { %v18089_v35 = vpop.f32.mrf.mxu1  ;;  %v9534_v40 = vadd.f32 %v18052_v45, %v18018_v14 }
 0xbfb   :  { %v9804_v50 = vpop.f32.mrf.mxu0 }
 0xbfc   :  { %v9827_v46 = vadd.f32 %v9804_v50, %v9550_v37 }
 0xbfe   :  { %v9521_v44 = vpop.f32.mrf.mxu2 }
 0xbff   :  { %v9535_v6 = vpop.f32.mrf.mxu3  ;;  %v9522_v63 = vadd.f32 %v9521_v44, %v18042_v13 }
 0xc00   :  { %v9561_v19 = vpop.f32.mrf.mxu1  ;;  %v9536_v8 = vadd.f32 %v9535_v6, %v18034_v28 }
 0xc01   :  { %v9562_v44 = vadd.f32 %v9561_v19, %v18060_v52  ;;  %v13828_v52 = vld [vmem:[%s18148_s10] ss:$0 sm:$0xff] }
 0xc03   :  { %v10065_v47 = vpop.f32.mrf.mxu0 }
 0xc04   :  { %v10086_v1 = vadd.f32 %v10065_v47, %v9823_v60 }
 0xc06   :  { %v10104_v17 = vadd.f32 %v10096_v32, %v10086_v1 }
 0xc07   :  { %v9774_v39 = vpop.f32.mrf.mxu2 }
 0xc08   :  { %v10112_v3 = vmax.f32 %v10104_v17, 0.0  ;;  %v9563_v59 = vpop.f32.mrf.mxu1  ;;  %v9821_v15 = vadd.f32 %v9774_v39, %v9520_v29 }
 0xc09   :  { %v9788_v56 = vpop.f32.mrf.mxu3  ;;  %v9564_v31 = vadd.f32 %v9563_v59, %v18089_v35 }
 0xc0a   :  { %v9822_v2 = vadd.f32 %v9788_v56, %v9534_v40 }
 0xc0b   :  { %v10067_v5 = vpop.f32.mrf.mxu0 }
 0xc0c   :  { %v10090_v36 = vadd.f32 %v10067_v5, %v9827_v46  ;;  %v10097_v46 = vperm.slane %v18065_v7, 3 }
 0xc0e   :  { %v10108_v23 = vadd.f32 %v10096_v32, %v10090_v36 }
 0xc0f   :  { %v9776_v22 = vpop.f32.mrf.mxu2 }
 0xc10   :  { %v10116_v0 = vmax.f32 %v10108_v23, 0.0  ;;  %v9825_v14 = vadd.f32 %v9776_v22, %v9522_v63 }
 0xc11   :  { %v9790_v61 = vpop.f32.mrf.mxu3 }
 0xc12   :  { %v10120_v48 = vpack.c.bf16 %v10116_v0, %v10112_v3  ;;  %v9826_v50 = vadd.f32 %v9790_v61, %v9536_v8 }
 0xc14   :  { %10418 = vmatmul.bf16.vlgmr.msrb.gmra.mxu0 %v10120_v48 }
 0xc20   :  { %v9816_v58 = vpop.f32.mrf.mxu1 }
 0xc21   :  { %v9824_v6 = vadd.f32 %v9816_v58, %v9562_v44 }
 0xc27   :  { %v10037_v38 = vpop.f32.mrf.mxu2 }
 0xc28   :  { %v10051_v21 = vpop.f32.mrf.mxu3  ;;  %v10084_v54 = vadd.f32 %v10037_v38, %v9821_v15  ;;  %v9818_v60 = vpop.f32.mrf.mxu1 }
 0xc29   :  { %v10085_v55 = vadd.f32 %v10051_v21, %v9822_v2  ;;  %v9828_v5 = vadd.f32 %v9818_v60, %v9564_v31 }
 0xc2a   :  { %v10102_v49 = vadd.f32 %v10094_v9, %v10084_v54 }
 0xc2b   :  { %v10103_v45 = vadd.f32 %v10095_v43, %v10085_v55 }
 0xc2c   :  { %v10110_v4 = vmax.f32 %v10102_v49, 0.0 }
 0xc2d   :  { %v10111_v28 = vmax.f32 %v10103_v45, 0.0 }
 0xc2f   :  { %v10039_v34 = vpop.f32.mrf.mxu2 }
 0xc30   :  { %v10053_v27 = vpop.f32.mrf.mxu3  ;;  %v10088_v24 = vadd.f32 %v10039_v34, %v9825_v14 }
 0xc31   :  { %v10089_v11 = vadd.f32 %v10053_v27, %v9826_v50 }
 0xc32   :  { %v10106_v47 = vadd.f32 %v10094_v9, %v10088_v24 }
 0xc33   :  { %v10107_v13 = vadd.f32 %v10095_v43, %v10089_v11 }
 0xc34   :  { %v10114_v62 = vmax.f32 %v10106_v47, 0.0 }
 0xc35   :  { %v10115_v26 = vmax.f32 %v10107_v13, 0.0 }
 0xc36   :  { %v10118_v37 = vpack.c.bf16 %v10114_v62, %v10110_v4 }
 0xc37   :  { %v10119_v1 = vpack.c.bf16 %v10115_v26, %v10111_v28 }
 0xc38   :  { %10390 = vmatmul.bf16.vlgmr.msra.gmra.mxu2 %v10118_v37 }
 0xc39   :  { %10404 = vmatmul.bf16.vlgmr.msra.gmra.mxu3 %v10119_v1 }
 0xc40   :  { %v10079_v32 = vpop.f32.mrf.mxu1 }
 0xc41   :  { %v10087_v25 = vadd.f32 %v10079_v32, %v9824_v6 }
 0xc43   :  { %v10105_v36 = vadd.f32 %v10097_v46, %v10087_v25 }
 0xc45   :  { %v10113_v16 = vmax.f32 %v10105_v36, 0.0 }
 0xc48   :  { %v10081_v17 = vpop.f32.mrf.mxu1 }
 0xc49   :  { %v10091_v18 = vadd.f32 %v10081_v17, %v9828_v5 }
 0xc4b   :  { %v10109_v33 = vadd.f32 %v10097_v46, %v10091_v18 }
 0xc4d   :  { %v10117_v23 = vmax.f32 %v10109_v33, 0.0 }
 0xc4f   :  { %v10121_v3 = vpack.c.bf16 %v10117_v23, %v10113_v16 }
 0xc51   :  { %10432 = vmatmul.bf16.vlgmr.msra.gmra.mxu1 %v10121_v3 }
 0xc91   :  { %v10419_v10 = vpop.f32.mrf.mxu0 }
 0xc99   :  { %v10421_v12 = vpop.f32.mrf.mxu0 }
 0xcbb   :  { %v10391_v0 = vpop.f32.mrf.mxu2 }
 0xcbc   :  { %v10392_v57 = vadd.f32 %v13828_v52, %v10391_v0  ;;  %v10405_v53 = vpop.f32.mrf.mxu3 }
 0xcbe   :  { %v10406_v35 = vadd.f32 %v10405_v53, %v10392_v57 }
 0xcc0   :  { %v10420_v39 = vadd.f32 %v10419_v10, %v10406_v35 }
 0xcc3   :  { %v10393_v48 = vpop.f32.mrf.mxu2 }
 0xcc4   :  { %v10394_v7 = vadd.f32 %v13828_v52, %v10393_v48  ;;  %v10407_v42 = vpop.f32.mrf.mxu3 }
 0xcc6   :  { %v10408_v19 = vadd.f32 %v10407_v42, %v10394_v7 }
 0xcc8   :  { %v10422_v22 = vadd.f32 %v10421_v12, %v10408_v19 }
 0xcce   :  { %v10433_v56 = vpop.f32.mrf.mxu1 }
 0xccf   :  { %v10434_v30 = vadd.f32 %v10433_v56, %v10420_v39 }
 0xcd1   :  { %10438 = vst [vmem:[%s18149_s11] sm:$0xff] %v10434_v30 }
 0xcd6   :  { %v10435_v61 = vpop.f32.mrf.mxu1 }
 0xcd7   :  { %v10436_v20 = vadd.f32 %v10435_v61, %v10422_v22 }
 0xcd9   :  { %10439 = vst [vmem:[%s18149_s11 + $0x8] sm:$0xff] %v10436_v20 }

</bundles_post_ra>
